<compile_context>
chip_gen: v7x
topology: tpu7x:2x2x1
jax: 0.10.0
libtpu: 0.0.40
codegen_flags: <defaults>
</compile_context>

<pallas_src>
import functools

import jax
import jax.numpy as jnp
from jax.experimental import pallas as pl
from jax.experimental.pallas import tpu as pltpu


LANE = 128


def _ceil_to(x, m):
    return ((x + m - 1) // m) * m


# ----------------------------------------------------------------------------
# Pallas kernels
# ----------------------------------------------------------------------------
def _mm_bias_relu_kernel(x_ref, w_ref, b_ref, o_ref):
    # o = relu(x @ w + b); bf16 inputs, f32 MXU accumulation, bf16 output.
    acc = jnp.dot(x_ref[...], w_ref[...], preferred_element_type=jnp.float32)
    o_ref[...] = jnp.maximum(acc + b_ref[...], 0.0).astype(o_ref.dtype)


def _fused_linear_kernel(x_ref, w1_ref, b1_ref, w2_ref, b2_ref, o_ref):
    # o = relu(x @ w1 + b1) @ w2 + b2 — both dots in one kernel; weights stay
    # resident in VMEM and the (8, 896) intermediate never leaves the chip.
    h = jnp.dot(x_ref[...], w1_ref[...], preferred_element_type=jnp.float32)
    h = jnp.maximum(h + b1_ref[...], 0.0)
    o = jnp.dot(h.astype(jnp.bfloat16), w2_ref[...],
                preferred_element_type=jnp.float32)
    o_ref[...] = o + b2_ref[...]


# ----------------------------------------------------------------------------
# Conv2d (stride, no padding) via NHWC im2col + single-shot Pallas matmul
# ----------------------------------------------------------------------------
def _im2col_nhwc(x, kh, kw, stride):
    """x: (B, H, W, C) -> (B*Ho*Wo, kh*kw*C); K ordered (kh, kw, C)."""
    B, H, W, C = x.shape
    Ho = (H - kh) // stride + 1
    Wo = (W - kw) // stride + 1
    cols = []
    for i in range(kh):
        for j in range(kw):
            cols.append(x[:, i:i + stride * Ho:stride,
                          j:j + stride * Wo:stride, :])
    patches = jnp.stack(cols, axis=3)                    # (B, Ho, Wo, kh*kw, C)
    return patches.reshape(B * Ho * Wo, kh * kw * C), Ho, Wo


def conv2d_relu(x, wmat, bmat, *, kh, kw, stride):
    """NHWC conv + ReLU.
    x: (B,H,W,Cpad) bf16; wmat: (kh*kw*Cpad, CoutPad) bf16; bmat: (1,CoutPad) f32.
    Returns (B, Ho, Wo, CoutPad) bf16; padded output channels are exactly 0."""
    B = x.shape[0]
    patches, Ho, Wo = _im2col_nhwc(x, kh, kw, stride)
    M, K = patches.shape
    Np = wmat.shape[1]

    # Two M-blocks so the grid can shard across v7x's two TensorCores; block
    # rows kept a multiple of 16 (bf16 sublane packing).
    Mp = _ceil_to(M, 32)
    tm = Mp // 2
    if Mp != M:
        patches = jnp.pad(patches, ((0, Mp - M), (0, 0)))

    out = pl.pallas_call(
        _mm_bias_relu_kernel,
        out_shape=jax.ShapeDtypeStruct((Mp, Np), jnp.bfloat16),
        grid_spec=pltpu.PrefetchScalarGridSpec(
            num_scalar_prefetch=0,
            grid=(2,),
            in_specs=[
                pl.BlockSpec((tm, K), lambda i: (i, 0)),
                pl.BlockSpec((K, Np), lambda i: (0, 0)),
                pl.BlockSpec((1, Np), lambda i: (0, 0)),
            ],
            out_specs=pl.BlockSpec((tm, Np), lambda i: (i, 0)),
        ),
        compiler_params=pltpu.CompilerParams(
            dimension_semantics=("parallel",),
        ),
    )(patches, wmat, bmat)
    return out[:M].reshape(B, Ho, Wo, Np)


# ----------------------------------------------------------------------------
# Fused linear_1 (ReLU) + linear_2 in one Pallas call
# ----------------------------------------------------------------------------
def fused_linear(x, w1, b1, w2, b2):
    """y = relu(x @ w1 + b1) @ w2 + b2.
    x: (B, K1) bf16; w1: (K1, N1p) bf16; b1: (1, N1p) f32;
    w2: (N1p, N2p) bf16; b2: (1, N2p) f32.  Returns (B, N2p) f32."""
    B, K1 = x.shape
    N1p = w1.shape[1]
    N2p = w2.shape[1]
    Mp = _ceil_to(max(B, 8), 8)
    if Mp != B:
        x = jnp.pad(x, ((0, Mp - B), (0, 0)))

    out = pl.pallas_call(
        _fused_linear_kernel,
        out_shape=jax.ShapeDtypeStruct((Mp, N2p), jnp.float32),
        grid_spec=pltpu.PrefetchScalarGridSpec(
            num_scalar_prefetch=0,
            grid=(1,),
            in_specs=[
                pl.BlockSpec((Mp, K1), lambda i: (0, 0)),
                pl.BlockSpec((K1, N1p), lambda i: (0, 0)),
                pl.BlockSpec((1, N1p), lambda i: (0, 0)),
                pl.BlockSpec((N1p, N2p), lambda i: (0, 0)),
                pl.BlockSpec((1, N2p), lambda i: (0, 0)),
            ],
            out_specs=pl.BlockSpec((Mp, N2p), lambda i: (0, 0)),
        ),
        compiler_params=pltpu.CompilerParams(
            dimension_semantics=("arbitrary",),
            # Largest resident weight is 4480x896 bf16 (~8 MiB); with double
            # buffering the call needs ~17 MiB — well under v7x's 64 MiB VMEM.
            vmem_limit_bytes=40 * 1024 * 1024,
        ),
    )(x, w1, b1, w2, b2)
    return out[:B]


# ----------------------------------------------------------------------------
# Parameter init (PyTorch-style) and one-time weight prep
# ----------------------------------------------------------------------------
def init_params(key, action_size):
    ks = jax.random.split(key, 10)

    def u(k, shape, fan_in):
        bound = 1.0 / (fan_in ** 0.5)
        return jax.random.uniform(k, shape, jnp.float32, -bound, bound)

    return {
        "w1": u(ks[0], (32, 4, 8, 8), 4 * 8 * 8),
        "b1": u(ks[1], (32,), 4 * 8 * 8),
        "w2": u(ks[2], (64, 32, 4, 4), 32 * 4 * 4),
        "b2": u(ks[3], (64,), 32 * 4 * 4),
        "w3": u(ks[4], (64, 64, 3, 3), 64 * 3 * 3),
        "b3": u(ks[5], (64,), 64 * 3 * 3),
        "wl1": u(ks[6], (784, 4480), 4480),
        "bl1": u(ks[7], (784,), 4480),
        "wl2": u(ks[8], (action_size, 784), 784),
        "bl2": u(ks[9], (action_size,), 784),
    }


def _prep_conv(w, b, cin_pad, cout_pad):
    """PyTorch (Cout,Cin,kh,kw) -> (kh*kw*cin_pad, cout_pad) bf16 + (1,cout_pad) f32.
    K ordered (kh, kw, Cin) to match the NHWC im2col; pads are zeros."""
    cout, cin, kh, kw = w.shape
    wt = jnp.transpose(w, (2, 3, 1, 0))                            # (kh,kw,Cin,Cout)
    wt = jnp.pad(wt, ((0, 0), (0, 0), (0, cin_pad - cin), (0, cout_pad - cout)))
    wmat = wt.reshape(kh * kw * cin_pad, cout_pad).astype(jnp.bfloat16)
    bmat = jnp.pad(b, (0, cout_pad - cout)).reshape(1, cout_pad).astype(jnp.float32)
    return wmat, bmat


def prepare_params(raw, action_size):
    """One-time weight prep: transpose / pad / permute / cast to bf16."""
    H3, W3, C3 = 7, 10, 64                 # conv_3 output (fixed by linear_1 = 4480)
    N1, N1p = 784, _ceil_to(784, LANE)     # 784 -> 896
    N2p = _ceil_to(action_size, LANE)      # action_size -> 128

    w1m, b1m = _prep_conv(raw["w1"], raw["b1"], cin_pad=4, cout_pad=LANE)
    w2m, b2m = _prep_conv(raw["w2"], raw["b2"], cin_pad=LANE, cout_pad=LANE)
    w3m, b3m = _prep_conv(raw["w3"], raw["b3"], cin_pad=LANE, cout_pad=LANE)

    # linear_1: permute columns from PyTorch's (C,H,W) flatten order to the
    # (H,W,C) order produced by the NHWC flatten, then transpose + pad + cast.
    wl1 = raw["wl1"].reshape(N1, C3, H3, W3).transpose(0, 2, 3, 1)
    wl1 = wl1.reshape(N1, C3 * H3 * W3)
    wl1m = jnp.pad(wl1.T, ((0, 0), (0, N1p - N1))).astype(jnp.bfloat16)   # (4480, 896)
    bl1m = jnp.pad(raw["bl1"], (0, N1p - N1)).reshape(1, N1p).astype(jnp.float32)

    wl2m = jnp.pad(raw["wl2"].T,
                   ((0, N1p - N1), (0, N2p - action_size))).astype(jnp.bfloat16)
    bl2m = jnp.pad(raw["bl2"], (0, N2p - action_size)).reshape(1, N2p).astype(jnp.float32)

    return {
        "w1m": w1m, "b1m": b1m, "w2m": w2m, "b2m": b2m, "w3m": w3m, "b3m": b3m,
        "wl1m": wl1m, "bl1m": bl1m, "wl2m": wl2m, "bl2m": bl2m,
    }


# ----------------------------------------------------------------------------
# Full CNN forward
# ----------------------------------------------------------------------------
@functools.partial(jax.jit, static_argnames=("action_size",))
def cnn_forward(x, p, *, action_size):
    """x: (B, 4, 84, 108) NCHW float32 (PyTorch layout) -> (B, action_size) f32."""
    B = x.shape[0]
    # Single layout change for the whole net: NCHW -> NHWC, cast to bf16 once.
    h = jnp.transpose(x, (0, 2, 3, 1)).astype(jnp.bfloat16)        # (B, 84, 108, 4)
    h = conv2d_relu(h, p["w1m"], p["b1m"], kh=8, kw=8, stride=4)   # (B, 20, 26, 128)
    h = conv2d_relu(h, p["w2m"], p["b2m"], kh=4, kw=4, stride=2)   # (B,  9, 12, 128)
    h = conv2d_relu(h, p["w3m"], p["b3m"], kh=3, kw=3, stride=1)   # (B,  7, 10, 128)
    # Flatten in (H, W, C) order (linear_1 columns were permuted to match),
    # dropping the zero-padded channels once.
    h = h[..., :64].reshape(B, 7 * 10 * 64)                        # (B, 4480) bf16
    out = fused_linear(h, p["wl1m"], p["bl1m"], p["wl2m"], p["bl2m"])
    return out[:, :action_size]


if __name__ == "__main__":
    action_size = 6  # Space Invaders action space
    key = jax.random.PRNGKey(0)
    pkey, xkey = jax.random.split(key)
    raw_params = init_params(pkey, action_size)
    params = prepare_params(raw_params, action_size)

    # Input spatial size is pinned by linear_1's 4480 = 64*7*10:
    # 84x108 -> conv1 20x26 -> conv2 9x12 -> conv3 7x10.
    x = jax.random.uniform(xkey, (2, 4, 84, 108), jnp.float32)

    out = cnn_forward(x, params, action_size=action_size)
    out = jax.block_until_ready(out)
    assert out.shape == (2, action_size), out.shape
    assert out.dtype == jnp.float32
    assert bool(jnp.all(jnp.isfinite(out)))
    print("KERNEL_OK")
</pallas_src>

<mosaic_0001>
module attributes {stable_mosaic.version = 11 : i64} {
  func.func @_mm_bias_relu_kernel(%arg0: i32, %arg1: memref<528x256xbf16, #tpu.memory_space<vmem>>, %arg2: memref<256x128xbf16, #tpu.memory_space<vmem>>, %arg3: memref<1x128xf32, #tpu.memory_space<vmem>>, %arg4: memref<528x128xbf16, #tpu.memory_space<vmem>>) attributes {dimension_semantics = [#tpu.dimension_semantics<parallel>], iteration_bounds = array<i64: 2>, scalar_prefetch = 0 : i64, scratch_operands = 0 : i64, tpu.core_type = #tpu.core_type<tc>, window_params = [{transform_indices = @transform_0, window_bounds = array<i64: 528, 256>}, {pipeline_mode = #tpu.pipeline_mode<synchronous>, transform_indices = @transform_1, window_bounds = array<i64: 256, 128>}, {pipeline_mode = #tpu.pipeline_mode<synchronous>, transform_indices = @transform_2, window_bounds = array<i64: 1, 128>}, {transform_indices = @transform_3, window_bounds = array<i64: 528, 128>}]} {
    %c0 = arith.constant 0 : index
    %c0_0 = arith.constant 0 : index
    %0 = vector.load %arg1[%c0, %c0_0] : memref<528x256xbf16, #tpu.memory_space<vmem>>, vector<528x256xbf16>
    %c0_1 = arith.constant 0 : index
    %c0_2 = arith.constant 0 : index
    %1 = vector.load %arg2[%c0_1, %c0_2] : memref<256x128xbf16, #tpu.memory_space<vmem>>, vector<256x128xbf16>
    %cst = arith.constant dense<0.000000e+00> : vector<528x128xf32>
    %2 = tpu.matmul %0, %1, %cst {dimension_numbers = #tpu.dot_dimension_numbers<[1], [0], [0], [1], [0, 0, 1, 1], [], []>} : vector<528x256xbf16>, vector<256x128xbf16>, vector<528x128xf32> -> vector<528x128xf32>
    %c0_3 = arith.constant 0 : index
    %c0_4 = arith.constant 0 : index
    %3 = vector.load %arg3[%c0_3, %c0_4] : memref<1x128xf32, #tpu.memory_space<vmem>>, vector<1x128xf32>
    %4 = vector.broadcast %3 : vector<1x128xf32> to vector<528x128xf32>
    %5 = arith.addf %2, %4 : vector<528x128xf32>
    %cst_5 = arith.constant 0.000000e+00 : f32
    %6 = vector.broadcast %cst_5 : f32 to vector<528x128xf32>
    %7 = arith.maximumf %5, %6 : vector<528x128xf32>
    %8 = arith.truncf %7 : vector<528x128xf32> to vector<528x128xbf16>
    %c0_6 = arith.constant 0 : index
    %c0_7 = arith.constant 0 : index
    %9 = vector.load %arg4[%c0_6, %c0_7] : memref<528x128xbf16, #tpu.memory_space<vmem>>, vector<528x128xbf16>
    tpu.vector_store %arg4[%c0_6, %c0_7], %8 {strides = array<i32>} : memref<528x128xbf16, #tpu.memory_space<vmem>>, vector<528x128xbf16>,
    return
  }
  func.func @transform_0(%arg0: i32) -> (i32, i32) {
    %c0_i32 = arith.constant 0 : i32
    %c0_i32_0 = arith.constant 0 : i32
    return %arg0, %c0_i32 : i32, i32
  }
  func.func @transform_1(%arg0: i32) -> (i32, i32) {
    %c0_i32 = arith.constant 0 : i32
    %c0_i32_0 = arith.constant 0 : i32
    %c0_i32_1 = arith.constant 0 : i32
    return %c0_i32, %c0_i32_0 : i32, i32
  }
  func.func @transform_2(%arg0: i32) -> (i32, i32) {
    %c0_i32 = arith.constant 0 : i32
    %c0_i32_0 = arith.constant 0 : i32
    %c0_i32_1 = arith.constant 0 : i32
    return %c0_i32, %c0_i32_0 : i32, i32
  }
  func.func @transform_3(%arg0: i32) -> (i32, i32) {
    %c0_i32 = arith.constant 0 : i32
    %c0_i32_0 = arith.constant 0 : i32
    return %arg0, %c0_i32 : i32, i32
  }
}

module attributes {stable_mosaic.version = 11 : i64} {
  func.func @_mm_bias_relu_kernel(%arg0: i32, %arg1: memref<112x2048xbf16, #tpu.memory_space<vmem>>, %arg2: memref<2048x128xbf16, #tpu.memory_space<vmem>>, %arg3: memref<1x128xf32, #tpu.memory_space<vmem>>, %arg4: memref<112x128xbf16, #tpu.memory_space<vmem>>) attributes {dimension_semantics = [#tpu.dimension_semantics<parallel>], iteration_bounds = array<i64: 2>, scalar_prefetch = 0 : i64, scratch_operands = 0 : i64, tpu.core_type = #tpu.core_type<tc>, window_params = [{transform_indices = @transform_0, window_bounds = array<i64: 112, 2048>}, {pipeline_mode = #tpu.pipeline_mode<synchronous>, transform_indices = @transform_1, window_bounds = array<i64: 2048, 128>}, {pipeline_mode = #tpu.pipeline_mode<synchronous>, transform_indices = @transform_2, window_bounds = array<i64: 1, 128>}, {transform_indices = @transform_3, window_bounds = array<i64: 112, 128>}]} {
    %c0 = arith.constant 0 : index
    %c0_0 = arith.constant 0 : index
    %0 = vector.load %arg1[%c0, %c0_0] : memref<112x2048xbf16, #tpu.memory_space<vmem>>, vector<112x2048xbf16>
    %c0_1 = arith.constant 0 : index
    %c0_2 = arith.constant 0 : index
    %1 = vector.load %arg2[%c0_1, %c0_2] : memref<2048x128xbf16, #tpu.memory_space<vmem>>, vector<2048x128xbf16>
    %cst = arith.constant dense<0.000000e+00> : vector<112x128xf32>
    %2 = tpu.matmul %0, %1, %cst {dimension_numbers = #tpu.dot_dimension_numbers<[1], [0], [0], [1], [0, 0, 1, 1], [], []>} : vector<112x2048xbf16>, vector<2048x128xbf16>, vector<112x128xf32> -> vector<112x128xf32>
    %c0_3 = arith.constant 0 : index
    %c0_4 = arith.constant 0 : index
    %3 = vector.load %arg3[%c0_3, %c0_4] : memref<1x128xf32, #tpu.memory_space<vmem>>, vector<1x128xf32>
    %4 = vector.broadcast %3 : vector<1x128xf32> to vector<112x128xf32>
    %5 = arith.addf %2, %4 : vector<112x128xf32>
    %cst_5 = arith.constant 0.000000e+00 : f32
    %6 = vector.broadcast %cst_5 : f32 to vector<112x128xf32>
    %7 = arith.maximumf %5, %6 : vector<112x128xf32>
    %8 = arith.truncf %7 : vector<112x128xf32> to vector<112x128xbf16>
    %c0_6 = arith.constant 0 : index
    %c0_7 = arith.constant 0 : index
    %9 = vector.load %arg4[%c0_6, %c0_7] : memref<112x128xbf16, #tpu.memory_space<vmem>>, vector<112x128xbf16>
    tpu.vector_store %arg4[%c0_6, %c0_7], %8 {strides = array<i32>} : memref<112x128xbf16, #tpu.memory_space<vmem>>, vector<112x128xbf16>,
    return
  }
  func.func @transform_0(%arg0: i32) -> (i32, i32) {
    %c0_i32 = arith.constant 0 : i32
    %c0_i32_0 = arith.constant 0 : i32
    return %arg0, %c0_i32 : i32, i32
  }
  func.func @transform_1(%arg0: i32) -> (i32, i32) {
    %c0_i32 = arith.constant 0 : i32
    %c0_i32_0 = arith.constant 0 : i32
    %c0_i32_1 = arith.constant 0 : i32
    return %c0_i32, %c0_i32_0 : i32, i32
  }
  func.func @transform_2(%arg0: i32) -> (i32, i32) {
    %c0_i32 = arith.constant 0 : i32
    %c0_i32_0 = arith.constant 0 : i32
    %c0_i32_1 = arith.constant 0 : i32
    return %c0_i32, %c0_i32_0 : i32, i32
  }
  func.func @transform_3(%arg0: i32) -> (i32, i32) {
    %c0_i32 = arith.constant 0 : i32
    %c0_i32_0 = arith.constant 0 : i32
    return %arg0, %c0_i32 : i32, i32
  }
}

module attributes {stable_mosaic.version = 11 : i64} {
  func.func @_mm_bias_relu_kernel(%arg0: i32, %arg1: memref<80x1152xbf16, #tpu.memory_space<vmem>>, %arg2: memref<1152x128xbf16, #tpu.memory_space<vmem>>, %arg3: memref<1x128xf32, #tpu.memory_space<vmem>>, %arg4: memref<80x128xbf16, #tpu.memory_space<vmem>>) attributes {dimension_semantics = [#tpu.dimension_semantics<parallel>], iteration_bounds = array<i64: 2>, scalar_prefetch = 0 : i64, scratch_operands = 0 : i64, tpu.core_type = #tpu.core_type<tc>, window_params = [{transform_indices = @transform_0, window_bounds = array<i64: 80, 1152>}, {pipeline_mode = #tpu.pipeline_mode<synchronous>, transform_indices = @transform_1, window_bounds = array<i64: 1152, 128>}, {pipeline_mode = #tpu.pipeline_mode<synchronous>, transform_indices = @transform_2, window_bounds = array<i64: 1, 128>}, {transform_indices = @transform_3, window_bounds = array<i64: 80, 128>}]} {
    %c0 = arith.constant 0 : index
    %c0_0 = arith.constant 0 : index
    %0 = vector.load %arg1[%c0, %c0_0] : memref<80x1152xbf16, #tpu.memory_space<vmem>>, vector<80x1152xbf16>
    %c0_1 = arith.constant 0 : index
    %c0_2 = arith.constant 0 : index
    %1 = vector.load %arg2[%c0_1, %c0_2] : memref<1152x128xbf16, #tpu.memory_space<vmem>>, vector<1152x128xbf16>
    %cst = arith.constant dense<0.000000e+00> : vector<80x128xf32>
    %2 = tpu.matmul %0, %1, %cst {dimension_numbers = #tpu.dot_dimension_numbers<[1], [0], [0], [1], [0, 0, 1, 1], [], []>} : vector<80x1152xbf16>, vector<1152x128xbf16>, vector<80x128xf32> -> vector<80x128xf32>
    %c0_3 = arith.constant 0 : index
    %c0_4 = arith.constant 0 : index
    %3 = vector.load %arg3[%c0_3, %c0_4] : memref<1x128xf32, #tpu.memory_space<vmem>>, vector<1x128xf32>
    %4 = vector.broadcast %3 : vector<1x128xf32> to vector<80x128xf32>
    %5 = arith.addf %2, %4 : vector<80x128xf32>
    %cst_5 = arith.constant 0.000000e+00 : f32
    %6 = vector.broadcast %cst_5 : f32 to vector<80x128xf32>
    %7 = arith.maximumf %5, %6 : vector<80x128xf32>
    %8 = arith.truncf %7 : vector<80x128xf32> to vector<80x128xbf16>
    %c0_6 = arith.constant 0 : index
    %c0_7 = arith.constant 0 : index
    %9 = vector.load %arg4[%c0_6, %c0_7] : memref<80x128xbf16, #tpu.memory_space<vmem>>, vector<80x128xbf16>
    tpu.vector_store %arg4[%c0_6, %c0_7], %8 {strides = array<i32>} : memref<80x128xbf16, #tpu.memory_space<vmem>>, vector<80x128xbf16>,
    return
  }
  func.func @transform_0(%arg0: i32) -> (i32, i32) {
    %c0_i32 = arith.constant 0 : i32
    %c0_i32_0 = arith.constant 0 : i32
    return %arg0, %c0_i32 : i32, i32
  }
  func.func @transform_1(%arg0: i32) -> (i32, i32) {
    %c0_i32 = arith.constant 0 : i32
    %c0_i32_0 = arith.constant 0 : i32
    %c0_i32_1 = arith.constant 0 : i32
    return %c0_i32, %c0_i32_0 : i32, i32
  }
  func.func @transform_2(%arg0: i32) -> (i32, i32) {
    %c0_i32 = arith.constant 0 : i32
    %c0_i32_0 = arith.constant 0 : i32
    %c0_i32_1 = arith.constant 0 : i32
    return %c0_i32, %c0_i32_0 : i32, i32
  }
  func.func @transform_3(%arg0: i32) -> (i32, i32) {
    %c0_i32 = arith.constant 0 : i32
    %c0_i32_0 = arith.constant 0 : i32
    return %arg0, %c0_i32 : i32, i32
  }
}

module attributes {stable_mosaic.version = 11 : i64} {
  func.func @_fused_linear_kernel(%arg0: i32, %arg1: memref<8x4480xbf16, #tpu.memory_space<vmem>>, %arg2: memref<4480x896xbf16, #tpu.memory_space<vmem>>, %arg3: memref<1x896xf32, #tpu.memory_space<vmem>>, %arg4: memref<896x128xbf16, #tpu.memory_space<vmem>>, %arg5: memref<1x128xf32, #tpu.memory_space<vmem>>, %arg6: memref<8x128xf32, #tpu.memory_space<vmem>>) attributes {dimension_semantics = [#tpu.dimension_semantics<arbitrary>], iteration_bounds = array<i64: 1>, scalar_prefetch = 0 : i64, scratch_operands = 0 : i64, tpu.core_type = #tpu.core_type<tc>, window_params = [{pipeline_mode = #tpu.pipeline_mode<synchronous>, transform_indices = @transform_0, window_bounds = array<i64: 8, 4480>}, {pipeline_mode = #tpu.pipeline_mode<synchronous>, transform_indices = @transform_1, window_bounds = array<i64: 4480, 896>}, {pipeline_mode = #tpu.pipeline_mode<synchronous>, transform_indices = @transform_2, window_bounds = array<i64: 1, 896>}, {pipeline_mode = #tpu.pipeline_mode<synchronous>, transform_indices = @transform_3, window_bounds = array<i64: 896, 128>}, {pipeline_mode = #tpu.pipeline_mode<synchronous>, transform_indices = @transform_4, window_bounds = array<i64: 1, 128>}, {pipeline_mode = #tpu.pipeline_mode<synchronous>, transform_indices = @transform_5, window_bounds = array<i64: 8, 128>}]} {
    %c0 = arith.constant 0 : index
    %c0_0 = arith.constant 0 : index
    %0 = vector.load %arg1[%c0, %c0_0] : memref<8x4480xbf16, #tpu.memory_space<vmem>>, vector<8x4480xbf16>
    %c0_1 = arith.constant 0 : index
    %c0_2 = arith.constant 0 : index
    %1 = vector.load %arg2[%c0_1, %c0_2] : memref<4480x896xbf16, #tpu.memory_space<vmem>>, vector<4480x896xbf16>
    %cst = arith.constant dense<0.000000e+00> : vector<8x896xf32>
    %2 = tpu.matmul %0, %1, %cst {dimension_numbers = #tpu.dot_dimension_numbers<[1], [0], [0], [1], [0, 0, 1, 1], [], []>} : vector<8x4480xbf16>, vector<4480x896xbf16>, vector<8x896xf32> -> vector<8x896xf32>
    %c0_3 = arith.constant 0 : index
    %c0_4 = arith.constant 0 : index
    %3 = vector.load %arg3[%c0_3, %c0_4] : memref<1x896xf32, #tpu.memory_space<vmem>>, vector<1x896xf32>
    %4 = vector.broadcast %3 : vector<1x896xf32> to vector<8x896xf32>
    %5 = arith.addf %2, %4 : vector<8x896xf32>
    %cst_5 = arith.constant 0.000000e+00 : f32
    %6 = vector.broadcast %cst_5 : f32 to vector<8x896xf32>
    %7 = arith.maximumf %5, %6 : vector<8x896xf32>
    %8 = arith.truncf %7 : vector<8x896xf32> to vector<8x896xbf16>
    %c0_6 = arith.constant 0 : index
    %c0_7 = arith.constant 0 : index
    %9 = vector.load %arg4[%c0_6, %c0_7] : memref<896x128xbf16, #tpu.memory_space<vmem>>, vector<896x128xbf16>
    %cst_8 = arith.constant dense<0.000000e+00> : vector<8x128xf32>
    %10 = tpu.matmul %8, %9, %cst_8 {dimension_numbers = #tpu.dot_dimension_numbers<[1], [0], [0], [1], [0, 0, 1, 1], [], []>} : vector<8x896xbf16>, vector<896x128xbf16>, vector<8x128xf32> -> vector<8x128xf32>
    %c0_9 = arith.constant 0 : index
    %c0_10 = arith.constant 0 : index
    %11 = vector.load %arg5[%c0_9, %c0_10] : memref<1x128xf32, #tpu.memory_space<vmem>>, vector<1x128xf32>
    %12 = vector.broadcast %11 : vector<1x128xf32> to vector<8x128xf32>
    %13 = arith.addf %10, %12 : vector<8x128xf32>
    %c0_11 = arith.constant 0 : index
    %c0_12 = arith.constant 0 : index
    %14 = vector.load %arg6[%c0_11, %c0_12] : memref<8x128xf32, #tpu.memory_space<vmem>>, vector<8x128xf32>
    tpu.vector_store %arg6[%c0_11, %c0_12], %13 {strides = array<i32>} : memref<8x128xf32, #tpu.memory_space<vmem>>, vector<8x128xf32>,
    return
  }
  func.func @transform_0(%arg0: i32) -> (i32, i32) {
    %c0_i32 = arith.constant 0 : i32
    %c0_i32_0 = arith.constant 0 : i32
    %c0_i32_1 = arith.constant 0 : i32
    return %c0_i32, %c0_i32_0 : i32, i32
  }
  func.func @transform_1(%arg0: i32) -> (i32, i32) {
    %c0_i32 = arith.constant 0 : i32
    %c0_i32_0 = arith.constant 0 : i32
    %c0_i32_1 = arith.constant 0 : i32
    return %c0_i32, %c0_i32_0 : i32, i32
  }
  func.func @transform_2(%arg0: i32) -> (i32, i32) {
    %c0_i32 = arith.constant 0 : i32
    %c0_i32_0 = arith.constant 0 : i32
    %c0_i32_1 = arith.constant 0 : i32
    return %c0_i32, %c0_i32_0 : i32, i32
  }
  func.func @transform_3(%arg0: i32) -> (i32, i32) {
    %c0_i32 = arith.constant 0 : i32
    %c0_i32_0 = arith.constant 0 : i32
    %c0_i32_1 = arith.constant 0 : i32
    return %c0_i32, %c0_i32_0 : i32, i32
  }
  func.func @transform_4(%arg0: i32) -> (i32, i32) {
    %c0_i32 = arith.constant 0 : i32
    %c0_i32_0 = arith.constant 0 : i32
    %c0_i32_1 = arith.constant 0 : i32
    return %c0_i32, %c0_i32_0 : i32, i32
  }
  func.func @transform_5(%arg0: i32) -> (i32, i32) {
    %c0_i32 = arith.constant 0 : i32
    %c0_i32_0 = arith.constant 0 : i32
    %c0_i32_1 = arith.constant 0 : i32
    return %c0_i32, %c0_i32_0 : i32, i32
  }
}

</mosaic_0001>

<bundles_post_ra>
// kernel: cnn_forward.4
= control target key start
LH: loop header
LB: loop body
LE: loop exit
PB: predicated region body
PF: predicated region fallthrough
CT: control target
= control target key end

     0   :  { %s2066_s12 = smov 0   ;;  %s2341_s0 = inlined_call_operand.vmem [shape: bf16[1056,256], index: 0, kind: input, shape index: {}]   ;;  %s2342_s1 = inlined_call_operand.vmem [shape: bf16[256,128], index: 1, kind: input, shape index: {}]   ;;  %s2343_s2 = inlined_call_operand.vmem [shape: f32[1,128], index: 2, kind: input, shape index: {}]   ;;  %s2344_s3 = inlined_call_operand.vmem [shape: bf16[1056,128], index: 3, kind: output, shape index: {}]  }
   0x1 LB: > { %s1458_s13 = sadd.s32 4294967295, %s2043_s12   ;;  %p1462_p0 = scmp.ge.s32.totalorder %s2043_s12, 1  ;;  %s2043_s12 = sphi %s2066_s12, %s13_s12  }
   0x2   : > { %p139_p1 = scmp.lt.s32.totalorder %s2043_s12, 3 }
   0x4   : > { %p140_p2 = pnand %p1462_p0, %p139_p1 }
   0x5   : > { %v1922_v0 = vld [vmem:[%s2342_s1] sm:$0xff] (!%p140_p2)   ;;  %v2045_v1 = vmov (!%p140_p2), 0   ;;  %s164_s16 = smul.u32 (!%p140_p2), 66, %s1458_s13  ;;  %v1923_v2 = vld [vmem:[%s2342_s1 + $0x8] sm:$0xff] (!%p140_p2)   ;;  %v1924_v3 = vld [vmem:[%s2342_s1 + $0x10] sm:$0xff] (!%p140_p2)  }
   0x6   : > { %143 = sbr.rel (%p140_p2) target bundleno = 419 (0x1a3), region = 32  ;;  %709 = vmatprep.subr.bf16.mxu0 (!%p140_p2), %v2045_v1  ;;  %1881 = vmatprep.subr.bf16.mxu1 (!%p140_p2), %v2045_v1  ;;  %v1925_v4 = vld [vmem:[%s2342_s1 + $0x18] sm:$0xff] (!%p140_p2)   ;;  %v1926_v5 = vld [vmem:[%s2342_s1 + $0x20] sm:$0xff] (!%p140_p2)   ;;  %v1927_v7 = vld [vmem:[%s2342_s1 + $0x28] sm:$0xff] (!%p140_p2)  }
   0x7   : > { %710 = vmatpush1.bf16.msra.mxu0 (!%p140_p2), %v1922_v0  ;;  %1897 = vmatpush1.bf16.msra.mxu1 (!%p140_p2), %v1922_v0  ;;  %p165_p3 = scmp.lt.s32.totalorder (!%p140_p2), %s164_s16, 131  ;;  %v1928_v9 = vld [vmem:[%s2342_s1 + $0x30] sm:$0xff] (!%p140_p2)   ;;  %v1929_v10 = vld [vmem:[%s2342_s1 + $0x38] sm:$0xff] (!%p140_p2)   ;;  %v1930_v11 = vld [vmem:[%s2342_s1 + $0x40] sm:$0xff] (!%p140_p2)  }
   0x8   : > { %711 = vmatprep.subr.bf16.mxu0 (!%p140_p2), %v2045_v1  ;;  %1882 = vmatprep.subr.bf16.mxu1 (!%p140_p2), %v2045_v1  ;;  %v1931_v12 = vld [vmem:[%s2342_s1 + $0x48] sm:$0xff] (!%p140_p2)   ;;  %v1932_v13 = vld [vmem:[%s2342_s1 + $0x50] sm:$0xff] (!%p140_p2)   ;;  %v1933_v14 = vld [vmem:[%s2342_s1 + $0x58] sm:$0xff] (!%p140_p2)  }
   0x9   : > { %v1934_v15 = vld [vmem:[%s2342_s1 + $0x60] sm:$0xff] (!%p140_p2)   ;;  %v1935_v16 = vld [vmem:[%s2342_s1 + $0x68] sm:$0xff] (!%p140_p2)   ;;  %v1936_v17 = vld [vmem:[%s2342_s1 + $0x70] sm:$0xff] (!%p140_p2)  }
   0xa   : > { %v1937_v18 = vld [vmem:[%s2342_s1 + $0x78] sm:$0xff] (!%p140_p2)  }
   0xb   : > { %712 = vmatpush1.bf16.msra.mxu0 (!%p140_p2), %v1923_v2  ;;  %1898 = vmatpush1.bf16.msra.mxu1 (!%p140_p2), %v1923_v2 }
   0xc   : > { %713 = vmatprep.subr.bf16.mxu0 (!%p140_p2), %v2045_v1  ;;  %1883 = vmatprep.subr.bf16.mxu1 (!%p140_p2), %v2045_v1 }
   0xd   : > { %s2346_s16 = smov (!%p165_p3, %s164_s16), 131 }
   0xe   : > { %s1617_s23 = sshll.u32 %s2346_s16, 3  ;;  %s1465_s29 = sshll.u32 %s2346_s16, 2 }
   0xf   : > { %714 = vmatpush1.bf16.msra.mxu0 %v1924_v3  ;;  %1899 = vmatpush1.bf16.msra.mxu1 %v1924_v3  ;;  %s2103_s28 = scalar_lea.vmem %s2341_s0, %s1617_s23  ;;  %s2241_s4 = scalar_lea.vmem %s2344_s3, %s1465_s29 }
  0x10   : > { %715 = vmatprep.subr.bf16.mxu0 %v2045_v1  ;;  %1884 = vmatprep.subr.bf16.mxu1 %v2045_v1  ;;  %v1940_v6 = vld [vmem:[%s2103_s28 + $0x4] ss:$8 sps:$4 sm:$0xff]   ;;  %v1943_v8 = vld [vmem:[%s2103_s28 + $0x114] ss:$8 sps:$4 sm:$0xff]   ;;  %v1938_v19 = vld [vmem:[%s2103_s28] ss:$8 sps:$4 sm:$0xff]  }
  0x11   : > { %741 = vmatprep.mubr.bf16.mxu0 %v1940_v6  ;;  %877 = vmatprep.mubr.bf16.mxu1 %v1943_v8  ;;  %v1941_v20 = vld [vmem:[%s2103_s28 + $0x110] ss:$8 sps:$4 sm:$0xff]   ;;  %v1944_v21 = vld [vmem:[%s2103_s28 + $0x14] ss:$8 sps:$4 sm:$0xff]   ;;  %v1947_v22 = vld [vmem:[%s2103_s28 + $0x124] ss:$8 sps:$4 sm:$0xff]  }
  0x12   : > { %v1946_v23 = vld [vmem:[%s2103_s28 + $0x10] ss:$8 sps:$4 sm:$0xff]   ;;  %v1949_v24 = vld [vmem:[%s2103_s28 + $0x120] ss:$8 sps:$4 sm:$0xff]   ;;  %v1950_v25 = vld [vmem:[%s2103_s28 + $0x24] ss:$8 sps:$4 sm:$0xff]  }
  0x13   : > { %716 = vmatpush1.bf16.msra.mxu0 %v1925_v4  ;;  %1900 = vmatpush1.bf16.msra.mxu1 %v1925_v4  ;;  %v1953_v26 = vld [vmem:[%s2103_s28 + $0x134] ss:$8 sps:$4 sm:$0xff]   ;;  %v1952_v27 = vld [vmem:[%s2103_s28 + $0x20] ss:$8 sps:$4 sm:$0xff]   ;;  %v1955_v28 = vld [vmem:[%s2103_s28 + $0x130] ss:$8 sps:$4 sm:$0xff]  }
  0x14   : > { %717 = vmatprep.subr.bf16.mxu0 %v2045_v1  ;;  %1885 = vmatprep.subr.bf16.mxu1 %v2045_v1  ;;  %v1956_v29 = vld [vmem:[%s2103_s28 + $0x34] ss:$8 sps:$4 sm:$0xff]   ;;  %v1959_v30 = vld [vmem:[%s2103_s28 + $0x144] ss:$8 sps:$4 sm:$0xff]   ;;  %v1958_v31 = vld [vmem:[%s2103_s28 + $0x30] ss:$8 sps:$4 sm:$0xff]  }
  0x15   : > { %v1961_v32 = vld [vmem:[%s2103_s28 + $0x140] ss:$8 sps:$4 sm:$0xff]   ;;  %v1962_v33 = vld [vmem:[%s2103_s28 + $0x44] ss:$8 sps:$4 sm:$0xff]   ;;  %v1965_v34 = vld [vmem:[%s2103_s28 + $0x154] ss:$8 sps:$4 sm:$0xff]  }
  0x16   : > { %v1964_v35 = vld [vmem:[%s2103_s28 + $0x40] ss:$8 sps:$4 sm:$0xff]   ;;  %v1967_v36 = vld [vmem:[%s2103_s28 + $0x150] ss:$8 sps:$4 sm:$0xff]   ;;  %v1968_v37 = vld [vmem:[%s2103_s28 + $0x54] ss:$8 sps:$4 sm:$0xff]  }
  0x17   : > { %718 = vmatpush1.bf16.msra.mxu0 %v1926_v5  ;;  %1901 = vmatpush1.bf16.msra.mxu1 %v1926_v5  ;;  %v1971_v38 = vld [vmem:[%s2103_s28 + $0x164] ss:$8 sps:$4 sm:$0xff]   ;;  %v1970_v39 = vld [vmem:[%s2103_s28 + $0x50] ss:$8 sps:$4 sm:$0xff]   ;;  %v1973_v40 = vld [vmem:[%s2103_s28 + $0x160] ss:$8 sps:$4 sm:$0xff]  }
  0x18   : > { %719 = vmatprep.subr.bf16.mxu0 %v2045_v1  ;;  %1886 = vmatprep.subr.bf16.mxu1 %v2045_v1  ;;  %v1974_v41 = vld [vmem:[%s2103_s28 + $0x64] ss:$8 sps:$4 sm:$0xff]   ;;  %v1977_v42 = vld [vmem:[%s2103_s28 + $0x174] ss:$8 sps:$4 sm:$0xff]   ;;  %v1976_v43 = vld [vmem:[%s2103_s28 + $0x60] ss:$8 sps:$4 sm:$0xff]  }
  0x19   : > { %v1979_v44 = vld [vmem:[%s2103_s28 + $0x170] ss:$8 sps:$4 sm:$0xff]   ;;  %v1980_v45 = vld [vmem:[%s2103_s28 + $0x74] ss:$8 sps:$4 sm:$0xff]   ;;  %v1983_v46 = vld [vmem:[%s2103_s28 + $0x184] ss:$8 sps:$4 sm:$0xff]  }
  0x1a   : > { %v1982_v47 = vld [vmem:[%s2103_s28 + $0x70] ss:$8 sps:$4 sm:$0xff]   ;;  %v1985_v48 = vld [vmem:[%s2103_s28 + $0x180] ss:$8 sps:$4 sm:$0xff]   ;;  %v1986_v49 = vld [vmem:[%s2103_s28 + $0x84] ss:$8 sps:$4 sm:$0xff]  }
  0x1b   : > { %720 = vmatpush1.bf16.msra.mxu0 %v1927_v7  ;;  %1902 = vmatpush1.bf16.msra.mxu1 %v1927_v7  ;;  %v1989_v50 = vld [vmem:[%s2103_s28 + $0x194] ss:$8 sps:$4 sm:$0xff]   ;;  %v1988_v51 = vld [vmem:[%s2103_s28 + $0x80] ss:$8 sps:$4 sm:$0xff]   ;;  %v1991_v52 = vld [vmem:[%s2103_s28 + $0x190] ss:$8 sps:$4 sm:$0xff]  }
  0x1c   : > { %721 = vmatprep.subr.bf16.mxu0 %v2045_v1  ;;  %1887 = vmatprep.subr.bf16.mxu1 %v2045_v1  ;;  %v1992_v53 = vld [vmem:[%s2103_s28 + $0x94] ss:$8 sps:$4 sm:$0xff]   ;;  %v1995_v54 = vld [vmem:[%s2103_s28 + $0x1a4] ss:$8 sps:$4 sm:$0xff]   ;;  %v1994_v55 = vld [vmem:[%s2103_s28 + $0x90] ss:$8 sps:$4 sm:$0xff]  }
  0x1d   : > { %v1997_v56 = vld [vmem:[%s2103_s28 + $0x1a0] ss:$8 sps:$4 sm:$0xff]   ;;  %v1998_v57 = vld [vmem:[%s2103_s28 + $0xa4] ss:$8 sps:$4 sm:$0xff]   ;;  %v2001_v58 = vld [vmem:[%s2103_s28 + $0x1b4] ss:$8 sps:$4 sm:$0xff]  }
  0x1e   : > { %v2000_v59 = vld [vmem:[%s2103_s28 + $0xa0] ss:$8 sps:$4 sm:$0xff]   ;;  %v2003_v60 = vld [vmem:[%s2103_s28 + $0x1b0] ss:$8 sps:$4 sm:$0xff]   ;;  %v2004_v61 = vld [vmem:[%s2103_s28 + $0xb4] ss:$8 sps:$4 sm:$0xff]  }
  0x1f   : > { %722 = vmatpush1.bf16.msra.mxu0 %v1928_v9  ;;  %1903 = vmatpush1.bf16.msra.mxu1 %v1928_v9  ;;  %v2007_v62 = vld [vmem:[%s2103_s28 + $0x1c4] ss:$8 sps:$4 sm:$0xff]   ;;  %v2006_v63 = vld [vmem:[%s2103_s28 + $0xb0] ss:$8 sps:$4 sm:$0xff]   ;;  %v2009_v0 = vld [vmem:[%s2103_s28 + $0x1c0] ss:$8 sps:$4 sm:$0xff]  }
  0x20   : > { %723 = vmatprep.subr.bf16.mxu0 %v2045_v1  ;;  %1888 = vmatprep.subr.bf16.mxu1 %v2045_v1  ;;  %v2013_v2 = vld [vmem:[%s2103_s28 + $0x1d4] ss:$8 sps:$4 sm:$0xff]   ;;  %v2012_v3 = vld [vmem:[%s2103_s28 + $0xc0] ss:$8 sps:$4 sm:$0xff]   ;;  %v2015_v4 = vld [vmem:[%s2103_s28 + $0x1d0] ss:$8 sps:$4 sm:$0xff]  }
  0x21   : > { %v2016_v5 = vld [vmem:[%s2103_s28 + $0xd4] ss:$8 sps:$4 sm:$0xff]   ;;  %v2019_v6 = vld [vmem:[%s2103_s28 + $0x1e4] ss:$8 sps:$4 sm:$0xff]   ;;  %v2018_v7 = vld [vmem:[%s2103_s28 + $0xd0] ss:$8 sps:$4 sm:$0xff]  }
  0x22   : > { %v2021_v8 = vld [vmem:[%s2103_s28 + $0x1e0] ss:$8 sps:$4 sm:$0xff]   ;;  %v2022_v9 = vld [vmem:[%s2103_s28 + $0xe4] ss:$8 sps:$4 sm:$0xff]  }
  0x23   : > { %724 = vmatpush1.bf16.msra.mxu0 %v1929_v10  ;;  %1904 = vmatpush1.bf16.msra.mxu1 %v1929_v10  ;;  %v2025_v10 = vld [vmem:[%s2103_s28 + $0x1f4] ss:$8 sps:$4 sm:$0xff]  }
  0x24   : > { %725 = vmatprep.subr.bf16.mxu0 %v2045_v1  ;;  %1889 = vmatprep.subr.bf16.mxu1 %v2045_v1 }
  0x27   : > { %726 = vmatpush1.bf16.msra.mxu0 %v1930_v11  ;;  %1905 = vmatpush1.bf16.msra.mxu1 %v1930_v11  ;;  %v2024_v11 = vld [vmem:[%s2103_s28 + $0xe0] ss:$8 sps:$4 sm:$0xff]  }
  0x28   : > { %727 = vmatprep.subr.bf16.mxu0 %v2045_v1  ;;  %1890 = vmatprep.subr.bf16.mxu1 %v2045_v1 }
  0x2b   : > { %728 = vmatpush1.bf16.msra.mxu0 %v1931_v12  ;;  %1906 = vmatpush1.bf16.msra.mxu1 %v1931_v12  ;;  %v2027_v12 = vld [vmem:[%s2103_s28 + $0x1f0] ss:$8 sps:$4 sm:$0xff]  }
  0x2c   : > { %729 = vmatprep.subr.bf16.mxu0 %v2045_v1  ;;  %1891 = vmatprep.subr.bf16.mxu1 %v2045_v1 }
  0x2f   : > { %730 = vmatpush1.bf16.msra.mxu0 %v1932_v13  ;;  %1907 = vmatpush1.bf16.msra.mxu1 %v1932_v13  ;;  %v2028_v13 = vld [vmem:[%s2103_s28 + $0xf4] ss:$8 sps:$4 sm:$0xff]  }
  0x30   : > { %731 = vmatprep.subr.bf16.mxu0 %v2045_v1  ;;  %1892 = vmatprep.subr.bf16.mxu1 %v2045_v1 }
  0x33   : > { %732 = vmatpush1.bf16.msra.mxu0 %v1933_v14  ;;  %1908 = vmatpush1.bf16.msra.mxu1 %v1933_v14  ;;  %v2031_v14 = vld [vmem:[%s2103_s28 + $0x204] ss:$8 sps:$4 sm:$0xff]  }
  0x34   : > { %733 = vmatprep.subr.bf16.mxu0 %v2045_v1  ;;  %1893 = vmatprep.subr.bf16.mxu1 %v2045_v1 }
  0x37   : > { %734 = vmatpush1.bf16.msra.mxu0 %v1934_v15  ;;  %1909 = vmatpush1.bf16.msra.mxu1 %v1934_v15  ;;  %v2030_v15 = vld [vmem:[%s2103_s28 + $0xf0] ss:$8 sps:$4 sm:$0xff]  }
  0x38   : > { %735 = vmatprep.subr.bf16.mxu0 %v2045_v1  ;;  %1894 = vmatprep.subr.bf16.mxu1 %v2045_v1 }
  0x3b   : > { %736 = vmatpush1.bf16.msra.mxu0 %v1935_v16  ;;  %1910 = vmatpush1.bf16.msra.mxu1 %v1935_v16  ;;  %v2033_v16 = vld [vmem:[%s2103_s28 + $0x200] ss:$8 sps:$4 sm:$0xff]  }
  0x3c   : > { %737 = vmatprep.subr.bf16.mxu0 %v2045_v1  ;;  %1895 = vmatprep.subr.bf16.mxu1 %v2045_v1 }
  0x3f   : > { %738 = vmatpush1.bf16.msra.mxu0 %v1936_v17  ;;  %1911 = vmatpush1.bf16.msra.mxu1 %v1936_v17  ;;  %v2034_v17 = vld [vmem:[%s2103_s28 + $0x104] ss:$8 sps:$4 sm:$0xff]  }
  0x40   : > { %739 = vmatprep.subr.bf16.mxu0 %v2045_v1  ;;  %1896 = vmatprep.subr.bf16.mxu1 %v2045_v1  ;;  %v2010_v1 = vld [vmem:[%s2103_s28 + $0xc4] ss:$8 sps:$4 sm:$0xff]  }
  0x43   : > { %740 = vmatpush1.bf16.msra.mxu0 %v1937_v18  ;;  %1912 = vmatpush1.bf16.msra.mxu1 %v1937_v18  ;;  %v2036_v18 = vld [vmem:[%s2103_s28 + $0x100] ss:$8 sps:$4 sm:$0xff]  }
  0x46   : > { %742 = vmatmul.mubr.bf16.vlgmr.msra.gmra.mrb[0].mxu0 %v1938_v19  ;;  %878 = vmatmul.mubr.bf16.vlgmr.msra.gmra.mrb[0].mxu1 %v1941_v20  ;;  %v2231_v19 = vld [vmem:[%s2343_s2] ss:$0 sm:$0xff] }
  0x47   : > { %749 = vmatprep.mubr.bf16.mxu0 %v1944_v21  ;;  %885 = vmatprep.mubr.bf16.mxu1 %v1947_v22 }
  0x4e   : > { %750 = vmatmul.mubr.bf16.gmra.mrb[4].mxu0 %v1946_v23  ;;  %886 = vmatmul.mubr.bf16.gmra.mrb[4].mxu1 %v1949_v24 }
  0x4f   : > { %757 = vmatprep.mubr.bf16.mxu0 %v1950_v25  ;;  %893 = vmatprep.mubr.bf16.mxu1 %v1953_v26 }
  0x56   : > { %758 = vmatmul.mubr.bf16.gmra.mrb[8].mxu0 %v1952_v27  ;;  %894 = vmatmul.mubr.bf16.gmra.mrb[8].mxu1 %v1955_v28 }
  0x57   : > { %765 = vmatprep.mubr.bf16.mxu0 %v1956_v29  ;;  %901 = vmatprep.mubr.bf16.mxu1 %v1959_v30 }
  0x5e   : > { %766 = vmatmul.mubr.bf16.gmra.mrb[12].mxu0 %v1958_v31  ;;  %902 = vmatmul.mubr.bf16.gmra.mrb[12].mxu1 %v1961_v32 }
  0x5f   : > { %773 = vmatprep.mubr.bf16.mxu0 %v1962_v33  ;;  %909 = vmatprep.mubr.bf16.mxu1 %v1965_v34 }
  0x66   : > { %774 = vmatmul.mubr.bf16.gmra.mrb[16].mxu0 %v1964_v35  ;;  %910 = vmatmul.mubr.bf16.gmra.mrb[16].mxu1 %v1967_v36 }
  0x67   : > { %781 = vmatprep.mubr.bf16.mxu0 %v1968_v37  ;;  %917 = vmatprep.mubr.bf16.mxu1 %v1971_v38 }
  0x6e   : > { %782 = vmatmul.mubr.bf16.gmra.mrb[20].mxu0 %v1970_v39  ;;  %918 = vmatmul.mubr.bf16.gmra.mrb[20].mxu1 %v1973_v40 }
  0x6f   : > { %789 = vmatprep.mubr.bf16.mxu0 %v1974_v41  ;;  %925 = vmatprep.mubr.bf16.mxu1 %v1977_v42 }
  0x76   : > { %790 = vmatmul.mubr.bf16.gmra.mrb[24].mxu0 %v1976_v43  ;;  %926 = vmatmul.mubr.bf16.gmra.mrb[24].mxu1 %v1979_v44 }
  0x77   : > { %797 = vmatprep.mubr.bf16.mxu0 %v1980_v45  ;;  %933 = vmatprep.mubr.bf16.mxu1 %v1983_v46 }
  0x7e   : > { %798 = vmatmul.mubr.bf16.gmra.mrb[28].mxu0 %v1982_v47  ;;  %934 = vmatmul.mubr.bf16.gmra.mrb[28].mxu1 %v1985_v48 }
  0x7f   : > { %805 = vmatprep.mubr.bf16.mxu0 %v1986_v49  ;;  %941 = vmatprep.mubr.bf16.mxu1 %v1989_v50 }
  0x86   : > { %806 = vmatmul.mubr.bf16.gmra.mrb[32].mxu0 %v1988_v51  ;;  %942 = vmatmul.mubr.bf16.gmra.mrb[32].mxu1 %v1991_v52 }
  0x87   : > { %813 = vmatprep.mubr.bf16.mxu0 %v1992_v53  ;;  %949 = vmatprep.mubr.bf16.mxu1 %v1995_v54 }
  0x8e   : > { %814 = vmatmul.mubr.bf16.gmra.mrb[36].mxu0 %v1994_v55  ;;  %950 = vmatmul.mubr.bf16.gmra.mrb[36].mxu1 %v1997_v56 }
  0x8f   : > { %821 = vmatprep.mubr.bf16.mxu0 %v1998_v57  ;;  %957 = vmatprep.mubr.bf16.mxu1 %v2001_v58 }
  0x96   : > { %822 = vmatmul.mubr.bf16.gmra.mrb[40].mxu0 %v2000_v59  ;;  %958 = vmatmul.mubr.bf16.gmra.mrb[40].mxu1 %v2003_v60 }
  0x97   : > { %829 = vmatprep.mubr.bf16.mxu0 %v2004_v61  ;;  %965 = vmatprep.mubr.bf16.mxu1 %v2007_v62 }
  0x9e   : > { %830 = vmatmul.mubr.bf16.gmra.mrb[44].mxu0 %v2006_v63  ;;  %966 = vmatmul.mubr.bf16.gmra.mrb[44].mxu1 %v2009_v0 }
  0x9f   : > { %837 = vmatprep.mubr.bf16.mxu0 %v2010_v1  ;;  %973 = vmatprep.mubr.bf16.mxu1 %v2013_v2 }
  0xa6   : > { %838 = vmatmul.mubr.bf16.gmra.mrb[48].mxu0 %v2012_v3  ;;  %974 = vmatmul.mubr.bf16.gmra.mrb[48].mxu1 %v2015_v4 }
  0xa7   : > { %845 = vmatprep.mubr.bf16.mxu0 %v2016_v5  ;;  %981 = vmatprep.mubr.bf16.mxu1 %v2019_v6 }
  0xae   : > { %846 = vmatmul.mubr.bf16.gmra.mrb[52].mxu0 %v2018_v7  ;;  %982 = vmatmul.mubr.bf16.gmra.mrb[52].mxu1 %v2021_v8 }
  0xaf   : > { %853 = vmatprep.mubr.bf16.mxu0 %v2022_v9  ;;  %989 = vmatprep.mubr.bf16.mxu1 %v2025_v10 }
  0xb6   : > { %854 = vmatmul.mubr.bf16.gmra.mrb[56].mxu0 %v2024_v11  ;;  %990 = vmatmul.mubr.bf16.gmra.mrb[56].mxu1 %v2027_v12 }
  0xb7   : > { %861 = vmatprep.mubr.bf16.mxu0 %v2028_v13  ;;  %997 = vmatprep.mubr.bf16.mxu1 %v2031_v14 }
  0xbe   : > { %862 = vmatmul.mubr.bf16.gmra.mrb[60].mxu0 %v2030_v15  ;;  %998 = vmatmul.mubr.bf16.gmra.mrb[60].mxu1 %v2033_v16 }
  0xbf   : > { %869 = vmatprep.mubr.bf16.mxu0 %v2034_v17 }
  0xc6   : > { %870 = vmatmul.mubr.bf16.gmra.mrb[64].mxu0 %v2036_v18 }
 0x119   : > { %v743_v20 = vpop.f32.mrb[0].mxu0  ;;  %v879_v21 = vpop.f32.mrb[0].mxu1 }
 0x11a   : > { %v744_v22 = vadd.f32 %v2231_v19, %v743_v20  ;;  %v745_v23 = vpop.f32.mrb[1].mxu0  ;;  %v880_v24 = vadd.f32 %v2231_v19, %v879_v21  ;;  %v881_v25 = vpop.f32.mrb[1].mxu1 }
 0x11b   : > { %v746_v26 = vpop.f32.mrb[2].mxu0  ;;  %v882_v27 = vpop.f32.mrb[2].mxu1 }
 0x11c   : > { %v747_v28 = vadd.f32 %v2231_v19, %v746_v26  ;;  %v748_v29 = vpop.f32.mrb[3].mxu0  ;;  %v1040_v30 = vmax.f32 %v880_v24, 0.0  ;;  %v883_v31 = vadd.f32 %v2231_v19, %v882_v27  ;;  %v884_v32 = vpop.f32.mrb[3].mxu1  ;;  %v1006_v33 = vmax.f32 %v744_v22, 0.0 }
 0x11e   : > { %v1007_v34 = vmax.f32 %v747_v28, 0.0  ;;  %v1041_v35 = vmax.f32 %v883_v31, 0.0 }
 0x120   : > { %v1687_v36 = vpack.c.bf16 %v1007_v34, %v1006_v33  ;;  %v1772_v37 = vpack.c.bf16 %v1041_v35, %v1040_v30 }
 0x121   : > { %v751_v38 = vpop.f32.mrb[4].mxu0  ;;  %v887_v39 = vpop.f32.mrb[4].mxu1 }
 0x122   : > { %1688 = vst [vmem:[%s2241_s4] sm:$0xff] %v1687_v36   ;;  %1865 = vst [vmem:[%s2241_s4 + $0x88] sm:$0xff] %v1772_v37   ;;  %v752_v40 = vadd.f32 %v2231_v19, %v751_v38  ;;  %v753_v41 = vpop.f32.mrb[5].mxu0  ;;  %v888_v42 = vadd.f32 %v2231_v19, %v887_v39  ;;  %v889_v43 = vpop.f32.mrb[5].mxu1 }
 0x123   : > { %v754_v44 = vpop.f32.mrb[6].mxu0  ;;  %v890_v45 = vpop.f32.mrb[6].mxu1 }
 0x124   : > { %v755_v46 = vadd.f32 %v2231_v19, %v754_v44  ;;  %v756_v47 = vpop.f32.mrb[7].mxu0  ;;  %v1042_v48 = vmax.f32 %v888_v42, 0.0  ;;  %v891_v49 = vadd.f32 %v2231_v19, %v890_v45  ;;  %v892_v50 = vpop.f32.mrb[7].mxu1  ;;  %v1008_v51 = vmax.f32 %v752_v40, 0.0 }
 0x126   : > { %v1009_v52 = vmax.f32 %v755_v46, 0.0  ;;  %v1043_v53 = vmax.f32 %v891_v49, 0.0 }
 0x128   : > { %v1692_v54 = vpack.c.bf16 %v1009_v52, %v1008_v51  ;;  %v1777_v55 = vpack.c.bf16 %v1043_v53, %v1042_v48 }
 0x129   : > { %v759_v56 = vpop.f32.mrb[8].mxu0  ;;  %v895_v57 = vpop.f32.mrb[8].mxu1 }
 0x12a   : > { %1849 = vst [vmem:[%s2241_s4 + $0x8] sm:$0xff] %v1692_v54   ;;  %1866 = vst [vmem:[%s2241_s4 + $0x90] sm:$0xff] %v1777_v55   ;;  %v760_v58 = vadd.f32 %v2231_v19, %v759_v56  ;;  %v761_v59 = vpop.f32.mrb[9].mxu0  ;;  %v896_v60 = vadd.f32 %v2231_v19, %v895_v57  ;;  %v897_v61 = vpop.f32.mrb[9].mxu1 }
 0x12b   : > { %v762_v62 = vpop.f32.mrb[10].mxu0  ;;  %v898_v63 = vpop.f32.mrb[10].mxu1 }
 0x12c   : > { %v763_v0 = vadd.f32 %v2231_v19, %v762_v62  ;;  %v764_v1 = vpop.f32.mrb[11].mxu0  ;;  %v1044_v2 = vmax.f32 %v896_v60, 0.0  ;;  %v899_v3 = vadd.f32 %v2231_v19, %v898_v63  ;;  %v900_v4 = vpop.f32.mrb[11].mxu1  ;;  %v1010_v5 = vmax.f32 %v760_v58, 0.0 }
 0x12e   : > { %v1011_v6 = vmax.f32 %v763_v0, 0.0  ;;  %v1045_v7 = vmax.f32 %v899_v3, 0.0 }
 0x130   : > { %v1697_v8 = vpack.c.bf16 %v1011_v6, %v1010_v5  ;;  %v1782_v9 = vpack.c.bf16 %v1045_v7, %v1044_v2 }
 0x131   : > { %v767_v10 = vpop.f32.mrb[12].mxu0  ;;  %v903_v11 = vpop.f32.mrb[12].mxu1 }
 0x132   : > { %1850 = vst [vmem:[%s2241_s4 + $0x10] sm:$0xff] %v1697_v8   ;;  %1867 = vst [vmem:[%s2241_s4 + $0x98] sm:$0xff] %v1782_v9   ;;  %v768_v12 = vadd.f32 %v2231_v19, %v767_v10  ;;  %v769_v13 = vpop.f32.mrb[13].mxu0  ;;  %v904_v14 = vadd.f32 %v2231_v19, %v903_v11  ;;  %v905_v15 = vpop.f32.mrb[13].mxu1 }
 0x133   : > { %v770_v16 = vpop.f32.mrb[14].mxu0  ;;  %v906_v17 = vpop.f32.mrb[14].mxu1 }
 0x134   : > { %v771_v18 = vadd.f32 %v2231_v19, %v770_v16  ;;  %v772_v20 = vpop.f32.mrb[15].mxu0  ;;  %v1046_v21 = vmax.f32 %v904_v14, 0.0  ;;  %v907_v22 = vadd.f32 %v2231_v19, %v906_v17  ;;  %v908_v23 = vpop.f32.mrb[15].mxu1  ;;  %v1012_v24 = vmax.f32 %v768_v12, 0.0 }
 0x136   : > { %v1013_v25 = vmax.f32 %v771_v18, 0.0  ;;  %v1047_v26 = vmax.f32 %v907_v22, 0.0 }
 0x138   : > { %v1702_v27 = vpack.c.bf16 %v1013_v25, %v1012_v24  ;;  %v1787_v28 = vpack.c.bf16 %v1047_v26, %v1046_v21 }
 0x139   : > { %v775_v29 = vpop.f32.mrb[16].mxu0  ;;  %v911_v30 = vpop.f32.mrb[16].mxu1 }
 0x13a   : > { %1851 = vst [vmem:[%s2241_s4 + $0x18] sm:$0xff] %v1702_v27   ;;  %1868 = vst [vmem:[%s2241_s4 + $0xa0] sm:$0xff] %v1787_v28   ;;  %v776_v31 = vadd.f32 %v2231_v19, %v775_v29  ;;  %v777_v32 = vpop.f32.mrb[17].mxu0  ;;  %v912_v33 = vadd.f32 %v2231_v19, %v911_v30  ;;  %v913_v34 = vpop.f32.mrb[17].mxu1 }
 0x13b   : > { %v778_v35 = vpop.f32.mrb[18].mxu0  ;;  %v914_v36 = vpop.f32.mrb[18].mxu1 }
 0x13c   : > { %v779_v37 = vadd.f32 %v2231_v19, %v778_v35  ;;  %v780_v38 = vpop.f32.mrb[19].mxu0  ;;  %v1048_v39 = vmax.f32 %v912_v33, 0.0  ;;  %v915_v40 = vadd.f32 %v2231_v19, %v914_v36  ;;  %v916_v41 = vpop.f32.mrb[19].mxu1  ;;  %v1014_v42 = vmax.f32 %v776_v31, 0.0 }
 0x13e   : > { %v1015_v43 = vmax.f32 %v779_v37, 0.0  ;;  %v1049_v44 = vmax.f32 %v915_v40, 0.0 }
 0x140   : > { %v1707_v45 = vpack.c.bf16 %v1015_v43, %v1014_v42  ;;  %v1792_v46 = vpack.c.bf16 %v1049_v44, %v1048_v39 }
 0x141   : > { %v783_v47 = vpop.f32.mrb[20].mxu0  ;;  %v919_v48 = vpop.f32.mrb[20].mxu1 }
 0x142   : > { %1852 = vst [vmem:[%s2241_s4 + $0x20] sm:$0xff] %v1707_v45   ;;  %1869 = vst [vmem:[%s2241_s4 + $0xa8] sm:$0xff] %v1792_v46   ;;  %v784_v49 = vadd.f32 %v2231_v19, %v783_v47  ;;  %v785_v50 = vpop.f32.mrb[21].mxu0  ;;  %v920_v51 = vadd.f32 %v2231_v19, %v919_v48  ;;  %v921_v52 = vpop.f32.mrb[21].mxu1 }
 0x143   : > { %v786_v53 = vpop.f32.mrb[22].mxu0  ;;  %v922_v54 = vpop.f32.mrb[22].mxu1 }
 0x144   : > { %v787_v55 = vadd.f32 %v2231_v19, %v786_v53  ;;  %v788_v56 = vpop.f32.mrb[23].mxu0  ;;  %v1050_v57 = vmax.f32 %v920_v51, 0.0  ;;  %v923_v58 = vadd.f32 %v2231_v19, %v922_v54  ;;  %v924_v59 = vpop.f32.mrb[23].mxu1  ;;  %v1016_v60 = vmax.f32 %v784_v49, 0.0 }
 0x146   : > { %v1017_v61 = vmax.f32 %v787_v55, 0.0  ;;  %v1051_v62 = vmax.f32 %v923_v58, 0.0 }
 0x148   : > { %v1712_v63 = vpack.c.bf16 %v1017_v61, %v1016_v60  ;;  %v1797_v0 = vpack.c.bf16 %v1051_v62, %v1050_v57 }
 0x149   : > { %v791_v1 = vpop.f32.mrb[24].mxu0  ;;  %v927_v2 = vpop.f32.mrb[24].mxu1 }
 0x14a   : > { %1853 = vst [vmem:[%s2241_s4 + $0x28] sm:$0xff] %v1712_v63   ;;  %1870 = vst [vmem:[%s2241_s4 + $0xb0] sm:$0xff] %v1797_v0   ;;  %v792_v3 = vadd.f32 %v2231_v19, %v791_v1  ;;  %v793_v4 = vpop.f32.mrb[25].mxu0  ;;  %v928_v5 = vadd.f32 %v2231_v19, %v927_v2  ;;  %v929_v6 = vpop.f32.mrb[25].mxu1 }
 0x14b   : > { %v794_v7 = vpop.f32.mrb[26].mxu0  ;;  %v930_v8 = vpop.f32.mrb[26].mxu1 }
 0x14c   : > { %v795_v9 = vadd.f32 %v2231_v19, %v794_v7  ;;  %v796_v10 = vpop.f32.mrb[27].mxu0  ;;  %v1052_v11 = vmax.f32 %v928_v5, 0.0  ;;  %v931_v12 = vadd.f32 %v2231_v19, %v930_v8  ;;  %v932_v13 = vpop.f32.mrb[27].mxu1  ;;  %v1018_v14 = vmax.f32 %v792_v3, 0.0 }
 0x14e   : > { %v1019_v15 = vmax.f32 %v795_v9, 0.0  ;;  %v1053_v16 = vmax.f32 %v931_v12, 0.0 }
 0x150   : > { %v1717_v17 = vpack.c.bf16 %v1019_v15, %v1018_v14  ;;  %v1802_v18 = vpack.c.bf16 %v1053_v16, %v1052_v11 }
 0x151   : > { %v799_v20 = vpop.f32.mrb[28].mxu0  ;;  %v935_v21 = vpop.f32.mrb[28].mxu1 }
 0x152   : > { %1854 = vst [vmem:[%s2241_s4 + $0x30] sm:$0xff] %v1717_v17   ;;  %1871 = vst [vmem:[%s2241_s4 + $0xb8] sm:$0xff] %v1802_v18   ;;  %v800_v22 = vadd.f32 %v2231_v19, %v799_v20  ;;  %v801_v23 = vpop.f32.mrb[29].mxu0  ;;  %v936_v24 = vadd.f32 %v2231_v19, %v935_v21  ;;  %v937_v25 = vpop.f32.mrb[29].mxu1 }
 0x153   : > { %v802_v26 = vpop.f32.mrb[30].mxu0  ;;  %v938_v27 = vpop.f32.mrb[30].mxu1 }
 0x154   : > { %v803_v28 = vadd.f32 %v2231_v19, %v802_v26  ;;  %v804_v29 = vpop.f32.mrb[31].mxu0  ;;  %v1054_v30 = vmax.f32 %v936_v24, 0.0  ;;  %v939_v31 = vadd.f32 %v2231_v19, %v938_v27  ;;  %v940_v32 = vpop.f32.mrb[31].mxu1  ;;  %v1020_v33 = vmax.f32 %v800_v22, 0.0 }
 0x156   : > { %v1021_v34 = vmax.f32 %v803_v28, 0.0  ;;  %v1055_v35 = vmax.f32 %v939_v31, 0.0 }
 0x158   : > { %v1722_v36 = vpack.c.bf16 %v1021_v34, %v1020_v33  ;;  %v1807_v37 = vpack.c.bf16 %v1055_v35, %v1054_v30 }
 0x159   : > { %v807_v38 = vpop.f32.mrb[32].mxu0  ;;  %v943_v39 = vpop.f32.mrb[32].mxu1 }
 0x15a   : > { %1855 = vst [vmem:[%s2241_s4 + $0x38] sm:$0xff] %v1722_v36   ;;  %1872 = vst [vmem:[%s2241_s4 + $0xc0] sm:$0xff] %v1807_v37   ;;  %v808_v40 = vadd.f32 %v2231_v19, %v807_v38  ;;  %v809_v41 = vpop.f32.mrb[33].mxu0  ;;  %v944_v42 = vadd.f32 %v2231_v19, %v943_v39  ;;  %v945_v43 = vpop.f32.mrb[33].mxu1 }
 0x15b   : > { %v810_v44 = vpop.f32.mrb[34].mxu0  ;;  %v946_v45 = vpop.f32.mrb[34].mxu1 }
 0x15c   : > { %v811_v46 = vadd.f32 %v2231_v19, %v810_v44  ;;  %v812_v47 = vpop.f32.mrb[35].mxu0  ;;  %v1056_v48 = vmax.f32 %v944_v42, 0.0  ;;  %v947_v49 = vadd.f32 %v2231_v19, %v946_v45  ;;  %v948_v50 = vpop.f32.mrb[35].mxu1  ;;  %v1022_v51 = vmax.f32 %v808_v40, 0.0 }
 0x15e   : > { %v1023_v52 = vmax.f32 %v811_v46, 0.0  ;;  %v1057_v53 = vmax.f32 %v947_v49, 0.0 }
 0x160   : > { %v1727_v54 = vpack.c.bf16 %v1023_v52, %v1022_v51  ;;  %v1812_v55 = vpack.c.bf16 %v1057_v53, %v1056_v48 }
 0x161   : > { %v815_v56 = vpop.f32.mrb[36].mxu0  ;;  %v951_v57 = vpop.f32.mrb[36].mxu1 }
 0x162   : > { %1856 = vst [vmem:[%s2241_s4 + $0x40] sm:$0xff] %v1727_v54   ;;  %1873 = vst [vmem:[%s2241_s4 + $0xc8] sm:$0xff] %v1812_v55   ;;  %v816_v58 = vadd.f32 %v2231_v19, %v815_v56  ;;  %v817_v59 = vpop.f32.mrb[37].mxu0  ;;  %v952_v60 = vadd.f32 %v2231_v19, %v951_v57  ;;  %v953_v61 = vpop.f32.mrb[37].mxu1 }
 0x163   : > { %v818_v62 = vpop.f32.mrb[38].mxu0  ;;  %v954_v63 = vpop.f32.mrb[38].mxu1 }
 0x164   : > { %v819_v0 = vadd.f32 %v2231_v19, %v818_v62  ;;  %v820_v1 = vpop.f32.mrb[39].mxu0  ;;  %v1058_v2 = vmax.f32 %v952_v60, 0.0  ;;  %v955_v3 = vadd.f32 %v2231_v19, %v954_v63  ;;  %v956_v4 = vpop.f32.mrb[39].mxu1  ;;  %v1024_v5 = vmax.f32 %v816_v58, 0.0 }
 0x166   : > { %v1025_v6 = vmax.f32 %v819_v0, 0.0  ;;  %v1059_v7 = vmax.f32 %v955_v3, 0.0 }
 0x168   : > { %v1732_v8 = vpack.c.bf16 %v1025_v6, %v1024_v5  ;;  %v1817_v9 = vpack.c.bf16 %v1059_v7, %v1058_v2 }
 0x169   : > { %v823_v10 = vpop.f32.mrb[40].mxu0  ;;  %v959_v11 = vpop.f32.mrb[40].mxu1 }
 0x16a   : > { %1857 = vst [vmem:[%s2241_s4 + $0x48] sm:$0xff] %v1732_v8   ;;  %1874 = vst [vmem:[%s2241_s4 + $0xd0] sm:$0xff] %v1817_v9   ;;  %v824_v12 = vadd.f32 %v2231_v19, %v823_v10  ;;  %v825_v13 = vpop.f32.mrb[41].mxu0  ;;  %v960_v14 = vadd.f32 %v2231_v19, %v959_v11  ;;  %v961_v15 = vpop.f32.mrb[41].mxu1 }
 0x16b   : > { %v826_v16 = vpop.f32.mrb[42].mxu0  ;;  %v962_v17 = vpop.f32.mrb[42].mxu1 }
 0x16c   : > { %v827_v18 = vadd.f32 %v2231_v19, %v826_v16  ;;  %v828_v20 = vpop.f32.mrb[43].mxu0  ;;  %v1060_v21 = vmax.f32 %v960_v14, 0.0  ;;  %v963_v22 = vadd.f32 %v2231_v19, %v962_v17  ;;  %v964_v23 = vpop.f32.mrb[43].mxu1  ;;  %v1026_v24 = vmax.f32 %v824_v12, 0.0 }
 0x16e   : > { %v1027_v25 = vmax.f32 %v827_v18, 0.0  ;;  %v1061_v26 = vmax.f32 %v963_v22, 0.0 }
 0x170   : > { %v1737_v27 = vpack.c.bf16 %v1027_v25, %v1026_v24  ;;  %v1822_v28 = vpack.c.bf16 %v1061_v26, %v1060_v21 }
 0x171   : > { %v831_v29 = vpop.f32.mrb[44].mxu0  ;;  %v967_v30 = vpop.f32.mrb[44].mxu1 }
 0x172   : > { %1858 = vst [vmem:[%s2241_s4 + $0x50] sm:$0xff] %v1737_v27   ;;  %1875 = vst [vmem:[%s2241_s4 + $0xd8] sm:$0xff] %v1822_v28   ;;  %v832_v31 = vadd.f32 %v2231_v19, %v831_v29  ;;  %v833_v32 = vpop.f32.mrb[45].mxu0  ;;  %v968_v33 = vadd.f32 %v2231_v19, %v967_v30  ;;  %v969_v34 = vpop.f32.mrb[45].mxu1 }
 0x173   : > { %v834_v35 = vpop.f32.mrb[46].mxu0  ;;  %v970_v36 = vpop.f32.mrb[46].mxu1 }
 0x174   : > { %v835_v37 = vadd.f32 %v2231_v19, %v834_v35  ;;  %v836_v38 = vpop.f32.mrb[47].mxu0  ;;  %v1062_v39 = vmax.f32 %v968_v33, 0.0  ;;  %v971_v40 = vadd.f32 %v2231_v19, %v970_v36  ;;  %v972_v41 = vpop.f32.mrb[47].mxu1  ;;  %v1028_v42 = vmax.f32 %v832_v31, 0.0 }
 0x176   : > { %v1029_v43 = vmax.f32 %v835_v37, 0.0  ;;  %v1063_v44 = vmax.f32 %v971_v40, 0.0 }
 0x178   : > { %v1742_v45 = vpack.c.bf16 %v1029_v43, %v1028_v42  ;;  %v1827_v46 = vpack.c.bf16 %v1063_v44, %v1062_v39 }
 0x179   : > { %v839_v47 = vpop.f32.mrb[48].mxu0  ;;  %v975_v48 = vpop.f32.mrb[48].mxu1 }
 0x17a   : > { %1859 = vst [vmem:[%s2241_s4 + $0x58] sm:$0xff] %v1742_v45   ;;  %1876 = vst [vmem:[%s2241_s4 + $0xe0] sm:$0xff] %v1827_v46   ;;  %v840_v49 = vadd.f32 %v2231_v19, %v839_v47  ;;  %v841_v50 = vpop.f32.mrb[49].mxu0  ;;  %v976_v51 = vadd.f32 %v2231_v19, %v975_v48  ;;  %v977_v52 = vpop.f32.mrb[49].mxu1 }
 0x17b   : > { %v842_v53 = vpop.f32.mrb[50].mxu0  ;;  %v978_v54 = vpop.f32.mrb[50].mxu1 }
 0x17c   : > { %v843_v55 = vadd.f32 %v2231_v19, %v842_v53  ;;  %v844_v56 = vpop.f32.mrb[51].mxu0  ;;  %v1064_v57 = vmax.f32 %v976_v51, 0.0  ;;  %v979_v58 = vadd.f32 %v2231_v19, %v978_v54  ;;  %v980_v59 = vpop.f32.mrb[51].mxu1  ;;  %v1030_v60 = vmax.f32 %v840_v49, 0.0 }
 0x17e   : > { %v1031_v61 = vmax.f32 %v843_v55, 0.0  ;;  %v1065_v62 = vmax.f32 %v979_v58, 0.0 }
 0x180   : > { %v1747_v63 = vpack.c.bf16 %v1031_v61, %v1030_v60  ;;  %v1832_v0 = vpack.c.bf16 %v1065_v62, %v1064_v57 }
 0x181   : > { %v847_v1 = vpop.f32.mrb[52].mxu0  ;;  %v983_v2 = vpop.f32.mrb[52].mxu1 }
 0x182   : > { %1860 = vst [vmem:[%s2241_s4 + $0x60] sm:$0xff] %v1747_v63   ;;  %1877 = vst [vmem:[%s2241_s4 + $0xe8] sm:$0xff] %v1832_v0   ;;  %v848_v3 = vadd.f32 %v2231_v19, %v847_v1  ;;  %v849_v4 = vpop.f32.mrb[53].mxu0  ;;  %v984_v5 = vadd.f32 %v2231_v19, %v983_v2  ;;  %v985_v6 = vpop.f32.mrb[53].mxu1 }
 0x183   : > { %v850_v7 = vpop.f32.mrb[54].mxu0  ;;  %v986_v8 = vpop.f32.mrb[54].mxu1 }
 0x184   : > { %v851_v9 = vadd.f32 %v2231_v19, %v850_v7  ;;  %v852_v10 = vpop.f32.mrb[55].mxu0  ;;  %v1066_v11 = vmax.f32 %v984_v5, 0.0  ;;  %v987_v12 = vadd.f32 %v2231_v19, %v986_v8  ;;  %v988_v13 = vpop.f32.mrb[55].mxu1  ;;  %v1032_v14 = vmax.f32 %v848_v3, 0.0 }
 0x186   : > { %v1033_v15 = vmax.f32 %v851_v9, 0.0  ;;  %v1067_v16 = vmax.f32 %v987_v12, 0.0 }
 0x188   : > { %v1752_v17 = vpack.c.bf16 %v1033_v15, %v1032_v14  ;;  %v1837_v18 = vpack.c.bf16 %v1067_v16, %v1066_v11 }
 0x189   : > { %v855_v20 = vpop.f32.mrb[56].mxu0  ;;  %v991_v21 = vpop.f32.mrb[56].mxu1 }
 0x18a   : > { %1861 = vst [vmem:[%s2241_s4 + $0x68] sm:$0xff] %v1752_v17   ;;  %1878 = vst [vmem:[%s2241_s4 + $0xf0] sm:$0xff] %v1837_v18   ;;  %v856_v22 = vadd.f32 %v2231_v19, %v855_v20  ;;  %v857_v23 = vpop.f32.mrb[57].mxu0  ;;  %v992_v24 = vadd.f32 %v2231_v19, %v991_v21  ;;  %v993_v25 = vpop.f32.mrb[57].mxu1 }
 0x18b   : > { %v858_v26 = vpop.f32.mrb[58].mxu0  ;;  %v994_v27 = vpop.f32.mrb[58].mxu1 }
 0x18c   : > { %v859_v28 = vadd.f32 %v2231_v19, %v858_v26  ;;  %v860_v29 = vpop.f32.mrb[59].mxu0  ;;  %v1068_v30 = vmax.f32 %v992_v24, 0.0  ;;  %v995_v31 = vadd.f32 %v2231_v19, %v994_v27  ;;  %v996_v32 = vpop.f32.mrb[59].mxu1  ;;  %v1034_v33 = vmax.f32 %v856_v22, 0.0 }
 0x18e   : > { %v1035_v34 = vmax.f32 %v859_v28, 0.0  ;;  %v1069_v35 = vmax.f32 %v995_v31, 0.0 }
 0x190   : > { %v1757_v36 = vpack.c.bf16 %v1035_v34, %v1034_v33  ;;  %v1842_v37 = vpack.c.bf16 %v1069_v35, %v1068_v30 }
 0x191   : > { %v863_v38 = vpop.f32.mrb[60].mxu0  ;;  %v999_v39 = vpop.f32.mrb[60].mxu1 }
 0x192   : > { %1862 = vst [vmem:[%s2241_s4 + $0x70] sm:$0xff] %v1757_v36   ;;  %1879 = vst [vmem:[%s2241_s4 + $0xf8] sm:$0xff] %v1842_v37   ;;  %v864_v40 = vadd.f32 %v2231_v19, %v863_v38  ;;  %v865_v41 = vpop.f32.mrb[61].mxu0  ;;  %v1000_v42 = vadd.f32 %v2231_v19, %v999_v39  ;;  %v1001_v43 = vpop.f32.mrb[61].mxu1 }
 0x193   : > { %v866_v44 = vpop.f32.mrb[62].mxu0  ;;  %v1002_v45 = vpop.f32.mrb[62].mxu1 }
 0x194   : > { %v867_v46 = vadd.f32 %v2231_v19, %v866_v44  ;;  %v868_v47 = vpop.f32.mrb[63].mxu0  ;;  %v1070_v48 = vmax.f32 %v1000_v42, 0.0  ;;  %v1003_v49 = vadd.f32 %v2231_v19, %v1002_v45  ;;  %v1004_v50 = vpop.f32.mrb[63].mxu1  ;;  %v1036_v51 = vmax.f32 %v864_v40, 0.0 }
 0x196   : > { %v1037_v52 = vmax.f32 %v867_v46, 0.0  ;;  %v1071_v53 = vmax.f32 %v1003_v49, 0.0 }
 0x198   : > { %v1762_v54 = vpack.c.bf16 %v1037_v52, %v1036_v51  ;;  %v1847_v55 = vpack.c.bf16 %v1071_v53, %v1070_v48 }
 0x199   : > { %v871_v56 = vpop.f32.mrb[64].mxu0 }
 0x19a   : > { %1863 = vst [vmem:[%s2241_s4 + $0x78] sm:$0xff] %v1762_v54   ;;  %1880 = vst [vmem:[%s2241_s4 + $0x100] sm:$0xff] %v1847_v55   ;;  %v872_v57 = vadd.f32 %v2231_v19, %v871_v56  ;;  %v873_v58 = vpop.f32.mrb[65].mxu0 }
 0x19b   : > { %v874_v59 = vpop.f32.mrb[66].mxu0 }
 0x19c   : > { %v875_v60 = vadd.f32 %v2231_v19, %v874_v59  ;;  %v876_v61 = vpop.f32.mrb[67].mxu0  ;;  %v1038_v62 = vmax.f32 %v872_v57, 0.0 }
 0x19e   : > { %v1039_v63 = vmax.f32 %v875_v60, 0.0 }
 0x1a0   : > { %v1767_v0 = vpack.c.bf16 %v1039_v63, %v1038_v62 }
 0x1a2   : > { %1864 = vst [vmem:[%s2241_s4 + $0x80] sm:$0xff] %v1767_v0  }
 0x1a3 PF: > { %s13_s12 = sadd.s32 1, %s2043_s12  }
 0x1a4   : > { %p10_p4 = scmp.ge.s32.totalorder %s13_s12, 4  }
 0x1a6   :  { %12 = sbr.rel (!%p10_p4) target bundleno = 1 (0x1), region = 62 }

// kernel: cnn_forward.5
= control target key start
LH: loop header
LB: loop body
LE: loop exit
PB: predicated region body
PF: predicated region fallthrough
CT: control target
= control target key end

     0   :  { %s3682_s12 = smov 0   ;;  %s4357_s0 = inlined_call_operand.vmem [shape: bf16[224,2048], index: 0, kind: input, shape index: {}]   ;;  %s4358_s1 = inlined_call_operand.vmem [shape: bf16[2048,128], index: 1, kind: input, shape index: {}]   ;;  %s4359_s2 = inlined_call_operand.vmem [shape: f32[1,128], index: 2, kind: input, shape index: {}]   ;;  %s4360_s3 = inlined_call_operand.vmem [shape: bf16[224,128], index: 3, kind: output, shape index: {}]  }
   0x1 LB: > { %s2733_s13 = sadd.s32 4294967295, %s3660_s12   ;;  %p2737_p0 = scmp.ge.s32.totalorder %s3660_s12, 1  ;;  %s3660_s12 = sphi %s3682_s12, %s13_s12  }
   0x2   : > { %p139_p1 = scmp.lt.s32.totalorder %s3660_s12, 3 }
   0x4   : > { %p140_p2 = pnand %p2737_p0, %p139_p1 }
   0x5   : > { %v3526_v0 = vld [vmem:[%s4358_s1 + $0x40] sm:$0xff] (!%p140_p2)   ;;  %v3530_v4 = vld [vmem:[%s4358_s1 + $0x48] sm:$0xff] (!%p140_p2)   ;;  %v3534_v8 = vld [vmem:[%s4358_s1 + $0x50] sm:$0xff] (!%p140_p2)   ;;  %s164_s19 = smul.u32 (!%p140_p2), 14, %s2733_s13 }
   0x6   : > { %143 = sbr.rel (%p140_p2) target bundleno = 481 (0x1e1), region = 32  ;;  %v3527_v1 = vld [vmem:[%s4358_s1 + $0xc0] sm:$0xff] (!%p140_p2)   ;;  %3054 = vmatprep.subr.bf16.mxu0 (!%p140_p2), %v3526_v0  ;;  %v3531_v5 = vld [vmem:[%s4358_s1 + $0xc8] sm:$0xff] (!%p140_p2)   ;;  %v3535_v9 = vld [vmem:[%s4358_s1 + $0xd0] sm:$0xff] (!%p140_p2)  }
   0x7   : > { %v3528_v2 = vld [vmem:[%s4358_s1] sm:$0xff] (!%p140_p2)   ;;  %3112 = vmatprep.subr.bf16.mxu1 (!%p140_p2), %v3527_v1  ;;  %v3532_v6 = vld [vmem:[%s4358_s1 + $0x8] sm:$0xff] (!%p140_p2)   ;;  %v3536_v10 = vld [vmem:[%s4358_s1 + $0x10] sm:$0xff] (!%p140_p2)   ;;  %p165_p3 = scmp.lt.s32.totalorder (!%p140_p2), %s164_s19, 27 }
   0x8   : > { %v3529_v3 = vld [vmem:[%s4358_s1 + $0x80] sm:$0xff] (!%p140_p2)   ;;  %3055 = vmatpush3.bf16.msra.mxu0 (!%p140_p2), %v3528_v2  ;;  %v3533_v7 = vld [vmem:[%s4358_s1 + $0x88] sm:$0xff] (!%p140_p2)   ;;  %v3537_v11 = vld [vmem:[%s4358_s1 + $0x90] sm:$0xff] (!%p140_p2)  }
   0x9   : > { %3113 = vmatpush3.bf16.msra.mxu1 (!%p140_p2), %v3529_v3  ;;  %3056 = vmatprep.subr.bf16.mxu0 (!%p140_p2), %v3530_v4  ;;  %v3538_v12 = vld [vmem:[%s4358_s1 + $0x58] sm:$0xff] (!%p140_p2)   ;;  %v3542_v16 = vld [vmem:[%s4358_s1 + $0x60] sm:$0xff] (!%p140_p2)   ;;  %v3546_v20 = vld [vmem:[%s4358_s1 + $0x68] sm:$0xff] (!%p140_p2)  }
   0xa   : > { %3114 = vmatprep.subr.bf16.mxu1 (!%p140_p2), %v3531_v5  ;;  %v3539_v13 = vld [vmem:[%s4358_s1 + $0xd8] sm:$0xff] (!%p140_p2)   ;;  %v3543_v17 = vld [vmem:[%s4358_s1 + $0xe0] sm:$0xff] (!%p140_p2)   ;;  %v3547_v21 = vld [vmem:[%s4358_s1 + $0xe8] sm:$0xff] (!%p140_p2)  }
   0xb   : > { %v3540_v14 = vld [vmem:[%s4358_s1 + $0x18] sm:$0xff] (!%p140_p2)   ;;  %v3544_v18 = vld [vmem:[%s4358_s1 + $0x20] sm:$0xff] (!%p140_p2)   ;;  %v3548_v22 = vld [vmem:[%s4358_s1 + $0x28] sm:$0xff] (!%p140_p2)  }
   0xc   : > { %3057 = vmatpush3.bf16.msra.mxu0 (!%p140_p2), %v3532_v6  ;;  %v3541_v15 = vld [vmem:[%s4358_s1 + $0x98] sm:$0xff] (!%p140_p2)   ;;  %v3545_v19 = vld [vmem:[%s4358_s1 + $0xa0] sm:$0xff] (!%p140_p2)   ;;  %v3549_v23 = vld [vmem:[%s4358_s1 + $0xa8] sm:$0xff] (!%p140_p2)  }
   0xd   : > { %3115 = vmatpush3.bf16.msra.mxu1 %v3533_v7  ;;  %3058 = vmatprep.subr.bf16.mxu0 %v3534_v8  ;;  %s4362_s19 = smov (!%p165_p3, %s164_s19), 27  ;;  %v3550_v24 = vld [vmem:[%s4358_s1 + $0x70] sm:$0xff]   ;;  %v3554_v28 = vld [vmem:[%s4358_s1 + $0x78] sm:$0xff]   ;;  %v3558_v40 = vld [vmem:[%s4358_s1 + $0x140] sm:$0xff]  }
   0xe   : > { %3116 = vmatprep.subr.bf16.mxu1 %v3535_v9  ;;  %v3551_v25 = vld [vmem:[%s4358_s1 + $0xf0] sm:$0xff]   ;;  %s2998_s18 = sshll.u32 %s4362_s19, 6  ;;  %v3555_v29 = vld [vmem:[%s4358_s1 + $0xf8] sm:$0xff]   ;;  %v3559_v41 = vld [vmem:[%s4358_s1 + $0x100] sm:$0xff]  }
   0xf   : > { %v3552_v26 = vld [vmem:[%s4358_s1 + $0x30] sm:$0xff]   ;;  %s3788_s13 = scalar_lea.vmem %s4357_s0, %s2998_s18  ;;  %v3556_v30 = vld [vmem:[%s4358_s1 + $0x38] sm:$0xff]   ;;  %v3560_v42 = vld [vmem:[%s4358_s1 + $0x1c0] sm:$0xff]  }
  0x10   : > { %3059 = vmatpush3.bf16.msra.mxu0 %v3536_v10  ;;  %v3553_v27 = vld [vmem:[%s4358_s1 + $0xb0] sm:$0xff]   ;;  %v3557_v31 = vld [vmem:[%s4358_s1 + $0xb8] sm:$0xff]   ;;  %v178_v32 = vld [vmem:[%s3788_s13] sm:$0xff] }
  0x11   : > { %3117 = vmatpush3.bf16.msra.mxu1 %v3537_v11  ;;  %3060 = vmatprep.subr.bf16.mxu0 %v3538_v12  ;;  %v186_v33 = vld [vmem:[%s3788_s13 + $0x40] sm:$0xff]  ;;  %v179_v34 = vld [vmem:[%s3788_s13 + $0x8] sm:$0xff]  ;;  %v3566_v56 = vld [vmem:[%s4358_s1 + $0x150] sm:$0xff]  }
  0x12   : > { %3118 = vmatprep.subr.bf16.mxu1 %v3539_v13  ;;  %v2742_v35 = vcombine.low %v178_v32, %v186_v33  ;;  %v2743_v36 = vcombine.high %v178_v32, %v186_v33  ;;  %v187_v37 = vld [vmem:[%s3788_s13 + $0x48] sm:$0xff]  ;;  %v3561_v43 = vld [vmem:[%s4358_s1 + $0x180] sm:$0xff]   ;;  %v3567_v63 = vld [vmem:[%s4358_s1 + $0x110] sm:$0xff]  }
  0x13   : > { %v2744_v38 = vcombine.low %v179_v34, %v187_v37  ;;  %v2745_v39 = vcombine.high %v179_v34, %v187_v37  ;;  %v194_v44 = vld [vmem:[%s3788_s13 + $0x80] sm:$0xff]  ;;  %v195_v47 = vld [vmem:[%s3788_s13 + $0x88] sm:$0xff]  ;;  %v3568_v0 = vld [vmem:[%s4358_s1 + $0x1d0] sm:$0xff]  }
  0x14   : > { %3061 = vmatpush3.bf16.msra.mxu0 %v3540_v14  ;;  %1913 = vmatprep.mubr.bf16.mxu0 %v2743_v36  ;;  %v202_v45 = vld [vmem:[%s3788_s13 + $0xc0] sm:$0xff]  ;;  %v203_v48 = vld [vmem:[%s3788_s13 + $0xc8] sm:$0xff]  ;;  %v3569_v1 = vld [vmem:[%s4358_s1 + $0x190] sm:$0xff]  }
  0x15   : > { %3119 = vmatpush3.bf16.msra.mxu1 %v3541_v15  ;;  %3062 = vmatprep.subr.bf16.mxu0 %v3542_v16  ;;  %v2759_v46 = vcombine.high %v194_v44, %v202_v45  ;;  %v2761_v49 = vcombine.high %v195_v47, %v203_v48  ;;  %v3562_v50 = vld [vmem:[%s4358_s1 + $0x148] sm:$0xff]   ;;  %v2758_v51 = vcombine.low %v194_v44, %v202_v45  ;;  %v210_v57 = vld [vmem:[%s3788_s13 + $0x100] sm:$0xff]  ;;  %v3570_v3 = vld [vmem:[%s4358_s1 + $0x158] sm:$0xff]  }
  0x16   : > { %3120 = vmatprep.subr.bf16.mxu1 %v3543_v17  ;;  %2002 = vmatprep.mubr.bf16.mxu1 %v2745_v39  ;;  %v3563_v52 = vld [vmem:[%s4358_s1 + $0x108] sm:$0xff]   ;;  %v2760_v53 = vcombine.low %v195_v47, %v203_v48  ;;  %v218_v58 = vld [vmem:[%s3788_s13 + $0x140] sm:$0xff]  ;;  %v3571_v5 = vld [vmem:[%s4358_s1 + $0x118] sm:$0xff]  }
  0x17   : > { %v3564_v54 = vld [vmem:[%s4358_s1 + $0x1c8] sm:$0xff]   ;;  %v2775_v61 = vcombine.high %v210_v57, %v218_v58  ;;  %v2774_v2 = vcombine.low %v210_v57, %v218_v58  ;;  %v226_v6 = vld [vmem:[%s3788_s13 + $0x180] sm:$0xff]  ;;  %v3572_v12 = vld [vmem:[%s4358_s1 + $0x1d8] sm:$0xff]  }
  0x18   : > { %3063 = vmatpush3.bf16.msra.mxu0 %v3544_v18  ;;  %v3565_v55 = vld [vmem:[%s4358_s1 + $0x188] sm:$0xff]   ;;  %v234_v7 = vld [vmem:[%s3788_s13 + $0x1c0] sm:$0xff]  ;;  %v3573_v13 = vld [vmem:[%s4358_s1 + $0x198] sm:$0xff]  }
  0x19   : > { %3121 = vmatpush3.bf16.msra.mxu1 %v3545_v19  ;;  %3064 = vmatprep.subr.bf16.mxu0 %v3546_v20  ;;  %v211_v59 = vld [vmem:[%s3788_s13 + $0x108] sm:$0xff]  ;;  %v2791_v9 = vcombine.high %v226_v6, %v234_v7  ;;  %v3574_v14 = vld [vmem:[%s4358_s1 + $0x160] sm:$0xff]   ;;  %v2790_v16 = vcombine.low %v226_v6, %v234_v7  ;;  %v3587_v47 = vld [vmem:[%s4358_s1 + $0x138] sm:$0xff]  }
  0x1a   : > { %3122 = vmatprep.subr.bf16.mxu1 %v3547_v21  ;;  %v219_v60 = vld [vmem:[%s3788_s13 + $0x148] sm:$0xff]  ;;  %v3575_v15 = vld [vmem:[%s4358_s1 + $0x120] sm:$0xff]   ;;  %v188_v57 = vld [vmem:[%s3788_s13 + $0x50] sm:$0xff] }
  0x1b   : > { %v2777_v62 = vcombine.high %v211_v59, %v219_v60  ;;  %v2776_v4 = vcombine.low %v211_v59, %v219_v60  ;;  %v227_v8 = vld [vmem:[%s3788_s13 + $0x188] sm:$0xff]  ;;  %v3576_v17 = vld [vmem:[%s4358_s1 + $0x1e0] sm:$0xff]   ;;  %v181_v58 = vld [vmem:[%s3788_s13 + $0x18] sm:$0xff] }
  0x1c   : > { %3065 = vmatpush3.bf16.msra.mxu0 %v3548_v22  ;;  %v235_v10 = vld [vmem:[%s3788_s13 + $0x1c8] sm:$0xff]  ;;  %v242_v18 = vld [vmem:[%s3788_s13 + $0x200] sm:$0xff]  ;;  %v189_v59 = vld [vmem:[%s3788_s13 + $0x58] sm:$0xff] }
  0x1d   : > { %3123 = vmatpush3.bf16.msra.mxu1 %v3549_v23  ;;  %3066 = vmatprep.subr.bf16.mxu0 %v3550_v24  ;;  %v2793_v11 = vcombine.high %v227_v8, %v235_v10  ;;  %v250_v19 = vld [vmem:[%s3788_s13 + $0x240] sm:$0xff]  ;;  %v2792_v20 = vcombine.low %v227_v8, %v235_v10  ;;  %v243_v22 = vld [vmem:[%s3788_s13 + $0x208] sm:$0xff] }
  0x1e   : > { %3124 = vmatprep.subr.bf16.mxu1 %v3551_v25  ;;  %v2807_v21 = vcombine.high %v242_v18, %v250_v19  ;;  %v251_v23 = vld [vmem:[%s3788_s13 + $0x248] sm:$0xff]  ;;  %v3577_v25 = vld [vmem:[%s4358_s1 + $0x1a0] sm:$0xff]   ;;  %v2806_v34 = vcombine.low %v242_v18, %v250_v19  ;;  %v221_v18 = vld [vmem:[%s3788_s13 + $0x158] sm:$0xff] }
  0x1f   : > { %v2809_v24 = vcombine.high %v243_v22, %v251_v23  ;;  %v259_v32 = vld [vmem:[%s3788_s13 + $0x288] sm:$0xff]  ;;  %v2808_v36 = vcombine.low %v243_v22, %v251_v23  ;;  %v3591_v6 = vld [vmem:[%s4358_s1 + $0x200] sm:$0xff]   ;;  %v3600_v19 = vld [vmem:[%s4358_s1 + $0x2d0] sm:$0xff]  }
  0x20   : > { %3067 = vmatpush3.bf16.msra.mxu0 %v3552_v26  ;;  %v3578_v26 = vld [vmem:[%s4358_s1 + $0x168] sm:$0xff]   ;;  %v3593_v7 = vld [vmem:[%s4358_s1 + $0x280] sm:$0xff]  }
  0x21   : > { %3125 = vmatpush3.bf16.msra.mxu1 %v3553_v27  ;;  %3068 = vmatprep.subr.bf16.mxu0 %v3554_v28  ;;  %v3579_v27 = vld [vmem:[%s4358_s1 + $0x128] sm:$0xff]  }
  0x22   : > { %3126 = vmatprep.subr.bf16.mxu1 %v3555_v29  ;;  %v3580_v28 = vld [vmem:[%s4358_s1 + $0x1e8] sm:$0xff]  }
  0x23   : > { %v3581_v29 = vld [vmem:[%s4358_s1 + $0x1a8] sm:$0xff]  }
  0x24   : > { %3069 = vmatpush3.bf16.msra.mxu0 %v3556_v30  ;;  %v258_v30 = vld [vmem:[%s3788_s13 + $0x280] sm:$0xff]  ;;  %v267_v33 = vld [vmem:[%s3788_s13 + $0x2c8] sm:$0xff] }
  0x25   : > { %3127 = vmatpush3.bf16.msra.mxu1 %v3557_v31  ;;  %3170 = vmatprep.subr.bf16.mxu0 %v3558_v40  ;;  %v266_v31 = vld [vmem:[%s3788_s13 + $0x2c0] sm:$0xff]  ;;  %v2825_v39 = vcombine.high %v259_v32, %v267_v33  ;;  %v3584_v40 = vld [vmem:[%s4358_s1 + $0x1f0] sm:$0xff]   ;;  %v275_v44 = vld [vmem:[%s3788_s13 + $0x308] sm:$0xff] }
  0x26   : > { %3228 = vmatprep.subr.bf16.mxu1 %v3560_v42  ;;  %v2823_v37 = vcombine.high %v258_v30, %v266_v31  ;;  %v274_v42 = vld [vmem:[%s3788_s13 + $0x300] sm:$0xff]  ;;  %v283_v45 = vld [vmem:[%s3788_s13 + $0x348] sm:$0xff]  ;;  %v2822_v48 = vcombine.low %v258_v30, %v266_v31  ;;  %v3604_v30 = vld [vmem:[%s4358_s1 + $0x2d8] sm:$0xff]  }
  0x27   : > { %1914 = vmatmul.mubr.bf16.vlgmr.msra.gmra.mrb[0].mxu0 %v2742_v35  ;;  %v3582_v35 = vld [vmem:[%s4358_s1 + $0x170] sm:$0xff]   ;;  %v3594_v10 = vld [vmem:[%s4358_s1 + $0x248] sm:$0xff]   ;;  %v229_v31 = vld [vmem:[%s3788_s13 + $0x198] sm:$0xff] }
  0x28   : > { %2003 = vmatmul.mubr.bf16.vlgmr.msra.gmra.mrb[0].mxu1 %v2744_v38  ;;  %3171 = vmatpush3.bf16.msra.mxu0 %v3559_v41  ;;  %v3583_v38 = vld [vmem:[%s4358_s1 + $0x130] sm:$0xff]  }
  0x29   : > { %3229 = vmatpush3.bf16.msra.mxu1 %v3561_v43  ;;  %1921 = vmatprep.mubr.bf16.mxu0 %v2759_v46  ;;  %v3585_v41 = vld [vmem:[%s4358_s1 + $0x1b0] sm:$0xff]   ;;  %v282_v43 = vld [vmem:[%s3788_s13 + $0x340] sm:$0xff]  ;;  %v3586_v46 = vld [vmem:[%s4358_s1 + $0x178] sm:$0xff]  }
  0x2a   : > { %2010 = vmatprep.mubr.bf16.mxu1 %v2761_v49  ;;  %3172 = vmatprep.subr.bf16.mxu0 %v3562_v50  ;;  %v3588_v49 = vld [vmem:[%s4358_s1 + $0x1f8] sm:$0xff]   ;;  %v2824_v50 = vcombine.low %v259_v32, %v267_v33  ;;  %v2838_v60 = vcombine.low %v274_v42, %v282_v43 }
  0x2b   : > { %3230 = vmatprep.subr.bf16.mxu1 %v3564_v54  ;;  %v3590_v54 = vld [vmem:[%s4358_s1 + $0x240] sm:$0xff]   ;;  %v237_v32 = vld [vmem:[%s3788_s13 + $0x1d8] sm:$0xff] }
  0x2c   : > { %3173 = vmatpush3.bf16.msra.mxu0 %v3563_v52  ;;  %v3589_v52 = vld [vmem:[%s4358_s1 + $0x1b8] sm:$0xff]  }
  0x2d   : > { %3231 = vmatpush3.bf16.msra.mxu1 %v3565_v55  ;;  %3174 = vmatprep.subr.bf16.mxu0 %v3566_v56  ;;  %v3592_v55 = vld [vmem:[%s4358_s1 + $0x2c0] sm:$0xff]   ;;  %v180_v56 = vld [vmem:[%s3788_s13 + $0x10] sm:$0xff]  ;;  %v3605_v33 = vld [vmem:[%s4358_s1 + $0x298] sm:$0xff]  }
  0x2e   : > { %3232 = vmatprep.subr.bf16.mxu1 %v3568_v0  ;;  %v196_v0 = vld [vmem:[%s3788_s13 + $0x90] sm:$0xff] }
  0x2f   : > { %1922 = vmatmul.mubr.bf16.gmra.mrb[4].mxu0 %v2758_v51  ;;  %v2839_v51 = vcombine.high %v274_v42, %v282_v43  ;;  %v3610_v42 = vld [vmem:[%s4358_s1 + $0x268] sm:$0xff]   ;;  %v244_v43 = vld [vmem:[%s3788_s13 + $0x210] sm:$0xff] }
  0x30   : > { %2011 = vmatmul.mubr.bf16.gmra.mrb[4].mxu1 %v2760_v53  ;;  %1929 = vmatprep.mubr.bf16.mxu0 %v2775_v61  ;;  %v2841_v53 = vcombine.high %v275_v44, %v283_v45  ;;  %v2840_v61 = vcombine.low %v275_v44, %v283_v45  ;;  %v3612_v44 = vld [vmem:[%s4358_s1 + $0x2e8] sm:$0xff]   ;;  %v252_v45 = vld [vmem:[%s3788_s13 + $0x250] sm:$0xff] }
  0x31   : > { %2018 = vmatprep.mubr.bf16.mxu1 %v2777_v62  ;;  %3175 = vmatpush3.bf16.msra.mxu0 %v3567_v63  ;;  %v2747_v62 = vcombine.high %v180_v56, %v188_v57  ;;  %v2749_v63 = vcombine.high %v181_v58, %v189_v59 }
  0x32   : > { %3233 = vmatpush3.bf16.msra.mxu1 %v3569_v1  ;;  %3176 = vmatprep.subr.bf16.mxu0 %v3570_v3  ;;  %v204_v1 = vld [vmem:[%s3788_s13 + $0xd0] sm:$0xff]  ;;  %v2746_v3 = vcombine.low %v180_v56, %v188_v57 }
  0x33   : > { %3234 = vmatprep.subr.bf16.mxu1 %v3572_v12  ;;  %v2763_v8 = vcombine.high %v196_v0, %v204_v1  ;;  %v3596_v12 = vld [vmem:[%s4358_s1 + $0x2c8] sm:$0xff]   ;;  %v3615_v56 = vld [vmem:[%s4358_s1 + $0x230] sm:$0xff]  }
  0x34   : > { %v3617_v57 = vld [vmem:[%s4358_s1 + $0x2b0] sm:$0xff]  }
  0x35   : > { %3177 = vmatpush3.bf16.msra.mxu0 %v3571_v5  ;;  %v2748_v5 = vcombine.low %v181_v58, %v189_v59  ;;  %v3618_v58 = vld [vmem:[%s4358_s1 + $0x278] sm:$0xff]   ;;  %v260_v59 = vld [vmem:[%s3788_s13 + $0x290] sm:$0xff] }
  0x36   : > { %3235 = vmatpush3.bf16.msra.mxu1 %v3573_v13  ;;  %3178 = vmatprep.subr.bf16.mxu0 %v3574_v14  ;;  %v3597_v13 = vld [vmem:[%s4358_s1 + $0x288] sm:$0xff]   ;;  %v3598_v14 = vld [vmem:[%s4358_s1 + $0x250] sm:$0xff]  }
  0x37   : > { %1930 = vmatmul.mubr.bf16.gmra.mrb[8].mxu0 %v2774_v2  ;;  %3236 = vmatprep.subr.bf16.mxu1 %v3576_v17  ;;  %v197_v2 = vld [vmem:[%s3788_s13 + $0x98] sm:$0xff] }
  0x38   : > { %2019 = vmatmul.mubr.bf16.gmra.mrb[8].mxu1 %v2776_v4  ;;  %1937 = vmatprep.mubr.bf16.mxu0 %v2791_v9  ;;  %v205_v4 = vld [vmem:[%s3788_s13 + $0xd8] sm:$0xff] }
  0x39   : > { %2026 = vmatprep.mubr.bf16.mxu1 %v2793_v11  ;;  %3179 = vmatpush3.bf16.msra.mxu0 %v3575_v15  ;;  %v2765_v9 = vcombine.high %v197_v2, %v205_v4  ;;  %v3595_v11 = vld [vmem:[%s4358_s1 + $0x208] sm:$0xff]   ;;  %v212_v15 = vld [vmem:[%s3788_s13 + $0x110] sm:$0xff]  ;;  %v213_v17 = vld [vmem:[%s3788_s13 + $0x118] sm:$0xff] }
  0x3a   : > { %3237 = vmatpush3.bf16.msra.mxu1 %v3577_v25  ;;  %3180 = vmatprep.subr.bf16.mxu0 %v3578_v26  ;;  %v2781_v23 = vcombine.high %v213_v17, %v221_v18  ;;  %v3601_v25 = vld [vmem:[%s4358_s1 + $0x290] sm:$0xff]   ;;  %v3602_v26 = vld [vmem:[%s4358_s1 + $0x258] sm:$0xff]  }
  0x3b   : > { %3238 = vmatprep.subr.bf16.mxu1 %v3580_v28  ;;  %v228_v28 = vld [vmem:[%s3788_s13 + $0x190] sm:$0xff] }
  0x3d   : > { %3181 = vmatpush3.bf16.msra.mxu0 %v3579_v27  ;;  %v3603_v27 = vld [vmem:[%s4358_s1 + $0x218] sm:$0xff]  }
  0x3e   : > { %3239 = vmatpush3.bf16.msra.mxu1 %v3581_v29  ;;  %3182 = vmatprep.subr.bf16.mxu0 %v3582_v35  ;;  %v236_v29 = vld [vmem:[%s3788_s13 + $0x1d0] sm:$0xff] }
  0x3f   : > { %1938 = vmatmul.mubr.bf16.gmra.mrb[12].mxu0 %v2790_v16  ;;  %3240 = vmatprep.subr.bf16.mxu1 %v3584_v40  ;;  %v220_v16 = vld [vmem:[%s3788_s13 + $0x150] sm:$0xff]  ;;  %v2797_v40 = vcombine.high %v229_v31, %v237_v32 }
  0x40   : > { %2027 = vmatmul.mubr.bf16.gmra.mrb[12].mxu1 %v2792_v20  ;;  %1945 = vmatprep.mubr.bf16.mxu0 %v2807_v21  ;;  %v2762_v20 = vcombine.low %v196_v0, %v204_v1  ;;  %v2764_v21 = vcombine.low %v197_v2, %v205_v4  ;;  %v2779_v22 = vcombine.high %v212_v15, %v220_v16  ;;  %v3619_v0 = vld [vmem:[%s4358_s1 + $0x238] sm:$0xff]   ;;  %v3622_v2 = vld [vmem:[%s4358_s1 + $0x340] sm:$0xff]  }
  0x41   : > { %2034 = vmatprep.mubr.bf16.mxu1 %v2809_v24  ;;  %3183 = vmatpush3.bf16.msra.mxu0 %v3583_v38  ;;  %v3599_v24 = vld [vmem:[%s4358_s1 + $0x210] sm:$0xff]   ;;  %v2778_v35 = vcombine.low %v212_v15, %v220_v16  ;;  %v2795_v38 = vcombine.high %v228_v28, %v236_v29  ;;  %v3621_v1 = vld [vmem:[%s4358_s1 + $0x2b8] sm:$0xff]   ;;  %v3624_v4 = vld [vmem:[%s4358_s1 + $0x3c0] sm:$0xff]  }
  0x42   : > { %3241 = vmatpush3.bf16.msra.mxu1 %v3585_v41  ;;  %3184 = vmatprep.subr.bf16.mxu0 %v3586_v46  ;;  %v3609_v41 = vld [vmem:[%s4358_s1 + $0x2a0] sm:$0xff]   ;;  %v245_v46 = vld [vmem:[%s3788_s13 + $0x218] sm:$0xff] }
  0x43   : > { %3242 = vmatprep.subr.bf16.mxu1 %v3588_v49  ;;  %v3613_v49 = vld [vmem:[%s4358_s1 + $0x2a8] sm:$0xff]   ;;  %v182_v16 = vld [vmem:[%s3788_s13 + $0x20] sm:$0xff] }
  0x45   : > { %3185 = vmatpush3.bf16.msra.mxu0 %v3587_v47  ;;  %v253_v47 = vld [vmem:[%s3788_s13 + $0x258] sm:$0xff] }
  0x46   : > { %3243 = vmatpush3.bf16.msra.mxu1 %v3589_v52  ;;  %3286 = vmatprep.subr.bf16.mxu0 %v3590_v54  ;;  %v3616_v52 = vld [vmem:[%s4358_s1 + $0x2f0] sm:$0xff]   ;;  %v2811_v54 = vcombine.high %v244_v43, %v252_v45 }
  0x47   : > { %1946 = vmatmul.mubr.bf16.gmra.mrb[16].mxu0 %v2806_v34  ;;  %3344 = vmatprep.subr.bf16.mxu1 %v3592_v55  ;;  %v3606_v34 = vld [vmem:[%s4358_s1 + $0x260] sm:$0xff]   ;;  %v2813_v55 = vcombine.high %v245_v46, %v253_v47 }
  0x48   : > { %2035 = vmatmul.mubr.bf16.gmra.mrb[16].mxu1 %v2808_v36  ;;  %1953 = vmatprep.mubr.bf16.mxu0 %v2823_v37  ;;  %v3608_v36 = vld [vmem:[%s4358_s1 + $0x2e0] sm:$0xff]   ;;  %v2780_v37 = vcombine.low %v213_v17, %v221_v18  ;;  %v183_v18 = vld [vmem:[%s3788_s13 + $0x28] sm:$0xff] }
  0x49   : > { %2042 = vmatprep.mubr.bf16.mxu1 %v2825_v39  ;;  %v3607_v39 = vld [vmem:[%s4358_s1 + $0x220] sm:$0xff]  }
  0x4a   : > { %v190_v17 = vld [vmem:[%s3788_s13 + $0x60] sm:$0xff] }
  0x4f   : > { %1954 = vmatmul.mubr.bf16.gmra.mrb[20].mxu0 %v2822_v48  ;;  %v3611_v48 = vld [vmem:[%s4358_s1 + $0x228] sm:$0xff]  }
  0x50   : > { %2043 = vmatmul.mubr.bf16.gmra.mrb[20].mxu1 %v2824_v50  ;;  %1961 = vmatprep.mubr.bf16.mxu0 %v2839_v51  ;;  %v3614_v50 = vld [vmem:[%s4358_s1 + $0x270] sm:$0xff]   ;;  %v2794_v51 = vcombine.low %v228_v28, %v236_v29  ;;  %v207_v28 = vld [vmem:[%s3788_s13 + $0xe8] sm:$0xff] }
  0x51   : > { %2050 = vmatprep.mubr.bf16.mxu1 %v2841_v53  ;;  %v2796_v53 = vcombine.low %v229_v31, %v237_v32  ;;  %v3625_v31 = vld [vmem:[%s4358_s1 + $0x380] sm:$0xff]  }
  0x57   : > { %1962 = vmatmul.mubr.bf16.gmra.mrb[24].mxu0 %v2838_v60  ;;  %v268_v60 = vld [vmem:[%s3788_s13 + $0x2d0] sm:$0xff] }
  0x58   : > { %2051 = vmatmul.mubr.bf16.gmra.mrb[24].mxu1 %v2840_v61  ;;  %2091 = vmatprep.mubr.bf16.mxu0 %v2747_v62  ;;  %v3620_v61 = vld [vmem:[%s4358_s1 + $0x2f8] sm:$0xff]  }
  0x59   : > { %2180 = vmatprep.mubr.bf16.mxu1 %v2749_v63  ;;  %v261_v62 = vld [vmem:[%s3788_s13 + $0x298] sm:$0xff] }
  0x5a   : > { %v269_v63 = vld [vmem:[%s3788_s13 + $0x2d8] sm:$0xff] }
  0x5f   : > { %2092 = vmatmul.mubr.bf16.vlgmr.msra.gmra.mrb[28].mxu0 %v2746_v3  ;;  %v2810_v3 = vcombine.low %v244_v43, %v252_v45  ;;  %v3632_v43 = vld [vmem:[%s4358_s1 + $0x3d0] sm:$0xff]  }
  0x60   : > { %2181 = vmatmul.mubr.bf16.vlgmr.msra.gmra.mrb[28].mxu1 %v2748_v5  ;;  %3287 = vmatpush3.bf16.msra.mxu0 %v3591_v6  ;;  %v2812_v5 = vcombine.low %v245_v46, %v253_v47  ;;  %v2827_v6 = vcombine.high %v260_v59, %v268_v60  ;;  %v3631_v47 = vld [vmem:[%s4358_s1 + $0x310] sm:$0xff]  }
  0x61   : > { %3345 = vmatpush3.bf16.msra.mxu1 %v3593_v7  ;;  %2099 = vmatprep.mubr.bf16.mxu0 %v2763_v8  ;;  %v2829_v7 = vcombine.high %v261_v62, %v269_v63  ;;  %v276_v8 = vld [vmem:[%s3788_s13 + $0x310] sm:$0xff] }
  0x62   : > { %2188 = vmatprep.mubr.bf16.mxu1 %v2765_v9  ;;  %3288 = vmatprep.subr.bf16.mxu0 %v3594_v10  ;;  %v284_v9 = vld [vmem:[%s3788_s13 + $0x350] sm:$0xff]  ;;  %v277_v10 = vld [vmem:[%s3788_s13 + $0x318] sm:$0xff] }
  0x63   : > { %3346 = vmatprep.subr.bf16.mxu1 %v3596_v12  ;;  %v2826_v12 = vcombine.low %v260_v59, %v268_v60  ;;  %v3640_v60 = vld [vmem:[%s4358_s1 + $0x3e0] sm:$0xff]  }
  0x64   : > { %3289 = vmatpush3.bf16.msra.mxu0 %v3595_v11  ;;  %v285_v11 = vld [vmem:[%s3788_s13 + $0x358] sm:$0xff] }
  0x65   : > { %3347 = vmatpush3.bf16.msra.mxu1 %v3597_v13  ;;  %3290 = vmatprep.subr.bf16.mxu0 %v3598_v14  ;;  %v2828_v13 = vcombine.low %v261_v62, %v269_v63  ;;  %v2843_v14 = vcombine.high %v276_v8, %v284_v9  ;;  %v2845_v15 = vcombine.high %v277_v10, %v285_v11 }
  0x66   : > { %3348 = vmatprep.subr.bf16.mxu1 %v3600_v19  ;;  %v191_v19 = vld [vmem:[%s3788_s13 + $0x68] sm:$0xff] }
  0x67   : > { %2100 = vmatmul.mubr.bf16.gmra.mrb[32].mxu0 %v2762_v20  ;;  %v2842_v20 = vcombine.low %v276_v8, %v284_v9  ;;  %v2752_v29 = vcombine.low %v183_v18, %v191_v19  ;;  %v255_v8 = vld [vmem:[%s3788_s13 + $0x268] sm:$0xff] }
  0x68   : > { %2189 = vmatmul.mubr.bf16.gmra.mrb[32].mxu1 %v2764_v21  ;;  %2107 = vmatprep.mubr.bf16.mxu0 %v2779_v22  ;;  %v2844_v21 = vcombine.low %v277_v10, %v285_v11  ;;  %v2751_v22 = vcombine.high %v182_v16, %v190_v17  ;;  %v3645_v9 = vld [vmem:[%s4358_s1 + $0x3a8] sm:$0xff]   ;;  %v3646_v10 = vld [vmem:[%s4358_s1 + $0x370] sm:$0xff]  }
  0x69   : > { %2196 = vmatprep.mubr.bf16.mxu1 %v2781_v23  ;;  %3291 = vmatpush3.bf16.msra.mxu0 %v3599_v24  ;;  %v2753_v23 = vcombine.high %v183_v18, %v191_v19  ;;  %v198_v24 = vld [vmem:[%s3788_s13 + $0xa0] sm:$0xff]  ;;  %v3650_v18 = vld [vmem:[%s4358_s1 + $0x378] sm:$0xff]  }
  0x6a   : > { %3349 = vmatpush3.bf16.msra.mxu1 %v3601_v25  ;;  %3292 = vmatprep.subr.bf16.mxu0 %v3602_v26  ;;  %v206_v25 = vld [vmem:[%s3788_s13 + $0xe0] sm:$0xff]  ;;  %v199_v26 = vld [vmem:[%s3788_s13 + $0xa8] sm:$0xff]  ;;  %v3652_v19 = vld [vmem:[%s4358_s1 + $0x3f8] sm:$0xff]  }
  0x6b   : > { %3350 = vmatprep.subr.bf16.mxu1 %v3604_v30  ;;  %v3623_v30 = vld [vmem:[%s4358_s1 + $0x300] sm:$0xff]   ;;  %v2767_v32 = vcombine.high %v198_v24, %v206_v25  ;;  %v2768_v45 = vcombine.low %v199_v26, %v207_v28 }
  0x6d   : > { %3293 = vmatpush3.bf16.msra.mxu0 %v3603_v27  ;;  %v2750_v27 = vcombine.low %v182_v16, %v190_v17  ;;  %v3647_v16 = vld [vmem:[%s4358_s1 + $0x330] sm:$0xff]  }
  0x6e   : > { %3351 = vmatpush3.bf16.msra.mxu1 %v3605_v33  ;;  %3294 = vmatprep.subr.bf16.mxu0 %v3606_v34  ;;  %v3626_v33 = vld [vmem:[%s4358_s1 + $0x348] sm:$0xff]   ;;  %v2769_v34 = vcombine.high %v199_v26, %v207_v28  ;;  %v3649_v17 = vld [vmem:[%s4358_s1 + $0x3b0] sm:$0xff]  }
  0x6f   : > { %2108 = vmatmul.mubr.bf16.gmra.mrb[36].mxu0 %v2778_v35  ;;  %3352 = vmatprep.subr.bf16.mxu1 %v3608_v36  ;;  %v3627_v35 = vld [vmem:[%s4358_s1 + $0x308] sm:$0xff]  }
  0x70   : > { %2197 = vmatmul.mubr.bf16.gmra.mrb[36].mxu1 %v2780_v37  ;;  %2115 = vmatprep.mubr.bf16.mxu0 %v2795_v38  ;;  %v3628_v36 = vld [vmem:[%s4358_s1 + $0x3c8] sm:$0xff]   ;;  %v3630_v38 = vld [vmem:[%s4358_s1 + $0x350] sm:$0xff]  }
  0x71   : > { %2204 = vmatprep.mubr.bf16.mxu1 %v2797_v40  ;;  %3295 = vmatpush3.bf16.msra.mxu0 %v3607_v39  ;;  %v3629_v37 = vld [vmem:[%s4358_s1 + $0x388] sm:$0xff]   ;;  %v214_v39 = vld [vmem:[%s3788_s13 + $0x120] sm:$0xff] }
  0x72   : > { %3353 = vmatpush3.bf16.msra.mxu1 %v3609_v41  ;;  %3296 = vmatprep.subr.bf16.mxu0 %v3610_v42  ;;  %v222_v40 = vld [vmem:[%s3788_s13 + $0x160] sm:$0xff]  ;;  %v215_v41 = vld [vmem:[%s3788_s13 + $0x128] sm:$0xff] }
  0x73   : > { %3354 = vmatprep.subr.bf16.mxu1 %v3612_v44  ;;  %v223_v42 = vld [vmem:[%s3788_s13 + $0x168] sm:$0xff]  ;;  %v2766_v44 = vcombine.low %v198_v24, %v206_v25  ;;  %v2783_v46 = vcombine.high %v214_v39, %v222_v40  ;;  %v2782_v59 = vcombine.low %v214_v39, %v222_v40  ;;  %v3653_v25 = vld [vmem:[%s4358_s1 + $0x3b8] sm:$0xff]   ;;  %v192_v39 = vld [vmem:[%s3788_s13 + $0x70] sm:$0xff] }
  0x74   : > { %v271_v24 = vld [vmem:[%s3788_s13 + $0x2e8] sm:$0xff]  ;;  %v185_v40 = vld [vmem:[%s3788_s13 + $0x38] sm:$0xff] }
  0x75   : > { %3297 = vmatpush3.bf16.msra.mxu0 %v3611_v48  ;;  %v2785_v48 = vcombine.high %v215_v41, %v223_v42 }
  0x76   : > { %3355 = vmatpush3.bf16.msra.mxu1 %v3613_v49  ;;  %3298 = vmatprep.subr.bf16.mxu0 %v3614_v50  ;;  %v3633_v49 = vld [vmem:[%s4358_s1 + $0x390] sm:$0xff]   ;;  %v3634_v50 = vld [vmem:[%s4358_s1 + $0x358] sm:$0xff]  }
  0x77   : > { %2116 = vmatmul.mubr.bf16.gmra.mrb[40].mxu0 %v2794_v51  ;;  %3356 = vmatprep.subr.bf16.mxu1 %v3616_v52  ;;  %v3636_v51 = vld [vmem:[%s4358_s1 + $0x3d8] sm:$0xff]  }
  0x78   : > { %2205 = vmatmul.mubr.bf16.gmra.mrb[40].mxu1 %v2796_v53  ;;  %2123 = vmatprep.mubr.bf16.mxu0 %v2811_v54  ;;  %v3635_v52 = vld [vmem:[%s4358_s1 + $0x318] sm:$0xff]   ;;  %v230_v53 = vld [vmem:[%s3788_s13 + $0x1a0] sm:$0xff] }
  0x79   : > { %2212 = vmatprep.mubr.bf16.mxu1 %v2813_v55  ;;  %3299 = vmatpush3.bf16.msra.mxu0 %v3615_v56  ;;  %v238_v54 = vld [vmem:[%s3788_s13 + $0x1e0] sm:$0xff]  ;;  %v231_v55 = vld [vmem:[%s3788_s13 + $0x1a8] sm:$0xff] }
  0x7a   : > { %3357 = vmatpush3.bf16.msra.mxu1 %v3617_v57  ;;  %3300 = vmatprep.subr.bf16.mxu0 %v3618_v58  ;;  %v239_v56 = vld [vmem:[%s3788_s13 + $0x1e8] sm:$0xff]  ;;  %v3637_v57 = vld [vmem:[%s4358_s1 + $0x398] sm:$0xff]   ;;  %v3638_v58 = vld [vmem:[%s4358_s1 + $0x360] sm:$0xff]   ;;  %v2799_v62 = vcombine.high %v230_v53, %v238_v54  ;;  %v2798_v11 = vcombine.low %v230_v53, %v238_v54 }
  0x7b   : > { %3358 = vmatprep.subr.bf16.mxu1 %v3620_v61  ;;  %v2784_v61 = vcombine.low %v215_v41, %v223_v42  ;;  %v2801_v63 = vcombine.high %v231_v55, %v239_v56  ;;  %v193_v41 = vld [vmem:[%s3788_s13 + $0x78] sm:$0xff]  ;;  %v216_v54 = vld [vmem:[%s3788_s13 + $0x130] sm:$0xff] }
  0x7d   : > { %3301 = vmatpush3.bf16.msra.mxu0 %v3619_v0  ;;  %v3639_v0 = vld [vmem:[%s4358_s1 + $0x320] sm:$0xff]  }
  0x7e   : > { %3359 = vmatpush3.bf16.msra.mxu1 %v3621_v1  ;;  %3402 = vmatprep.subr.bf16.mxu0 %v3622_v2  ;;  %v3641_v1 = vld [vmem:[%s4358_s1 + $0x3a0] sm:$0xff]   ;;  %v3642_v2 = vld [vmem:[%s4358_s1 + $0x368] sm:$0xff]  }
  0x7f   : > { %2124 = vmatmul.mubr.bf16.gmra.mrb[44].mxu0 %v2810_v3  ;;  %3460 = vmatprep.subr.bf16.mxu1 %v3624_v4  ;;  %v3644_v3 = vld [vmem:[%s4358_s1 + $0x3e8] sm:$0xff]   ;;  %v246_v4 = vld [vmem:[%s3788_s13 + $0x220] sm:$0xff] }
  0x80   : > { %2213 = vmatmul.mubr.bf16.gmra.mrb[44].mxu1 %v2812_v5  ;;  %2131 = vmatprep.mubr.bf16.mxu0 %v2827_v6  ;;  %v254_v5 = vld [vmem:[%s3788_s13 + $0x260] sm:$0xff]  ;;  %v247_v6 = vld [vmem:[%s3788_s13 + $0x228] sm:$0xff] }
  0x81   : > { %2220 = vmatprep.mubr.bf16.mxu1 %v2829_v7  ;;  %v3643_v7 = vld [vmem:[%s4358_s1 + $0x328] sm:$0xff]   ;;  %v2814_v26 = vcombine.low %v246_v4, %v254_v5 }
  0x87   : > { %2132 = vmatmul.mubr.bf16.gmra.mrb[48].mxu0 %v2826_v12  ;;  %v3648_v12 = vld [vmem:[%s4358_s1 + $0x3f0] sm:$0xff]  }
  0x88   : > { %2221 = vmatmul.mubr.bf16.gmra.mrb[48].mxu1 %v2828_v13  ;;  %2139 = vmatprep.mubr.bf16.mxu0 %v2843_v14  ;;  %v2800_v13 = vcombine.low %v231_v55, %v239_v56  ;;  %v2815_v14 = vcombine.high %v246_v4, %v254_v5  ;;  %v224_v55 = vld [vmem:[%s3788_s13 + $0x170] sm:$0xff]  ;;  %v217_v56 = vld [vmem:[%s3788_s13 + $0x138] sm:$0xff] }
  0x89   : > { %2228 = vmatprep.mubr.bf16.mxu1 %v2845_v15  ;;  %v2817_v15 = vcombine.high %v247_v6, %v255_v8 }
  0x8f   : > { %2140 = vmatmul.mubr.bf16.gmra.mrb[52].mxu0 %v2842_v20  ;;  %v262_v20 = vld [vmem:[%s3788_s13 + $0x2a0] sm:$0xff] }
  0x90   : > { %2229 = vmatmul.mubr.bf16.gmra.mrb[52].mxu1 %v2844_v21  ;;  %2269 = vmatprep.mubr.bf16.mxu0 %v2751_v22  ;;  %v270_v21 = vld [vmem:[%s3788_s13 + $0x2e0] sm:$0xff]  ;;  %v3651_v22 = vld [vmem:[%s4358_s1 + $0x338] sm:$0xff]  }
  0x91   : > { %2358 = vmatprep.mubr.bf16.mxu1 %v2753_v23  ;;  %v263_v23 = vld [vmem:[%s3788_s13 + $0x2a8] sm:$0xff]  ;;  %v2831_v28 = vcombine.high %v262_v20, %v270_v21 }
  0x97   : > { %2270 = vmatmul.mubr.bf16.vlgmr.msra.gmra.mrb[56].mxu0 %v2750_v27  ;;  %v2816_v27 = vcombine.low %v247_v6, %v255_v8  ;;  %v248_v6 = vld [vmem:[%s3788_s13 + $0x230] sm:$0xff]  ;;  %v249_v8 = vld [vmem:[%s3788_s13 + $0x238] sm:$0xff] }
  0x98   : > { %2359 = vmatmul.mubr.bf16.vlgmr.msra.gmra.mrb[56].mxu1 %v2752_v29  ;;  %3403 = vmatpush3.bf16.msra.mxu0 %v3623_v30  ;;  %v2833_v29 = vcombine.high %v263_v23, %v271_v24  ;;  %v278_v30 = vld [vmem:[%s3788_s13 + $0x320] sm:$0xff] }
  0x99   : > { %3461 = vmatpush3.bf16.msra.mxu1 %v3625_v31  ;;  %2277 = vmatprep.mubr.bf16.mxu0 %v2767_v32  ;;  %v286_v31 = vld [vmem:[%s3788_s13 + $0x360] sm:$0xff]  ;;  %v279_v32 = vld [vmem:[%s3788_s13 + $0x328] sm:$0xff] }
  0x9a   : > { %2366 = vmatprep.mubr.bf16.mxu1 %v2769_v34  ;;  %3404 = vmatprep.subr.bf16.mxu0 %v3626_v33  ;;  %v287_v33 = vld [vmem:[%s3788_s13 + $0x368] sm:$0xff]  ;;  %v2830_v34 = vcombine.low %v262_v20, %v270_v21  ;;  %v2846_v42 = vcombine.low %v278_v30, %v286_v31 }
  0x9b   : > { %3462 = vmatprep.subr.bf16.mxu1 %v3628_v36  ;;  %v2847_v36 = vcombine.high %v278_v30, %v286_v31 }
  0x9c   : > { %3405 = vmatpush3.bf16.msra.mxu0 %v3627_v35  ;;  %v2832_v35 = vcombine.low %v263_v23, %v271_v24  ;;  %v288_v23 = vld [vmem:[%s3788_s13 + $0x370] sm:$0xff]  ;;  %v281_v24 = vld [vmem:[%s3788_s13 + $0x338] sm:$0xff] }
  0x9d   : > { %3463 = vmatpush3.bf16.msra.mxu1 %v3629_v37  ;;  %3406 = vmatprep.subr.bf16.mxu0 %v3630_v38  ;;  %v2849_v37 = vcombine.high %v279_v32, %v287_v33  ;;  %v184_v38 = vld [vmem:[%s3788_s13 + $0x30] sm:$0xff] }
  0x9e   : > { %3464 = vmatprep.subr.bf16.mxu1 %v3632_v43  ;;  %v2848_v43 = vcombine.low %v279_v32, %v287_v33  ;;  %v4199_v32 = vld [vmem:[%s4359_s2] ss:$0 sm:$0xff] }
  0x9f   : > { %2278 = vmatmul.mubr.bf16.gmra.mrb[60].mxu0 %v2766_v44  ;;  %v2755_v44 = vcombine.high %v184_v38, %v192_v39 }
  0xa0   : > { %2367 = vmatmul.mubr.bf16.gmra.mrb[60].mxu1 %v2768_v45  ;;  %2285 = vmatprep.mubr.bf16.mxu0 %v2783_v46  ;;  %v2757_v45 = vcombine.high %v185_v40, %v193_v41  ;;  %v200_v46 = vld [vmem:[%s3788_s13 + $0xb0] sm:$0xff] }
  0xa1   : > { %2374 = vmatprep.mubr.bf16.mxu1 %v2785_v48  ;;  %3407 = vmatpush3.bf16.msra.mxu0 %v3631_v47  ;;  %v208_v47 = vld [vmem:[%s3788_s13 + $0xf0] sm:$0xff]  ;;  %v201_v48 = vld [vmem:[%s3788_s13 + $0xb8] sm:$0xff] }
  0xa2   : > { %3465 = vmatpush3.bf16.msra.mxu1 %v3633_v49  ;;  %3408 = vmatprep.subr.bf16.mxu0 %v3634_v50  ;;  %v209_v49 = vld [vmem:[%s3788_s13 + $0xf8] sm:$0xff]  ;;  %v2754_v50 = vcombine.low %v184_v38, %v192_v39 }
  0xa3   : > { %3466 = vmatprep.subr.bf16.mxu1 %v3636_v51  ;;  %v2756_v51 = vcombine.low %v185_v40, %v193_v41  ;;  %v2773_v53 = vcombine.high %v201_v48, %v209_v49 }
  0xa5   : > { %3409 = vmatpush3.bf16.msra.mxu0 %v3635_v52  ;;  %v2771_v52 = vcombine.high %v200_v46, %v208_v47 }
  0xa6   : > { %3467 = vmatpush3.bf16.msra.mxu1 %v3637_v57  ;;  %3410 = vmatprep.subr.bf16.mxu0 %v3638_v58  ;;  %v225_v57 = vld [vmem:[%s3788_s13 + $0x178] sm:$0xff]  ;;  %v2770_v58 = vcombine.low %v200_v46, %v208_v47 }
  0xa7   : > { %2286 = vmatmul.mubr.bf16.gmra.mrb[64].mxu0 %v2782_v59  ;;  %3468 = vmatprep.subr.bf16.mxu1 %v3640_v60  ;;  %v2772_v59 = vcombine.low %v201_v48, %v209_v49  ;;  %v2787_v60 = vcombine.high %v216_v54, %v224_v55 }
  0xa8   : > { %2375 = vmatmul.mubr.bf16.gmra.mrb[64].mxu1 %v2784_v61  ;;  %2293 = vmatprep.mubr.bf16.mxu0 %v2799_v62  ;;  %v2789_v61 = vcombine.high %v217_v56, %v225_v57  ;;  %v232_v62 = vld [vmem:[%s3788_s13 + $0x1b0] sm:$0xff] }
  0xa9   : > { %2382 = vmatprep.mubr.bf16.mxu1 %v2801_v63  ;;  %3411 = vmatpush3.bf16.msra.mxu0 %v3639_v0  ;;  %v240_v63 = vld [vmem:[%s3788_s13 + $0x1f0] sm:$0xff]  ;;  %v233_v0 = vld [vmem:[%s3788_s13 + $0x1b8] sm:$0xff] }
  0xaa   : > { %3469 = vmatpush3.bf16.msra.mxu1 %v3641_v1  ;;  %3412 = vmatprep.subr.bf16.mxu0 %v3642_v2  ;;  %v241_v1 = vld [vmem:[%s3788_s13 + $0x1f8] sm:$0xff]  ;;  %v2786_v2 = vcombine.low %v216_v54, %v224_v55  ;;  %v2803_v4 = vcombine.high %v232_v62, %v240_v63 }
  0xab   : > { %3470 = vmatprep.subr.bf16.mxu1 %v3644_v3  ;;  %v2788_v3 = vcombine.low %v217_v56, %v225_v57  ;;  %v2805_v5 = vcombine.high %v233_v0, %v241_v1 }
  0xad   : > { %3413 = vmatpush3.bf16.msra.mxu0 %v3643_v7  ;;  %v256_v7 = vld [vmem:[%s3788_s13 + $0x270] sm:$0xff] }
  0xae   : > { %3471 = vmatpush3.bf16.msra.mxu1 %v3645_v9  ;;  %3414 = vmatprep.subr.bf16.mxu0 %v3646_v10  ;;  %v257_v9 = vld [vmem:[%s3788_s13 + $0x278] sm:$0xff]  ;;  %v2802_v10 = vcombine.low %v232_v62, %v240_v63 }
  0xaf   : > { %2294 = vmatmul.mubr.bf16.gmra.mrb[68].mxu0 %v2798_v11  ;;  %3472 = vmatprep.subr.bf16.mxu1 %v3648_v12  ;;  %v2804_v11 = vcombine.low %v233_v0, %v241_v1  ;;  %v2819_v12 = vcombine.high %v248_v6, %v256_v7 }
  0xb0   : > { %2383 = vmatmul.mubr.bf16.gmra.mrb[68].mxu1 %v2800_v13  ;;  %2301 = vmatprep.mubr.bf16.mxu0 %v2815_v14  ;;  %v2821_v13 = vcombine.high %v249_v8, %v257_v9  ;;  %v264_v14 = vld [vmem:[%s3788_s13 + $0x2b0] sm:$0xff] }
  0xb1   : > { %2390 = vmatprep.mubr.bf16.mxu1 %v2817_v15  ;;  %3415 = vmatpush3.bf16.msra.mxu0 %v3647_v16  ;;  %v272_v15 = vld [vmem:[%s3788_s13 + $0x2f0] sm:$0xff]  ;;  %v265_v16 = vld [vmem:[%s3788_s13 + $0x2b8] sm:$0xff] }
  0xb2   : > { %3473 = vmatpush3.bf16.msra.mxu1 %v3649_v17  ;;  %3416 = vmatprep.subr.bf16.mxu0 %v3650_v18  ;;  %v273_v17 = vld [vmem:[%s3788_s13 + $0x2f8] sm:$0xff]  ;;  %v2818_v18 = vcombine.low %v248_v6, %v256_v7  ;;  %v2835_v20 = vcombine.high %v264_v14, %v272_v15 }
  0xb3   : > { %3474 = vmatprep.subr.bf16.mxu1 %v3652_v19  ;;  %v2820_v19 = vcombine.low %v249_v8, %v257_v9  ;;  %v2837_v21 = vcombine.high %v265_v16, %v273_v17 }
  0xb5   : > { %3417 = vmatpush3.bf16.msra.mxu0 %v3651_v22  ;;  %v280_v22 = vld [vmem:[%s3788_s13 + $0x330] sm:$0xff] }
  0xb6   : > { %3475 = vmatpush3.bf16.msra.mxu1 %v3653_v25  ;;  %v289_v25 = vld [vmem:[%s3788_s13 + $0x378] sm:$0xff]  ;;  %s2740_s13 = sshll.u32 %s4362_s19, 2 }
  0xb7   : > { %2302 = vmatmul.mubr.bf16.gmra.mrb[72].mxu0 %v2814_v26  ;;  %v2834_v26 = vcombine.low %v264_v14, %v272_v15  ;;  %v2852_v38 = vcombine.low %v281_v24, %v289_v25  ;;  %s4333_s9 = scalar_lea.vmem %s4360_s3, %s2740_s13 }
  0xb8   : > { %2391 = vmatmul.mubr.bf16.gmra.mrb[72].mxu1 %v2816_v27  ;;  %2309 = vmatprep.mubr.bf16.mxu0 %v2831_v28  ;;  %v2836_v27 = vcombine.low %v265_v16, %v273_v17  ;;  %v2851_v28 = vcombine.high %v280_v22, %v288_v23 }
  0xb9   : > { %2398 = vmatprep.mubr.bf16.mxu1 %v2833_v29  ;;  %v2853_v29 = vcombine.high %v281_v24, %v289_v25 }
  0xbf   : > { %2310 = vmatmul.mubr.bf16.gmra.mrb[76].mxu0 %v2830_v34  ;;  %v2850_v34 = vcombine.low %v280_v22, %v288_v23 }
  0xc0   : > { %2399 = vmatmul.mubr.bf16.gmra.mrb[76].mxu1 %v2832_v35  ;;  %2317 = vmatprep.mubr.bf16.mxu0 %v2847_v36 }
  0xc1   : > { %2406 = vmatprep.mubr.bf16.mxu1 %v2849_v37 }
  0xc7   : > { %2318 = vmatmul.mubr.bf16.gmra.mrb[80].mxu0 %v2846_v42 }
  0xc8   : > { %2407 = vmatmul.mubr.bf16.gmra.mrb[80].mxu1 %v2848_v43  ;;  %2447 = vmatprep.mubr.bf16.mxu0 %v2755_v44 }
  0xc9   : > { %2536 = vmatprep.mubr.bf16.mxu1 %v2757_v45 }
  0xcf   : > { %2448 = vmatmul.mubr.bf16.vlgmr.msra.gmra.mrb[84].mxu0 %v2754_v50 }
  0xd0   : > { %2537 = vmatmul.mubr.bf16.vlgmr.msra.gmra.mrb[84].mxu1 %v2756_v51  ;;  %2455 = vmatprep.mubr.bf16.mxu0 %v2771_v52 }
  0xd1   : > { %2544 = vmatprep.mubr.bf16.mxu1 %v2773_v53 }
  0xd7   : > { %2456 = vmatmul.mubr.bf16.gmra.mrb[88].mxu0 %v2770_v58 }
  0xd8   : > { %2545 = vmatmul.mubr.bf16.gmra.mrb[88].mxu1 %v2772_v59  ;;  %2463 = vmatprep.mubr.bf16.mxu0 %v2787_v60 }
  0xd9   : > { %2552 = vmatprep.mubr.bf16.mxu1 %v2789_v61 }
  0xdf   : > { %2464 = vmatmul.mubr.bf16.gmra.mrb[92].mxu0 %v2786_v2 }
  0xe0   : > { %2553 = vmatmul.mubr.bf16.gmra.mrb[92].mxu1 %v2788_v3  ;;  %2471 = vmatprep.mubr.bf16.mxu0 %v2803_v4 }
  0xe1   : > { %2560 = vmatprep.mubr.bf16.mxu1 %v2805_v5 }
  0xe7   : > { %2472 = vmatmul.mubr.bf16.gmra.mrb[96].mxu0 %v2802_v10 }
  0xe8   : > { %2561 = vmatmul.mubr.bf16.gmra.mrb[96].mxu1 %v2804_v11  ;;  %2479 = vmatprep.mubr.bf16.mxu0 %v2819_v12 }
  0xe9   : > { %2568 = vmatprep.mubr.bf16.mxu1 %v2821_v13 }
  0xef   : > { %2480 = vmatmul.mubr.bf16.gmra.mrb[100].mxu0 %v2818_v18 }
  0xf0   : > { %2569 = vmatmul.mubr.bf16.gmra.mrb[100].mxu1 %v2820_v19  ;;  %2487 = vmatprep.mubr.bf16.mxu0 %v2835_v20 }
  0xf1   : > { %2576 = vmatprep.mubr.bf16.mxu1 %v2837_v21 }
  0xf7   : > { %2488 = vmatmul.mubr.bf16.gmra.mrb[104].mxu0 %v2834_v26 }
  0xf8   : > { %2577 = vmatmul.mubr.bf16.gmra.mrb[104].mxu1 %v2836_v27  ;;  %2495 = vmatprep.mubr.bf16.mxu0 %v2851_v28 }
  0xf9   : > { %2584 = vmatprep.mubr.bf16.mxu1 %v2853_v29 }
  0xfa   : > { %v3070_v30 = vpop.f32.mrb[0].mxu0 }
  0xfb   : > { %v3128_v31 = vpop.f32.mrb[0].mxu1  ;;  %v3071_v33 = vpop.f32.mrb[1].mxu0 }
  0xfc   : > { %v3072_v35 = vadd.f32 %v3071_v33, %v3070_v30  ;;  %v3129_v36 = vpop.f32.mrb[1].mxu1  ;;  %v3073_v37 = vpop.f32.mrb[2].mxu0 }
  0xfd   : > { %v3130_v39 = vadd.f32 %v3129_v36, %v3128_v31  ;;  %v3131_v40 = vpop.f32.mrb[2].mxu1  ;;  %v3074_v41 = vpop.f32.mrb[3].mxu0 }
  0xfe   : > { %v1916_v42 = vadd.f32 %v3072_v35, %v4199_v32  ;;  %v3075_v43 = vadd.f32 %v3074_v41, %v3073_v37  ;;  %v3132_v44 = vpop.f32.mrb[3].mxu1 }
  0xff   : > { %v3133_v45 = vadd.f32 %v3132_v44, %v3131_v40  ;;  %2496 = vmatmul.mubr.bf16.gmra.mrb[108].mxu0 %v2850_v34 }
 0x100   : > { %v4202_v46 = vadd.f32 %v3130_v39, %v1916_v42  ;;  %v1919_v47 = vadd.f32 %v3075_v43, %v4199_v32  ;;  %2585 = vmatmul.mubr.bf16.gmra.mrb[108].mxu1 %v2852_v38 }
 0x102   : > { %v4205_v48 = vadd.f32 %v3133_v45, %v1919_v47  ;;  %v3076_v49 = vpop.f32.mrb[4].mxu0 }
 0x103   : > { %v3134_v50 = vpop.f32.mrb[4].mxu1  ;;  %v3077_v51 = vpop.f32.mrb[5].mxu0 }
 0x104   : > { %v3078_v52 = vadd.f32 %v3077_v51, %v3076_v49  ;;  %v3135_v53 = vpop.f32.mrb[5].mxu1  ;;  %v3079_v54 = vpop.f32.mrb[6].mxu0 }
 0x105   : > { %v3136_v55 = vadd.f32 %v3135_v53, %v3134_v50  ;;  %v3137_v56 = vpop.f32.mrb[6].mxu1  ;;  %v3080_v57 = vpop.f32.mrb[7].mxu0 }
 0x106   : > { %v1924_v58 = vadd.f32 %v3078_v52, %v4199_v32  ;;  %v3081_v59 = vadd.f32 %v3080_v57, %v3079_v54  ;;  %v3138_v60 = vpop.f32.mrb[7].mxu1 }
 0x107   : > { %v3139_v61 = vadd.f32 %v3138_v60, %v3137_v56 }
 0x108   : > { %v4208_v62 = vadd.f32 %v3136_v55, %v1924_v58  ;;  %v1927_v63 = vadd.f32 %v3081_v59, %v4199_v32 }
 0x10a   : > { %v4211_v0 = vadd.f32 %v3139_v61, %v1927_v63  ;;  %v3082_v1 = vpop.f32.mrb[8].mxu0 }
 0x10b   : > { %v3140_v2 = vpop.f32.mrb[8].mxu1  ;;  %v3083_v3 = vpop.f32.mrb[9].mxu0 }
 0x10c   : > { %v3084_v4 = vadd.f32 %v3083_v3, %v3082_v1  ;;  %v3141_v5 = vpop.f32.mrb[9].mxu1  ;;  %v3085_v6 = vpop.f32.mrb[10].mxu0 }
 0x10d   : > { %v3142_v7 = vadd.f32 %v3141_v5, %v3140_v2  ;;  %v3143_v8 = vpop.f32.mrb[10].mxu1  ;;  %v3086_v9 = vpop.f32.mrb[11].mxu0 }
 0x10e   : > { %v1932_v10 = vadd.f32 %v3084_v4, %v4199_v32  ;;  %v3087_v11 = vadd.f32 %v3086_v9, %v3085_v6  ;;  %v3144_v12 = vpop.f32.mrb[11].mxu1 }
 0x10f   : > { %v3145_v13 = vadd.f32 %v3144_v12, %v3143_v8 }
 0x110   : > { %v4214_v14 = vadd.f32 %v3142_v7, %v1932_v10  ;;  %v1935_v15 = vadd.f32 %v3087_v11, %v4199_v32 }
 0x112   : > { %v4217_v16 = vadd.f32 %v3145_v13, %v1935_v15  ;;  %v3088_v17 = vpop.f32.mrb[12].mxu0 }
 0x113   : > { %v3146_v18 = vpop.f32.mrb[12].mxu1  ;;  %v3089_v19 = vpop.f32.mrb[13].mxu0 }
 0x114   : > { %v3090_v20 = vadd.f32 %v3089_v19, %v3088_v17  ;;  %v3147_v21 = vpop.f32.mrb[13].mxu1  ;;  %v3091_v22 = vpop.f32.mrb[14].mxu0 }
 0x115   : > { %v3148_v23 = vadd.f32 %v3147_v21, %v3146_v18  ;;  %v3149_v24 = vpop.f32.mrb[14].mxu1  ;;  %v3092_v25 = vpop.f32.mrb[15].mxu0 }
 0x116   : > { %v1940_v26 = vadd.f32 %v3090_v20, %v4199_v32  ;;  %v3093_v27 = vadd.f32 %v3092_v25, %v3091_v22  ;;  %v3150_v28 = vpop.f32.mrb[15].mxu1 }
 0x117   : > { %v3151_v29 = vadd.f32 %v3150_v28, %v3149_v24 }
 0x118   : > { %v4220_v30 = vadd.f32 %v3148_v23, %v1940_v26  ;;  %v1943_v31 = vadd.f32 %v3093_v27, %v4199_v32 }
 0x11a   : > { %v4223_v33 = vadd.f32 %v3151_v29, %v1943_v31  ;;  %v3094_v34 = vpop.f32.mrb[16].mxu0 }
 0x11b   : > { %v3152_v35 = vpop.f32.mrb[16].mxu1  ;;  %v3095_v36 = vpop.f32.mrb[17].mxu0 }
 0x11c   : > { %v3096_v37 = vadd.f32 %v3095_v36, %v3094_v34  ;;  %v3153_v38 = vpop.f32.mrb[17].mxu1  ;;  %v3097_v39 = vpop.f32.mrb[18].mxu0 }
 0x11d   : > { %v3154_v40 = vadd.f32 %v3153_v38, %v3152_v35  ;;  %v3155_v41 = vpop.f32.mrb[18].mxu1  ;;  %v3098_v42 = vpop.f32.mrb[19].mxu0 }
 0x11e   : > { %v1948_v43 = vadd.f32 %v3096_v37, %v4199_v32  ;;  %v3099_v44 = vadd.f32 %v3098_v42, %v3097_v39  ;;  %v3156_v45 = vpop.f32.mrb[19].mxu1 }
 0x11f   : > { %v3157_v47 = vadd.f32 %v3156_v45, %v3155_v41 }
 0x120   : > { %v4226_v49 = vadd.f32 %v3154_v40, %v1948_v43  ;;  %v1951_v50 = vadd.f32 %v3099_v44, %v4199_v32 }
 0x122   : > { %v4229_v51 = vadd.f32 %v3157_v47, %v1951_v50  ;;  %v3100_v52 = vpop.f32.mrb[20].mxu0 }
 0x123   : > { %v3158_v53 = vpop.f32.mrb[20].mxu1  ;;  %v3101_v54 = vpop.f32.mrb[21].mxu0 }
 0x124   : > { %v3102_v55 = vadd.f32 %v3101_v54, %v3100_v52  ;;  %v3159_v56 = vpop.f32.mrb[21].mxu1  ;;  %v3103_v57 = vpop.f32.mrb[22].mxu0 }
 0x125   : > { %v3160_v58 = vadd.f32 %v3159_v56, %v3158_v53  ;;  %v3161_v59 = vpop.f32.mrb[22].mxu1  ;;  %v3104_v60 = vpop.f32.mrb[23].mxu0 }
 0x126   : > { %v1956_v61 = vadd.f32 %v3102_v55, %v4199_v32  ;;  %v3105_v63 = vadd.f32 %v3104_v60, %v3103_v57  ;;  %v3162_v1 = vpop.f32.mrb[23].mxu1 }
 0x127   : > { %v3163_v2 = vadd.f32 %v3162_v1, %v3161_v59 }
 0x128   : > { %v4232_v3 = vadd.f32 %v3160_v58, %v1956_v61  ;;  %v1959_v4 = vadd.f32 %v3105_v63, %v4199_v32 }
 0x12a   : > { %v4235_v5 = vadd.f32 %v3163_v2, %v1959_v4  ;;  %v3106_v6 = vpop.f32.mrb[24].mxu0 }
 0x12b   : > { %v3164_v7 = vpop.f32.mrb[24].mxu1  ;;  %v3107_v8 = vpop.f32.mrb[25].mxu0 }
 0x12c   : > { %v3108_v9 = vadd.f32 %v3107_v8, %v3106_v6  ;;  %v3165_v10 = vpop.f32.mrb[25].mxu1  ;;  %v3109_v11 = vpop.f32.mrb[26].mxu0 }
 0x12d   : > { %v3166_v12 = vadd.f32 %v3165_v10, %v3164_v7  ;;  %v3167_v13 = vpop.f32.mrb[26].mxu1  ;;  %v3110_v15 = vpop.f32.mrb[27].mxu0 }
 0x12e   : > { %v1964_v17 = vadd.f32 %v3108_v9, %v4199_v32  ;;  %v3111_v18 = vadd.f32 %v3110_v15, %v3109_v11  ;;  %v3168_v19 = vpop.f32.mrb[27].mxu1 }
 0x12f   : > { %v3169_v20 = vadd.f32 %v3168_v19, %v3167_v13 }
 0x130   : > { %v4238_v21 = vadd.f32 %v3166_v12, %v1964_v17  ;;  %v1967_v22 = vadd.f32 %v3111_v18, %v4199_v32 }
 0x132   : > { %v4241_v23 = vadd.f32 %v3169_v20, %v1967_v22  ;;  %v3186_v24 = vpop.f32.mrb[28].mxu0 }
 0x133   : > { %v3244_v25 = vpop.f32.mrb[28].mxu1  ;;  %v3187_v26 = vpop.f32.mrb[29].mxu0 }
 0x134   : > { %v3188_v27 = vadd.f32 %v3187_v26, %v3186_v24  ;;  %v3245_v28 = vpop.f32.mrb[29].mxu1  ;;  %v3189_v29 = vpop.f32.mrb[30].mxu0 }
 0x135   : > { %v3246_v31 = vadd.f32 %v3245_v28, %v3244_v25  ;;  %v3247_v34 = vpop.f32.mrb[30].mxu1  ;;  %v3190_v35 = vpop.f32.mrb[31].mxu0 }
 0x136   : > { %v2094_v36 = vadd.f32 %v3188_v27, %v4202_v46  ;;  %v3191_v37 = vadd.f32 %v3190_v35, %v3189_v29  ;;  %v3248_v38 = vpop.f32.mrb[31].mxu1 }
 0x137   : > { %v3249_v39 = vadd.f32 %v3248_v38, %v3247_v34 }
 0x138   : > { %v4244_v40 = vadd.f32 %v3246_v31, %v2094_v36  ;;  %v2097_v32 = vadd.f32 %v3191_v37, %v4205_v48 }
 0x13a   : > { %v4247_v41 = vadd.f32 %v3249_v39, %v2097_v32  ;;  %v3192_v42 = vpop.f32.mrb[32].mxu0 }
 0x13b   : > { %v3250_v43 = vpop.f32.mrb[32].mxu1  ;;  %v3193_v44 = vpop.f32.mrb[33].mxu0 }
 0x13c   : > { %v3194_v45 = vadd.f32 %v3193_v44, %v3192_v42  ;;  %v3251_v47 = vpop.f32.mrb[33].mxu1  ;;  %v3195_v50 = vpop.f32.mrb[34].mxu0 }
 0x13d   : > { %v3252_v52 = vadd.f32 %v3251_v47, %v3250_v43  ;;  %v3253_v53 = vpop.f32.mrb[34].mxu1  ;;  %v3196_v54 = vpop.f32.mrb[35].mxu0 }
 0x13e   : > { %v2102_v46 = vadd.f32 %v3194_v45, %v4208_v62  ;;  %v3197_v55 = vadd.f32 %v3196_v54, %v3195_v50  ;;  %v3254_v56 = vpop.f32.mrb[35].mxu1 }
 0x13f   : > { %v3255_v57 = vadd.f32 %v3254_v56, %v3253_v53 }
 0x140   : > { %v4250_v58 = vadd.f32 %v3252_v52, %v2102_v46  ;;  %v2105_v48 = vadd.f32 %v3197_v55, %v4211_v0 }
 0x142   : > { %v4253_v59 = vadd.f32 %v3255_v57, %v2105_v48  ;;  %v3198_v60 = vpop.f32.mrb[36].mxu0 }
 0x143   : > { %v3256_v61 = vpop.f32.mrb[36].mxu1  ;;  %v3199_v63 = vpop.f32.mrb[37].mxu0 }
 0x144   : > { %v3200_v1 = vadd.f32 %v3199_v63, %v3198_v60  ;;  %v3257_v2 = vpop.f32.mrb[37].mxu1  ;;  %v3201_v4 = vpop.f32.mrb[38].mxu0 }
 0x145   : > { %v3258_v6 = vadd.f32 %v3257_v2, %v3256_v61  ;;  %v3259_v7 = vpop.f32.mrb[38].mxu1  ;;  %v3202_v8 = vpop.f32.mrb[39].mxu0 }
 0x146   : > { %v2110_v62 = vadd.f32 %v3200_v1, %v4214_v14  ;;  %v3203_v9 = vadd.f32 %v3202_v8, %v3201_v4  ;;  %v3260_v10 = vpop.f32.mrb[39].mxu1 }
 0x147   : > { %v3261_v11 = vadd.f32 %v3260_v10, %v3259_v7 }
 0x148   : > { %v4256_v12 = vadd.f32 %v3258_v6, %v2110_v62  ;;  %v2113_v0 = vadd.f32 %v3203_v9, %v4217_v16 }
 0x14a   : > { %v4259_v13 = vadd.f32 %v3261_v11, %v2113_v0  ;;  %v3204_v15 = vpop.f32.mrb[40].mxu0 }
 0x14b   : > { %v3262_v17 = vpop.f32.mrb[40].mxu1  ;;  %v3205_v18 = vpop.f32.mrb[41].mxu0 }
 0x14c   : > { %v3206_v19 = vadd.f32 %v3205_v18, %v3204_v15  ;;  %v3263_v20 = vpop.f32.mrb[41].mxu1  ;;  %v3207_v22 = vpop.f32.mrb[42].mxu0 }
 0x14d   : > { %v3264_v24 = vadd.f32 %v3263_v20, %v3262_v17  ;;  %v3265_v25 = vpop.f32.mrb[42].mxu1  ;;  %v3208_v26 = vpop.f32.mrb[43].mxu0 }
 0x14e   : > { %v2118_v14 = vadd.f32 %v3206_v19, %v4220_v30  ;;  %v3209_v27 = vadd.f32 %v3208_v26, %v3207_v22  ;;  %v3266_v28 = vpop.f32.mrb[43].mxu1 }
 0x14f   : > { %v3267_v29 = vadd.f32 %v3266_v28, %v3265_v25 }
 0x150   : > { %v4262_v31 = vadd.f32 %v3264_v24, %v2118_v14  ;;  %v2121_v16 = vadd.f32 %v3209_v27, %v4223_v33 }
 0x152   : > { %v4265_v34 = vadd.f32 %v3267_v29, %v2121_v16  ;;  %v3210_v35 = vpop.f32.mrb[44].mxu0 }
 0x153   : > { %v3268_v36 = vpop.f32.mrb[44].mxu1  ;;  %v3211_v37 = vpop.f32.mrb[45].mxu0 }
 0x154   : > { %v3212_v38 = vadd.f32 %v3211_v37, %v3210_v35  ;;  %v3269_v39 = vpop.f32.mrb[45].mxu1  ;;  %v3213_v32 = vpop.f32.mrb[46].mxu0 }
 0x155   : > { %v3270_v42 = vadd.f32 %v3269_v39, %v3268_v36  ;;  %v3271_v43 = vpop.f32.mrb[46].mxu1  ;;  %v3214_v44 = vpop.f32.mrb[47].mxu0 }
 0x156   : > { %v2126_v30 = vadd.f32 %v3212_v38, %v4226_v49  ;;  %v3215_v45 = vadd.f32 %v3214_v44, %v3213_v32  ;;  %v3272_v47 = vpop.f32.mrb[47].mxu1 }
 0x157   : > { %v3273_v50 = vadd.f32 %v3272_v47, %v3271_v43 }
 0x158   : > { %v4268_v52 = vadd.f32 %v3270_v42, %v2126_v30  ;;  %v2129_v33 = vadd.f32 %v3215_v45, %v4229_v51 }
 0x15a   : > { %v4271_v53 = vadd.f32 %v3273_v50, %v2129_v33  ;;  %v3216_v54 = vpop.f32.mrb[48].mxu0 }
 0x15b   : > { %v3274_v46 = vpop.f32.mrb[48].mxu1  ;;  %v3217_v55 = vpop.f32.mrb[49].mxu0 }
 0x15c   : > { %v3218_v56 = vadd.f32 %v3217_v55, %v3216_v54  ;;  %v3275_v57 = vpop.f32.mrb[49].mxu1  ;;  %v3219_v48 = vpop.f32.mrb[50].mxu0 }
 0x15d   : > { %v3276_v60 = vadd.f32 %v3275_v57, %v3274_v46  ;;  %v3277_v61 = vpop.f32.mrb[50].mxu1  ;;  %v3220_v63 = vpop.f32.mrb[51].mxu0 }
 0x15e   : > { %v2134_v49 = vadd.f32 %v3218_v56, %v4232_v3  ;;  %v3221_v1 = vadd.f32 %v3220_v63, %v3219_v48  ;;  %v3278_v2 = vpop.f32.mrb[51].mxu1 }
 0x15f   : > { %v3279_v4 = vadd.f32 %v3278_v2, %v3277_v61 }
 0x160   : > { %v4274_v6 = vadd.f32 %v3276_v60, %v2134_v49  ;;  %v2137_v51 = vadd.f32 %v3221_v1, %v4235_v5 }
 0x162   : > { %v4277_v7 = vadd.f32 %v3279_v4, %v2137_v51  ;;  %v3222_v8 = vpop.f32.mrb[52].mxu0 }
 0x163   : > { %v3280_v62 = vpop.f32.mrb[52].mxu1  ;;  %v3223_v9 = vpop.f32.mrb[53].mxu0 }
 0x164   : > { %v3224_v10 = vadd.f32 %v3223_v9, %v3222_v8  ;;  %v3281_v11 = vpop.f32.mrb[53].mxu1  ;;  %v3225_v0 = vpop.f32.mrb[54].mxu0 }
 0x165   : > { %v3282_v15 = vadd.f32 %v3281_v11, %v3280_v62  ;;  %v3283_v17 = vpop.f32.mrb[54].mxu1  ;;  %v3226_v18 = vpop.f32.mrb[55].mxu0 }
 0x166   : > { %v2142_v3 = vadd.f32 %v3224_v10, %v4238_v21  ;;  %v3227_v19 = vadd.f32 %v3226_v18, %v3225_v0  ;;  %v3284_v20 = vpop.f32.mrb[55].mxu1 }
 0x167   : > { %v3285_v22 = vadd.f32 %v3284_v20, %v3283_v17 }
 0x168   : > { %v4280_v24 = vadd.f32 %v3282_v15, %v2142_v3  ;;  %v2145_v5 = vadd.f32 %v3227_v19, %v4241_v23 }
 0x16a   : > { %v4283_v25 = vadd.f32 %v3285_v22, %v2145_v5  ;;  %v3302_v26 = vpop.f32.mrb[56].mxu0 }
 0x16b   : > { %v3360_v14 = vpop.f32.mrb[56].mxu1  ;;  %v3303_v27 = vpop.f32.mrb[57].mxu0 }
 0x16c   : > { %v3304_v28 = vadd.f32 %v3303_v27, %v3302_v26  ;;  %v3361_v29 = vpop.f32.mrb[57].mxu1  ;;  %v3305_v16 = vpop.f32.mrb[58].mxu0 }
 0x16d   : > { %v3362_v35 = vadd.f32 %v3361_v29, %v3360_v14  ;;  %v3363_v36 = vpop.f32.mrb[58].mxu1  ;;  %v3306_v37 = vpop.f32.mrb[59].mxu0 }
 0x16e   : > { %v2272_v21 = vadd.f32 %v3304_v28, %v4244_v40  ;;  %v3307_v38 = vadd.f32 %v3306_v37, %v3305_v16  ;;  %v3364_v39 = vpop.f32.mrb[59].mxu1 }
 0x16f   : > { %v3365_v32 = vadd.f32 %v3364_v39, %v3363_v36 }
 0x170   : > { %v4286_v42 = vadd.f32 %v3362_v35, %v2272_v21  ;;  %v2275_v23 = vadd.f32 %v3307_v38, %v4247_v41 }
 0x172   : > { %v4289_v43 = vadd.f32 %v3365_v32, %v2275_v23  ;;  %v3308_v44 = vpop.f32.mrb[60].mxu0 }
 0x173   : > { %v3366_v30 = vpop.f32.mrb[60].mxu1  ;;  %v3309_v45 = vpop.f32.mrb[61].mxu0 }
 0x174   : > { %v3310_v47 = vadd.f32 %v3309_v45, %v3308_v44  ;;  %v3367_v50 = vpop.f32.mrb[61].mxu1  ;;  %v3311_v33 = vpop.f32.mrb[62].mxu0 }
 0x175   : > { %v3368_v54 = vadd.f32 %v3367_v50, %v3366_v30  ;;  %v3369_v46 = vpop.f32.mrb[62].mxu1  ;;  %v3312_v55 = vpop.f32.mrb[63].mxu0 }
 0x176   : > { %v2280_v40 = vadd.f32 %v3310_v47, %v4250_v58  ;;  %v3313_v56 = vadd.f32 %v3312_v55, %v3311_v33  ;;  %v3370_v57 = vpop.f32.mrb[63].mxu1 }
 0x177   : > { %v3371_v48 = vadd.f32 %v3370_v57, %v3369_v46 }
 0x178   : > { %v4292_v60 = vadd.f32 %v3368_v54, %v2280_v40  ;;  %v2283_v41 = vadd.f32 %v3313_v56, %v4253_v59 }
 0x17a   : > { %v4295_v61 = vadd.f32 %v3371_v48, %v2283_v41  ;;  %v3314_v63 = vpop.f32.mrb[64].mxu0 }
 0x17b   : > { %v3372_v49 = vpop.f32.mrb[64].mxu1  ;;  %v3315_v1 = vpop.f32.mrb[65].mxu0 }
 0x17c   : > { %v3316_v2 = vadd.f32 %v3315_v1, %v3314_v63  ;;  %v3373_v4 = vpop.f32.mrb[65].mxu1  ;;  %v3317_v51 = vpop.f32.mrb[66].mxu0 }
 0x17d   : > { %v3374_v8 = vadd.f32 %v3373_v4, %v3372_v49  ;;  %v3375_v62 = vpop.f32.mrb[66].mxu1  ;;  %v3318_v9 = vpop.f32.mrb[67].mxu0 }
 0x17e   : > { %v2288_v58 = vadd.f32 %v3316_v2, %v4256_v12  ;;  %v3319_v10 = vadd.f32 %v3318_v9, %v3317_v51  ;;  %v3376_v11 = vpop.f32.mrb[67].mxu1 }
 0x17f   : > { %v3377_v0 = vadd.f32 %v3376_v11, %v3375_v62 }
 0x180   : > { %v4298_v15 = vadd.f32 %v3374_v8, %v2288_v58  ;;  %v2291_v59 = vadd.f32 %v3319_v10, %v4259_v13 }
 0x182   : > { %v4301_v17 = vadd.f32 %v3377_v0, %v2291_v59  ;;  %v3320_v18 = vpop.f32.mrb[68].mxu0 }
 0x183   : > { %v3378_v3 = vpop.f32.mrb[68].mxu1  ;;  %v3321_v19 = vpop.f32.mrb[69].mxu0 }
 0x184   : > { %v3322_v20 = vadd.f32 %v3321_v19, %v3320_v18  ;;  %v3379_v22 = vpop.f32.mrb[69].mxu1  ;;  %v3323_v5 = vpop.f32.mrb[70].mxu0 }
 0x185   : > { %v3380_v26 = vadd.f32 %v3379_v22, %v3378_v3  ;;  %v3381_v14 = vpop.f32.mrb[70].mxu1  ;;  %v3324_v27 = vpop.f32.mrb[71].mxu0 }
 0x186   : > { %v2296_v12 = vadd.f32 %v3322_v20, %v4262_v31  ;;  %v3325_v28 = vadd.f32 %v3324_v27, %v3323_v5  ;;  %v3382_v29 = vpop.f32.mrb[71].mxu1 }
 0x187   : > { %v3383_v16 = vadd.f32 %v3382_v29, %v3381_v14 }
 0x188   : > { %v4304_v35 = vadd.f32 %v3380_v26, %v2296_v12  ;;  %v2299_v13 = vadd.f32 %v3325_v28, %v4265_v34 }
 0x18a   : > { %v4307_v36 = vadd.f32 %v3383_v16, %v2299_v13  ;;  %v3326_v37 = vpop.f32.mrb[72].mxu0 }
 0x18b   : > { %v3384_v21 = vpop.f32.mrb[72].mxu1  ;;  %v3327_v38 = vpop.f32.mrb[73].mxu0 }
 0x18c   : > { %v3328_v39 = vadd.f32 %v3327_v38, %v3326_v37  ;;  %v3385_v32 = vpop.f32.mrb[73].mxu1  ;;  %v3329_v23 = vpop.f32.mrb[74].mxu0 }
 0x18d   : > { %v3386_v44 = vadd.f32 %v3385_v32, %v3384_v21  ;;  %v3387_v30 = vpop.f32.mrb[74].mxu1  ;;  %v3330_v45 = vpop.f32.mrb[75].mxu0 }
 0x18e   : > { %v2304_v31 = vadd.f32 %v3328_v39, %v4268_v52  ;;  %v3331_v47 = vadd.f32 %v3330_v45, %v3329_v23  ;;  %v3388_v50 = vpop.f32.mrb[75].mxu1 }
 0x18f   : > { %v3389_v33 = vadd.f32 %v3388_v50, %v3387_v30 }
 0x190   : > { %v4310_v54 = vadd.f32 %v3386_v44, %v2304_v31  ;;  %v2307_v34 = vadd.f32 %v3331_v47, %v4271_v53 }
 0x192   : > { %v4313_v46 = vadd.f32 %v3389_v33, %v2307_v34  ;;  %v3332_v55 = vpop.f32.mrb[76].mxu0 }
 0x193   : > { %v3390_v40 = vpop.f32.mrb[76].mxu1  ;;  %v3333_v56 = vpop.f32.mrb[77].mxu0 }
 0x194   : > { %v3334_v57 = vadd.f32 %v3333_v56, %v3332_v55  ;;  %v3391_v48 = vpop.f32.mrb[77].mxu1  ;;  %v3335_v41 = vpop.f32.mrb[78].mxu0 }
 0x195   : > { %v3392_v63 = vadd.f32 %v3391_v48, %v3390_v40  ;;  %v3393_v49 = vpop.f32.mrb[78].mxu1  ;;  %v3336_v1 = vpop.f32.mrb[79].mxu0 }
 0x196   : > { %v2312_v52 = vadd.f32 %v3334_v57, %v4274_v6  ;;  %v3337_v2 = vadd.f32 %v3336_v1, %v3335_v41  ;;  %v3394_v4 = vpop.f32.mrb[79].mxu1 }
 0x197   : > { %v3395_v51 = vadd.f32 %v3394_v4, %v3393_v49 }
 0x198   : > { %v4316_v8 = vadd.f32 %v3392_v63, %v2312_v52  ;;  %v2315_v53 = vadd.f32 %v3337_v2, %v4277_v7 }
 0x19a   : > { %v4319_v62 = vadd.f32 %v3395_v51, %v2315_v53  ;;  %v3338_v9 = vpop.f32.mrb[80].mxu0 }
 0x19b   : > { %v3396_v58 = vpop.f32.mrb[80].mxu1  ;;  %v3339_v10 = vpop.f32.mrb[81].mxu0 }
 0x19c   : > { %v3340_v11 = vadd.f32 %v3339_v10, %v3338_v9  ;;  %v3397_v0 = vpop.f32.mrb[81].mxu1  ;;  %v3341_v59 = vpop.f32.mrb[82].mxu0 }
 0x19d   : > { %v3398_v18 = vadd.f32 %v3397_v0, %v3396_v58  ;;  %v3399_v3 = vpop.f32.mrb[82].mxu1  ;;  %v3342_v19 = vpop.f32.mrb[83].mxu0 }
 0x19e   : > { %v2320_v6 = vadd.f32 %v3340_v11, %v4280_v24  ;;  %v3343_v20 = vadd.f32 %v3342_v19, %v3341_v59  ;;  %v3400_v22 = vpop.f32.mrb[83].mxu1 }
 0x19f   : > { %v3401_v5 = vadd.f32 %v3400_v22, %v3399_v3 }
 0x1a0   : > { %v4322_v26 = vadd.f32 %v3398_v18, %v2320_v6  ;;  %v2323_v7 = vadd.f32 %v3343_v20, %v4283_v25 }
 0x1a2   : > { %v4325_v14 = vadd.f32 %v3401_v5, %v2323_v7  ;;  %v3418_v27 = vpop.f32.mrb[84].mxu0 }
 0x1a3   : > { %v3476_v12 = vpop.f32.mrb[84].mxu1  ;;  %v3419_v28 = vpop.f32.mrb[85].mxu0 }
 0x1a4   : > { %v3420_v29 = vadd.f32 %v3419_v28, %v3418_v27  ;;  %v3477_v16 = vpop.f32.mrb[85].mxu1  ;;  %v3421_v13 = vpop.f32.mrb[86].mxu0 }
 0x1a5   : > { %v3478_v37 = vadd.f32 %v3477_v16, %v3476_v12  ;;  %v3479_v21 = vpop.f32.mrb[86].mxu1  ;;  %v3422_v38 = vpop.f32.mrb[87].mxu0 }
 0x1a6   : > { %v2450_v24 = vadd.f32 %v3420_v29, %v4286_v42  ;;  %v3423_v39 = vadd.f32 %v3422_v38, %v3421_v13  ;;  %v3480_v32 = vpop.f32.mrb[87].mxu1 }
 0x1a7   : > { %v3481_v23 = vadd.f32 %v3480_v32, %v3479_v21 }
 0x1a8   : > { %v2539_v44 = vadd.f32 %v3478_v37, %v2450_v24  ;;  %v2453_v25 = vadd.f32 %v3423_v39, %v4289_v43 }
 0x1aa   : > { %v2542_v30 = vadd.f32 %v3481_v23, %v2453_v25  ;;  %v3424_v45 = vpop.f32.mrb[88].mxu0  ;;  %v2593_v50 = vmax.f32 %v2539_v44, 0.0 }
 0x1ab   : > { %v3482_v31 = vpop.f32.mrb[88].mxu1  ;;  %v3425_v47 = vpop.f32.mrb[89].mxu0 }
 0x1ac   : > { %v2594_v33 = vmax.f32 %v2542_v30, 0.0  ;;  %v3426_v34 = vadd.f32 %v3425_v47, %v3424_v45  ;;  %v3483_v55 = vpop.f32.mrb[89].mxu1  ;;  %v3427_v40 = vpop.f32.mrb[90].mxu0 }
 0x1ad   : > { %v3484_v42 = vadd.f32 %v3483_v55, %v3482_v31  ;;  %v3485_v56 = vpop.f32.mrb[90].mxu1  ;;  %v3428_v57 = vpop.f32.mrb[91].mxu0 }
 0x1ae   : > { %v3016_v43 = vpack.c.bf16 %v2594_v33, %v2593_v50  ;;  %v2458_v48 = vadd.f32 %v3426_v34, %v4292_v60  ;;  %v3429_v41 = vadd.f32 %v3428_v57, %v3427_v40  ;;  %v3486_v63 = vpop.f32.mrb[91].mxu1 }
 0x1af   : > { %v3487_v49 = vadd.f32 %v3486_v63, %v3485_v56 }
 0x1b0   : > { %3017 = vst [vmem:[%s4333_s9] sm:$0xff] %v3016_v43   ;;  %v2547_v1 = vadd.f32 %v3484_v42, %v2458_v48  ;;  %v2461_v52 = vadd.f32 %v3429_v41, %v4295_v61 }
 0x1b2   : > { %v2550_v2 = vadd.f32 %v3487_v49, %v2461_v52  ;;  %v3430_v4 = vpop.f32.mrb[92].mxu0  ;;  %v2595_v9 = vmax.f32 %v2547_v1, 0.0 }
 0x1b3   : > { %v3488_v51 = vpop.f32.mrb[92].mxu1  ;;  %v3431_v53 = vpop.f32.mrb[93].mxu0 }
 0x1b4   : > { %v2596_v58 = vmax.f32 %v2550_v2, 0.0  ;;  %v3432_v10 = vadd.f32 %v3431_v53, %v3430_v4  ;;  %v3489_v11 = vpop.f32.mrb[93].mxu1  ;;  %v3433_v0 = vpop.f32.mrb[94].mxu0 }
 0x1b5   : > { %v3490_v59 = vadd.f32 %v3489_v11, %v3488_v51  ;;  %v3491_v18 = vpop.f32.mrb[94].mxu1  ;;  %v3434_v60 = vpop.f32.mrb[95].mxu0 }
 0x1b6   : > { %v3021_v3 = vpack.c.bf16 %v2596_v58, %v2595_v9  ;;  %v2466_v19 = vadd.f32 %v3432_v10, %v4298_v15  ;;  %v3435_v6 = vadd.f32 %v3434_v60, %v3433_v0  ;;  %v3492_v20 = vpop.f32.mrb[95].mxu1 }
 0x1b7   : > { %v3493_v22 = vadd.f32 %v3492_v20, %v3491_v18 }
 0x1b8   : > { %3048 = vst [vmem:[%s4333_s9 + $0x8] sm:$0xff] %v3021_v3   ;;  %v2555_v61 = vadd.f32 %v3490_v59, %v2466_v19  ;;  %v2469_v5 = vadd.f32 %v3435_v6, %v4301_v17 }
 0x1ba   : > { %v2558_v7 = vadd.f32 %v3493_v22, %v2469_v5  ;;  %v3436_v27 = vpop.f32.mrb[96].mxu0  ;;  %v2597_v29 = vmax.f32 %v2555_v61, 0.0 }
 0x1bb   : > { %v3494_v12 = vpop.f32.mrb[96].mxu1  ;;  %v3437_v28 = vpop.f32.mrb[97].mxu0 }
 0x1bc   : > { %v2598_v16 = vmax.f32 %v2558_v7, 0.0  ;;  %v3438_v13 = vadd.f32 %v3437_v28, %v3436_v27  ;;  %v3495_v37 = vpop.f32.mrb[97].mxu1  ;;  %v3439_v21 = vpop.f32.mrb[98].mxu0 }
 0x1bd   : > { %v3496_v38 = vadd.f32 %v3495_v37, %v3494_v12  ;;  %v3497_v24 = vpop.f32.mrb[98].mxu1  ;;  %v3440_v15 = vpop.f32.mrb[99].mxu0 }
 0x1be   : > { %v3026_v39 = vpack.c.bf16 %v2598_v16, %v2597_v29  ;;  %v2474_v32 = vadd.f32 %v3438_v13, %v4304_v35  ;;  %v3441_v23 = vadd.f32 %v3440_v15, %v3439_v21  ;;  %v3498_v44 = vpop.f32.mrb[99].mxu1 }
 0x1bf   : > { %v3499_v25 = vadd.f32 %v3498_v44, %v3497_v24 }
 0x1c0   : > { %3049 = vst [vmem:[%s4333_s9 + $0x10] sm:$0xff] %v3026_v39   ;;  %v2563_v17 = vadd.f32 %v3496_v38, %v2474_v32  ;;  %v2477_v30 = vadd.f32 %v3441_v23, %v4307_v36 }
 0x1c2   : > { %v2566_v45 = vadd.f32 %v3499_v25, %v2477_v30  ;;  %v3442_v31 = vpop.f32.mrb[100].mxu0  ;;  %v2599_v33 = vmax.f32 %v2563_v17, 0.0 }
 0x1c3   : > { %v3500_v47 = vpop.f32.mrb[100].mxu1  ;;  %v3443_v50 = vpop.f32.mrb[101].mxu0 }
 0x1c4   : > { %v2600_v34 = vmax.f32 %v2566_v45, 0.0  ;;  %v3444_v55 = vadd.f32 %v3443_v50, %v3442_v31  ;;  %v3501_v40 = vpop.f32.mrb[101].mxu1  ;;  %v3445_v42 = vpop.f32.mrb[102].mxu0 }
 0x1c5   : > { %v3502_v56 = vadd.f32 %v3501_v40, %v3500_v47  ;;  %v3503_v57 = vpop.f32.mrb[102].mxu1  ;;  %v3446_v35 = vpop.f32.mrb[103].mxu0 }
 0x1c6   : > { %v3031_v43 = vpack.c.bf16 %v2600_v34, %v2599_v33  ;;  %v2482_v48 = vadd.f32 %v3444_v55, %v4310_v54  ;;  %v3447_v41 = vadd.f32 %v3446_v35, %v3445_v42  ;;  %v3504_v63 = vpop.f32.mrb[103].mxu1 }
 0x1c7   : > { %v3505_v49 = vadd.f32 %v3504_v63, %v3503_v57 }
 0x1c8   : > { %3050 = vst [vmem:[%s4333_s9 + $0x18] sm:$0xff] %v3031_v43   ;;  %v2571_v36 = vadd.f32 %v3502_v56, %v2482_v48  ;;  %v2485_v1 = vadd.f32 %v3447_v41, %v4313_v46 }
 0x1ca   : > { %v2574_v52 = vadd.f32 %v3505_v49, %v2485_v1  ;;  %v3448_v2 = vpop.f32.mrb[104].mxu0  ;;  %v2601_v53 = vmax.f32 %v2571_v36, 0.0 }
 0x1cb   : > { %v3506_v4 = vpop.f32.mrb[104].mxu1  ;;  %v3449_v51 = vpop.f32.mrb[105].mxu0 }
 0x1cc   : > { %v2602_v9 = vmax.f32 %v2574_v52, 0.0  ;;  %v3450_v58 = vadd.f32 %v3449_v51, %v3448_v2  ;;  %v3507_v10 = vpop.f32.mrb[105].mxu1  ;;  %v3451_v11 = vpop.f32.mrb[106].mxu0 }
 0x1cd   : > { %v3508_v0 = vadd.f32 %v3507_v10, %v3506_v4  ;;  %v3509_v59 = vpop.f32.mrb[106].mxu1  ;;  %v3452_v54 = vpop.f32.mrb[107].mxu0 }
 0x1ce   : > { %v3036_v18 = vpack.c.bf16 %v2602_v9, %v2601_v53  ;;  %v2490_v60 = vadd.f32 %v3450_v58, %v4316_v8  ;;  %v3453_v3 = vadd.f32 %v3452_v54, %v3451_v11  ;;  %v3510_v19 = vpop.f32.mrb[107].mxu1 }
 0x1cf   : > { %v3511_v6 = vadd.f32 %v3510_v19, %v3509_v59 }
 0x1d0   : > { %3051 = vst [vmem:[%s4333_s9 + $0x20] sm:$0xff] %v3036_v18   ;;  %v2579_v46 = vadd.f32 %v3508_v0, %v2490_v60  ;;  %v2493_v20 = vadd.f32 %v3453_v3, %v4319_v62 }
 0x1d2   : > { %v2582_v22 = vadd.f32 %v3511_v6, %v2493_v20  ;;  %v3454_v61 = vpop.f32.mrb[108].mxu0  ;;  %v2603_v27 = vmax.f32 %v2579_v46, 0.0 }
 0x1d3   : > { %v3512_v5 = vpop.f32.mrb[108].mxu1  ;;  %v3455_v7 = vpop.f32.mrb[109].mxu0 }
 0x1d4   : > { %v2604_v12 = vmax.f32 %v2582_v22, 0.0  ;;  %v3456_v28 = vadd.f32 %v3455_v7, %v3454_v61  ;;  %v3513_v29 = vpop.f32.mrb[109].mxu1  ;;  %v3457_v16 = vpop.f32.mrb[110].mxu0 }
 0x1d5   : > { %v3514_v13 = vadd.f32 %v3513_v29, %v3512_v5  ;;  %v3515_v8 = vpop.f32.mrb[110].mxu1  ;;  %v3458_v37 = vpop.f32.mrb[111].mxu0 }
 0x1d6   : > { %v3041_v21 = vpack.c.bf16 %v2604_v12, %v2603_v27  ;;  %v2498_v38 = vadd.f32 %v3456_v28, %v4322_v26  ;;  %v3459_v24 = vadd.f32 %v3458_v37, %v3457_v16  ;;  %v3516_v15 = vpop.f32.mrb[111].mxu1 }
 0x1d7   : > { %v3517_v62 = vadd.f32 %v3516_v15, %v3515_v8 }
 0x1d8   : > { %3052 = vst [vmem:[%s4333_s9 + $0x28] sm:$0xff] %v3041_v21   ;;  %v2587_v39 = vadd.f32 %v3514_v13, %v2498_v38  ;;  %v2501_v32 = vadd.f32 %v3459_v24, %v4325_v14 }
 0x1da   : > { %v2590_v23 = vadd.f32 %v3517_v62, %v2501_v32  ;;  %v2605_v44 = vmax.f32 %v2587_v39, 0.0 }
 0x1dc   : > { %v2606_v25 = vmax.f32 %v2590_v23, 0.0 }
 0x1de   : > { %v3046_v17 = vpack.c.bf16 %v2606_v25, %v2605_v44 }
 0x1e0   : > { %3053 = vst [vmem:[%s4333_s9 + $0x30] sm:$0xff] %v3046_v17  }
 0x1e1 PF: > { %s13_s12 = sadd.s32 1, %s3660_s12  }
 0x1e2   : > { %p10_p4 = scmp.ge.s32.totalorder %s13_s12, 4  }
 0x1e4   :  { %12 = sbr.rel (!%p10_p4) target bundleno = 1 (0x1), region = 62 }

// kernel: cnn_forward.6
= control target key start
LH: loop header
LB: loop body
LE: loop exit
PB: predicated region body
PF: predicated region fallthrough
CT: control target
= control target key end

     0   :  { %s2125_s12 = smov 0   ;;  %s2502_s0 = inlined_call_operand.vmem [shape: bf16[160,1152], index: 0, kind: input, shape index: {}]   ;;  %s2503_s1 = inlined_call_operand.vmem [shape: bf16[1152,128], index: 1, kind: input, shape index: {}]   ;;  %s2504_s2 = inlined_call_operand.vmem [shape: f32[1,128], index: 2, kind: input, shape index: {}]   ;;  %s2505_s3 = inlined_call_operand.vmem [shape: bf16[160,128], index: 3, kind: output, shape index: {}]  }
   0x1 LB: > { %s1522_s13 = sadd.s32 4294967295, %s2101_s12   ;;  %p1526_p0 = scmp.ge.s32.totalorder %s2101_s12, 1  ;;  %s2101_s12 = sphi %s2125_s12, %s13_s12  }
   0x2   : > { %p139_p1 = scmp.lt.s32.totalorder %s2101_s12, 3 }
   0x4   : > { %p140_p2 = pnand %p1526_p0, %p139_p1 }
   0x5   : > { %v1958_v0 = vld [vmem:[%s2503_s1 + $0x40] sm:$0xff] (!%p140_p2)   ;;  %v1962_v4 = vld [vmem:[%s2503_s1 + $0x48] sm:$0xff] (!%p140_p2)   ;;  %v1966_v8 = vld [vmem:[%s2503_s1 + $0x50] sm:$0xff] (!%p140_p2)   ;;  %s164_s17 = smul.u32 (!%p140_p2), 10, %s1522_s13  ;;  %vm2104_vm0 = vmmov (!%p140_p2), 0  }
   0x6   : > { %143 = sbr.rel (%p140_p2) target bundleno = 356 (0x164), region = 32  ;;  %v1959_v1 = vld [vmem:[%s2503_s1 + $0xc0] sm:$0xff] (!%p140_p2)   ;;  %1698 = vmatprep.subr.bf16.mxu0 (!%p140_p2), %v1958_v0  ;;  %v1963_v5 = vld [vmem:[%s2503_s1 + $0xc8] sm:$0xff] (!%p140_p2)   ;;  %v1967_v9 = vld [vmem:[%s2503_s1 + $0xd0] sm:$0xff] (!%p140_p2)  }
   0x7   : > { %v1960_v2 = vld [vmem:[%s2503_s1] sm:$0xff] (!%p140_p2)   ;;  %1744 = vmatprep.subr.bf16.mxu1 (!%p140_p2), %v1959_v1  ;;  %v1964_v6 = vld [vmem:[%s2503_s1 + $0x8] sm:$0xff] (!%p140_p2)   ;;  %v1968_v10 = vld [vmem:[%s2503_s1 + $0x10] sm:$0xff] (!%p140_p2)   ;;  %p165_p3 = scmp.lt.s32.totalorder (!%p140_p2), %s164_s17, 19 }
   0x8   : > { %v1961_v3 = vld [vmem:[%s2503_s1 + $0x80] sm:$0xff] (!%p140_p2)   ;;  %1699 = vmatpush3.bf16.msra.mxu0 (!%p140_p2), %v1960_v2  ;;  %v1965_v7 = vld [vmem:[%s2503_s1 + $0x88] sm:$0xff] (!%p140_p2)   ;;  %v1969_v11 = vld [vmem:[%s2503_s1 + $0x90] sm:$0xff] (!%p140_p2)  }
   0x9   : > { %1745 = vmatpush3.bf16.msra.mxu1 (!%p140_p2), %v1961_v3  ;;  %1700 = vmatprep.subr.bf16.mxu0 (!%p140_p2), %v1962_v4  ;;  %v1970_v12 = vld [vmem:[%s2503_s1 + $0x58] sm:$0xff] (!%p140_p2)   ;;  %v1974_v16 = vld [vmem:[%s2503_s1 + $0x60] sm:$0xff] (!%p140_p2)   ;;  %v1978_v20 = vld [vmem:[%s2503_s1 + $0x68] sm:$0xff] (!%p140_p2)  }
   0xa   : > { %1746 = vmatprep.subr.bf16.mxu1 (!%p140_p2), %v1963_v5  ;;  %v1971_v13 = vld [vmem:[%s2503_s1 + $0xd8] sm:$0xff] (!%p140_p2)   ;;  %v1975_v17 = vld [vmem:[%s2503_s1 + $0xe0] sm:$0xff] (!%p140_p2)   ;;  %v1979_v21 = vld [vmem:[%s2503_s1 + $0xe8] sm:$0xff] (!%p140_p2)  }
   0xb   : > { %v1972_v14 = vld [vmem:[%s2503_s1 + $0x18] sm:$0xff] (!%p140_p2)   ;;  %v1976_v18 = vld [vmem:[%s2503_s1 + $0x20] sm:$0xff] (!%p140_p2)   ;;  %v1980_v22 = vld [vmem:[%s2503_s1 + $0x28] sm:$0xff] (!%p140_p2)  }
   0xc   : > { %1701 = vmatpush3.bf16.msra.mxu0 (!%p140_p2), %v1964_v6  ;;  %v1973_v15 = vld [vmem:[%s2503_s1 + $0x98] sm:$0xff] (!%p140_p2)   ;;  %v1977_v19 = vld [vmem:[%s2503_s1 + $0xa0] sm:$0xff] (!%p140_p2)   ;;  %v1981_v23 = vld [vmem:[%s2503_s1 + $0xa8] sm:$0xff] (!%p140_p2)  }
   0xd   : > { %1747 = vmatpush3.bf16.msra.mxu1 %v1965_v7  ;;  %1702 = vmatprep.subr.bf16.mxu0 %v1966_v8  ;;  %s2507_s17 = smov (!%p165_p3, %s164_s17), 19  ;;  %v1982_v24 = vld [vmem:[%s2503_s1 + $0x70] sm:$0xff]   ;;  %v1986_v28 = vld [vmem:[%s2503_s1 + $0x78] sm:$0xff]   ;;  %v1996_v36 = vld [vmem:[%s2503_s1 + $0x140] sm:$0xff]  }
   0xe   : > { %1748 = vmatprep.subr.bf16.mxu1 %v1967_v9  ;;  %v1983_v25 = vld [vmem:[%s2503_s1 + $0xf0] sm:$0xff]   ;;  %s1947_s16 = smul.u32 36, %s2507_s17  ;;  %v1987_v29 = vld [vmem:[%s2503_s1 + $0xf8] sm:$0xff]   ;;  %v1997_v37 = vld [vmem:[%s2503_s1 + $0x100] sm:$0xff]  }
   0xf   : > { %v1984_v26 = vld [vmem:[%s2503_s1 + $0x30] sm:$0xff]   ;;  %v1988_v30 = vld [vmem:[%s2503_s1 + $0x38] sm:$0xff]   ;;  %v1998_v38 = vld [vmem:[%s2503_s1 + $0x148] sm:$0xff]  }
  0x10   : > { %1703 = vmatpush3.bf16.msra.mxu0 %v1968_v10  ;;  %v1985_v27 = vld [vmem:[%s2503_s1 + $0xb0] sm:$0xff]   ;;  %s2231_s27 = scalar_lea.vmem %s2502_s0, %s1947_s16  ;;  %v1989_v31 = vld [vmem:[%s2503_s1 + $0xb8] sm:$0xff]   ;;  %v1999_v39 = vld [vmem:[%s2503_s1 + $0x108] sm:$0xff]  }
  0x11   : > { %1749 = vmatpush3.bf16.msra.mxu1 %v1969_v11  ;;  %1704 = vmatprep.subr.bf16.mxu0 %v1970_v12  ;;  %v1990_v32 = vld [vmem:[%s2231_s27] ss:$36 sps:$4 sm:$0xff]   ;;  %v1993_v34 = vld [vmem:[%s2231_s27 + $0x8] ss:$36 sps:$4 sm:$0xff]   ;;  %v2002_v41 = vld [vmem:[%s2231_s27 + $0x54] ss:$36 sps:$4 sm:$0xff]  }
  0x12   : > { %1750 = vmatprep.subr.bf16.mxu1 %v1971_v13  ;;  %v1992_v33 = vld [vmem:[%s2231_s27 + $0x4] ss:$36 sps:$4 sm:$0xff]   ;;  %v1995_v35 = vld [vmem:[%s2231_s27 + $0xc] ss:$36 sps:$4 sm:$0xff]   ;;  %v2012_v50 = vld [vmem:[%s2231_s27 + $0x94] ss:$36 sps:$4 sm:$0xff]  }
  0x13   : > { %1073 = vmatprep.mubr.bf16.mxu0 %v1992_v33  ;;  %1146 = vmatprep.mubr.bf16.mxu1 %v1995_v35  ;;  %v2000_v40 = vld [vmem:[%s2231_s27 + $0x4c] ss:$36 sps:$4 sm:$0xff]   ;;  %v2006_v44 = vld [vmem:[%s2503_s1 + $0x1c0] sm:$0xff]   ;;  %v2016_v52 = vld [vmem:[%s2503_s1 + $0x158] sm:$0xff]  }
  0x14   : > { %1705 = vmatpush3.bf16.msra.mxu0 %v1972_v14  ;;  %v2004_v42 = vld [vmem:[%s2231_s27 + $0x48] ss:$36 sps:$4 sm:$0xff]   ;;  %v2005_v43 = vld [vmem:[%s2231_s27 + $0x50] ss:$36 sps:$4 sm:$0xff]   ;;  %v2007_v45 = vld [vmem:[%s2503_s1 + $0x180] sm:$0xff]  }
  0x15   : > { %1751 = vmatpush3.bf16.msra.mxu1 %v1973_v15  ;;  %1706 = vmatprep.subr.bf16.mxu0 %v1974_v16  ;;  %v2008_v46 = vld [vmem:[%s2503_s1 + $0x150] sm:$0xff]   ;;  %v2010_v48 = vld [vmem:[%s2503_s1 + $0x1c8] sm:$0xff]   ;;  %v2014_v51 = vld [vmem:[%s2231_s27 + $0x9c] ss:$36 sps:$4 sm:$0xff]  }
  0x16   : > { %1752 = vmatprep.subr.bf16.mxu1 %v1975_v17  ;;  %v2009_v47 = vld [vmem:[%s2503_s1 + $0x110] sm:$0xff]   ;;  %v2011_v49 = vld [vmem:[%s2503_s1 + $0x188] sm:$0xff]   ;;  %v2018_v54 = vld [vmem:[%s2231_s27 + $0x98] ss:$36 sps:$4 sm:$0xff]  }
  0x17   : > { %v2017_v53 = vld [vmem:[%s2231_s27 + $0x90] ss:$36 sps:$4 sm:$0xff]   ;;  %v2019_v55 = vld [vmem:[%s2503_s1 + $0x118] sm:$0xff]   ;;  %v2022_v58 = vld [vmem:[%s2503_s1 + $0x160] sm:$0xff]  }
  0x18   : > { %1707 = vmatpush3.bf16.msra.mxu0 %v1976_v18  ;;  %v2020_v56 = vld [vmem:[%s2503_s1 + $0x1d0] sm:$0xff]   ;;  %v2023_v59 = vld [vmem:[%s2503_s1 + $0x1d8] sm:$0xff]   ;;  %v2024_v60 = vld [vmem:[%s2503_s1 + $0x120] sm:$0xff]  }
  0x19   : > { %1753 = vmatpush3.bf16.msra.mxu1 %v1977_v19  ;;  %1708 = vmatprep.subr.bf16.mxu0 %v1978_v20  ;;  %v2021_v57 = vld [vmem:[%s2503_s1 + $0x190] sm:$0xff]   ;;  %v2025_v61 = vld [vmem:[%s2503_s1 + $0x198] sm:$0xff]   ;;  %v2028_v63 = vld [vmem:[%s2231_s27 + $0xe4] ss:$36 sps:$4 sm:$0xff]  }
  0x1a   : > { %1754 = vmatprep.subr.bf16.mxu1 %v1979_v21  ;;  %v2026_v62 = vld [vmem:[%s2231_s27 + $0xdc] ss:$36 sps:$4 sm:$0xff]   ;;  %v2033_v3 = vld [vmem:[%s2503_s1 + $0x168] sm:$0xff]   ;;  %v2038_v8 = vld [vmem:[%s2503_s1 + $0x170] sm:$0xff]  }
  0x1b   : > { %v2030_v0 = vld [vmem:[%s2231_s27 + $0xd8] ss:$36 sps:$4 sm:$0xff]   ;;  %v2031_v1 = vld [vmem:[%s2231_s27 + $0xe0] ss:$36 sps:$4 sm:$0xff]   ;;  %v2035_v5 = vld [vmem:[%s2503_s1 + $0x128] sm:$0xff]  }
  0x1c   : > { %1709 = vmatpush3.bf16.msra.mxu0 %v1980_v22  ;;  %v2032_v2 = vld [vmem:[%s2503_s1 + $0x1e0] sm:$0xff]   ;;  %v2036_v6 = vld [vmem:[%s2503_s1 + $0x1e8] sm:$0xff]   ;;  %v2043_v11 = vld [vmem:[%s2503_s1 + $0x130] sm:$0xff]   ;;  %v2103_v22 = vmov 0.0  }
  0x1d   : > { %1755 = vmatpush3.bf16.msra.mxu1 %v1981_v23  ;;  %1710 = vmatprep.subr.bf16.mxu0 %v1982_v24  ;;  %v2034_v4 = vld [vmem:[%s2503_s1 + $0x1a0] sm:$0xff]   ;;  %v2037_v7 = vld [vmem:[%s2503_s1 + $0x1a8] sm:$0xff]   ;;  %v2046_v14 = vld [vmem:[%s2503_s1 + $0x1f0] sm:$0xff]  }
  0x1e   : > { %1756 = vmatprep.subr.bf16.mxu1 %v1983_v25  ;;  %v2039_v9 = vld [vmem:[%s2231_s27 + $0x124] ss:$36 sps:$4 sm:$0xff]   ;;  %v2041_v10 = vld [vmem:[%s2231_s27 + $0x12c] ss:$36 sps:$4 sm:$0xff]   ;;  %v2048_v16 = vld [vmem:[%s2503_s1 + $0x178] sm:$0xff]  }
  0x1f   : > { %v2044_v12 = vld [vmem:[%s2231_s27 + $0x120] ss:$36 sps:$4 sm:$0xff]   ;;  %v2045_v13 = vld [vmem:[%s2231_s27 + $0x128] ss:$36 sps:$4 sm:$0xff]   ;;  %v2047_v15 = vld [vmem:[%s2503_s1 + $0x1b0] sm:$0xff]  }
  0x20   : > { %1711 = vmatpush3.bf16.msra.mxu0 %v1984_v26  ;;  %v2049_v17 = vld [vmem:[%s2503_s1 + $0x138] sm:$0xff]   ;;  %v2052_v20 = vld [vmem:[%s2231_s27 + $0x10] ss:$36 sps:$4 sm:$0xff]   ;;  %v2058_v25 = vld [vmem:[%s2503_s1 + $0x200] sm:$0xff]  }
  0x21   : > { %1757 = vmatpush3.bf16.msra.mxu1 %v1985_v27  ;;  %1712 = vmatprep.subr.bf16.mxu0 %v1986_v28  ;;  %v2050_v18 = vld [vmem:[%s2503_s1 + $0x1f8] sm:$0xff]   ;;  %v2059_v26 = vld [vmem:[%s2503_s1 + $0x208] sm:$0xff]   ;;  %v2071_v35 = vld [vmem:[%s2231_s27 + $0xa0] ss:$36 sps:$4 sm:$0xff]  }
  0x22   : > { %1758 = vmatprep.subr.bf16.mxu1 %v1987_v29  ;;  %v2051_v19 = vld [vmem:[%s2503_s1 + $0x1b8] sm:$0xff]   ;;  %v2062_v28 = vld [vmem:[%s2231_s27 + $0x64] ss:$36 sps:$4 sm:$0xff]   ;;  %v2069_v33 = vld [vmem:[%s2231_s27 + $0xac] ss:$36 sps:$4 sm:$0xff]  }
  0x23   : > { %v2054_v21 = vld [vmem:[%s2231_s27 + $0x14] ss:$36 sps:$4 sm:$0xff]   ;;  %v2057_v24 = vld [vmem:[%s2231_s27 + $0x1c] ss:$36 sps:$4 sm:$0xff]  }
  0x24   : > { %1713 = vmatpush3.bf16.msra.mxu0 %v1988_v30  ;;  %v2055_v23 = vld [vmem:[%s2231_s27 + $0x18] ss:$36 sps:$4 sm:$0xff]   ;;  %v2065_v30 = vld [vmem:[%s2231_s27 + $0x60] ss:$36 sps:$4 sm:$0xff]  }
  0x25   : > { %1759 = vmatpush3.bf16.msra.mxu1 %v1989_v31  ;;  %1790 = vmatprep.subr.bf16.mxu0 %v1996_v36  ;;  %v2060_v27 = vld [vmem:[%s2231_s27 + $0x5c] ss:$36 sps:$4 sm:$0xff]   ;;  %v2066_v31 = vld [vmem:[%s2503_s1 + $0x210] sm:$0xff]   ;;  %v2072_v36 = vld [vmem:[%s2231_s27 + $0xa8] ss:$36 sps:$4 sm:$0xff]  }
  0x26   : > { %1836 = vmatprep.subr.bf16.mxu1 %v2006_v44  ;;  %v2064_v29 = vld [vmem:[%s2231_s27 + $0x58] ss:$36 sps:$4 sm:$0xff]  }
  0x27   : > { %1074 = vmatmul.mubr.bf16.vlgmr.msra.gmra.mrb[0].mxu0 %v1990_v32  ;;  %v2067_v32 = vld [vmem:[%s2231_s27 + $0xa4] ss:$36 sps:$4 sm:$0xff]   ;;  %v2084_v44 = vld [vmem:[%s2231_s27 + $0x13c] ss:$36 sps:$4 sm:$0xff]  }
  0x28   : > { %1147 = vmatmul.mubr.bf16.vlgmr.msra.gmra.mrb[0].mxu1 %v1993_v34  ;;  %1791 = vmatpush3.bf16.msra.mxu0 %v1997_v37  ;;  %v2073_v34 = vld [vmem:[%s2503_s1 + $0x218] sm:$0xff]   ;;  %v2074_v37 = vld [vmem:[%s2503_s1 + $0x220] sm:$0xff]  }
  0x29   : > { %1792 = vmatprep.subr.bf16.mxu0 %v1998_v38  ;;  %1081 = vmatprep.mubr.bf16.mxu0 %v2000_v40  ;;  %v2075_v38 = vld [vmem:[%s2231_s27 + $0xec] ss:$36 sps:$4 sm:$0xff]  }
  0x2a   : > { %1154 = vmatprep.mubr.bf16.mxu1 %v2002_v41  ;;  %1837 = vmatpush3.bf16.msra.mxu1 %v2007_v45  ;;  %v2081_v40 = vld [vmem:[%s2503_s1 + $0x228] sm:$0xff]   ;;  %v2086_v45 = vld [vmem:[%s2503_s1 + $0x230] sm:$0xff]  }
  0x2b   : > { %1838 = vmatprep.subr.bf16.mxu1 %v2010_v48  ;;  %v2079_v41 = vld [vmem:[%s2231_s27 + $0xe8] ss:$36 sps:$4 sm:$0xff]   ;;  %v2088_v48 = vld [vmem:[%s2231_s27 + $0x138] ss:$36 sps:$4 sm:$0xff]  }
  0x2c   : > { %1793 = vmatpush3.bf16.msra.mxu0 %v1999_v39  ;;  %v2077_v39 = vld [vmem:[%s2231_s27 + $0xf4] ss:$36 sps:$4 sm:$0xff]  }
  0x2d   : > { %1794 = vmatprep.subr.bf16.mxu0 %v2008_v46  ;;  %v2089_v46 = vld [vmem:[%s2503_s1 + $0x238] sm:$0xff]  }
  0x2e   : > { %1839 = vmatpush3.bf16.msra.mxu1 %v2011_v49  ;;  %v2090_v49 = vld [vmem:[%s2231_s27 + $0x20] ss:$36 sps:$4 sm:$0xff]  }
  0x2f   : > { %1082 = vmatmul.mubr.bf16.gmra.mrb[4].mxu0 %v2004_v42  ;;  %1840 = vmatprep.subr.bf16.mxu1 %v2020_v56  ;;  %v2080_v42 = vld [vmem:[%s2231_s27 + $0xf0] ss:$36 sps:$4 sm:$0xff]  }
  0x30   : > { %1155 = vmatmul.mubr.bf16.gmra.mrb[4].mxu1 %v2005_v43  ;;  %1795 = vmatpush3.bf16.msra.mxu0 %v2009_v47  ;;  %v2082_v43 = vld [vmem:[%s2231_s27 + $0x134] ss:$36 sps:$4 sm:$0xff]  }
  0x31   : > { %1089 = vmatprep.mubr.bf16.mxu0 %v2012_v50  ;;  %1162 = vmatprep.mubr.bf16.mxu1 %v2014_v51  ;;  %v2087_v47 = vld [vmem:[%s2231_s27 + $0x130] ss:$36 sps:$4 sm:$0xff]   ;;  %v2091_v50 = vld [vmem:[%s2231_s27 + $0xf8] ss:$36 sps:$4 sm:$0xff]   ;;  %v2092_v51 = vld [vmem:[%s2231_s27 + $0x68] ss:$36 sps:$4 sm:$0xff]  }
  0x32   : > { %1796 = vmatprep.subr.bf16.mxu0 %v2016_v52  ;;  %1841 = vmatpush3.bf16.msra.mxu1 %v2021_v57  ;;  %v2093_v52 = vld [vmem:[%s2231_s27 + $0x140] ss:$36 sps:$4 sm:$0xff]  }
  0x33   : > { %1842 = vmatprep.subr.bf16.mxu1 %v2023_v59 }
  0x34   : > { %1797 = vmatpush3.bf16.msra.mxu0 %v2019_v55  ;;  %v2428_v55 = vld [vmem:[%s2504_s2] ss:$0 sm:$0xff] }
  0x35   : > { %1798 = vmatprep.subr.bf16.mxu0 %v2022_v58 }
  0x36   : > { %1843 = vmatpush3.bf16.msra.mxu1 %v2025_v61 }
  0x37   : > { %1090 = vmatmul.mubr.bf16.gmra.mrb[8].mxu0 %v2017_v53  ;;  %1844 = vmatprep.subr.bf16.mxu1 %v2032_v2  ;;  %v2094_v53 = vld [vmem:[%s2231_s27 + $0xb0] ss:$36 sps:$4 sm:$0xff]   ;;  %s1528_s27 = sshll.u32 %s2507_s17, 2 }
  0x38   : > { %1163 = vmatmul.mubr.bf16.gmra.mrb[8].mxu1 %v2018_v54  ;;  %1799 = vmatpush3.bf16.msra.mxu0 %v2024_v60  ;;  %s2488_s20 = scalar_lea.vmem %s2505_s3, %s1528_s27 }
  0x39   : > { %1097 = vmatprep.mubr.bf16.mxu0 %v2026_v62  ;;  %1170 = vmatprep.mubr.bf16.mxu1 %v2028_v63 }
  0x3a   : > { %1800 = vmatprep.subr.bf16.mxu0 %v2033_v3  ;;  %1845 = vmatpush3.bf16.msra.mxu1 %v2034_v4 }
  0x3b   : > { %1846 = vmatprep.subr.bf16.mxu1 %v2036_v6 }
  0x3c   : > { %1801 = vmatpush3.bf16.msra.mxu0 %v2035_v5 }
  0x3d   : > { %1802 = vmatprep.subr.bf16.mxu0 %v2038_v8 }
  0x3e   : > { %1847 = vmatpush3.bf16.msra.mxu1 %v2037_v7 }
  0x3f   : > { %1098 = vmatmul.mubr.bf16.gmra.mrb[12].mxu0 %v2030_v0  ;;  %1848 = vmatprep.subr.bf16.mxu1 %v2046_v14 }
  0x40   : > { %1171 = vmatmul.mubr.bf16.gmra.mrb[12].mxu1 %v2031_v1  ;;  %1105 = vmatprep.mubr.bf16.mxu0 %v2039_v9 }
  0x41   : > { %1178 = vmatprep.mubr.bf16.mxu1 %v2041_v10  ;;  %1803 = vmatpush3.bf16.msra.mxu0 %v2043_v11 }
  0x42   : > { %1849 = vmatpush3.bf16.msra.mxu1 %v2047_v15  ;;  %1804 = vmatprep.subr.bf16.mxu0 %v2048_v16 }
  0x43   : > { %1850 = vmatprep.subr.bf16.mxu1 %v2050_v18 }
  0x45   : > { %1805 = vmatpush3.bf16.msra.mxu0 %v2049_v17 }
  0x46   : > { %1895 = vmatprep.subr.bf16.mxu0 %v2103_v22  ;;  %1851 = vmatpush3.bf16.msra.mxu1 %v2051_v19 }
  0x47   : > { %1106 = vmatmul.mubr.bf16.gmra.mrb[16].mxu0 %v2044_v12  ;;  %1931 = vmatprep.subr.bf16.mxu1 %v2103_v22 }
  0x48   : > { %1179 = vmatmul.mubr.bf16.gmra.mrb[16].mxu1 %v2045_v13  ;;  %1219 = vmatprep.mubr.bf16.mxu0 %v2054_v21 }
  0x49   : > { %1292 = vmatprep.mubr.bf16.mxu1 %v2057_v24 }
  0x4f   : > { %1220 = vmatmul.mubr.bf16.vlgmr.msra.gmra.mrb[20].mxu0 %v2052_v20 }
  0x50   : > { %1293 = vmatmul.mubr.bf16.vlgmr.msra.gmra.mrb[20].mxu1 %v2055_v23  ;;  %1896 = vmatpush3.bf16.msra.mxu0 %v2058_v25 }
  0x51   : > { %1897 = vmatprep.subr.bf16.mxu0 %v2103_v22  ;;  %1939 = vmatpush3.bf16.msra.mxu1 %v2058_v25 }
  0x52   : > { %1227 = vmatprep.mubr.bf16.mxu0 %v2060_v27  ;;  %1932 = vmatprep.subr.bf16.mxu1 %v2103_v22 }
  0x53   : > { %1300 = vmatprep.mubr.bf16.mxu1 %v2062_v28 }
  0x54   : > { %1898 = vmatpush3.bf16.msra.mxu0 %v2059_v26 }
  0x55   : > { %1899 = vmatprep.subr.bf16.mxu0 %v2103_v22  ;;  %1940 = vmatpush3.bf16.msra.mxu1 %v2059_v26 }
  0x56   : > { %1933 = vmatprep.subr.bf16.mxu1 %v2103_v22 }
  0x57   : > { %1228 = vmatmul.mubr.bf16.gmra.mrb[24].mxu0 %v2064_v29 }
  0x58   : > { %1301 = vmatmul.mubr.bf16.gmra.mrb[24].mxu1 %v2065_v30  ;;  %1900 = vmatpush3.bf16.msra.mxu0 %v2066_v31 }
  0x59   : > { %1235 = vmatprep.mubr.bf16.mxu0 %v2067_v32  ;;  %1308 = vmatprep.mubr.bf16.mxu1 %v2069_v33 }
  0x5a   : > { %1901 = vmatprep.subr.bf16.mxu0 %v2103_v22  ;;  %1941 = vmatpush3.bf16.msra.mxu1 %v2066_v31 }
  0x5b   : > { %1934 = vmatprep.subr.bf16.mxu1 %v2103_v22 }
  0x5c   : > { %1902 = vmatpush3.bf16.msra.mxu0 %v2073_v34 }
  0x5d   : > { %1903 = vmatprep.subr.bf16.mxu0 %v2103_v22 }
  0x5e   : > { %1942 = vmatpush3.bf16.msra.mxu1 %v2073_v34 }
  0x5f   : > { %1236 = vmatmul.mubr.bf16.gmra.mrb[28].mxu0 %v2071_v35  ;;  %1935 = vmatprep.subr.bf16.mxu1 %v2103_v22 }
  0x60   : > { %1309 = vmatmul.mubr.bf16.gmra.mrb[28].mxu1 %v2072_v36  ;;  %1904 = vmatpush3.bf16.msra.mxu0 %v2074_v37 }
  0x61   : > { %1243 = vmatprep.mubr.bf16.mxu0 %v2075_v38  ;;  %1316 = vmatprep.mubr.bf16.mxu1 %v2077_v39 }
  0x62   : > { %1943 = vmatpush3.bf16.msra.mxu1 %v2074_v37  ;;  %1905 = vmatprep.subr.bf16.mxu0 %v2103_v22 }
  0x63   : > { %1936 = vmatprep.subr.bf16.mxu1 %v2103_v22 }
  0x64   : > { %1906 = vmatpush3.bf16.msra.mxu0 %v2081_v40 }
  0x65   : > { %1907 = vmatprep.subr.bf16.mxu0 %v2103_v22 }
  0x66   : > { %1944 = vmatpush3.bf16.msra.mxu1 %v2081_v40 }
  0x67   : > { %1244 = vmatmul.mubr.bf16.gmra.mrb[32].mxu0 %v2079_v41  ;;  %1937 = vmatprep.subr.bf16.mxu1 %v2103_v22 }
  0x68   : > { %1317 = vmatmul.mubr.bf16.gmra.mrb[32].mxu1 %v2080_v42  ;;  %1251 = vmatprep.mubr.bf16.mxu0 %v2082_v43 }
  0x69   : > { %1324 = vmatprep.mubr.bf16.mxu1 %v2084_v44  ;;  %1908 = vmatpush3.bf16.msra.mxu0 %v2086_v45 }
  0x6a   : > { %1945 = vmatpush3.bf16.msra.mxu1 %v2086_v45  ;;  %1909 = vmatprep.subr.bf16.mxu0 %v2103_v22 }
  0x6b   : > { %1938 = vmatprep.subr.bf16.mxu1 %v2103_v22 }
  0x6d   : > { %1910 = vmatpush3.bf16.msra.mxu0 %v2089_v46 }
  0x6e   : > { %1946 = vmatpush3.bf16.msra.mxu1 %v2089_v46 }
  0x6f   : > { %1252 = vmatmul.mubr.bf16.gmra.mrb[36].mxu0 %v2087_v47 }
  0x70   : > { %1325 = vmatmul.mubr.bf16.gmra.mrb[36].mxu1 %v2088_v48  ;;  %1911 = vmatprep.mubr.msk.bf16.mxu0 %vm2104_vm0, %v2103_v22 }
  0x71   : > { %1923 = vmatprep.mubr.msk.bf16.mxu1 %vm2104_vm0, %v2103_v22 }
  0x77   : > { %1912 = vmatmul.mubr.bf16.vlgmr.msra.gmra.mrb[40].mxu0 %v2090_v49 }
  0x78   : > { %1924 = vmatmul.mubr.bf16.vlgmr.msra.gmra.mrb[40].mxu1 %v2091_v50  ;;  %1915 = vmatprep.mubr.msk.bf16.mxu0 %vm2104_vm0, %v2103_v22 }
  0x79   : > { %1927 = vmatprep.mubr.msk.bf16.mxu1 %vm2104_vm0, %v2103_v22 }
  0x7f   : > { %1916 = vmatmul.mubr.bf16.gmra.mrb[44].mxu0 %v2092_v51 }
  0x80   : > { %1928 = vmatmul.mubr.bf16.gmra.mrb[44].mxu1 %v2093_v52  ;;  %1919 = vmatprep.mubr.msk.bf16.mxu0 %vm2104_vm0, %v2103_v22 }
  0x87   : > { %1920 = vmatmul.mubr.bf16.gmra.mrb[48].mxu0 %v2094_v53 }
  0xfa   : > { %v1714_v54 = vpop.f32.mrb[0].mxu0 }
  0xfb   : > { %v1715_v56 = vpop.f32.mrb[1].mxu0  ;;  %v1760_v57 = vpop.f32.mrb[0].mxu1 }
  0xfc   : > { %v1716_v58 = vadd.f32 %v1715_v56, %v1714_v54  ;;  %v1717_v59 = vpop.f32.mrb[2].mxu0  ;;  %v1761_v60 = vpop.f32.mrb[1].mxu1 }
  0xfd   : > { %v1718_v61 = vpop.f32.mrb[3].mxu0  ;;  %v1762_v62 = vadd.f32 %v1761_v60, %v1760_v57  ;;  %v1763_v63 = vpop.f32.mrb[2].mxu1 }
  0xfe   : > { %v1076_v0 = vadd.f32 %v1716_v58, %v2428_v55  ;;  %v1719_v1 = vadd.f32 %v1718_v61, %v1717_v59  ;;  %v1764_v2 = vpop.f32.mrb[3].mxu1 }
  0xff   : > { %v1765_v3 = vadd.f32 %v1764_v2, %v1763_v63 }
 0x100   : > { %v1079_v4 = vadd.f32 %v1719_v1, %v2428_v55  ;;  %v2432_v5 = vadd.f32 %v1762_v62, %v1076_v0 }
 0x102   : > { %v2434_v6 = vadd.f32 %v1765_v3, %v1079_v4  ;;  %v1720_v7 = vpop.f32.mrb[4].mxu0 }
 0x103   : > { %v1721_v8 = vpop.f32.mrb[5].mxu0  ;;  %v1766_v9 = vpop.f32.mrb[4].mxu1 }
 0x104   : > { %v1722_v10 = vadd.f32 %v1721_v8, %v1720_v7  ;;  %v1723_v11 = vpop.f32.mrb[6].mxu0  ;;  %v1767_v12 = vpop.f32.mrb[5].mxu1 }
 0x105   : > { %v1724_v13 = vpop.f32.mrb[7].mxu0  ;;  %v1768_v14 = vadd.f32 %v1767_v12, %v1766_v9  ;;  %v1769_v15 = vpop.f32.mrb[6].mxu1 }
 0x106   : > { %v1084_v16 = vadd.f32 %v1722_v10, %v2428_v55  ;;  %v1725_v17 = vadd.f32 %v1724_v13, %v1723_v11  ;;  %v1770_v18 = vpop.f32.mrb[7].mxu1 }
 0x107   : > { %v1771_v19 = vadd.f32 %v1770_v18, %v1769_v15 }
 0x108   : > { %v1087_v20 = vadd.f32 %v1725_v17, %v2428_v55  ;;  %v2438_v21 = vadd.f32 %v1768_v14, %v1084_v16 }
 0x10a   : > { %v2440_v22 = vadd.f32 %v1771_v19, %v1087_v20  ;;  %v1726_v23 = vpop.f32.mrb[8].mxu0 }
 0x10b   : > { %v1727_v24 = vpop.f32.mrb[9].mxu0  ;;  %v1772_v25 = vpop.f32.mrb[8].mxu1 }
 0x10c   : > { %v1728_v26 = vadd.f32 %v1727_v24, %v1726_v23  ;;  %v1729_v27 = vpop.f32.mrb[10].mxu0  ;;  %v1773_v28 = vpop.f32.mrb[9].mxu1 }
 0x10d   : > { %v1730_v29 = vpop.f32.mrb[11].mxu0  ;;  %v1774_v30 = vadd.f32 %v1773_v28, %v1772_v25  ;;  %v1775_v31 = vpop.f32.mrb[10].mxu1 }
 0x10e   : > { %v1092_v32 = vadd.f32 %v1728_v26, %v2428_v55  ;;  %v1731_v33 = vadd.f32 %v1730_v29, %v1729_v27  ;;  %v1776_v34 = vpop.f32.mrb[11].mxu1 }
 0x10f   : > { %v1777_v35 = vadd.f32 %v1776_v34, %v1775_v31 }
 0x110   : > { %v1095_v36 = vadd.f32 %v1731_v33, %v2428_v55  ;;  %v2444_v37 = vadd.f32 %v1774_v30, %v1092_v32 }
 0x112   : > { %v2446_v38 = vadd.f32 %v1777_v35, %v1095_v36  ;;  %v1732_v39 = vpop.f32.mrb[12].mxu0 }
 0x113   : > { %v1778_v40 = vpop.f32.mrb[12].mxu1  ;;  %v1733_v41 = vpop.f32.mrb[13].mxu0 }
 0x114   : > { %v1779_v42 = vpop.f32.mrb[13].mxu1  ;;  %v1734_v43 = vadd.f32 %v1733_v41, %v1732_v39  ;;  %v1735_v44 = vpop.f32.mrb[14].mxu0 }
 0x115   : > { %v1780_v45 = vadd.f32 %v1779_v42, %v1778_v40  ;;  %v1781_v46 = vpop.f32.mrb[14].mxu1  ;;  %v1736_v47 = vpop.f32.mrb[15].mxu0 }
 0x116   : > { %v1782_v48 = vpop.f32.mrb[15].mxu1  ;;  %v1100_v49 = vadd.f32 %v1734_v43, %v2428_v55  ;;  %v1737_v50 = vadd.f32 %v1736_v47, %v1735_v44 }
 0x117   : > { %v1783_v51 = vadd.f32 %v1782_v48, %v1781_v46 }
 0x118   : > { %v1103_v52 = vadd.f32 %v1737_v50, %v2428_v55  ;;  %v2450_v53 = vadd.f32 %v1780_v45, %v1100_v49 }
 0x11a   : > { %v2452_v54 = vadd.f32 %v1783_v51, %v1103_v52  ;;  %v1738_v56 = vpop.f32.mrb[16].mxu0 }
 0x11b   : > { %v1784_v57 = vpop.f32.mrb[16].mxu1  ;;  %v1739_v58 = vpop.f32.mrb[17].mxu0 }
 0x11c   : > { %v1785_v59 = vpop.f32.mrb[17].mxu1  ;;  %v1740_v60 = vadd.f32 %v1739_v58, %v1738_v56  ;;  %v1741_v61 = vpop.f32.mrb[18].mxu0 }
 0x11d   : > { %v1786_v62 = vadd.f32 %v1785_v59, %v1784_v57  ;;  %v1787_v63 = vpop.f32.mrb[18].mxu1  ;;  %v1742_v0 = vpop.f32.mrb[19].mxu0 }
 0x11e   : > { %v1788_v1 = vpop.f32.mrb[19].mxu1  ;;  %v1108_v2 = vadd.f32 %v1740_v60, %v2428_v55  ;;  %v1743_v3 = vadd.f32 %v1742_v0, %v1741_v61 }
 0x11f   : > { %v1789_v4 = vadd.f32 %v1788_v1, %v1787_v63 }
 0x120   : > { %v1111_v7 = vadd.f32 %v1743_v3, %v2428_v55  ;;  %v2456_v8 = vadd.f32 %v1786_v62, %v1108_v2 }
 0x122   : > { %v2458_v9 = vadd.f32 %v1789_v4, %v1111_v7  ;;  %v1806_v10 = vpop.f32.mrb[20].mxu0 }
 0x123   : > { %v1807_v11 = vpop.f32.mrb[21].mxu0  ;;  %v1852_v12 = vpop.f32.mrb[20].mxu1 }
 0x124   : > { %v1808_v13 = vadd.f32 %v1807_v11, %v1806_v10  ;;  %v1809_v14 = vpop.f32.mrb[22].mxu0  ;;  %v1853_v15 = vpop.f32.mrb[21].mxu1 }
 0x125   : > { %v1810_v16 = vpop.f32.mrb[23].mxu0  ;;  %v1854_v17 = vadd.f32 %v1853_v15, %v1852_v12  ;;  %v1855_v18 = vpop.f32.mrb[22].mxu1 }
 0x126   : > { %v1222_v19 = vadd.f32 %v1808_v13, %v2432_v5  ;;  %v1811_v20 = vadd.f32 %v1810_v16, %v1809_v14  ;;  %v1856_v23 = vpop.f32.mrb[23].mxu1 }
 0x127   : > { %v1857_v24 = vadd.f32 %v1856_v23, %v1855_v18 }
 0x128   : > { %v1225_v55 = vadd.f32 %v1811_v20, %v2434_v6  ;;  %v2462_v25 = vadd.f32 %v1854_v17, %v1222_v19 }
 0x12a   : > { %v1812_v26 = vpop.f32.mrb[24].mxu0  ;;  %v2464_v27 = vadd.f32 %v1857_v24, %v1225_v55 }
 0x12b   : > { %v1813_v28 = vpop.f32.mrb[25].mxu0  ;;  %v1858_v29 = vpop.f32.mrb[24].mxu1 }
 0x12c   : > { %v1814_v30 = vadd.f32 %v1813_v28, %v1812_v26  ;;  %v1815_v31 = vpop.f32.mrb[26].mxu0  ;;  %v1859_v32 = vpop.f32.mrb[25].mxu1 }
 0x12d   : > { %v1816_v33 = vpop.f32.mrb[27].mxu0  ;;  %v1860_v34 = vadd.f32 %v1859_v32, %v1858_v29  ;;  %v1861_v35 = vpop.f32.mrb[26].mxu1 }
 0x12e   : > { %v1230_v5 = vadd.f32 %v1814_v30, %v2438_v21  ;;  %v1817_v36 = vadd.f32 %v1816_v33, %v1815_v31  ;;  %v1862_v39 = vpop.f32.mrb[27].mxu1 }
 0x12f   : > { %v1863_v40 = vadd.f32 %v1862_v39, %v1861_v35 }
 0x130   : > { %v1233_v6 = vadd.f32 %v1817_v36, %v2440_v22  ;;  %v2468_v41 = vadd.f32 %v1860_v34, %v1230_v5 }
 0x132   : > { %v1818_v42 = vpop.f32.mrb[28].mxu0  ;;  %v2470_v43 = vadd.f32 %v1863_v40, %v1233_v6 }
 0x133   : > { %v1819_v44 = vpop.f32.mrb[29].mxu0  ;;  %v1864_v45 = vpop.f32.mrb[28].mxu1 }
 0x134   : > { %v1820_v46 = vadd.f32 %v1819_v44, %v1818_v42  ;;  %v1821_v47 = vpop.f32.mrb[30].mxu0  ;;  %v1865_v48 = vpop.f32.mrb[29].mxu1 }
 0x135   : > { %v1822_v49 = vpop.f32.mrb[31].mxu0  ;;  %v1866_v50 = vadd.f32 %v1865_v48, %v1864_v45  ;;  %v1867_v51 = vpop.f32.mrb[30].mxu1 }
 0x136   : > { %v1238_v21 = vadd.f32 %v1820_v46, %v2444_v37  ;;  %v1823_v52 = vadd.f32 %v1822_v49, %v1821_v47  ;;  %v1868_v56 = vpop.f32.mrb[31].mxu1 }
 0x137   : > { %v1869_v57 = vadd.f32 %v1868_v56, %v1867_v51 }
 0x138   : > { %v1241_v22 = vadd.f32 %v1823_v52, %v2446_v38  ;;  %v2474_v58 = vadd.f32 %v1866_v50, %v1238_v21 }
 0x13a   : > { %v1824_v59 = vpop.f32.mrb[32].mxu0  ;;  %v2476_v60 = vadd.f32 %v1869_v57, %v1241_v22 }
 0x13b   : > { %v1825_v61 = vpop.f32.mrb[33].mxu0  ;;  %v1870_v62 = vpop.f32.mrb[32].mxu1 }
 0x13c   : > { %v1826_v63 = vadd.f32 %v1825_v61, %v1824_v59  ;;  %v1827_v0 = vpop.f32.mrb[34].mxu0  ;;  %v1871_v1 = vpop.f32.mrb[33].mxu1 }
 0x13d   : > { %v1828_v2 = vpop.f32.mrb[35].mxu0  ;;  %v1872_v3 = vadd.f32 %v1871_v1, %v1870_v62  ;;  %v1873_v4 = vpop.f32.mrb[34].mxu1 }
 0x13e   : > { %v1246_v37 = vadd.f32 %v1826_v63, %v2450_v53  ;;  %v1829_v7 = vadd.f32 %v1828_v2, %v1827_v0  ;;  %v1874_v10 = vpop.f32.mrb[35].mxu1 }
 0x13f   : > { %v1875_v11 = vadd.f32 %v1874_v10, %v1873_v4 }
 0x140   : > { %v1249_v38 = vadd.f32 %v1829_v7, %v2452_v54  ;;  %v1319_v12 = vadd.f32 %v1872_v3, %v1246_v37 }
 0x142   : > { %v1830_v13 = vpop.f32.mrb[36].mxu0  ;;  %v1322_v14 = vadd.f32 %v1875_v11, %v1249_v38 }
 0x143   : > { %v1831_v15 = vpop.f32.mrb[37].mxu0  ;;  %v1876_v16 = vpop.f32.mrb[36].mxu1 }
 0x144   : > { %v1832_v17 = vadd.f32 %v1831_v15, %v1830_v13  ;;  %v1833_v18 = vpop.f32.mrb[38].mxu0  ;;  %v1877_v19 = vpop.f32.mrb[37].mxu1 }
 0x145   : > { %v1834_v20 = vpop.f32.mrb[39].mxu0  ;;  %v1878_v23 = vadd.f32 %v1877_v19, %v1876_v16  ;;  %v1879_v24 = vpop.f32.mrb[38].mxu1 }
 0x146   : > { %v1254_v55 = vadd.f32 %v1832_v17, %v2456_v8  ;;  %v1835_v53 = vadd.f32 %v1834_v20, %v1833_v18  ;;  %v1880_v26 = vpop.f32.mrb[39].mxu1 }
 0x147   : > { %v1881_v28 = vadd.f32 %v1880_v26, %v1879_v24 }
 0x148   : > { %v1257_v29 = vadd.f32 %v1835_v53, %v2458_v9  ;;  %v1327_v54 = vadd.f32 %v1878_v23, %v1254_v55 }
 0x14a   : > { %v1367_v30 = vpop.f32.mrb[40].mxu0  ;;  %v1330_v31 = vadd.f32 %v1881_v28, %v1257_v29 }
 0x14b   : > { %v1368_v32 = vadd.f32 %v1367_v30, %v2462_v25  ;;  %v1391_v33 = vpop.f32.mrb[40].mxu1  ;;  %v1913_v34 = vpop.f32.mrb[41].mxu0 }
 0x14c   : > { %v1392_v35 = vadd.f32 %v1391_v33, %v1319_v12  ;;  %v1925_v5 = vpop.f32.mrb[41].mxu1  ;;  %v1370_v36 = vpop.f32.mrb[42].mxu0 }
 0x14d   : > { %v1371_v39 = vadd.f32 %v1370_v36, %v2464_v27  ;;  %v1394_v40 = vpop.f32.mrb[42].mxu1  ;;  %v1914_v8 = vpop.f32.mrb[43].mxu0  ;;  %v1406_v44 = vmax.f32 %v1368_v32, 0.0 }
 0x14e   : > { %v1395_v6 = vadd.f32 %v1394_v40, %v1322_v14  ;;  %v1926_v42 = vpop.f32.mrb[43].mxu1  ;;  %v1412_v9 = vmax.f32 %v1392_v35, 0.0 }
 0x14f   : > { %v1407_v45 = vmax.f32 %v1371_v39, 0.0 }
 0x150   : > { %v1413_v25 = vmax.f32 %v1395_v6, 0.0 }
 0x151   : > { %v1672_v46 = vpack.c.bf16 %v1407_v45, %v1406_v44 }
 0x152   : > { %v1687_v47 = vpack.c.bf16 %v1413_v25, %v1412_v9  ;;  %v1375_v48 = vpop.f32.mrb[44].mxu0 }
 0x153   : > { %1673 = vst [vmem:[%s2488_s20] sm:$0xff] %v1672_v46   ;;  %v1376_v27 = vadd.f32 %v1375_v48, %v2468_v41  ;;  %v1399_v49 = vpop.f32.mrb[44].mxu1  ;;  %v1917_v50 = vpop.f32.mrb[45].mxu0 }
 0x154   : > { %1696 = vst [vmem:[%s2488_s20 + $0x18] sm:$0xff] %v1687_v47   ;;  %v1400_v51 = vadd.f32 %v1399_v49, %v1327_v54  ;;  %v1929_v21 = vpop.f32.mrb[45].mxu1  ;;  %v1378_v52 = vpop.f32.mrb[46].mxu0 }
 0x155   : > { %v1379_v56 = vadd.f32 %v1378_v52, %v2470_v43  ;;  %v1402_v57 = vpop.f32.mrb[46].mxu1  ;;  %v1918_v22 = vpop.f32.mrb[47].mxu0  ;;  %v1408_v62 = vmax.f32 %v1376_v27, 0.0 }
 0x156   : > { %v1403_v59 = vadd.f32 %v1402_v57, %v1330_v31  ;;  %v1930_v61 = vpop.f32.mrb[47].mxu1  ;;  %v1414_v0 = vmax.f32 %v1400_v51, 0.0 }
 0x157   : > { %v1409_v63 = vmax.f32 %v1379_v56, 0.0 }
 0x158   : > { %v1415_v1 = vmax.f32 %v1403_v59, 0.0 }
 0x159   : > { %v1677_v41 = vpack.c.bf16 %v1409_v63, %v1408_v62 }
 0x15a   : > { %v1692_v2 = vpack.c.bf16 %v1415_v1, %v1414_v0  ;;  %v1383_v3 = vpop.f32.mrb[48].mxu0 }
 0x15b   : > { %1694 = vst [vmem:[%s2488_s20 + $0x8] sm:$0xff] %v1677_v41   ;;  %v1384_v4 = vadd.f32 %v1383_v3, %v2474_v58  ;;  %v1921_v37 = vpop.f32.mrb[49].mxu0 }
 0x15c   : > { %1697 = vst [vmem:[%s2488_s20 + $0x20] sm:$0xff] %v1692_v2   ;;  %v1386_v7 = vpop.f32.mrb[50].mxu0 }
 0x15d   : > { %v1387_v43 = vadd.f32 %v1386_v7, %v2476_v60  ;;  %v1922_v10 = vpop.f32.mrb[51].mxu0  ;;  %v1410_v11 = vmax.f32 %v1384_v4, 0.0 }
 0x15f   : > { %v1411_v38 = vmax.f32 %v1387_v43, 0.0 }
 0x161   : > { %v1682_v12 = vpack.c.bf16 %v1411_v38, %v1410_v11 }
 0x163   : > { %1695 = vst [vmem:[%s2488_s20 + $0x10] sm:$0xff] %v1682_v12  }
 0x164 PF: > { %s13_s12 = sadd.s32 1, %s2101_s12  }
 0x165   : > { %p10_p4 = scmp.ge.s32.totalorder %s13_s12, 4  }
 0x167   :  { %12 = sbr.rel (!%p10_p4) target bundleno = 1 (0x1), region = 62 }

// kernel: cnn_forward.7
= control target key start
LH: loop header
LB: loop body
LE: loop exit
PB: predicated region body
PF: predicated region fallthrough
CT: control target
= control target key end

     0   :  { %vm21745_vm0 = vmmov 0   ;;  %s28286_s1 = inlined_call_operand.vmem [shape: bf16[4480,896], index: 1, kind: input, shape index: {}]   ;;  %s28287_s0 = inlined_call_operand.vmem [shape: bf16[8,4480], index: 0, kind: input, shape index: {}]   ;;  %s28288_s2 = inlined_call_operand.vmem [shape: f32[1,896], index: 2, kind: input, shape index: {}]   ;;  %s28289_s3 = inlined_call_operand.vmem [shape: bf16[896,128], index: 3, kind: input, shape index: {}]   ;;  %s28290_s4 = inlined_call_operand.vmem [shape: f32[1,128], index: 4, kind: input, shape index: {}]   ;;  %s28291_s5 = inlined_call_operand.vmem [shape: f32[8,128], index: 5, kind: output, shape index: {}]  }
   0x1   :  { %v18848_v0 = vld [vmem:[%s28286_s1 + $0x4] ss:$28 sps:$4 sm:$0xff]   ;;  %v18854_v4 = vld [vmem:[%s28286_s1 + $0x3c] ss:$28 sps:$4 sm:$0xff]   ;;  %v18860_v8 = vld [vmem:[%s28286_s1 + $0x74] ss:$28 sps:$4 sm:$0xff]  }
   0x2   :  { %v18850_v1 = vld [vmem:[%s28286_s1 + $0xa84] ss:$28 sps:$4 sm:$0xff]   ;;  %12519 = vmatprep.subr.bf16.mxu1 %v18848_v0  ;;  %v18856_v5 = vld [vmem:[%s28286_s1 + $0xabc] ss:$28 sps:$4 sm:$0xff]   ;;  %v18862_v9 = vld [vmem:[%s28286_s1 + $0xaf4] ss:$28 sps:$4 sm:$0xff]  }
   0x3   :  { %v18852_v2 = vld [vmem:[%s28286_s1] ss:$28 sps:$4 sm:$0xff]   ;;  %12642 = vmatprep.subr.bf16.mxu0 %v18850_v1  ;;  %v18858_v6 = vld [vmem:[%s28286_s1 + $0x38] ss:$28 sps:$4 sm:$0xff]   ;;  %v18864_v10 = vld [vmem:[%s28286_s1 + $0x70] ss:$28 sps:$4 sm:$0xff]  }
   0x4   :  { %v18853_v3 = vld [vmem:[%s28286_s1 + $0xa80] ss:$28 sps:$4 sm:$0xff]   ;;  %12520 = vmatpush1.bf16.msra.mxu1 %v18852_v2  ;;  %v18859_v7 = vld [vmem:[%s28286_s1 + $0xab8] ss:$28 sps:$4 sm:$0xff]   ;;  %v18865_v11 = vld [vmem:[%s28286_s1 + $0xaf0] ss:$28 sps:$4 sm:$0xff]  }
   0x5   :  { %12643 = vmatpush1.bf16.msra.mxu0 %v18853_v3  ;;  %12521 = vmatprep.subr.bf16.mxu1 %v18854_v4  ;;  %v18866_v12 = vld [vmem:[%s28286_s1 + $0xac] ss:$28 sps:$4 sm:$0xff]   ;;  %v18872_v16 = vld [vmem:[%s28286_s1 + $0xe4] ss:$28 sps:$4 sm:$0xff]   ;;  %v18878_v20 = vld [vmem:[%s28286_s1 + $0x11c] ss:$28 sps:$4 sm:$0xff]  }
   0x6   :  { %12644 = vmatprep.subr.bf16.mxu0 %v18856_v5  ;;  %v18868_v13 = vld [vmem:[%s28286_s1 + $0xb2c] ss:$28 sps:$4 sm:$0xff]   ;;  %v18874_v17 = vld [vmem:[%s28286_s1 + $0xb64] ss:$28 sps:$4 sm:$0xff]   ;;  %v18880_v21 = vld [vmem:[%s28286_s1 + $0xb9c] ss:$28 sps:$4 sm:$0xff]  }
   0x7   :  { %v18870_v14 = vld [vmem:[%s28286_s1 + $0xa8] ss:$28 sps:$4 sm:$0xff]   ;;  %v18876_v18 = vld [vmem:[%s28286_s1 + $0xe0] ss:$28 sps:$4 sm:$0xff]   ;;  %v18882_v22 = vld [vmem:[%s28286_s1 + $0x118] ss:$28 sps:$4 sm:$0xff]  }
   0x8   :  { %12522 = vmatpush1.bf16.msra.mxu1 %v18858_v6  ;;  %v18871_v15 = vld [vmem:[%s28286_s1 + $0xb28] ss:$28 sps:$4 sm:$0xff]   ;;  %v18877_v19 = vld [vmem:[%s28286_s1 + $0xb60] ss:$28 sps:$4 sm:$0xff]   ;;  %v18883_v23 = vld [vmem:[%s28286_s1 + $0xb98] ss:$28 sps:$4 sm:$0xff]  }
   0x9   :  { %12645 = vmatpush1.bf16.msra.mxu0 %v18859_v7  ;;  %12523 = vmatprep.subr.bf16.mxu1 %v18860_v8  ;;  %v18884_v24 = vld [vmem:[%s28286_s1 + $0x154] ss:$28 sps:$4 sm:$0xff]   ;;  %v18890_v28 = vld [vmem:[%s28286_s1 + $0x18c] ss:$28 sps:$4 sm:$0xff]   ;;  %v18896_v32 = vld [vmem:[%s28286_s1 + $0x1c4] ss:$28 sps:$4 sm:$0xff]  }
   0xa   :  { %12646 = vmatprep.subr.bf16.mxu0 %v18862_v9  ;;  %v18886_v25 = vld [vmem:[%s28286_s1 + $0xbd4] ss:$28 sps:$4 sm:$0xff]   ;;  %v18892_v29 = vld [vmem:[%s28286_s1 + $0xc0c] ss:$28 sps:$4 sm:$0xff]   ;;  %v18898_v33 = vld [vmem:[%s28286_s1 + $0xc44] ss:$28 sps:$4 sm:$0xff]  }
   0xb   :  { %v18888_v26 = vld [vmem:[%s28286_s1 + $0x150] ss:$28 sps:$4 sm:$0xff]   ;;  %v18894_v30 = vld [vmem:[%s28286_s1 + $0x188] ss:$28 sps:$4 sm:$0xff]   ;;  %v18900_v34 = vld [vmem:[%s28286_s1 + $0x1c0] ss:$28 sps:$4 sm:$0xff]  }
   0xc   :  { %12524 = vmatpush1.bf16.msra.mxu1 %v18864_v10  ;;  %v18889_v27 = vld [vmem:[%s28286_s1 + $0xbd0] ss:$28 sps:$4 sm:$0xff]   ;;  %v18895_v31 = vld [vmem:[%s28286_s1 + $0xc08] ss:$28 sps:$4 sm:$0xff]   ;;  %v18901_v35 = vld [vmem:[%s28286_s1 + $0xc40] ss:$28 sps:$4 sm:$0xff]  }
   0xd   :  { %12647 = vmatpush1.bf16.msra.mxu0 %v18865_v11  ;;  %12525 = vmatprep.subr.bf16.mxu1 %v18866_v12  ;;  %v18902_v36 = vld [vmem:[%s28286_s1 + $0x1fc] ss:$28 sps:$4 sm:$0xff]   ;;  %v18908_v40 = vld [vmem:[%s28286_s1 + $0x234] ss:$28 sps:$4 sm:$0xff]   ;;  %v18914_v44 = vld [vmem:[%s28286_s1 + $0x26c] ss:$28 sps:$4 sm:$0xff]  }
   0xe   :  { %12648 = vmatprep.subr.bf16.mxu0 %v18868_v13  ;;  %v18904_v37 = vld [vmem:[%s28286_s1 + $0xc7c] ss:$28 sps:$4 sm:$0xff]   ;;  %v18910_v41 = vld [vmem:[%s28286_s1 + $0xcb4] ss:$28 sps:$4 sm:$0xff]   ;;  %v18916_v45 = vld [vmem:[%s28286_s1 + $0xcec] ss:$28 sps:$4 sm:$0xff]  }
   0xf   :  { %v18906_v38 = vld [vmem:[%s28286_s1 + $0x1f8] ss:$28 sps:$4 sm:$0xff]   ;;  %v18912_v42 = vld [vmem:[%s28286_s1 + $0x230] ss:$28 sps:$4 sm:$0xff]   ;;  %v21_v46 = vld [vmem:[%s28287_s0] sm:$0xff] }
  0x10   :  { %12526 = vmatpush1.bf16.msra.mxu1 %v18870_v14  ;;  %v18907_v39 = vld [vmem:[%s28286_s1 + $0xc78] ss:$28 sps:$4 sm:$0xff]   ;;  %v18913_v43 = vld [vmem:[%s28286_s1 + $0xcb0] ss:$28 sps:$4 sm:$0xff]   ;;  %v18918_v47 = vld [vmem:[%s28286_s1 + $0x268] ss:$28 sps:$4 sm:$0xff]   ;;  %v21920_v48 = vcombine.high %v21_v46, %v21_v46  ;;  %v21986_v6 = vcombine.low %v21_v46, %v21_v46 }
  0x11   :  { %12649 = vmatpush1.bf16.msra.mxu0 %v18871_v15  ;;  %12527 = vmatprep.subr.bf16.mxu1 %v18872_v16  ;;  %v18919_v49 = vld [vmem:[%s28286_s1 + $0xce8] ss:$28 sps:$4 sm:$0xff]   ;;  %v24_v50 = vld [vmem:[%s28287_s0 + $0x18] sm:$0xff]  ;;  %v18932_v60 = vld [vmem:[%s28286_s1 + $0x314] ss:$28 sps:$4 sm:$0xff]  }
  0x12   :  { %12650 = vmatprep.subr.bf16.mxu0 %v18874_v17  ;;  %v18920_v51 = vld [vmem:[%s28286_s1 + $0x2a4] ss:$28 sps:$4 sm:$0xff]   ;;  %v21934_v53 = vcombine.high %v24_v50, %v24_v50  ;;  %12551 = vmatprep.mubr.bf16.mxu1 %v21920_v48  ;;  %v18926_v56 = vld [vmem:[%s28286_s1 + $0x2dc] ss:$28 sps:$4 sm:$0xff]   ;;  %v18934_v61 = vld [vmem:[%s28286_s1 + $0xd94] ss:$28 sps:$4 sm:$0xff]   ;;  %v21988_v7 = vcombine.low %v24_v50, %v24_v50 }
  0x13   :  { %v18922_v52 = vld [vmem:[%s28286_s1 + $0xd24] ss:$28 sps:$4 sm:$0xff]   ;;  %v18928_v57 = vld [vmem:[%s28286_s1 + $0xd5c] ss:$28 sps:$4 sm:$0xff]   ;;  %v18936_v62 = vld [vmem:[%s28286_s1 + $0x310] ss:$28 sps:$4 sm:$0xff]  }
  0x14   :  { %12528 = vmatpush1.bf16.msra.mxu1 %v18876_v18  ;;  %12674 = vmatprep.mubr.bf16.mxu0 %v21934_v53  ;;  %v18924_v54 = vld [vmem:[%s28286_s1 + $0x2a0] ss:$28 sps:$4 sm:$0xff]   ;;  %v18930_v58 = vld [vmem:[%s28286_s1 + $0x2d8] ss:$28 sps:$4 sm:$0xff]   ;;  %v18937_v63 = vld [vmem:[%s28286_s1 + $0xd90] ss:$28 sps:$4 sm:$0xff]  }
  0x15   :  { %12651 = vmatpush1.bf16.msra.mxu0 %v18877_v19  ;;  %12529 = vmatprep.subr.bf16.mxu1 %v18878_v20  ;;  %v18925_v55 = vld [vmem:[%s28286_s1 + $0xd20] ss:$28 sps:$4 sm:$0xff]   ;;  %v18931_v59 = vld [vmem:[%s28286_s1 + $0xd58] ss:$28 sps:$4 sm:$0xff]   ;;  %v18938_v0 = vld [vmem:[%s28286_s1 + $0x34c] ss:$28 sps:$4 sm:$0xff]  }
  0x16   :  { %12652 = vmatprep.subr.bf16.mxu0 %v18880_v21  ;;  %v18940_v1 = vld [vmem:[%s28286_s1 + $0xdcc] ss:$28 sps:$4 sm:$0xff]   ;;  %v18947_v4 = vld [vmem:[%s28286_s1 + $0x384] ss:$28 sps:$4 sm:$0xff]   ;;  %v18956_v10 = vld [vmem:[%s28286_s1 + $0x3bc] ss:$28 sps:$4 sm:$0xff]  }
  0x17   :  { %v18942_v2 = vld [vmem:[%s28286_s1 + $0x348] ss:$28 sps:$4 sm:$0xff]   ;;  %v18945_v8 = vld [vmem:[%s28286_s1 + $0x380] ss:$28 sps:$4 sm:$0xff]   ;;  %v18954_v12 = vld [vmem:[%s28286_s1 + $0x3b8] ss:$28 sps:$4 sm:$0xff]  }
  0x18   :  { %12530 = vmatpush1.bf16.msra.mxu1 %v18882_v22  ;;  %v18943_v3 = vld [vmem:[%s28286_s1 + $0xdc8] ss:$28 sps:$4 sm:$0xff]   ;;  %v18949_v9 = vld [vmem:[%s28286_s1 + $0xe00] ss:$28 sps:$4 sm:$0xff]   ;;  %v18957_v13 = vld [vmem:[%s28286_s1 + $0xe38] ss:$28 sps:$4 sm:$0xff]  }
  0x19   :  { %12653 = vmatpush1.bf16.msra.mxu0 %v18883_v23  ;;  %12531 = vmatprep.subr.bf16.mxu1 %v18884_v24  ;;  %v18951_v5 = vld [vmem:[%s28286_s1 + $0xe04] ss:$28 sps:$4 sm:$0xff]   ;;  %v18959_v11 = vld [vmem:[%s28286_s1 + $0xe3c] ss:$28 sps:$4 sm:$0xff]   ;;  %v18962_v14 = vld [vmem:[%s28286_s1 + $0x3f4] ss:$28 sps:$4 sm:$0xff]  }
  0x1a   :  { %12654 = vmatprep.subr.bf16.mxu0 %v18886_v25  ;;  %v18965_v15 = vld [vmem:[%s28286_s1 + $0xe74] ss:$28 sps:$4 sm:$0xff]   ;;  %v18968_v18 = vld [vmem:[%s28286_s1 + $0x42c] ss:$28 sps:$4 sm:$0xff]   ;;  %v18974_v22 = vld [vmem:[%s28286_s1 + $0x464] ss:$28 sps:$4 sm:$0xff]  }
  0x1b   :  { %v18960_v16 = vld [vmem:[%s28286_s1 + $0x3f0] ss:$28 sps:$4 sm:$0xff]   ;;  %v18966_v20 = vld [vmem:[%s28286_s1 + $0x428] ss:$28 sps:$4 sm:$0xff]   ;;  %v18972_v24 = vld [vmem:[%s28286_s1 + $0x460] ss:$28 sps:$4 sm:$0xff]  }
  0x1c   :  { %12532 = vmatpush1.bf16.msra.mxu1 %v18888_v26  ;;  %v18963_v17 = vld [vmem:[%s28286_s1 + $0xe70] ss:$28 sps:$4 sm:$0xff]   ;;  %v18969_v21 = vld [vmem:[%s28286_s1 + $0xea8] ss:$28 sps:$4 sm:$0xff]   ;;  %v18975_v25 = vld [vmem:[%s28286_s1 + $0xee0] ss:$28 sps:$4 sm:$0xff]  }
  0x1d   :  { %12655 = vmatpush1.bf16.msra.mxu0 %v18889_v27  ;;  %12533 = vmatprep.subr.bf16.mxu1 %v18890_v28  ;;  %v18971_v19 = vld [vmem:[%s28286_s1 + $0xeac] ss:$28 sps:$4 sm:$0xff]   ;;  %v18977_v23 = vld [vmem:[%s28286_s1 + $0xee4] ss:$28 sps:$4 sm:$0xff]   ;;  %v18980_v26 = vld [vmem:[%s28286_s1 + $0x49c] ss:$28 sps:$4 sm:$0xff]  }
  0x1e   :  { %12656 = vmatprep.subr.bf16.mxu0 %v18892_v29  ;;  %v18983_v27 = vld [vmem:[%s28286_s1 + $0xf1c] ss:$28 sps:$4 sm:$0xff]  }
  0x1f   :  { %v18978_v28 = vld [vmem:[%s28286_s1 + $0x498] ss:$28 sps:$4 sm:$0xff]  }
  0x20   :  { %12534 = vmatpush1.bf16.msra.mxu1 %v18894_v30  ;;  %v18981_v29 = vld [vmem:[%s28286_s1 + $0xf18] ss:$28 sps:$4 sm:$0xff]  }
  0x21   :  { %12657 = vmatpush1.bf16.msra.mxu0 %v18895_v31  ;;  %12535 = vmatprep.subr.bf16.mxu1 %v18896_v32  ;;  %v18986_v30 = vld [vmem:[%s28286_s1 + $0x4d4] ss:$28 sps:$4 sm:$0xff]   ;;  %v22067_v32 = vld [vmem:[%s28287_s0 + $0x8] sm:$0xff]  ;;  %v19004_v46 = vld [vmem:[%s28286_s1 + $0x57c] ss:$28 sps:$4 sm:$0xff]  }
  0x22   :  { %12658 = vmatprep.subr.bf16.mxu0 %v18898_v33  ;;  %v18989_v31 = vld [vmem:[%s28286_s1 + $0xf54] ss:$28 sps:$4 sm:$0xff]  }
  0x23   :  { %v18984_v33 = vld [vmem:[%s28286_s1 + $0x4d0] ss:$28 sps:$4 sm:$0xff]   ;;  %v19005_v50 = vld [vmem:[%s28286_s1 + $0xff8] ss:$28 sps:$4 sm:$0xff]  }
  0x24   :  { %12536 = vmatpush1.bf16.msra.mxu1 %v18900_v34  ;;  %v18987_v34 = vld [vmem:[%s28286_s1 + $0xf50] ss:$28 sps:$4 sm:$0xff]  }
  0x25   :  { %12659 = vmatpush1.bf16.msra.mxu0 %v18901_v35  ;;  %12537 = vmatprep.subr.bf16.mxu1 %v18902_v36  ;;  %v22077_v35 = vcombine.high %v22067_v32, %v22067_v32  ;;  %v22082_v36 = vld [vmem:[%s28287_s0 + $0x20] sm:$0xff] }
  0x26   :  { %12660 = vmatprep.subr.bf16.mxu0 %v18904_v37  ;;  %v18992_v37 = vld [vmem:[%s28286_s1 + $0x50c] ss:$28 sps:$4 sm:$0xff]  }
  0x28   :  { %12538 = vmatpush1.bf16.msra.mxu1 %v18906_v38  ;;  %v22089_v38 = vcombine.high %v22082_v36, %v22082_v36 }
  0x29   :  { %12661 = vmatpush1.bf16.msra.mxu0 %v18907_v39  ;;  %12539 = vmatprep.subr.bf16.mxu1 %v18908_v40  ;;  %v18995_v39 = vld [vmem:[%s28286_s1 + $0xf8c] ss:$28 sps:$4 sm:$0xff]  }
  0x2a   :  { %12662 = vmatprep.subr.bf16.mxu0 %v18910_v41  ;;  %v18990_v40 = vld [vmem:[%s28286_s1 + $0x508] ss:$28 sps:$4 sm:$0xff]  }
  0x2b   :  { %v18993_v41 = vld [vmem:[%s28286_s1 + $0xf88] ss:$28 sps:$4 sm:$0xff]  }
  0x2c   :  { %12540 = vmatpush1.bf16.msra.mxu1 %v18912_v42  ;;  %v18998_v42 = vld [vmem:[%s28286_s1 + $0x544] ss:$28 sps:$4 sm:$0xff]  }
  0x2d   :  { %12663 = vmatpush1.bf16.msra.mxu0 %v18913_v43  ;;  %12541 = vmatprep.subr.bf16.mxu1 %v18914_v44  ;;  %v19001_v43 = vld [vmem:[%s28286_s1 + $0xfc4] ss:$28 sps:$4 sm:$0xff]  }
  0x2e   :  { %12664 = vmatprep.subr.bf16.mxu0 %v18916_v45  ;;  %v18996_v44 = vld [vmem:[%s28286_s1 + $0x540] ss:$28 sps:$4 sm:$0xff]  }
  0x2f   :  { %v18999_v45 = vld [vmem:[%s28286_s1 + $0xfc0] ss:$28 sps:$4 sm:$0xff]  }
  0x30   :  { %12542 = vmatpush1.bf16.msra.mxu1 %v18918_v47  ;;  %v19007_v47 = vld [vmem:[%s28286_s1 + $0xffc] ss:$28 sps:$4 sm:$0xff]  }
  0x31   :  { %12665 = vmatpush1.bf16.msra.mxu0 %v18919_v49  ;;  %12543 = vmatprep.subr.bf16.mxu1 %v18920_v51  ;;  %v19002_v49 = vld [vmem:[%s28286_s1 + $0x578] ss:$28 sps:$4 sm:$0xff]  }
  0x32   :  { %12666 = vmatprep.subr.bf16.mxu0 %v18922_v52  ;;  %v19010_v51 = vld [vmem:[%s28286_s1 + $0x5b4] ss:$28 sps:$4 sm:$0xff]  }
  0x33   :  { %v19013_v52 = vld [vmem:[%s28286_s1 + $0x1034] ss:$28 sps:$4 sm:$0xff]  }
  0x34   :  { %12544 = vmatpush1.bf16.msra.mxu1 %v18924_v54  ;;  %v19008_v54 = vld [vmem:[%s28286_s1 + $0x5b0] ss:$28 sps:$4 sm:$0xff]  }
  0x35   :  { %12667 = vmatpush1.bf16.msra.mxu0 %v18925_v55  ;;  %12545 = vmatprep.subr.bf16.mxu1 %v18926_v56  ;;  %v19011_v55 = vld [vmem:[%s28286_s1 + $0x1030] ss:$28 sps:$4 sm:$0xff]  }
  0x36   :  { %12668 = vmatprep.subr.bf16.mxu0 %v18928_v57  ;;  %v19016_v56 = vld [vmem:[%s28286_s1 + $0x5ec] ss:$28 sps:$4 sm:$0xff]  }
  0x37   :  { %v19019_v57 = vld [vmem:[%s28286_s1 + $0x106c] ss:$28 sps:$4 sm:$0xff]  }
  0x38   :  { %12546 = vmatpush1.bf16.msra.mxu1 %v18930_v58  ;;  %v19014_v58 = vld [vmem:[%s28286_s1 + $0x5e8] ss:$28 sps:$4 sm:$0xff]  }
  0x39   :  { %12669 = vmatpush1.bf16.msra.mxu0 %v18931_v59  ;;  %12547 = vmatprep.subr.bf16.mxu1 %v18932_v60  ;;  %v19017_v59 = vld [vmem:[%s28286_s1 + $0x1068] ss:$28 sps:$4 sm:$0xff]  }
  0x3a   :  { %12670 = vmatprep.subr.bf16.mxu0 %v18934_v61  ;;  %v19022_v60 = vld [vmem:[%s28286_s1 + $0x624] ss:$28 sps:$4 sm:$0xff]  }
  0x3b   :  { %v19025_v61 = vld [vmem:[%s28286_s1 + $0x10a4] ss:$28 sps:$4 sm:$0xff]  }
  0x3c   :  { %12548 = vmatpush1.bf16.msra.mxu1 %v18936_v62  ;;  %v19020_v62 = vld [vmem:[%s28286_s1 + $0x620] ss:$28 sps:$4 sm:$0xff]  }
  0x3d   :  { %12671 = vmatpush1.bf16.msra.mxu0 %v18937_v63  ;;  %12549 = vmatprep.subr.bf16.mxu1 %v18938_v0  ;;  %v19023_v63 = vld [vmem:[%s28286_s1 + $0x10a0] ss:$28 sps:$4 sm:$0xff]  }
  0x3e   :  { %12672 = vmatprep.subr.bf16.mxu0 %v18940_v1  ;;  %v19028_v0 = vld [vmem:[%s28286_s1 + $0x65c] ss:$28 sps:$4 sm:$0xff]  }
  0x3f   :  { %v19031_v1 = vld [vmem:[%s28286_s1 + $0x10dc] ss:$28 sps:$4 sm:$0xff]  }
  0x40   :  { %12550 = vmatpush1.bf16.msra.mxu1 %v18942_v2  ;;  %v19026_v2 = vld [vmem:[%s28286_s1 + $0x658] ss:$28 sps:$4 sm:$0xff]  }
  0x41   :  { %12673 = vmatpush1.bf16.msra.mxu0 %v18943_v3  ;;  %12560 = vmatprep.subr.bf16.mxu1 %v18947_v4  ;;  %v19029_v3 = vld [vmem:[%s28286_s1 + $0x10d8] ss:$28 sps:$4 sm:$0xff]  }
  0x42   :  { %12683 = vmatprep.subr.bf16.mxu0 %v18951_v5  ;;  %v19034_v4 = vld [vmem:[%s28286_s1 + $0x694] ss:$28 sps:$4 sm:$0xff]  }
  0x43   :  { %12552 = vmatmul.mubr.bf16.vlgmr.msra.gmra.mrb[0].mxu1 %v21986_v6  ;;  %v19037_v5 = vld [vmem:[%s28286_s1 + $0x1114] ss:$28 sps:$4 sm:$0xff]  }
  0x44   :  { %12675 = vmatmul.mubr.bf16.vlgmr.msra.gmra.mrb[0].mxu0 %v21988_v7  ;;  %12561 = vmatpush1.bf16.msra.mxu1 %v18945_v8  ;;  %v19032_v8 = vld [vmem:[%s28286_s1 + $0x690] ss:$28 sps:$4 sm:$0xff]  }
  0x45   :  { %12684 = vmatpush1.bf16.msra.mxu0 %v18949_v9  ;;  %12562 = vmatprep.subr.bf16.mxu1 %v18956_v10  ;;  %v19035_v9 = vld [vmem:[%s28286_s1 + $0x1110] ss:$28 sps:$4 sm:$0xff]  }
  0x46   :  { %12685 = vmatprep.subr.bf16.mxu0 %v18959_v11  ;;  %12592 = vmatprep.mubr.bf16.mxu1 %v22077_v35  ;;  %v19040_v10 = vld [vmem:[%s28286_s1 + $0x6cc] ss:$28 sps:$4 sm:$0xff]  }
  0x47   :  { %12715 = vmatprep.mubr.bf16.mxu0 %v22089_v38  ;;  %v19043_v11 = vld [vmem:[%s28286_s1 + $0x114c] ss:$28 sps:$4 sm:$0xff]  }
  0x48   :  { %12563 = vmatpush1.bf16.msra.mxu1 %v18954_v12  ;;  %v19038_v12 = vld [vmem:[%s28286_s1 + $0x6c8] ss:$28 sps:$4 sm:$0xff]  }
  0x49   :  { %12686 = vmatpush1.bf16.msra.mxu0 %v18957_v13  ;;  %12564 = vmatprep.subr.bf16.mxu1 %v18962_v14  ;;  %v19041_v13 = vld [vmem:[%s28286_s1 + $0x1148] ss:$28 sps:$4 sm:$0xff]  }
  0x4a   :  { %12687 = vmatprep.subr.bf16.mxu0 %v18965_v15  ;;  %v19047_v14 = vld [vmem:[%s28286_s1 + $0x704] ss:$28 sps:$4 sm:$0xff]  }
  0x4b   :  { %v19051_v15 = vld [vmem:[%s28286_s1 + $0x1184] ss:$28 sps:$4 sm:$0xff]  }
  0x4c   :  { %12565 = vmatpush1.bf16.msra.mxu1 %v18960_v16  ;;  %v19045_v16 = vld [vmem:[%s28286_s1 + $0x700] ss:$28 sps:$4 sm:$0xff]  }
  0x4d   :  { %12688 = vmatpush1.bf16.msra.mxu0 %v18963_v17  ;;  %12566 = vmatprep.subr.bf16.mxu1 %v18968_v18  ;;  %v19049_v17 = vld [vmem:[%s28286_s1 + $0x1180] ss:$28 sps:$4 sm:$0xff]   ;;  %v22212_v18 = vcombine.low %v22067_v32, %v22067_v32  ;;  %v19068_v32 = vld [vmem:[%s28286_s1 + $0x7ac] ss:$28 sps:$4 sm:$0xff]  }
  0x4e   :  { %12689 = vmatprep.subr.bf16.mxu0 %v18971_v19  ;;  %v22216_v19 = vcombine.low %v22082_v36, %v22082_v36  ;;  %v19069_v36 = vld [vmem:[%s28286_s1 + $0x1228] ss:$28 sps:$4 sm:$0xff]  }
  0x50   :  { %12567 = vmatpush1.bf16.msra.mxu1 %v18966_v20  ;;  %v19056_v20 = vld [vmem:[%s28286_s1 + $0x73c] ss:$28 sps:$4 sm:$0xff]  }
  0x51   :  { %12690 = vmatpush1.bf16.msra.mxu0 %v18969_v21  ;;  %12568 = vmatprep.subr.bf16.mxu1 %v18974_v22  ;;  %v19059_v21 = vld [vmem:[%s28286_s1 + $0x11bc] ss:$28 sps:$4 sm:$0xff]   ;;  %v22227_v22 = vld [vmem:[%s28287_s0 + $0x10] sm:$0xff] }
  0x52   :  { %12691 = vmatprep.subr.bf16.mxu0 %v18977_v23  ;;  %v22232_v23 = vld [vmem:[%s28287_s0 + $0x28] sm:$0xff] }
  0x54   :  { %12569 = vmatpush1.bf16.msra.mxu1 %v18972_v24  ;;  %v22236_v24 = vcombine.high %v22227_v22, %v22227_v22 }
  0x55   :  { %12692 = vmatpush1.bf16.msra.mxu0 %v18975_v25  ;;  %12570 = vmatprep.subr.bf16.mxu1 %v18980_v26  ;;  %v22240_v25 = vcombine.high %v22232_v23, %v22232_v23  ;;  %v19054_v26 = vld [vmem:[%s28286_s1 + $0x738] ss:$28 sps:$4 sm:$0xff]  }
  0x56   :  { %12693 = vmatprep.subr.bf16.mxu0 %v18983_v27  ;;  %v19057_v27 = vld [vmem:[%s28286_s1 + $0x11b8] ss:$28 sps:$4 sm:$0xff]  }
  0x58   :  { %12571 = vmatpush1.bf16.msra.mxu1 %v18978_v28  ;;  %v19062_v28 = vld [vmem:[%s28286_s1 + $0x774] ss:$28 sps:$4 sm:$0xff]  }
  0x59   :  { %12694 = vmatpush1.bf16.msra.mxu0 %v18981_v29  ;;  %12572 = vmatprep.subr.bf16.mxu1 %v18986_v30  ;;  %v19065_v29 = vld [vmem:[%s28286_s1 + $0x11f4] ss:$28 sps:$4 sm:$0xff]  }
  0x5a   :  { %12695 = vmatprep.subr.bf16.mxu0 %v18989_v31  ;;  %v19060_v30 = vld [vmem:[%s28286_s1 + $0x770] ss:$28 sps:$4 sm:$0xff]  }
  0x5b   :  { %v19063_v31 = vld [vmem:[%s28286_s1 + $0x11f0] ss:$28 sps:$4 sm:$0xff]  }
  0x5c   :  { %12573 = vmatpush1.bf16.msra.mxu1 %v18984_v33  ;;  %v19071_v33 = vld [vmem:[%s28286_s1 + $0x122c] ss:$28 sps:$4 sm:$0xff]  }
  0x5d   :  { %12696 = vmatpush1.bf16.msra.mxu0 %v18987_v34  ;;  %12574 = vmatprep.subr.bf16.mxu1 %v18992_v37  ;;  %v19066_v34 = vld [vmem:[%s28286_s1 + $0x7a8] ss:$28 sps:$4 sm:$0xff]  }
  0x5e   :  { %12697 = vmatprep.subr.bf16.mxu0 %v18995_v39  ;;  %v19074_v37 = vld [vmem:[%s28286_s1 + $0x7e4] ss:$28 sps:$4 sm:$0xff]  }
  0x5f   :  { %v19077_v39 = vld [vmem:[%s28286_s1 + $0x1264] ss:$28 sps:$4 sm:$0xff]  }
  0x60   :  { %12575 = vmatpush1.bf16.msra.mxu1 %v18990_v40  ;;  %v19072_v40 = vld [vmem:[%s28286_s1 + $0x7e0] ss:$28 sps:$4 sm:$0xff]  }
  0x61   :  { %12698 = vmatpush1.bf16.msra.mxu0 %v18993_v41  ;;  %12576 = vmatprep.subr.bf16.mxu1 %v18998_v42  ;;  %v19075_v41 = vld [vmem:[%s28286_s1 + $0x1260] ss:$28 sps:$4 sm:$0xff]  }
  0x62   :  { %12699 = vmatprep.subr.bf16.mxu0 %v19001_v43  ;;  %v19080_v42 = vld [vmem:[%s28286_s1 + $0x81c] ss:$28 sps:$4 sm:$0xff]  }
  0x63   :  { %v19083_v43 = vld [vmem:[%s28286_s1 + $0x129c] ss:$28 sps:$4 sm:$0xff]  }
  0x64   :  { %12577 = vmatpush1.bf16.msra.mxu1 %v18996_v44  ;;  %v19078_v44 = vld [vmem:[%s28286_s1 + $0x818] ss:$28 sps:$4 sm:$0xff]  }
  0x65   :  { %12700 = vmatpush1.bf16.msra.mxu0 %v18999_v45  ;;  %12578 = vmatprep.subr.bf16.mxu1 %v19004_v46  ;;  %v19081_v45 = vld [vmem:[%s28286_s1 + $0x1298] ss:$28 sps:$4 sm:$0xff]  }
  0x66   :  { %12701 = vmatprep.subr.bf16.mxu0 %v19007_v47  ;;  %v19086_v46 = vld [vmem:[%s28286_s1 + $0x854] ss:$28 sps:$4 sm:$0xff]  }
  0x67   :  { %v19089_v47 = vld [vmem:[%s28286_s1 + $0x12d4] ss:$28 sps:$4 sm:$0xff]  }
  0x68   :  { %12579 = vmatpush1.bf16.msra.mxu1 %v19002_v49  ;;  %v19084_v49 = vld [vmem:[%s28286_s1 + $0x850] ss:$28 sps:$4 sm:$0xff]  }
  0x69   :  { %12702 = vmatpush1.bf16.msra.mxu0 %v19005_v50  ;;  %12580 = vmatprep.subr.bf16.mxu1 %v19010_v51  ;;  %v19087_v50 = vld [vmem:[%s28286_s1 + $0x12d0] ss:$28 sps:$4 sm:$0xff]  }
  0x6a   :  { %12703 = vmatprep.subr.bf16.mxu0 %v19013_v52  ;;  %v19092_v51 = vld [vmem:[%s28286_s1 + $0x88c] ss:$28 sps:$4 sm:$0xff]  }
  0x6b   :  { %v19095_v52 = vld [vmem:[%s28286_s1 + $0x130c] ss:$28 sps:$4 sm:$0xff]  }
  0x6c   :  { %12581 = vmatpush1.bf16.msra.mxu1 %v19008_v54  ;;  %v19090_v54 = vld [vmem:[%s28286_s1 + $0x888] ss:$28 sps:$4 sm:$0xff]  }
  0x6d   :  { %12704 = vmatpush1.bf16.msra.mxu0 %v19011_v55  ;;  %12582 = vmatprep.subr.bf16.mxu1 %v19016_v56  ;;  %v19093_v55 = vld [vmem:[%s28286_s1 + $0x1308] ss:$28 sps:$4 sm:$0xff]  }
  0x6e   :  { %12705 = vmatprep.subr.bf16.mxu0 %v19019_v57  ;;  %v19098_v56 = vld [vmem:[%s28286_s1 + $0x8c4] ss:$28 sps:$4 sm:$0xff]  }
  0x6f   :  { %v19101_v57 = vld [vmem:[%s28286_s1 + $0x1344] ss:$28 sps:$4 sm:$0xff]  }
  0x70   :  { %12583 = vmatpush1.bf16.msra.mxu1 %v19014_v58  ;;  %v19096_v58 = vld [vmem:[%s28286_s1 + $0x8c0] ss:$28 sps:$4 sm:$0xff]  }
  0x71   :  { %12706 = vmatpush1.bf16.msra.mxu0 %v19017_v59  ;;  %12584 = vmatprep.subr.bf16.mxu1 %v19022_v60  ;;  %v19099_v59 = vld [vmem:[%s28286_s1 + $0x1340] ss:$28 sps:$4 sm:$0xff]  }
  0x72   :  { %12707 = vmatprep.subr.bf16.mxu0 %v19025_v61  ;;  %v19104_v60 = vld [vmem:[%s28286_s1 + $0x8fc] ss:$28 sps:$4 sm:$0xff]  }
  0x73   :  { %v19107_v61 = vld [vmem:[%s28286_s1 + $0x137c] ss:$28 sps:$4 sm:$0xff]  }
  0x74   :  { %12585 = vmatpush1.bf16.msra.mxu1 %v19020_v62  ;;  %v19102_v62 = vld [vmem:[%s28286_s1 + $0x8f8] ss:$28 sps:$4 sm:$0xff]  }
  0x75   :  { %12708 = vmatpush1.bf16.msra.mxu0 %v19023_v63  ;;  %12586 = vmatprep.subr.bf16.mxu1 %v19028_v0  ;;  %v19105_v63 = vld [vmem:[%s28286_s1 + $0x1378] ss:$28 sps:$4 sm:$0xff]  }
  0x76   :  { %12709 = vmatprep.subr.bf16.mxu0 %v19031_v1  ;;  %v19110_v0 = vld [vmem:[%s28286_s1 + $0x934] ss:$28 sps:$4 sm:$0xff]  }
  0x77   :  { %v19113_v1 = vld [vmem:[%s28286_s1 + $0x13b4] ss:$28 sps:$4 sm:$0xff]  }
  0x78   :  { %12587 = vmatpush1.bf16.msra.mxu1 %v19026_v2  ;;  %v19108_v2 = vld [vmem:[%s28286_s1 + $0x930] ss:$28 sps:$4 sm:$0xff]  }
  0x79   :  { %12710 = vmatpush1.bf16.msra.mxu0 %v19029_v3  ;;  %12588 = vmatprep.subr.bf16.mxu1 %v19034_v4  ;;  %v19111_v3 = vld [vmem:[%s28286_s1 + $0x13b0] ss:$28 sps:$4 sm:$0xff]  }
  0x7a   :  { %12711 = vmatprep.subr.bf16.mxu0 %v19037_v5  ;;  %v19116_v4 = vld [vmem:[%s28286_s1 + $0x96c] ss:$28 sps:$4 sm:$0xff]  }
  0x7b   :  { %v19119_v5 = vld [vmem:[%s28286_s1 + $0x13ec] ss:$28 sps:$4 sm:$0xff]  }
  0x7c   :  { %12589 = vmatpush1.bf16.msra.mxu1 %v19032_v8  ;;  %v19114_v8 = vld [vmem:[%s28286_s1 + $0x968] ss:$28 sps:$4 sm:$0xff]  }
  0x7d   :  { %12712 = vmatpush1.bf16.msra.mxu0 %v19035_v9  ;;  %12590 = vmatprep.subr.bf16.mxu1 %v19040_v10  ;;  %v19117_v9 = vld [vmem:[%s28286_s1 + $0x13e8] ss:$28 sps:$4 sm:$0xff]  }
  0x7e   :  { %12713 = vmatprep.subr.bf16.mxu0 %v19043_v11  ;;  %v19122_v10 = vld [vmem:[%s28286_s1 + $0x9a4] ss:$28 sps:$4 sm:$0xff]  }
  0x7f   :  { %v19125_v11 = vld [vmem:[%s28286_s1 + $0x1424] ss:$28 sps:$4 sm:$0xff]  }
  0x80   :  { %12591 = vmatpush1.bf16.msra.mxu1 %v19038_v12  ;;  %v19120_v12 = vld [vmem:[%s28286_s1 + $0x9a0] ss:$28 sps:$4 sm:$0xff]  }
  0x81   :  { %12714 = vmatpush1.bf16.msra.mxu0 %v19041_v13  ;;  %12601 = vmatprep.subr.bf16.mxu1 %v19047_v14  ;;  %v19123_v13 = vld [vmem:[%s28286_s1 + $0x1420] ss:$28 sps:$4 sm:$0xff]  }
  0x82   :  { %12724 = vmatprep.subr.bf16.mxu0 %v19051_v15  ;;  %v19128_v14 = vld [vmem:[%s28286_s1 + $0x9dc] ss:$28 sps:$4 sm:$0xff]  }
  0x83   :  { %12593 = vmatmul.mubr.bf16.vlgmr.msra.gmra.mrb[0].mxu1 %v22212_v18  ;;  %v19131_v15 = vld [vmem:[%s28286_s1 + $0x145c] ss:$28 sps:$4 sm:$0xff]  }
  0x84   :  { %12716 = vmatmul.mubr.bf16.vlgmr.msra.gmra.mrb[0].mxu0 %v22216_v19  ;;  %12602 = vmatpush1.bf16.msra.mxu1 %v19045_v16  ;;  %v19126_v16 = vld [vmem:[%s28286_s1 + $0x9d8] ss:$28 sps:$4 sm:$0xff]  }
  0x85   :  { %12725 = vmatpush1.bf16.msra.mxu0 %v19049_v17  ;;  %12603 = vmatprep.subr.bf16.mxu1 %v19056_v20  ;;  %v19129_v17 = vld [vmem:[%s28286_s1 + $0x1458] ss:$28 sps:$4 sm:$0xff]  }
  0x86   :  { %12726 = vmatprep.subr.bf16.mxu0 %v19059_v21  ;;  %12633 = vmatprep.mubr.bf16.mxu1 %v22236_v24  ;;  %v19134_v20 = vld [vmem:[%s28286_s1 + $0xa14] ss:$28 sps:$4 sm:$0xff]  }
  0x87   :  { %12756 = vmatprep.mubr.bf16.mxu0 %v22240_v25  ;;  %v19137_v21 = vld [vmem:[%s28286_s1 + $0x1494] ss:$28 sps:$4 sm:$0xff]  }
  0x88   :  { %12604 = vmatpush1.bf16.msra.mxu1 %v19054_v26  ;;  %v19132_v26 = vld [vmem:[%s28286_s1 + $0xa10] ss:$28 sps:$4 sm:$0xff]  }
  0x89   :  { %12727 = vmatpush1.bf16.msra.mxu0 %v19057_v27  ;;  %12605 = vmatprep.subr.bf16.mxu1 %v19062_v28  ;;  %v19135_v27 = vld [vmem:[%s28286_s1 + $0x1490] ss:$28 sps:$4 sm:$0xff]  }
  0x8a   :  { %12728 = vmatprep.subr.bf16.mxu0 %v19065_v29  ;;  %v19140_v28 = vld [vmem:[%s28286_s1 + $0xa4c] ss:$28 sps:$4 sm:$0xff]  }
  0x8b   :  { %v19143_v29 = vld [vmem:[%s28286_s1 + $0x14cc] ss:$28 sps:$4 sm:$0xff]  }
  0x8c   :  { %12606 = vmatpush1.bf16.msra.mxu1 %v19060_v30  ;;  %v19138_v30 = vld [vmem:[%s28286_s1 + $0xa48] ss:$28 sps:$4 sm:$0xff]  }
  0x8d   :  { %12729 = vmatpush1.bf16.msra.mxu0 %v19063_v31  ;;  %12607 = vmatprep.subr.bf16.mxu1 %v19068_v32  ;;  %v19141_v31 = vld [vmem:[%s28286_s1 + $0x14c8] ss:$28 sps:$4 sm:$0xff]  }
  0x8e   :  { %12730 = vmatprep.subr.bf16.mxu0 %v19071_v33  ;;  %v19148_v32 = vld [vmem:[%s28286_s1 + $0x1504] ss:$28 sps:$4 sm:$0xff]   ;;  %v19151_v33 = vld [vmem:[%s28286_s1 + $0xc] ss:$28 sps:$4 sm:$0xff]  }
  0x90   :  { %12608 = vmatpush1.bf16.msra.mxu1 %v19066_v34  ;;  %v19146_v34 = vld [vmem:[%s28286_s1 + $0x1500] ss:$28 sps:$4 sm:$0xff]  }
  0x91   :  { %12731 = vmatpush1.bf16.msra.mxu0 %v19069_v36  ;;  %12609 = vmatprep.subr.bf16.mxu1 %v19074_v37  ;;  %v22431_v36 = vcombine.low %v22227_v22, %v22227_v22  ;;  %v22435_v37 = vcombine.low %v22232_v23, %v22232_v23  ;;  %v19156_v22 = vld [vmem:[%s28286_s1 + $0x153c] ss:$28 sps:$4 sm:$0xff]   ;;  %v19159_v23 = vld [vmem:[%s28286_s1 + $0x44] ss:$28 sps:$4 sm:$0xff]  }
  0x92   :  { %12732 = vmatprep.subr.bf16.mxu0 %v19077_v39  ;;  %v22440_v39 = vld [vmem:[%s28287_s0 + $0x30] sm:$0xff] }
  0x94   :  { %12610 = vmatpush1.bf16.msra.mxu1 %v19072_v40  ;;  %v19149_v40 = vld [vmem:[%s28286_s1 + $0x8] ss:$28 sps:$4 sm:$0xff]  }
  0x95   :  { %12733 = vmatpush1.bf16.msra.mxu0 %v19075_v41  ;;  %12611 = vmatprep.subr.bf16.mxu1 %v19080_v42  ;;  %v22453_v41 = vcombine.high %v22440_v39, %v22440_v39  ;;  %v19154_v42 = vld [vmem:[%s28286_s1 + $0x1538] ss:$28 sps:$4 sm:$0xff]  }
  0x96   :  { %12734 = vmatprep.subr.bf16.mxu0 %v19083_v43  ;;  %v19157_v43 = vld [vmem:[%s28286_s1 + $0x40] ss:$28 sps:$4 sm:$0xff]  }
  0x98   :  { %12612 = vmatpush1.bf16.msra.mxu1 %v19078_v44  ;;  %v19162_v44 = vld [vmem:[%s28286_s1 + $0x1574] ss:$28 sps:$4 sm:$0xff]  }
  0x99   :  { %12735 = vmatpush1.bf16.msra.mxu0 %v19081_v45  ;;  %12613 = vmatprep.subr.bf16.mxu1 %v19086_v46  ;;  %v19165_v45 = vld [vmem:[%s28286_s1 + $0x7c] ss:$28 sps:$4 sm:$0xff]   ;;  %v19160_v46 = vld [vmem:[%s28286_s1 + $0x1570] ss:$28 sps:$4 sm:$0xff]  }
  0x9a   :  { %12736 = vmatprep.subr.bf16.mxu0 %v19089_v47  ;;  %v19163_v47 = vld [vmem:[%s28286_s1 + $0x78] ss:$28 sps:$4 sm:$0xff]  }
  0x9c   :  { %12614 = vmatpush1.bf16.msra.mxu1 %v19084_v49  ;;  %v19168_v49 = vld [vmem:[%s28286_s1 + $0x15ac] ss:$28 sps:$4 sm:$0xff]  }
  0x9d   :  { %12737 = vmatpush1.bf16.msra.mxu0 %v19087_v50  ;;  %12615 = vmatprep.subr.bf16.mxu1 %v19092_v51  ;;  %v19171_v50 = vld [vmem:[%s28286_s1 + $0xb4] ss:$28 sps:$4 sm:$0xff]   ;;  %v19166_v51 = vld [vmem:[%s28286_s1 + $0x15a8] ss:$28 sps:$4 sm:$0xff]  }
  0x9e   :  { %12738 = vmatprep.subr.bf16.mxu0 %v19095_v52  ;;  %v19169_v52 = vld [vmem:[%s28286_s1 + $0xb0] ss:$28 sps:$4 sm:$0xff]  }
  0xa0   :  { %12616 = vmatpush1.bf16.msra.mxu1 %v19090_v54  ;;  %v19174_v54 = vld [vmem:[%s28286_s1 + $0x15e4] ss:$28 sps:$4 sm:$0xff]  }
  0xa1   :  { %12739 = vmatpush1.bf16.msra.mxu0 %v19093_v55  ;;  %12617 = vmatprep.subr.bf16.mxu1 %v19098_v56  ;;  %v19177_v55 = vld [vmem:[%s28286_s1 + $0xec] ss:$28 sps:$4 sm:$0xff]   ;;  %v19172_v56 = vld [vmem:[%s28286_s1 + $0x15e0] ss:$28 sps:$4 sm:$0xff]  }
  0xa2   :  { %12740 = vmatprep.subr.bf16.mxu0 %v19101_v57  ;;  %v19175_v57 = vld [vmem:[%s28286_s1 + $0xe8] ss:$28 sps:$4 sm:$0xff]  }
  0xa4   :  { %12618 = vmatpush1.bf16.msra.mxu1 %v19096_v58  ;;  %v19180_v58 = vld [vmem:[%s28286_s1 + $0x161c] ss:$28 sps:$4 sm:$0xff]  }
  0xa5   :  { %12741 = vmatpush1.bf16.msra.mxu0 %v19099_v59  ;;  %12619 = vmatprep.subr.bf16.mxu1 %v19104_v60  ;;  %v19183_v59 = vld [vmem:[%s28286_s1 + $0x124] ss:$28 sps:$4 sm:$0xff]   ;;  %v19178_v60 = vld [vmem:[%s28286_s1 + $0x1618] ss:$28 sps:$4 sm:$0xff]  }
  0xa6   :  { %12742 = vmatprep.subr.bf16.mxu0 %v19107_v61  ;;  %v19181_v61 = vld [vmem:[%s28286_s1 + $0x120] ss:$28 sps:$4 sm:$0xff]  }
  0xa8   :  { %12620 = vmatpush1.bf16.msra.mxu1 %v19102_v62  ;;  %v19186_v62 = vld [vmem:[%s28286_s1 + $0x1654] ss:$28 sps:$4 sm:$0xff]  }
  0xa9   :  { %12743 = vmatpush1.bf16.msra.mxu0 %v19105_v63  ;;  %12621 = vmatprep.subr.bf16.mxu1 %v19110_v0  ;;  %v19189_v63 = vld [vmem:[%s28286_s1 + $0x15c] ss:$28 sps:$4 sm:$0xff]   ;;  %v19184_v0 = vld [vmem:[%s28286_s1 + $0x1650] ss:$28 sps:$4 sm:$0xff]  }
  0xaa   :  { %12744 = vmatprep.subr.bf16.mxu0 %v19113_v1  ;;  %v19187_v1 = vld [vmem:[%s28286_s1 + $0x158] ss:$28 sps:$4 sm:$0xff]  }
  0xac   :  { %12622 = vmatpush1.bf16.msra.mxu1 %v19108_v2  ;;  %v19192_v2 = vld [vmem:[%s28286_s1 + $0x168c] ss:$28 sps:$4 sm:$0xff]  }
  0xad   :  { %12745 = vmatpush1.bf16.msra.mxu0 %v19111_v3  ;;  %12623 = vmatprep.subr.bf16.mxu1 %v19116_v4  ;;  %v19195_v3 = vld [vmem:[%s28286_s1 + $0x194] ss:$28 sps:$4 sm:$0xff]   ;;  %v19190_v4 = vld [vmem:[%s28286_s1 + $0x1688] ss:$28 sps:$4 sm:$0xff]  }
  0xae   :  { %12746 = vmatprep.subr.bf16.mxu0 %v19119_v5  ;;  %v19193_v5 = vld [vmem:[%s28286_s1 + $0x190] ss:$28 sps:$4 sm:$0xff]  }
  0xb0   :  { %12624 = vmatpush1.bf16.msra.mxu1 %v19114_v8  ;;  %v19198_v8 = vld [vmem:[%s28286_s1 + $0x16c4] ss:$28 sps:$4 sm:$0xff]  }
  0xb1   :  { %12747 = vmatpush1.bf16.msra.mxu0 %v19117_v9  ;;  %12625 = vmatprep.subr.bf16.mxu1 %v19122_v10  ;;  %v19201_v9 = vld [vmem:[%s28286_s1 + $0x1cc] ss:$28 sps:$4 sm:$0xff]   ;;  %v19196_v10 = vld [vmem:[%s28286_s1 + $0x16c0] ss:$28 sps:$4 sm:$0xff]  }
  0xb2   :  { %12748 = vmatprep.subr.bf16.mxu0 %v19125_v11  ;;  %v19199_v11 = vld [vmem:[%s28286_s1 + $0x1c8] ss:$28 sps:$4 sm:$0xff]  }
  0xb4   :  { %12626 = vmatpush1.bf16.msra.mxu1 %v19120_v12  ;;  %v19204_v12 = vld [vmem:[%s28286_s1 + $0x16fc] ss:$28 sps:$4 sm:$0xff]  }
  0xb5   :  { %12749 = vmatpush1.bf16.msra.mxu0 %v19123_v13  ;;  %12627 = vmatprep.subr.bf16.mxu1 %v19128_v14  ;;  %v19207_v13 = vld [vmem:[%s28286_s1 + $0x204] ss:$28 sps:$4 sm:$0xff]   ;;  %v19202_v14 = vld [vmem:[%s28286_s1 + $0x16f8] ss:$28 sps:$4 sm:$0xff]  }
  0xb6   :  { %12750 = vmatprep.subr.bf16.mxu0 %v19131_v15  ;;  %v19205_v15 = vld [vmem:[%s28286_s1 + $0x200] ss:$28 sps:$4 sm:$0xff]  }
  0xb8   :  { %12628 = vmatpush1.bf16.msra.mxu1 %v19126_v16  ;;  %v19210_v16 = vld [vmem:[%s28286_s1 + $0x1734] ss:$28 sps:$4 sm:$0xff]  }
  0xb9   :  { %12751 = vmatpush1.bf16.msra.mxu0 %v19129_v17  ;;  %12629 = vmatprep.subr.bf16.mxu1 %v19134_v20  ;;  %v19213_v17 = vld [vmem:[%s28286_s1 + $0x23c] ss:$28 sps:$4 sm:$0xff]   ;;  %v19208_v20 = vld [vmem:[%s28286_s1 + $0x1730] ss:$28 sps:$4 sm:$0xff]  }
  0xba   :  { %12752 = vmatprep.subr.bf16.mxu0 %v19137_v21  ;;  %v19211_v21 = vld [vmem:[%s28286_s1 + $0x238] ss:$28 sps:$4 sm:$0xff]  }
  0xbc   :  { %12630 = vmatpush1.bf16.msra.mxu1 %v19132_v26  ;;  %v19216_v26 = vld [vmem:[%s28286_s1 + $0x176c] ss:$28 sps:$4 sm:$0xff]  }
  0xbd   :  { %12753 = vmatpush1.bf16.msra.mxu0 %v19135_v27  ;;  %12631 = vmatprep.subr.bf16.mxu1 %v19140_v28  ;;  %v19219_v27 = vld [vmem:[%s28286_s1 + $0x274] ss:$28 sps:$4 sm:$0xff]   ;;  %v19214_v28 = vld [vmem:[%s28286_s1 + $0x1768] ss:$28 sps:$4 sm:$0xff]  }
  0xbe   :  { %12754 = vmatprep.subr.bf16.mxu0 %v19143_v29  ;;  %v19217_v29 = vld [vmem:[%s28286_s1 + $0x270] ss:$28 sps:$4 sm:$0xff]  }
  0xc0   :  { %12632 = vmatpush1.bf16.msra.mxu1 %v19138_v30  ;;  %v19222_v30 = vld [vmem:[%s28286_s1 + $0x17a4] ss:$28 sps:$4 sm:$0xff]  }
  0xc1   :  { %12755 = vmatpush1.bf16.msra.mxu0 %v19141_v31  ;;  %13257 = vmatprep.subr.bf16.mxu1 %v19151_v33  ;;  %v19225_v31 = vld [vmem:[%s28286_s1 + $0x2ac] ss:$28 sps:$4 sm:$0xff]  }
  0xc2   :  { %12765 = vmatprep.subr.bf16.mxu0 %v19148_v32  ;;  %v19220_v32 = vld [vmem:[%s28286_s1 + $0x17a0] ss:$28 sps:$4 sm:$0xff]   ;;  %v19223_v33 = vld [vmem:[%s28286_s1 + $0x2a8] ss:$28 sps:$4 sm:$0xff]  }
  0xc3   :  { %12634 = vmatmul.mubr.bf16.vlgmr.msra.gmra.mrb[0].mxu1 %v22431_v36 }
  0xc4   :  { %12757 = vmatmul.mubr.bf16.vlgmr.msra.gmra.mrb[0].mxu0 %v22435_v37  ;;  %13258 = vmatpush1.bf16.msra.mxu1 %v19149_v40  ;;  %v19231_v40 = vld [vmem:[%s28286_s1 + $0x2e4] ss:$28 sps:$4 sm:$0xff]  }
  0xc5   :  { %12766 = vmatpush1.bf16.msra.mxu0 %v19146_v34  ;;  %13259 = vmatprep.subr.bf16.mxu1 %v19159_v23  ;;  %v19228_v34 = vld [vmem:[%s28286_s1 + $0x17dc] ss:$28 sps:$4 sm:$0xff]  }
  0xc6   :  { %12767 = vmatprep.subr.bf16.mxu0 %v19156_v22  ;;  %12797 = vmatprep.mubr.bf16.mxu0 %v22453_v41  ;;  %v19226_v22 = vld [vmem:[%s28286_s1 + $0x17d8] ss:$28 sps:$4 sm:$0xff]   ;;  %v19229_v23 = vld [vmem:[%s28286_s1 + $0x2e0] ss:$28 sps:$4 sm:$0xff]  }
  0xc7   :  { %13289 = vmatprep.mubr.bf16.mxu1 %v21920_v48 }
  0xc8   :  { %13260 = vmatpush1.bf16.msra.mxu1 %v19157_v43  ;;  %v19237_v43 = vld [vmem:[%s28286_s1 + $0x31c] ss:$28 sps:$4 sm:$0xff]  }
  0xc9   :  { %12768 = vmatpush1.bf16.msra.mxu0 %v19154_v42  ;;  %13261 = vmatprep.subr.bf16.mxu1 %v19165_v45  ;;  %v19234_v42 = vld [vmem:[%s28286_s1 + $0x1814] ss:$28 sps:$4 sm:$0xff]  }
  0xca   :  { %12769 = vmatprep.subr.bf16.mxu0 %v19162_v44  ;;  %v19232_v44 = vld [vmem:[%s28286_s1 + $0x1810] ss:$28 sps:$4 sm:$0xff]   ;;  %v19235_v45 = vld [vmem:[%s28286_s1 + $0x318] ss:$28 sps:$4 sm:$0xff]  }
  0xcc   :  { %13262 = vmatpush1.bf16.msra.mxu1 %v19163_v47  ;;  %v19243_v47 = vld [vmem:[%s28286_s1 + $0x354] ss:$28 sps:$4 sm:$0xff]  }
  0xcd   :  { %12770 = vmatpush1.bf16.msra.mxu0 %v19160_v46  ;;  %13263 = vmatprep.subr.bf16.mxu1 %v19171_v50  ;;  %v19240_v46 = vld [vmem:[%s28286_s1 + $0x184c] ss:$28 sps:$4 sm:$0xff]  }
  0xce   :  { %12771 = vmatprep.subr.bf16.mxu0 %v19168_v49  ;;  %v19238_v49 = vld [vmem:[%s28286_s1 + $0x1848] ss:$28 sps:$4 sm:$0xff]   ;;  %v19241_v50 = vld [vmem:[%s28286_s1 + $0x350] ss:$28 sps:$4 sm:$0xff]  }
  0xd0   :  { %13264 = vmatpush1.bf16.msra.mxu1 %v19169_v52  ;;  %v19250_v52 = vld [vmem:[%s28286_s1 + $0x38c] ss:$28 sps:$4 sm:$0xff]  }
  0xd1   :  { %12772 = vmatpush1.bf16.msra.mxu0 %v19166_v51  ;;  %13265 = vmatprep.subr.bf16.mxu1 %v19177_v55  ;;  %v19247_v51 = vld [vmem:[%s28286_s1 + $0x1884] ss:$28 sps:$4 sm:$0xff]  }
  0xd2   :  { %12773 = vmatprep.subr.bf16.mxu0 %v19174_v54  ;;  %v19245_v54 = vld [vmem:[%s28286_s1 + $0x1880] ss:$28 sps:$4 sm:$0xff]   ;;  %v19248_v55 = vld [vmem:[%s28286_s1 + $0x388] ss:$28 sps:$4 sm:$0xff]  }
  0xd4   :  { %13266 = vmatpush1.bf16.msra.mxu1 %v19175_v57  ;;  %v22652_v57 = vld [vmem:[%s28287_s0 + $0x38] sm:$0xff] }
  0xd5   :  { %12774 = vmatpush1.bf16.msra.mxu0 %v19172_v56  ;;  %13267 = vmatprep.subr.bf16.mxu1 %v19183_v59  ;;  %v22647_v56 = vcombine.low %v22440_v39, %v22440_v39  ;;  %v19257_v59 = vld [vmem:[%s28286_s1 + $0x3c4] ss:$28 sps:$4 sm:$0xff]   ;;  %v22662_v39 = vcombine.high %v22652_v57, %v22652_v57 }
  0xd6   :  { %12775 = vmatprep.subr.bf16.mxu0 %v19180_v58  ;;  %v19254_v58 = vld [vmem:[%s28286_s1 + $0x18bc] ss:$28 sps:$4 sm:$0xff]  }
  0xd8   :  { %13268 = vmatpush1.bf16.msra.mxu1 %v19181_v61  ;;  %v19255_v61 = vld [vmem:[%s28286_s1 + $0x3c0] ss:$28 sps:$4 sm:$0xff]  }
  0xd9   :  { %12776 = vmatpush1.bf16.msra.mxu0 %v19178_v60  ;;  %13269 = vmatprep.subr.bf16.mxu1 %v19189_v63  ;;  %v19252_v60 = vld [vmem:[%s28286_s1 + $0x18b8] ss:$28 sps:$4 sm:$0xff]  }
  0xda   :  { %12777 = vmatprep.subr.bf16.mxu0 %v19186_v62  ;;  %v19260_v62 = vld [vmem:[%s28286_s1 + $0x18f4] ss:$28 sps:$4 sm:$0xff]   ;;  %v19263_v63 = vld [vmem:[%s28286_s1 + $0x3fc] ss:$28 sps:$4 sm:$0xff]  }
  0xdc   :  { %13270 = vmatpush1.bf16.msra.mxu1 %v19187_v1  ;;  %v19261_v1 = vld [vmem:[%s28286_s1 + $0x3f8] ss:$28 sps:$4 sm:$0xff]  }
  0xdd   :  { %12778 = vmatpush1.bf16.msra.mxu0 %v19184_v0  ;;  %13271 = vmatprep.subr.bf16.mxu1 %v19195_v3  ;;  %v19258_v0 = vld [vmem:[%s28286_s1 + $0x18f0] ss:$28 sps:$4 sm:$0xff]  }
  0xde   :  { %12779 = vmatprep.subr.bf16.mxu0 %v19192_v2  ;;  %v19266_v2 = vld [vmem:[%s28286_s1 + $0x192c] ss:$28 sps:$4 sm:$0xff]   ;;  %v19269_v3 = vld [vmem:[%s28286_s1 + $0x434] ss:$28 sps:$4 sm:$0xff]  }
  0xe0   :  { %13272 = vmatpush1.bf16.msra.mxu1 %v19193_v5  ;;  %v19267_v5 = vld [vmem:[%s28286_s1 + $0x430] ss:$28 sps:$4 sm:$0xff]  }
  0xe1   :  { %12780 = vmatpush1.bf16.msra.mxu0 %v19190_v4  ;;  %13273 = vmatprep.subr.bf16.mxu1 %v19201_v9  ;;  %v19264_v4 = vld [vmem:[%s28286_s1 + $0x1928] ss:$28 sps:$4 sm:$0xff]  }
  0xe2   :  { %12781 = vmatprep.subr.bf16.mxu0 %v19198_v8  ;;  %v19272_v8 = vld [vmem:[%s28286_s1 + $0x1964] ss:$28 sps:$4 sm:$0xff]   ;;  %v19275_v9 = vld [vmem:[%s28286_s1 + $0x46c] ss:$28 sps:$4 sm:$0xff]  }
  0xe4   :  { %13274 = vmatpush1.bf16.msra.mxu1 %v19199_v11  ;;  %v19273_v11 = vld [vmem:[%s28286_s1 + $0x468] ss:$28 sps:$4 sm:$0xff]  }
  0xe5   :  { %12782 = vmatpush1.bf16.msra.mxu0 %v19196_v10  ;;  %13275 = vmatprep.subr.bf16.mxu1 %v19207_v13  ;;  %v19270_v10 = vld [vmem:[%s28286_s1 + $0x1960] ss:$28 sps:$4 sm:$0xff]  }
  0xe6   :  { %12783 = vmatprep.subr.bf16.mxu0 %v19204_v12  ;;  %v19278_v12 = vld [vmem:[%s28286_s1 + $0x199c] ss:$28 sps:$4 sm:$0xff]   ;;  %v19281_v13 = vld [vmem:[%s28286_s1 + $0x4a4] ss:$28 sps:$4 sm:$0xff]  }
  0xe8   :  { %13276 = vmatpush1.bf16.msra.mxu1 %v19205_v15  ;;  %v19279_v15 = vld [vmem:[%s28286_s1 + $0x4a0] ss:$28 sps:$4 sm:$0xff]  }
  0xe9   :  { %12784 = vmatpush1.bf16.msra.mxu0 %v19202_v14  ;;  %13277 = vmatprep.subr.bf16.mxu1 %v19213_v17  ;;  %v19276_v14 = vld [vmem:[%s28286_s1 + $0x1998] ss:$28 sps:$4 sm:$0xff]  }
  0xea   :  { %12785 = vmatprep.subr.bf16.mxu0 %v19210_v16  ;;  %v19284_v16 = vld [vmem:[%s28286_s1 + $0x19d4] ss:$28 sps:$4 sm:$0xff]   ;;  %v19287_v17 = vld [vmem:[%s28286_s1 + $0x4dc] ss:$28 sps:$4 sm:$0xff]  }
  0xec   :  { %13278 = vmatpush1.bf16.msra.mxu1 %v19211_v21  ;;  %v19285_v21 = vld [vmem:[%s28286_s1 + $0x4d8] ss:$28 sps:$4 sm:$0xff]  }
  0xed   :  { %12786 = vmatpush1.bf16.msra.mxu0 %v19208_v20  ;;  %13279 = vmatprep.subr.bf16.mxu1 %v19219_v27  ;;  %v19282_v20 = vld [vmem:[%s28286_s1 + $0x19d0] ss:$28 sps:$4 sm:$0xff]  }
  0xee   :  { %12787 = vmatprep.subr.bf16.mxu0 %v19216_v26  ;;  %v19290_v26 = vld [vmem:[%s28286_s1 + $0x1a0c] ss:$28 sps:$4 sm:$0xff]   ;;  %v19293_v27 = vld [vmem:[%s28286_s1 + $0x514] ss:$28 sps:$4 sm:$0xff]  }
  0xf0   :  { %13280 = vmatpush1.bf16.msra.mxu1 %v19217_v29  ;;  %v19291_v29 = vld [vmem:[%s28286_s1 + $0x510] ss:$28 sps:$4 sm:$0xff]  }
  0xf1   :  { %12788 = vmatpush1.bf16.msra.mxu0 %v19214_v28  ;;  %13281 = vmatprep.subr.bf16.mxu1 %v19225_v31  ;;  %v19288_v28 = vld [vmem:[%s28286_s1 + $0x1a08] ss:$28 sps:$4 sm:$0xff]  }
  0xf2   :  { %12789 = vmatprep.subr.bf16.mxu0 %v19222_v30  ;;  %v19296_v30 = vld [vmem:[%s28286_s1 + $0x1a44] ss:$28 sps:$4 sm:$0xff]   ;;  %v19299_v31 = vld [vmem:[%s28286_s1 + $0x54c] ss:$28 sps:$4 sm:$0xff]  }
  0xf4   :  { %13282 = vmatpush1.bf16.msra.mxu1 %v19223_v33  ;;  %v19297_v33 = vld [vmem:[%s28286_s1 + $0x548] ss:$28 sps:$4 sm:$0xff]  }
  0xf5   :  { %12790 = vmatpush1.bf16.msra.mxu0 %v19220_v32  ;;  %13283 = vmatprep.subr.bf16.mxu1 %v19231_v40  ;;  %v19294_v32 = vld [vmem:[%s28286_s1 + $0x1a40] ss:$28 sps:$4 sm:$0xff]  }
  0xf6   :  { %12791 = vmatprep.subr.bf16.mxu0 %v19228_v34  ;;  %v19302_v34 = vld [vmem:[%s28286_s1 + $0x1a7c] ss:$28 sps:$4 sm:$0xff]   ;;  %v19305_v40 = vld [vmem:[%s28286_s1 + $0x584] ss:$28 sps:$4 sm:$0xff]  }
  0xf8   :  { %13284 = vmatpush1.bf16.msra.mxu1 %v19229_v23  ;;  %v19303_v23 = vld [vmem:[%s28286_s1 + $0x580] ss:$28 sps:$4 sm:$0xff]  }
  0xf9   :  { %12792 = vmatpush1.bf16.msra.mxu0 %v19226_v22  ;;  %13285 = vmatprep.subr.bf16.mxu1 %v19237_v43  ;;  %v19300_v22 = vld [vmem:[%s28286_s1 + $0x1a78] ss:$28 sps:$4 sm:$0xff]  }
  0xfa   :  { %12793 = vmatprep.subr.bf16.mxu0 %v19234_v42  ;;  %v19308_v42 = vld [vmem:[%s28286_s1 + $0x1ab4] ss:$28 sps:$4 sm:$0xff]   ;;  %v19311_v43 = vld [vmem:[%s28286_s1 + $0x5bc] ss:$28 sps:$4 sm:$0xff]  }
  0xfc   :  { %13286 = vmatpush1.bf16.msra.mxu1 %v19235_v45  ;;  %v19309_v45 = vld [vmem:[%s28286_s1 + $0x5b8] ss:$28 sps:$4 sm:$0xff]  }
  0xfd   :  { %12794 = vmatpush1.bf16.msra.mxu0 %v19232_v44  ;;  %13287 = vmatprep.subr.bf16.mxu1 %v19243_v47  ;;  %v19306_v44 = vld [vmem:[%s28286_s1 + $0x1ab0] ss:$28 sps:$4 sm:$0xff]  }
  0xfe   :  { %12795 = vmatprep.subr.bf16.mxu0 %v19240_v46  ;;  %v19314_v46 = vld [vmem:[%s28286_s1 + $0x1aec] ss:$28 sps:$4 sm:$0xff]   ;;  %v19317_v47 = vld [vmem:[%s28286_s1 + $0x5f4] ss:$28 sps:$4 sm:$0xff]  }
 0x100   :  { %13288 = vmatpush1.bf16.msra.mxu1 %v19241_v50  ;;  %v19315_v50 = vld [vmem:[%s28286_s1 + $0x5f0] ss:$28 sps:$4 sm:$0xff]  }
 0x101   :  { %12796 = vmatpush1.bf16.msra.mxu0 %v19238_v49  ;;  %13298 = vmatprep.subr.bf16.mxu1 %v19250_v52  ;;  %v19312_v49 = vld [vmem:[%s28286_s1 + $0x1ae8] ss:$28 sps:$4 sm:$0xff]  }
 0x102   :  { %12806 = vmatprep.subr.bf16.mxu0 %v19247_v51  ;;  %v19320_v51 = vld [vmem:[%s28286_s1 + $0x1b24] ss:$28 sps:$4 sm:$0xff]   ;;  %v19323_v52 = vld [vmem:[%s28286_s1 + $0x62c] ss:$28 sps:$4 sm:$0xff]  }
 0x103   :  { %13290 = vmatmul.mubr.bf16.vlgmr.msra.gmra.mrb[4].mxu1 %v21986_v6 }
 0x104   :  { %12798 = vmatmul.mubr.bf16.vlgmr.msra.gmra.mrb[0].mxu0 %v22647_v56  ;;  %13299 = vmatpush1.bf16.msra.mxu1 %v19248_v55  ;;  %v19321_v55 = vld [vmem:[%s28286_s1 + $0x628] ss:$28 sps:$4 sm:$0xff]  }
 0x105   :  { %12807 = vmatpush1.bf16.msra.mxu0 %v19245_v54  ;;  %13300 = vmatprep.subr.bf16.mxu1 %v19257_v59  ;;  %v19318_v54 = vld [vmem:[%s28286_s1 + $0x1b20] ss:$28 sps:$4 sm:$0xff]  }
 0x106   :  { %12808 = vmatprep.subr.bf16.mxu0 %v19254_v58  ;;  %12838 = vmatprep.mubr.bf16.mxu0 %v22662_v39  ;;  %v19326_v58 = vld [vmem:[%s28286_s1 + $0x1b5c] ss:$28 sps:$4 sm:$0xff]   ;;  %v19329_v59 = vld [vmem:[%s28286_s1 + $0x664] ss:$28 sps:$4 sm:$0xff]  }
 0x107   :  { %13330 = vmatprep.mubr.bf16.mxu1 %v22077_v35 }
 0x108   :  { %13301 = vmatpush1.bf16.msra.mxu1 %v19255_v61  ;;  %v19327_v61 = vld [vmem:[%s28286_s1 + $0x660] ss:$28 sps:$4 sm:$0xff]  }
 0x109   :  { %12809 = vmatpush1.bf16.msra.mxu0 %v19252_v60  ;;  %13302 = vmatprep.subr.bf16.mxu1 %v19263_v63  ;;  %v19324_v60 = vld [vmem:[%s28286_s1 + $0x1b58] ss:$28 sps:$4 sm:$0xff]  }
 0x10a   :  { %12810 = vmatprep.subr.bf16.mxu0 %v19260_v62  ;;  %v19332_v62 = vld [vmem:[%s28286_s1 + $0x1b94] ss:$28 sps:$4 sm:$0xff]   ;;  %v19335_v63 = vld [vmem:[%s28286_s1 + $0x69c] ss:$28 sps:$4 sm:$0xff]  }
 0x10c   :  { %13303 = vmatpush1.bf16.msra.mxu1 %v19261_v1  ;;  %v19333_v1 = vld [vmem:[%s28286_s1 + $0x698] ss:$28 sps:$4 sm:$0xff]  }
 0x10d   :  { %12811 = vmatpush1.bf16.msra.mxu0 %v19258_v0  ;;  %13304 = vmatprep.subr.bf16.mxu1 %v19269_v3  ;;  %v19330_v0 = vld [vmem:[%s28286_s1 + $0x1b90] ss:$28 sps:$4 sm:$0xff]  }
 0x10e   :  { %12812 = vmatprep.subr.bf16.mxu0 %v19266_v2  ;;  %v19338_v2 = vld [vmem:[%s28286_s1 + $0x1bcc] ss:$28 sps:$4 sm:$0xff]   ;;  %v19341_v3 = vld [vmem:[%s28286_s1 + $0x6d4] ss:$28 sps:$4 sm:$0xff]  }
 0x110   :  { %13305 = vmatpush1.bf16.msra.mxu1 %v19267_v5  ;;  %v19339_v5 = vld [vmem:[%s28286_s1 + $0x6d0] ss:$28 sps:$4 sm:$0xff]  }
 0x111   :  { %12813 = vmatpush1.bf16.msra.mxu0 %v19264_v4  ;;  %13306 = vmatprep.subr.bf16.mxu1 %v19275_v9  ;;  %v19336_v4 = vld [vmem:[%s28286_s1 + $0x1bc8] ss:$28 sps:$4 sm:$0xff]  }
 0x112   :  { %12814 = vmatprep.subr.bf16.mxu0 %v19272_v8  ;;  %v19345_v8 = vld [vmem:[%s28286_s1 + $0x1c04] ss:$28 sps:$4 sm:$0xff]   ;;  %v19348_v9 = vld [vmem:[%s28286_s1 + $0x70c] ss:$28 sps:$4 sm:$0xff]  }
 0x114   :  { %13307 = vmatpush1.bf16.msra.mxu1 %v19273_v11  ;;  %v22855_v11 = vcombine.low %v22652_v57, %v22652_v57  ;;  %v19355_v57 = vld [vmem:[%s28286_s1 + $0x744] ss:$28 sps:$4 sm:$0xff]  }
 0x115   :  { %12815 = vmatpush1.bf16.msra.mxu0 %v19270_v10  ;;  %13308 = vmatprep.subr.bf16.mxu1 %v19281_v13  ;;  %v22851_v10 = vld [vmem:[%s28287_s0 + $0x40] sm:$0xff] }
 0x116   :  { %12816 = vmatprep.subr.bf16.mxu0 %v19278_v12  ;;  %v19343_v12 = vld [vmem:[%s28286_s1 + $0x1c00] ss:$28 sps:$4 sm:$0xff]   ;;  %v19346_v13 = vld [vmem:[%s28286_s1 + $0x708] ss:$28 sps:$4 sm:$0xff]  }
 0x118   :  { %13309 = vmatpush1.bf16.msra.mxu1 %v19279_v15  ;;  %v22871_v15 = vcombine.high %v22851_v10, %v22851_v10 }
 0x119   :  { %12817 = vmatpush1.bf16.msra.mxu0 %v19276_v14  ;;  %13310 = vmatprep.subr.bf16.mxu1 %v19287_v17  ;;  %v19352_v14 = vld [vmem:[%s28286_s1 + $0x1c3c] ss:$28 sps:$4 sm:$0xff]  }
 0x11a   :  { %12818 = vmatprep.subr.bf16.mxu0 %v19284_v16  ;;  %v19350_v16 = vld [vmem:[%s28286_s1 + $0x1c38] ss:$28 sps:$4 sm:$0xff]   ;;  %v19353_v17 = vld [vmem:[%s28286_s1 + $0x740] ss:$28 sps:$4 sm:$0xff]  }
 0x11c   :  { %13311 = vmatpush1.bf16.msra.mxu1 %v19285_v21  ;;  %v19361_v21 = vld [vmem:[%s28286_s1 + $0x77c] ss:$28 sps:$4 sm:$0xff]  }
 0x11d   :  { %12819 = vmatpush1.bf16.msra.mxu0 %v19282_v20  ;;  %13312 = vmatprep.subr.bf16.mxu1 %v19293_v27  ;;  %v19358_v20 = vld [vmem:[%s28286_s1 + $0x1c74] ss:$28 sps:$4 sm:$0xff]  }
 0x11e   :  { %12820 = vmatprep.subr.bf16.mxu0 %v19290_v26  ;;  %v19356_v26 = vld [vmem:[%s28286_s1 + $0x1c70] ss:$28 sps:$4 sm:$0xff]   ;;  %v19359_v27 = vld [vmem:[%s28286_s1 + $0x778] ss:$28 sps:$4 sm:$0xff]  }
 0x120   :  { %13313 = vmatpush1.bf16.msra.mxu1 %v19291_v29  ;;  %v19367_v29 = vld [vmem:[%s28286_s1 + $0x7b4] ss:$28 sps:$4 sm:$0xff]  }
 0x121   :  { %12821 = vmatpush1.bf16.msra.mxu0 %v19288_v28  ;;  %13314 = vmatprep.subr.bf16.mxu1 %v19299_v31  ;;  %v19364_v28 = vld [vmem:[%s28286_s1 + $0x1cac] ss:$28 sps:$4 sm:$0xff]  }
 0x122   :  { %12822 = vmatprep.subr.bf16.mxu0 %v19296_v30  ;;  %v19362_v30 = vld [vmem:[%s28286_s1 + $0x1ca8] ss:$28 sps:$4 sm:$0xff]   ;;  %v19365_v31 = vld [vmem:[%s28286_s1 + $0x7b0] ss:$28 sps:$4 sm:$0xff]  }
 0x124   :  { %13315 = vmatpush1.bf16.msra.mxu1 %v19297_v33  ;;  %v19373_v33 = vld [vmem:[%s28286_s1 + $0x7ec] ss:$28 sps:$4 sm:$0xff]  }
 0x125   :  { %12823 = vmatpush1.bf16.msra.mxu0 %v19294_v32  ;;  %13316 = vmatprep.subr.bf16.mxu1 %v19305_v40  ;;  %v19370_v32 = vld [vmem:[%s28286_s1 + $0x1ce4] ss:$28 sps:$4 sm:$0xff]  }
 0x126   :  { %12824 = vmatprep.subr.bf16.mxu0 %v19302_v34  ;;  %v19368_v34 = vld [vmem:[%s28286_s1 + $0x1ce0] ss:$28 sps:$4 sm:$0xff]   ;;  %v19371_v40 = vld [vmem:[%s28286_s1 + $0x7e8] ss:$28 sps:$4 sm:$0xff]  }
 0x128   :  { %13317 = vmatpush1.bf16.msra.mxu1 %v19303_v23  ;;  %v19379_v23 = vld [vmem:[%s28286_s1 + $0x824] ss:$28 sps:$4 sm:$0xff]  }
 0x129   :  { %12825 = vmatpush1.bf16.msra.mxu0 %v19300_v22  ;;  %13318 = vmatprep.subr.bf16.mxu1 %v19311_v43  ;;  %v19376_v22 = vld [vmem:[%s28286_s1 + $0x1d1c] ss:$28 sps:$4 sm:$0xff]  }
 0x12a   :  { %12826 = vmatprep.subr.bf16.mxu0 %v19308_v42  ;;  %v19374_v42 = vld [vmem:[%s28286_s1 + $0x1d18] ss:$28 sps:$4 sm:$0xff]   ;;  %v19377_v43 = vld [vmem:[%s28286_s1 + $0x820] ss:$28 sps:$4 sm:$0xff]  }
 0x12c   :  { %13319 = vmatpush1.bf16.msra.mxu1 %v19309_v45  ;;  %v19385_v45 = vld [vmem:[%s28286_s1 + $0x85c] ss:$28 sps:$4 sm:$0xff]  }
 0x12d   :  { %12827 = vmatpush1.bf16.msra.mxu0 %v19306_v44  ;;  %13320 = vmatprep.subr.bf16.mxu1 %v19317_v47  ;;  %v19382_v44 = vld [vmem:[%s28286_s1 + $0x1d54] ss:$28 sps:$4 sm:$0xff]  }
 0x12e   :  { %12828 = vmatprep.subr.bf16.mxu0 %v19314_v46  ;;  %v19380_v46 = vld [vmem:[%s28286_s1 + $0x1d50] ss:$28 sps:$4 sm:$0xff]   ;;  %v19383_v47 = vld [vmem:[%s28286_s1 + $0x858] ss:$28 sps:$4 sm:$0xff]  }
 0x130   :  { %13321 = vmatpush1.bf16.msra.mxu1 %v19315_v50  ;;  %v19391_v50 = vld [vmem:[%s28286_s1 + $0x894] ss:$28 sps:$4 sm:$0xff]  }
 0x131   :  { %12829 = vmatpush1.bf16.msra.mxu0 %v19312_v49  ;;  %13322 = vmatprep.subr.bf16.mxu1 %v19323_v52  ;;  %v19388_v49 = vld [vmem:[%s28286_s1 + $0x1d8c] ss:$28 sps:$4 sm:$0xff]  }
 0x132   :  { %12830 = vmatprep.subr.bf16.mxu0 %v19320_v51  ;;  %v19386_v51 = vld [vmem:[%s28286_s1 + $0x1d88] ss:$28 sps:$4 sm:$0xff]   ;;  %v19389_v52 = vld [vmem:[%s28286_s1 + $0x890] ss:$28 sps:$4 sm:$0xff]  }
 0x134   :  { %13323 = vmatpush1.bf16.msra.mxu1 %v19321_v55  ;;  %v19397_v55 = vld [vmem:[%s28286_s1 + $0x8cc] ss:$28 sps:$4 sm:$0xff]  }
 0x135   :  { %12831 = vmatpush1.bf16.msra.mxu0 %v19318_v54  ;;  %13324 = vmatprep.subr.bf16.mxu1 %v19329_v59  ;;  %v19394_v54 = vld [vmem:[%s28286_s1 + $0x1dc4] ss:$28 sps:$4 sm:$0xff]  }
 0x136   :  { %12832 = vmatprep.subr.bf16.mxu0 %v19326_v58  ;;  %v19392_v58 = vld [vmem:[%s28286_s1 + $0x1dc0] ss:$28 sps:$4 sm:$0xff]   ;;  %v19395_v59 = vld [vmem:[%s28286_s1 + $0x8c8] ss:$28 sps:$4 sm:$0xff]  }
 0x138   :  { %13325 = vmatpush1.bf16.msra.mxu1 %v19327_v61  ;;  %v19403_v61 = vld [vmem:[%s28286_s1 + $0x904] ss:$28 sps:$4 sm:$0xff]  }
 0x139   :  { %12833 = vmatpush1.bf16.msra.mxu0 %v19324_v60  ;;  %13326 = vmatprep.subr.bf16.mxu1 %v19335_v63  ;;  %v19400_v60 = vld [vmem:[%s28286_s1 + $0x1dfc] ss:$28 sps:$4 sm:$0xff]  }
 0x13a   :  { %12834 = vmatprep.subr.bf16.mxu0 %v19332_v62  ;;  %v19398_v62 = vld [vmem:[%s28286_s1 + $0x1df8] ss:$28 sps:$4 sm:$0xff]   ;;  %v19401_v63 = vld [vmem:[%s28286_s1 + $0x900] ss:$28 sps:$4 sm:$0xff]  }
 0x13c   :  { %13327 = vmatpush1.bf16.msra.mxu1 %v19333_v1  ;;  %v19409_v1 = vld [vmem:[%s28286_s1 + $0x93c] ss:$28 sps:$4 sm:$0xff]  }
 0x13d   :  { %12835 = vmatpush1.bf16.msra.mxu0 %v19330_v0  ;;  %13328 = vmatprep.subr.bf16.mxu1 %v19341_v3  ;;  %v19406_v0 = vld [vmem:[%s28286_s1 + $0x1e34] ss:$28 sps:$4 sm:$0xff]  }
 0x13e   :  { %12836 = vmatprep.subr.bf16.mxu0 %v19338_v2  ;;  %v19404_v2 = vld [vmem:[%s28286_s1 + $0x1e30] ss:$28 sps:$4 sm:$0xff]   ;;  %v19407_v3 = vld [vmem:[%s28286_s1 + $0x938] ss:$28 sps:$4 sm:$0xff]  }
 0x140   :  { %13329 = vmatpush1.bf16.msra.mxu1 %v19339_v5  ;;  %v19415_v5 = vld [vmem:[%s28286_s1 + $0x974] ss:$28 sps:$4 sm:$0xff]  }
 0x141   :  { %12837 = vmatpush1.bf16.msra.mxu0 %v19336_v4  ;;  %13339 = vmatprep.subr.bf16.mxu1 %v19348_v9  ;;  %v19412_v4 = vld [vmem:[%s28286_s1 + $0x1e6c] ss:$28 sps:$4 sm:$0xff]  }
 0x142   :  { %12847 = vmatprep.subr.bf16.mxu0 %v19345_v8  ;;  %v19410_v8 = vld [vmem:[%s28286_s1 + $0x1e68] ss:$28 sps:$4 sm:$0xff]   ;;  %v19413_v9 = vld [vmem:[%s28286_s1 + $0x970] ss:$28 sps:$4 sm:$0xff]  }
 0x143   :  { %13331 = vmatmul.mubr.bf16.vlgmr.msra.gmra.mrb[4].mxu1 %v22212_v18 }
 0x144   :  { %12839 = vmatmul.mubr.bf16.vlgmr.msra.gmra.mrb[0].mxu0 %v22855_v11  ;;  %13340 = vmatpush1.bf16.msra.mxu1 %v19346_v13  ;;  %v19421_v13 = vld [vmem:[%s28286_s1 + $0x9ac] ss:$28 sps:$4 sm:$0xff]  }
 0x145   :  { %12848 = vmatpush1.bf16.msra.mxu0 %v19343_v12  ;;  %13341 = vmatprep.subr.bf16.mxu1 %v19355_v57  ;;  %v19418_v12 = vld [vmem:[%s28286_s1 + $0x1ea4] ss:$28 sps:$4 sm:$0xff]  }
 0x146   :  { %12849 = vmatprep.subr.bf16.mxu0 %v19352_v14  ;;  %12879 = vmatprep.mubr.bf16.mxu0 %v22871_v15  ;;  %v19416_v14 = vld [vmem:[%s28286_s1 + $0x1ea0] ss:$28 sps:$4 sm:$0xff]   ;;  %v19419_v57 = vld [vmem:[%s28286_s1 + $0x9a8] ss:$28 sps:$4 sm:$0xff]  }
 0x147   :  { %13371 = vmatprep.mubr.bf16.mxu1 %v22236_v24 }
 0x148   :  { %13342 = vmatpush1.bf16.msra.mxu1 %v19353_v17  ;;  %v19427_v17 = vld [vmem:[%s28286_s1 + $0x9e4] ss:$28 sps:$4 sm:$0xff]  }
 0x149   :  { %12850 = vmatpush1.bf16.msra.mxu0 %v19350_v16  ;;  %13343 = vmatprep.subr.bf16.mxu1 %v19361_v21  ;;  %v19424_v16 = vld [vmem:[%s28286_s1 + $0x1edc] ss:$28 sps:$4 sm:$0xff]  }
 0x14a   :  { %12851 = vmatprep.subr.bf16.mxu0 %v19358_v20  ;;  %v19422_v20 = vld [vmem:[%s28286_s1 + $0x1ed8] ss:$28 sps:$4 sm:$0xff]   ;;  %v19425_v21 = vld [vmem:[%s28286_s1 + $0x9e0] ss:$28 sps:$4 sm:$0xff]  }
 0x14c   :  { %13344 = vmatpush1.bf16.msra.mxu1 %v19359_v27  ;;  %v19433_v27 = vld [vmem:[%s28286_s1 + $0xa1c] ss:$28 sps:$4 sm:$0xff]  }
 0x14d   :  { %12852 = vmatpush1.bf16.msra.mxu0 %v19356_v26  ;;  %13345 = vmatprep.subr.bf16.mxu1 %v19367_v29  ;;  %v19430_v26 = vld [vmem:[%s28286_s1 + $0x1f14] ss:$28 sps:$4 sm:$0xff]  }
 0x14e   :  { %12853 = vmatprep.subr.bf16.mxu0 %v19364_v28  ;;  %v19428_v28 = vld [vmem:[%s28286_s1 + $0x1f10] ss:$28 sps:$4 sm:$0xff]   ;;  %v19431_v29 = vld [vmem:[%s28286_s1 + $0xa18] ss:$28 sps:$4 sm:$0xff]  }
 0x150   :  { %13346 = vmatpush1.bf16.msra.mxu1 %v19365_v31  ;;  %v19439_v31 = vld [vmem:[%s28286_s1 + $0xa54] ss:$28 sps:$4 sm:$0xff]  }
 0x151   :  { %12854 = vmatpush1.bf16.msra.mxu0 %v19362_v30  ;;  %13347 = vmatprep.subr.bf16.mxu1 %v19373_v33  ;;  %v19436_v30 = vld [vmem:[%s28286_s1 + $0x1f4c] ss:$28 sps:$4 sm:$0xff]  }
 0x152   :  { %12855 = vmatprep.subr.bf16.mxu0 %v19370_v32  ;;  %v19434_v32 = vld [vmem:[%s28286_s1 + $0x1f48] ss:$28 sps:$4 sm:$0xff]   ;;  %v19437_v33 = vld [vmem:[%s28286_s1 + $0xa50] ss:$28 sps:$4 sm:$0xff]  }
 0x154   :  { %13348 = vmatpush1.bf16.msra.mxu1 %v19371_v40  ;;  %v19446_v40 = vld [vmem:[%s28286_s1 + $0xa8c] ss:$28 sps:$4 sm:$0xff]  }
 0x155   :  { %12856 = vmatpush1.bf16.msra.mxu0 %v19368_v34  ;;  %13349 = vmatprep.subr.bf16.mxu1 %v19379_v23  ;;  %v19443_v34 = vld [vmem:[%s28286_s1 + $0x1f84] ss:$28 sps:$4 sm:$0xff]   ;;  %v23064_v23 = vcombine.low %v22851_v10, %v22851_v10 }
 0x156   :  { %12857 = vmatprep.subr.bf16.mxu0 %v19376_v22  ;;  %v23060_v22 = vld [vmem:[%s28287_s0 + $0x48] sm:$0xff]  ;;  %v19453_v10 = vld [vmem:[%s28286_s1 + $0xac4] ss:$28 sps:$4 sm:$0xff]  }
 0x158   :  { %13350 = vmatpush1.bf16.msra.mxu1 %v19377_v43  ;;  %v19444_v43 = vld [vmem:[%s28286_s1 + $0xa88] ss:$28 sps:$4 sm:$0xff]  }
 0x159   :  { %12858 = vmatpush1.bf16.msra.mxu0 %v19374_v42  ;;  %13351 = vmatprep.subr.bf16.mxu1 %v19385_v45  ;;  %v19441_v42 = vld [vmem:[%s28286_s1 + $0x1f80] ss:$28 sps:$4 sm:$0xff]   ;;  %v23080_v45 = vcombine.high %v23060_v22, %v23060_v22 }
 0x15a   :  { %12859 = vmatprep.subr.bf16.mxu0 %v19382_v44  ;;  %v19450_v44 = vld [vmem:[%s28286_s1 + $0x1fbc] ss:$28 sps:$4 sm:$0xff]  }
 0x15c   :  { %13352 = vmatpush1.bf16.msra.mxu1 %v19383_v47  ;;  %v19451_v47 = vld [vmem:[%s28286_s1 + $0xac0] ss:$28 sps:$4 sm:$0xff]  }
 0x15d   :  { %12860 = vmatpush1.bf16.msra.mxu0 %v19380_v46  ;;  %13353 = vmatprep.subr.bf16.mxu1 %v19391_v50  ;;  %v19448_v46 = vld [vmem:[%s28286_s1 + $0x1fb8] ss:$28 sps:$4 sm:$0xff]  }
 0x15e   :  { %12861 = vmatprep.subr.bf16.mxu0 %v19388_v49  ;;  %v19456_v49 = vld [vmem:[%s28286_s1 + $0x1ff4] ss:$28 sps:$4 sm:$0xff]   ;;  %v19459_v50 = vld [vmem:[%s28286_s1 + $0xafc] ss:$28 sps:$4 sm:$0xff]  }
 0x160   :  { %13354 = vmatpush1.bf16.msra.mxu1 %v19389_v52  ;;  %v19457_v52 = vld [vmem:[%s28286_s1 + $0xaf8] ss:$28 sps:$4 sm:$0xff]  }
 0x161   :  { %12862 = vmatpush1.bf16.msra.mxu0 %v19386_v51  ;;  %13355 = vmatprep.subr.bf16.mxu1 %v19397_v55  ;;  %v19454_v51 = vld [vmem:[%s28286_s1 + $0x1ff0] ss:$28 sps:$4 sm:$0xff]  }
 0x162   :  { %12863 = vmatprep.subr.bf16.mxu0 %v19394_v54  ;;  %v19462_v54 = vld [vmem:[%s28286_s1 + $0x202c] ss:$28 sps:$4 sm:$0xff]   ;;  %v19465_v55 = vld [vmem:[%s28286_s1 + $0xb34] ss:$28 sps:$4 sm:$0xff]  }
 0x164   :  { %13356 = vmatpush1.bf16.msra.mxu1 %v19395_v59  ;;  %v19463_v59 = vld [vmem:[%s28286_s1 + $0xb30] ss:$28 sps:$4 sm:$0xff]  }
 0x165   :  { %12864 = vmatpush1.bf16.msra.mxu0 %v19392_v58  ;;  %13357 = vmatprep.subr.bf16.mxu1 %v19403_v61  ;;  %v19460_v58 = vld [vmem:[%s28286_s1 + $0x2028] ss:$28 sps:$4 sm:$0xff]  }
 0x166   :  { %12865 = vmatprep.subr.bf16.mxu0 %v19400_v60  ;;  %v19468_v60 = vld [vmem:[%s28286_s1 + $0x2064] ss:$28 sps:$4 sm:$0xff]   ;;  %v19471_v61 = vld [vmem:[%s28286_s1 + $0xb6c] ss:$28 sps:$4 sm:$0xff]  }
 0x168   :  { %13358 = vmatpush1.bf16.msra.mxu1 %v19401_v63  ;;  %v19469_v63 = vld [vmem:[%s28286_s1 + $0xb68] ss:$28 sps:$4 sm:$0xff]  }
 0x169   :  { %12866 = vmatpush1.bf16.msra.mxu0 %v19398_v62  ;;  %13359 = vmatprep.subr.bf16.mxu1 %v19409_v1  ;;  %v19466_v62 = vld [vmem:[%s28286_s1 + $0x2060] ss:$28 sps:$4 sm:$0xff]  }
 0x16a   :  { %12867 = vmatprep.subr.bf16.mxu0 %v19406_v0  ;;  %v19474_v0 = vld [vmem:[%s28286_s1 + $0x209c] ss:$28 sps:$4 sm:$0xff]   ;;  %v19477_v1 = vld [vmem:[%s28286_s1 + $0xba4] ss:$28 sps:$4 sm:$0xff]  }
 0x16c   :  { %13360 = vmatpush1.bf16.msra.mxu1 %v19407_v3  ;;  %v19475_v3 = vld [vmem:[%s28286_s1 + $0xba0] ss:$28 sps:$4 sm:$0xff]  }
 0x16d   :  { %12868 = vmatpush1.bf16.msra.mxu0 %v19404_v2  ;;  %13361 = vmatprep.subr.bf16.mxu1 %v19415_v5  ;;  %v19472_v2 = vld [vmem:[%s28286_s1 + $0x2098] ss:$28 sps:$4 sm:$0xff]  }
 0x16e   :  { %12869 = vmatprep.subr.bf16.mxu0 %v19412_v4  ;;  %v19480_v4 = vld [vmem:[%s28286_s1 + $0x20d4] ss:$28 sps:$4 sm:$0xff]   ;;  %v19483_v5 = vld [vmem:[%s28286_s1 + $0xbdc] ss:$28 sps:$4 sm:$0xff]  }
 0x170   :  { %13362 = vmatpush1.bf16.msra.mxu1 %v19413_v9 }
 0x171   :  { %12870 = vmatpush1.bf16.msra.mxu0 %v19410_v8  ;;  %13363 = vmatprep.subr.bf16.mxu1 %v19421_v13  ;;  %v19481_v13 = vld [vmem:[%s28286_s1 + $0xbd8] ss:$28 sps:$4 sm:$0xff]  }
 0x172   :  { %12871 = vmatprep.subr.bf16.mxu0 %v19418_v12  ;;  %v19478_v12 = vld [vmem:[%s28286_s1 + $0x20d0] ss:$28 sps:$4 sm:$0xff]  }
 0x174   :  { %13364 = vmatpush1.bf16.msra.mxu1 %v19419_v57  ;;  %v19486_v57 = vld [vmem:[%s28286_s1 + $0x210c] ss:$28 sps:$4 sm:$0xff]  }
 0x175   :  { %12872 = vmatpush1.bf16.msra.mxu0 %v19416_v14  ;;  %13365 = vmatprep.subr.bf16.mxu1 %v19427_v17 }
 0x176   :  { %12873 = vmatprep.subr.bf16.mxu0 %v19424_v16  ;;  %v19489_v16 = vld [vmem:[%s28286_s1 + $0xc14] ss:$28 sps:$4 sm:$0xff]  }
 0x178   :  { %13366 = vmatpush1.bf16.msra.mxu1 %v19425_v21  ;;  %v19487_v21 = vld [vmem:[%s28286_s1 + $0xc10] ss:$28 sps:$4 sm:$0xff]  }
 0x179   :  { %12874 = vmatpush1.bf16.msra.mxu0 %v19422_v20  ;;  %13367 = vmatprep.subr.bf16.mxu1 %v19433_v27  ;;  %v19484_v20 = vld [vmem:[%s28286_s1 + $0x2108] ss:$28 sps:$4 sm:$0xff]  }
 0x17a   :  { %12875 = vmatprep.subr.bf16.mxu0 %v19430_v26  ;;  %v19492_v26 = vld [vmem:[%s28286_s1 + $0x2144] ss:$28 sps:$4 sm:$0xff]   ;;  %v19495_v27 = vld [vmem:[%s28286_s1 + $0xc4c] ss:$28 sps:$4 sm:$0xff]  }
 0x17c   :  { %13368 = vmatpush1.bf16.msra.mxu1 %v19431_v29  ;;  %v19493_v29 = vld [vmem:[%s28286_s1 + $0xc48] ss:$28 sps:$4 sm:$0xff]  }
 0x17d   :  { %12876 = vmatpush1.bf16.msra.mxu0 %v19428_v28  ;;  %13369 = vmatprep.subr.bf16.mxu1 %v19439_v31  ;;  %v19490_v28 = vld [vmem:[%s28286_s1 + $0x2140] ss:$28 sps:$4 sm:$0xff]  }
 0x17e   :  { %12877 = vmatprep.subr.bf16.mxu0 %v19436_v30  ;;  %v19498_v30 = vld [vmem:[%s28286_s1 + $0x217c] ss:$28 sps:$4 sm:$0xff]   ;;  %v19501_v31 = vld [vmem:[%s28286_s1 + $0xc84] ss:$28 sps:$4 sm:$0xff]  }
 0x180   :  { %13370 = vmatpush1.bf16.msra.mxu1 %v19437_v33  ;;  %v19499_v33 = vld [vmem:[%s28286_s1 + $0xc80] ss:$28 sps:$4 sm:$0xff]  }
 0x181   :  { %12878 = vmatpush1.bf16.msra.mxu0 %v19434_v32  ;;  %13380 = vmatprep.subr.bf16.mxu1 %v19446_v40  ;;  %v19496_v32 = vld [vmem:[%s28286_s1 + $0x2178] ss:$28 sps:$4 sm:$0xff]  }
 0x182   :  { %12888 = vmatprep.subr.bf16.mxu0 %v19443_v34  ;;  %v19504_v34 = vld [vmem:[%s28286_s1 + $0x21b4] ss:$28 sps:$4 sm:$0xff]   ;;  %v19507_v40 = vld [vmem:[%s28286_s1 + $0xcbc] ss:$28 sps:$4 sm:$0xff]  }
 0x183   :  { %13372 = vmatmul.mubr.bf16.vlgmr.msra.gmra.mrb[4].mxu1 %v22431_v36 }
 0x184   :  { %12880 = vmatmul.mubr.bf16.vlgmr.msra.gmra.mrb[0].mxu0 %v23064_v23  ;;  %13381 = vmatpush1.bf16.msra.mxu1 %v19444_v43  ;;  %v19505_v43 = vld [vmem:[%s28286_s1 + $0xcb8] ss:$28 sps:$4 sm:$0xff]  }
 0x185   :  { %12889 = vmatpush1.bf16.msra.mxu0 %v19441_v42  ;;  %13382 = vmatprep.subr.bf16.mxu1 %v19453_v10  ;;  %v19502_v42 = vld [vmem:[%s28286_s1 + $0x21b0] ss:$28 sps:$4 sm:$0xff]  }
 0x186   :  { %12890 = vmatprep.subr.bf16.mxu0 %v19450_v44  ;;  %12920 = vmatprep.mubr.bf16.mxu0 %v23080_v45  ;;  %v19510_v44 = vld [vmem:[%s28286_s1 + $0x21ec] ss:$28 sps:$4 sm:$0xff]   ;;  %v19513_v10 = vld [vmem:[%s28286_s1 + $0xcf4] ss:$28 sps:$4 sm:$0xff]  }
 0x187   :  { %13412 = vmatprep.mubr.bf16.mxu1 %v21934_v53 }
 0x188   :  { %13383 = vmatpush1.bf16.msra.mxu1 %v19451_v47  ;;  %v19511_v47 = vld [vmem:[%s28286_s1 + $0xcf0] ss:$28 sps:$4 sm:$0xff]  }
 0x189   :  { %12891 = vmatpush1.bf16.msra.mxu0 %v19448_v46  ;;  %13384 = vmatprep.subr.bf16.mxu1 %v19459_v50  ;;  %v19508_v46 = vld [vmem:[%s28286_s1 + $0x21e8] ss:$28 sps:$4 sm:$0xff]  }
 0x18a   :  { %12892 = vmatprep.subr.bf16.mxu0 %v19456_v49  ;;  %v19516_v49 = vld [vmem:[%s28286_s1 + $0x2224] ss:$28 sps:$4 sm:$0xff]   ;;  %v19519_v50 = vld [vmem:[%s28286_s1 + $0xd2c] ss:$28 sps:$4 sm:$0xff]  }
 0x18c   :  { %13385 = vmatpush1.bf16.msra.mxu1 %v19457_v52  ;;  %v19517_v52 = vld [vmem:[%s28286_s1 + $0xd28] ss:$28 sps:$4 sm:$0xff]  }
 0x18d   :  { %12893 = vmatpush1.bf16.msra.mxu0 %v19454_v51  ;;  %13386 = vmatprep.subr.bf16.mxu1 %v19465_v55  ;;  %v19514_v51 = vld [vmem:[%s28286_s1 + $0x2220] ss:$28 sps:$4 sm:$0xff]  }
 0x18e   :  { %12894 = vmatprep.subr.bf16.mxu0 %v19462_v54  ;;  %v19522_v54 = vld [vmem:[%s28286_s1 + $0x225c] ss:$28 sps:$4 sm:$0xff]   ;;  %v19525_v55 = vld [vmem:[%s28286_s1 + $0xd64] ss:$28 sps:$4 sm:$0xff]  }
 0x190   :  { %13387 = vmatpush1.bf16.msra.mxu1 %v19463_v59  ;;  %v19523_v59 = vld [vmem:[%s28286_s1 + $0xd60] ss:$28 sps:$4 sm:$0xff]  }
 0x191   :  { %12895 = vmatpush1.bf16.msra.mxu0 %v19460_v58  ;;  %13388 = vmatprep.subr.bf16.mxu1 %v19471_v61  ;;  %v19520_v58 = vld [vmem:[%s28286_s1 + $0x2258] ss:$28 sps:$4 sm:$0xff]  }
 0x192   :  { %12896 = vmatprep.subr.bf16.mxu0 %v19468_v60  ;;  %v19528_v60 = vld [vmem:[%s28286_s1 + $0x2294] ss:$28 sps:$4 sm:$0xff]   ;;  %v19531_v61 = vld [vmem:[%s28286_s1 + $0xd9c] ss:$28 sps:$4 sm:$0xff]  }
 0x194   :  { %13389 = vmatpush1.bf16.msra.mxu1 %v19469_v63  ;;  %v19529_v63 = vld [vmem:[%s28286_s1 + $0xd98] ss:$28 sps:$4 sm:$0xff]  }
 0x195   :  { %12897 = vmatpush1.bf16.msra.mxu0 %v19466_v62  ;;  %13390 = vmatprep.subr.bf16.mxu1 %v19477_v1  ;;  %v19526_v62 = vld [vmem:[%s28286_s1 + $0x2290] ss:$28 sps:$4 sm:$0xff]  }
 0x196   :  { %12898 = vmatprep.subr.bf16.mxu0 %v19474_v0  ;;  %v23146_v8 = vpop.f32.mrb[0].mxu1  ;;  %v19534_v0 = vld [vmem:[%s28286_s1 + $0x22cc] ss:$28 sps:$4 sm:$0xff]   ;;  %v19537_v1 = vld [vmem:[%s28286_s1 + $0xdd4] ss:$28 sps:$4 sm:$0xff]  }
 0x197   :  { %v23148_v9 = vpop.f32.mrb[1].mxu1 }
 0x198   :  { %13391 = vmatpush1.bf16.msra.mxu1 %v19475_v3  ;;  %v12639_v14 = vpop.f32.mrb[2].mxu1  ;;  %v19535_v3 = vld [vmem:[%s28286_s1 + $0xdd0] ss:$28 sps:$4 sm:$0xff]  }
 0x199   :  { %12899 = vmatpush1.bf16.msra.mxu0 %v19472_v2  ;;  %13392 = vmatprep.subr.bf16.mxu1 %v19483_v5  ;;  %v12640_v17 = vpop.f32.mrb[3].mxu1  ;;  %v19532_v2 = vld [vmem:[%s28286_s1 + $0x22c8] ss:$28 sps:$4 sm:$0xff]   ;;  %v19539_v14 = vld [vmem:[%s28286_s1 + $0x2300] ss:$28 sps:$4 sm:$0xff]  }
 0x19a   :  { %12900 = vmatprep.subr.bf16.mxu0 %v19480_v4  ;;  %v19541_v4 = vld [vmem:[%s28286_s1 + $0x2304] ss:$28 sps:$4 sm:$0xff]   ;;  %v19544_v5 = vld [vmem:[%s28286_s1 + $0xe0c] ss:$28 sps:$4 sm:$0xff]  }
 0x19c   :  { %13393 = vmatpush1.bf16.msra.mxu1 %v19481_v13  ;;  %v23277_v13 = vcombine.low %v23060_v22, %v23060_v22  ;;  %v19551_v22 = vld [vmem:[%s28286_s1 + $0xe44] ss:$28 sps:$4 sm:$0xff]  }
 0x19d   :  { %12901 = vmatpush1.bf16.msra.mxu0 %v19478_v12  ;;  %13394 = vmatprep.subr.bf16.mxu1 %v19489_v16  ;;  %v23273_v12 = vld [vmem:[%s28287_s0 + $0x50] sm:$0xff]  ;;  %v19548_v16 = vld [vmem:[%s28286_s1 + $0x233c] ss:$28 sps:$4 sm:$0xff]  }
 0x19e   :  { %12902 = vmatprep.subr.bf16.mxu0 %v19486_v57  ;;  %v19542_v57 = vld [vmem:[%s28286_s1 + $0xe08] ss:$28 sps:$4 sm:$0xff]   ;;  %v23293_v17 = vcombine.high %v23273_v12, %v23273_v12 }
 0x1a0   :  { %13395 = vmatpush1.bf16.msra.mxu1 %v19487_v21  ;;  %v19549_v21 = vld [vmem:[%s28286_s1 + $0xe40] ss:$28 sps:$4 sm:$0xff]  }
 0x1a1   :  { %12903 = vmatpush1.bf16.msra.mxu0 %v19484_v20  ;;  %13396 = vmatprep.subr.bf16.mxu1 %v19495_v27  ;;  %v19546_v20 = vld [vmem:[%s28286_s1 + $0x2338] ss:$28 sps:$4 sm:$0xff]  }
 0x1a2   :  { %12904 = vmatprep.subr.bf16.mxu0 %v19492_v26  ;;  %v19554_v26 = vld [vmem:[%s28286_s1 + $0x2374] ss:$28 sps:$4 sm:$0xff]   ;;  %v19557_v27 = vld [vmem:[%s28286_s1 + $0xe7c] ss:$28 sps:$4 sm:$0xff]  }
 0x1a4   :  { %13397 = vmatpush1.bf16.msra.mxu1 %v19493_v29  ;;  %v19555_v29 = vld [vmem:[%s28286_s1 + $0xe78] ss:$28 sps:$4 sm:$0xff]  }
 0x1a5   :  { %12905 = vmatpush1.bf16.msra.mxu0 %v19490_v28  ;;  %13398 = vmatprep.subr.bf16.mxu1 %v19501_v31  ;;  %v19552_v28 = vld [vmem:[%s28286_s1 + $0x2370] ss:$28 sps:$4 sm:$0xff]  }
 0x1a6   :  { %12906 = vmatprep.subr.bf16.mxu0 %v19498_v30  ;;  %v19560_v30 = vld [vmem:[%s28286_s1 + $0x23ac] ss:$28 sps:$4 sm:$0xff]   ;;  %v19563_v31 = vld [vmem:[%s28286_s1 + $0xeb4] ss:$28 sps:$4 sm:$0xff]  }
 0x1a8   :  { %13399 = vmatpush1.bf16.msra.mxu1 %v19499_v33  ;;  %v19561_v33 = vld [vmem:[%s28286_s1 + $0xeb0] ss:$28 sps:$4 sm:$0xff]  }
 0x1a9   :  { %12907 = vmatpush1.bf16.msra.mxu0 %v19496_v32  ;;  %13400 = vmatprep.subr.bf16.mxu1 %v19507_v40  ;;  %v19558_v32 = vld [vmem:[%s28286_s1 + $0x23a8] ss:$28 sps:$4 sm:$0xff]  }
 0x1aa   :  { %12908 = vmatprep.subr.bf16.mxu0 %v19504_v34  ;;  %v19566_v34 = vld [vmem:[%s28286_s1 + $0x23e4] ss:$28 sps:$4 sm:$0xff]   ;;  %v19569_v40 = vld [vmem:[%s28286_s1 + $0xeec] ss:$28 sps:$4 sm:$0xff]  }
 0x1ac   :  { %13401 = vmatpush1.bf16.msra.mxu1 %v19505_v43  ;;  %v19567_v43 = vld [vmem:[%s28286_s1 + $0xee8] ss:$28 sps:$4 sm:$0xff]  }
 0x1ad   :  { %12909 = vmatpush1.bf16.msra.mxu0 %v19502_v42  ;;  %13402 = vmatprep.subr.bf16.mxu1 %v19513_v10  ;;  %v19564_v42 = vld [vmem:[%s28286_s1 + $0x23e0] ss:$28 sps:$4 sm:$0xff]  }
 0x1ae   :  { %12910 = vmatprep.subr.bf16.mxu0 %v19510_v44  ;;  %v19572_v44 = vld [vmem:[%s28286_s1 + $0x241c] ss:$28 sps:$4 sm:$0xff]   ;;  %v19575_v10 = vld [vmem:[%s28286_s1 + $0xf24] ss:$28 sps:$4 sm:$0xff]  }
 0x1b0   :  { %13403 = vmatpush1.bf16.msra.mxu1 %v19511_v47  ;;  %v19573_v47 = vld [vmem:[%s28286_s1 + $0xf20] ss:$28 sps:$4 sm:$0xff]  }
 0x1b1   :  { %12911 = vmatpush1.bf16.msra.mxu0 %v19508_v46  ;;  %13404 = vmatprep.subr.bf16.mxu1 %v19519_v50  ;;  %v19570_v46 = vld [vmem:[%s28286_s1 + $0x2418] ss:$28 sps:$4 sm:$0xff]  }
 0x1b2   :  { %12912 = vmatprep.subr.bf16.mxu0 %v19516_v49  ;;  %v19578_v49 = vld [vmem:[%s28286_s1 + $0x2454] ss:$28 sps:$4 sm:$0xff]   ;;  %v19581_v50 = vld [vmem:[%s28286_s1 + $0xf5c] ss:$28 sps:$4 sm:$0xff]  }
 0x1b4   :  { %13405 = vmatpush1.bf16.msra.mxu1 %v19517_v52  ;;  %v19579_v52 = vld [vmem:[%s28286_s1 + $0xf58] ss:$28 sps:$4 sm:$0xff]  }
 0x1b5   :  { %12913 = vmatpush1.bf16.msra.mxu0 %v19514_v51  ;;  %13406 = vmatprep.subr.bf16.mxu1 %v19525_v55  ;;  %v19576_v51 = vld [vmem:[%s28286_s1 + $0x2450] ss:$28 sps:$4 sm:$0xff]  }
 0x1b6   :  { %12914 = vmatprep.subr.bf16.mxu0 %v19522_v54  ;;  %v19584_v54 = vld [vmem:[%s28286_s1 + $0x248c] ss:$28 sps:$4 sm:$0xff]   ;;  %v19587_v55 = vld [vmem:[%s28286_s1 + $0xf94] ss:$28 sps:$4 sm:$0xff]  }
 0x1b8   :  { %13407 = vmatpush1.bf16.msra.mxu1 %v19523_v59  ;;  %v19585_v59 = vld [vmem:[%s28286_s1 + $0xf90] ss:$28 sps:$4 sm:$0xff]  }
 0x1b9   :  { %12915 = vmatpush1.bf16.msra.mxu0 %v19520_v58  ;;  %13408 = vmatprep.subr.bf16.mxu1 %v19531_v61  ;;  %v19582_v58 = vld [vmem:[%s28286_s1 + $0x2488] ss:$28 sps:$4 sm:$0xff]  }
 0x1ba   :  { %12916 = vmatprep.subr.bf16.mxu0 %v19528_v60  ;;  %v19590_v60 = vld [vmem:[%s28286_s1 + $0x24c4] ss:$28 sps:$4 sm:$0xff]   ;;  %v19593_v61 = vld [vmem:[%s28286_s1 + $0xfcc] ss:$28 sps:$4 sm:$0xff]  }
 0x1bc   :  { %13409 = vmatpush1.bf16.msra.mxu1 %v19529_v63  ;;  %v19591_v63 = vld [vmem:[%s28286_s1 + $0xfc8] ss:$28 sps:$4 sm:$0xff]  }
 0x1bd   :  { %12917 = vmatpush1.bf16.msra.mxu0 %v19526_v62  ;;  %13410 = vmatprep.subr.bf16.mxu1 %v19537_v1  ;;  %v19588_v62 = vld [vmem:[%s28286_s1 + $0x24c0] ss:$28 sps:$4 sm:$0xff]  }
 0x1be   :  { %12918 = vmatprep.subr.bf16.mxu0 %v19534_v0  ;;  %v19596_v0 = vld [vmem:[%s28286_s1 + $0x24fc] ss:$28 sps:$4 sm:$0xff]   ;;  %v19599_v1 = vld [vmem:[%s28286_s1 + $0x1004] ss:$28 sps:$4 sm:$0xff]  }
 0x1c0   :  { %13411 = vmatpush1.bf16.msra.mxu1 %v19535_v3  ;;  %v19597_v3 = vld [vmem:[%s28286_s1 + $0x1000] ss:$28 sps:$4 sm:$0xff]  }
 0x1c1   :  { %12919 = vmatpush1.bf16.msra.mxu0 %v19532_v2  ;;  %13421 = vmatprep.subr.bf16.mxu1 %v19544_v5  ;;  %v19594_v2 = vld [vmem:[%s28286_s1 + $0x24f8] ss:$28 sps:$4 sm:$0xff]  }
 0x1c2   :  { %12929 = vmatprep.subr.bf16.mxu0 %v19541_v4  ;;  %v19602_v4 = vld [vmem:[%s28286_s1 + $0x2534] ss:$28 sps:$4 sm:$0xff]   ;;  %v19605_v5 = vld [vmem:[%s28286_s1 + $0x103c] ss:$28 sps:$4 sm:$0xff]  }
 0x1c3   :  { %13413 = vmatmul.mubr.bf16.vlgmr.msra.gmra.mrb[4].mxu1 %v21988_v7 }
 0x1c4   :  { %12921 = vmatmul.mubr.bf16.vlgmr.msra.gmra.mrb[0].mxu0 %v23277_v13  ;;  %13422 = vmatpush1.bf16.msra.mxu1 %v19542_v57  ;;  %v19603_v57 = vld [vmem:[%s28286_s1 + $0x1038] ss:$28 sps:$4 sm:$0xff]  }
 0x1c5   :  { %12930 = vmatpush1.bf16.msra.mxu0 %v19539_v14  ;;  %13423 = vmatprep.subr.bf16.mxu1 %v19551_v22  ;;  %v19600_v14 = vld [vmem:[%s28286_s1 + $0x2530] ss:$28 sps:$4 sm:$0xff]  }
 0x1c6   :  { %12931 = vmatprep.subr.bf16.mxu0 %v19548_v16  ;;  %12961 = vmatprep.mubr.bf16.mxu0 %v23293_v17  ;;  %v19608_v16 = vld [vmem:[%s28286_s1 + $0x256c] ss:$28 sps:$4 sm:$0xff]   ;;  %v19611_v22 = vld [vmem:[%s28286_s1 + $0x1074] ss:$28 sps:$4 sm:$0xff]  }
 0x1c7   :  { %13453 = vmatprep.mubr.bf16.mxu1 %v22089_v38 }
 0x1c8   :  { %13424 = vmatpush1.bf16.msra.mxu1 %v19549_v21  ;;  %v19609_v21 = vld [vmem:[%s28286_s1 + $0x1070] ss:$28 sps:$4 sm:$0xff]  }
 0x1c9   :  { %12932 = vmatpush1.bf16.msra.mxu0 %v19546_v20  ;;  %13425 = vmatprep.subr.bf16.mxu1 %v19557_v27  ;;  %v19606_v20 = vld [vmem:[%s28286_s1 + $0x2568] ss:$28 sps:$4 sm:$0xff]  }
 0x1ca   :  { %12933 = vmatprep.subr.bf16.mxu0 %v19554_v26  ;;  %v19614_v26 = vld [vmem:[%s28286_s1 + $0x25a4] ss:$28 sps:$4 sm:$0xff]   ;;  %v19617_v27 = vld [vmem:[%s28286_s1 + $0x10ac] ss:$28 sps:$4 sm:$0xff]  }
 0x1cc   :  { %13426 = vmatpush1.bf16.msra.mxu1 %v19555_v29  ;;  %v19615_v29 = vld [vmem:[%s28286_s1 + $0x10a8] ss:$28 sps:$4 sm:$0xff]  }
 0x1cd   :  { %12934 = vmatpush1.bf16.msra.mxu0 %v19552_v28  ;;  %13427 = vmatprep.subr.bf16.mxu1 %v19563_v31  ;;  %v19612_v28 = vld [vmem:[%s28286_s1 + $0x25a0] ss:$28 sps:$4 sm:$0xff]  }
 0x1ce   :  { %12935 = vmatprep.subr.bf16.mxu0 %v19560_v30  ;;  %v19620_v30 = vld [vmem:[%s28286_s1 + $0x25dc] ss:$28 sps:$4 sm:$0xff]   ;;  %v19623_v31 = vld [vmem:[%s28286_s1 + $0x10e4] ss:$28 sps:$4 sm:$0xff]  }
 0x1d0   :  { %13428 = vmatpush1.bf16.msra.mxu1 %v19561_v33  ;;  %v19621_v33 = vld [vmem:[%s28286_s1 + $0x10e0] ss:$28 sps:$4 sm:$0xff]  }
 0x1d1   :  { %12936 = vmatpush1.bf16.msra.mxu0 %v19558_v32  ;;  %13429 = vmatprep.subr.bf16.mxu1 %v19569_v40  ;;  %v19618_v32 = vld [vmem:[%s28286_s1 + $0x25d8] ss:$28 sps:$4 sm:$0xff]  }
 0x1d2   :  { %12937 = vmatprep.subr.bf16.mxu0 %v19566_v34  ;;  %v19626_v34 = vld [vmem:[%s28286_s1 + $0x2614] ss:$28 sps:$4 sm:$0xff]   ;;  %v19629_v40 = vld [vmem:[%s28286_s1 + $0x111c] ss:$28 sps:$4 sm:$0xff]  }
 0x1d4   :  { %13430 = vmatpush1.bf16.msra.mxu1 %v19567_v43  ;;  %v19627_v43 = vld [vmem:[%s28286_s1 + $0x1118] ss:$28 sps:$4 sm:$0xff]  }
 0x1d5   :  { %12938 = vmatpush1.bf16.msra.mxu0 %v19564_v42  ;;  %13431 = vmatprep.subr.bf16.mxu1 %v19575_v10  ;;  %v19624_v42 = vld [vmem:[%s28286_s1 + $0x2610] ss:$28 sps:$4 sm:$0xff]  }
 0x1d6   :  { %12939 = vmatprep.subr.bf16.mxu0 %v19572_v44  ;;  %v19632_v44 = vld [vmem:[%s28286_s1 + $0x264c] ss:$28 sps:$4 sm:$0xff]   ;;  %v19635_v10 = vld [vmem:[%s28286_s1 + $0x1154] ss:$28 sps:$4 sm:$0xff]  }
 0x1d8   :  { %13432 = vmatpush1.bf16.msra.mxu1 %v19573_v47  ;;  %v19633_v47 = vld [vmem:[%s28286_s1 + $0x1150] ss:$28 sps:$4 sm:$0xff]  }
 0x1d9   :  { %12940 = vmatpush1.bf16.msra.mxu0 %v19570_v46  ;;  %13433 = vmatprep.subr.bf16.mxu1 %v19581_v50  ;;  %v19630_v46 = vld [vmem:[%s28286_s1 + $0x2648] ss:$28 sps:$4 sm:$0xff]  }
 0x1da   :  { %12941 = vmatprep.subr.bf16.mxu0 %v19578_v49  ;;  %v19639_v49 = vld [vmem:[%s28286_s1 + $0x2684] ss:$28 sps:$4 sm:$0xff]   ;;  %v19642_v50 = vld [vmem:[%s28286_s1 + $0x118c] ss:$28 sps:$4 sm:$0xff]  }
 0x1dc   :  { %13434 = vmatpush1.bf16.msra.mxu1 %v19579_v52  ;;  %v23486_v52 = vcombine.low %v23273_v12, %v23273_v12  ;;  %v19649_v12 = vld [vmem:[%s28286_s1 + $0x11c4] ss:$28 sps:$4 sm:$0xff]  }
 0x1dd   :  { %12942 = vmatpush1.bf16.msra.mxu0 %v19576_v51  ;;  %13435 = vmatprep.subr.bf16.mxu1 %v19587_v55  ;;  %v23482_v51 = vld [vmem:[%s28287_s0 + $0x58] sm:$0xff]  ;;  %v19640_v55 = vld [vmem:[%s28286_s1 + $0x1188] ss:$28 sps:$4 sm:$0xff]  }
 0x1de   :  { %12943 = vmatprep.subr.bf16.mxu0 %v19584_v54  ;;  %v19637_v54 = vld [vmem:[%s28286_s1 + $0x2680] ss:$28 sps:$4 sm:$0xff]  }
 0x1e0   :  { %13436 = vmatpush1.bf16.msra.mxu1 %v19585_v59  ;;  %v23502_v59 = vcombine.high %v23482_v51, %v23482_v51 }
 0x1e1   :  { %12944 = vmatpush1.bf16.msra.mxu0 %v19582_v58  ;;  %13437 = vmatprep.subr.bf16.mxu1 %v19593_v61  ;;  %v19646_v58 = vld [vmem:[%s28286_s1 + $0x26bc] ss:$28 sps:$4 sm:$0xff]  }
 0x1e2   :  { %12945 = vmatprep.subr.bf16.mxu0 %v19590_v60  ;;  %v19644_v60 = vld [vmem:[%s28286_s1 + $0x26b8] ss:$28 sps:$4 sm:$0xff]   ;;  %v19647_v61 = vld [vmem:[%s28286_s1 + $0x11c0] ss:$28 sps:$4 sm:$0xff]  }
 0x1e4   :  { %13438 = vmatpush1.bf16.msra.mxu1 %v19591_v63  ;;  %v19655_v63 = vld [vmem:[%s28286_s1 + $0x11fc] ss:$28 sps:$4 sm:$0xff]  }
 0x1e5   :  { %12946 = vmatpush1.bf16.msra.mxu0 %v19588_v62  ;;  %13439 = vmatprep.subr.bf16.mxu1 %v19599_v1  ;;  %v19652_v62 = vld [vmem:[%s28286_s1 + $0x26f4] ss:$28 sps:$4 sm:$0xff]  }
 0x1e6   :  { %12947 = vmatprep.subr.bf16.mxu0 %v19596_v0  ;;  %v19650_v0 = vld [vmem:[%s28286_s1 + $0x26f0] ss:$28 sps:$4 sm:$0xff]   ;;  %v19653_v1 = vld [vmem:[%s28286_s1 + $0x11f8] ss:$28 sps:$4 sm:$0xff]  }
 0x1e8   :  { %13440 = vmatpush1.bf16.msra.mxu1 %v19597_v3  ;;  %v19661_v3 = vld [vmem:[%s28286_s1 + $0x1234] ss:$28 sps:$4 sm:$0xff]  }
 0x1e9   :  { %12948 = vmatpush1.bf16.msra.mxu0 %v19594_v2  ;;  %13441 = vmatprep.subr.bf16.mxu1 %v19605_v5  ;;  %v19658_v2 = vld [vmem:[%s28286_s1 + $0x272c] ss:$28 sps:$4 sm:$0xff]  }
 0x1ea   :  { %12949 = vmatprep.subr.bf16.mxu0 %v19602_v4  ;;  %v19656_v4 = vld [vmem:[%s28286_s1 + $0x2728] ss:$28 sps:$4 sm:$0xff]   ;;  %v19659_v5 = vld [vmem:[%s28286_s1 + $0x1230] ss:$28 sps:$4 sm:$0xff]  }
 0x1ec   :  { %13442 = vmatpush1.bf16.msra.mxu1 %v19603_v57  ;;  %v19667_v57 = vld [vmem:[%s28286_s1 + $0x126c] ss:$28 sps:$4 sm:$0xff]  }
 0x1ed   :  { %12950 = vmatpush1.bf16.msra.mxu0 %v19600_v14  ;;  %13443 = vmatprep.subr.bf16.mxu1 %v19611_v22  ;;  %v19664_v14 = vld [vmem:[%s28286_s1 + $0x2764] ss:$28 sps:$4 sm:$0xff]  }
 0x1ee   :  { %12951 = vmatprep.subr.bf16.mxu0 %v19608_v16  ;;  %v19662_v16 = vld [vmem:[%s28286_s1 + $0x2760] ss:$28 sps:$4 sm:$0xff]   ;;  %v19665_v22 = vld [vmem:[%s28286_s1 + $0x1268] ss:$28 sps:$4 sm:$0xff]  }
 0x1f0   :  { %13444 = vmatpush1.bf16.msra.mxu1 %v19609_v21  ;;  %v19673_v21 = vld [vmem:[%s28286_s1 + $0x12a4] ss:$28 sps:$4 sm:$0xff]  }
 0x1f1   :  { %12952 = vmatpush1.bf16.msra.mxu0 %v19606_v20  ;;  %13445 = vmatprep.subr.bf16.mxu1 %v19617_v27  ;;  %v19670_v20 = vld [vmem:[%s28286_s1 + $0x279c] ss:$28 sps:$4 sm:$0xff]  }
 0x1f2   :  { %12953 = vmatprep.subr.bf16.mxu0 %v19614_v26  ;;  %v19668_v26 = vld [vmem:[%s28286_s1 + $0x2798] ss:$28 sps:$4 sm:$0xff]   ;;  %v19671_v27 = vld [vmem:[%s28286_s1 + $0x12a0] ss:$28 sps:$4 sm:$0xff]  }
 0x1f4   :  { %13446 = vmatpush1.bf16.msra.mxu1 %v19615_v29  ;;  %v19679_v29 = vld [vmem:[%s28286_s1 + $0x12dc] ss:$28 sps:$4 sm:$0xff]  }
 0x1f5   :  { %12954 = vmatpush1.bf16.msra.mxu0 %v19612_v28  ;;  %13447 = vmatprep.subr.bf16.mxu1 %v19623_v31  ;;  %v19676_v28 = vld [vmem:[%s28286_s1 + $0x27d4] ss:$28 sps:$4 sm:$0xff]  }
 0x1f6   :  { %12955 = vmatprep.subr.bf16.mxu0 %v19620_v30  ;;  %v19674_v30 = vld [vmem:[%s28286_s1 + $0x27d0] ss:$28 sps:$4 sm:$0xff]   ;;  %v19677_v31 = vld [vmem:[%s28286_s1 + $0x12d8] ss:$28 sps:$4 sm:$0xff]  }
 0x1f8   :  { %13448 = vmatpush1.bf16.msra.mxu1 %v19621_v33  ;;  %v19685_v33 = vld [vmem:[%s28286_s1 + $0x1314] ss:$28 sps:$4 sm:$0xff]  }
 0x1f9   :  { %12956 = vmatpush1.bf16.msra.mxu0 %v19618_v32  ;;  %13449 = vmatprep.subr.bf16.mxu1 %v19629_v40  ;;  %v19682_v32 = vld [vmem:[%s28286_s1 + $0x280c] ss:$28 sps:$4 sm:$0xff]  }
 0x1fa   :  { %12957 = vmatprep.subr.bf16.mxu0 %v19626_v34  ;;  %v19680_v34 = vld [vmem:[%s28286_s1 + $0x2808] ss:$28 sps:$4 sm:$0xff]   ;;  %v19683_v40 = vld [vmem:[%s28286_s1 + $0x1310] ss:$28 sps:$4 sm:$0xff]  }
 0x1fc   :  { %13450 = vmatpush1.bf16.msra.mxu1 %v19627_v43  ;;  %v19691_v43 = vld [vmem:[%s28286_s1 + $0x134c] ss:$28 sps:$4 sm:$0xff]  }
 0x1fd   :  { %12958 = vmatpush1.bf16.msra.mxu0 %v19624_v42  ;;  %13451 = vmatprep.subr.bf16.mxu1 %v19635_v10  ;;  %v19688_v42 = vld [vmem:[%s28286_s1 + $0x2844] ss:$28 sps:$4 sm:$0xff]  }
 0x1fe   :  { %12959 = vmatprep.subr.bf16.mxu0 %v19632_v44  ;;  %v19686_v44 = vld [vmem:[%s28286_s1 + $0x2840] ss:$28 sps:$4 sm:$0xff]   ;;  %v19689_v10 = vld [vmem:[%s28286_s1 + $0x1348] ss:$28 sps:$4 sm:$0xff]  }
 0x200   :  { %13452 = vmatpush1.bf16.msra.mxu1 %v19633_v47  ;;  %v19697_v47 = vld [vmem:[%s28286_s1 + $0x1384] ss:$28 sps:$4 sm:$0xff]  }
 0x201   :  { %12960 = vmatpush1.bf16.msra.mxu0 %v19630_v46  ;;  %13462 = vmatprep.subr.bf16.mxu1 %v19642_v50  ;;  %v19694_v46 = vld [vmem:[%s28286_s1 + $0x287c] ss:$28 sps:$4 sm:$0xff]  }
 0x202   :  { %12970 = vmatprep.subr.bf16.mxu0 %v19639_v49  ;;  %v19692_v49 = vld [vmem:[%s28286_s1 + $0x2878] ss:$28 sps:$4 sm:$0xff]   ;;  %v19695_v50 = vld [vmem:[%s28286_s1 + $0x1380] ss:$28 sps:$4 sm:$0xff]  }
 0x203   :  { %13454 = vmatmul.mubr.bf16.vlgmr.msra.gmra.mrb[4].mxu1 %v22216_v19 }
 0x204   :  { %12962 = vmatmul.mubr.bf16.vlgmr.msra.gmra.mrb[0].mxu0 %v23486_v52  ;;  %13463 = vmatpush1.bf16.msra.mxu1 %v19640_v55  ;;  %v19703_v55 = vld [vmem:[%s28286_s1 + $0x13bc] ss:$28 sps:$4 sm:$0xff]  }
 0x205   :  { %12971 = vmatpush1.bf16.msra.mxu0 %v19637_v54  ;;  %13464 = vmatprep.subr.bf16.mxu1 %v19649_v12  ;;  %v19700_v54 = vld [vmem:[%s28286_s1 + $0x28b4] ss:$28 sps:$4 sm:$0xff]  }
 0x206   :  { %12972 = vmatprep.subr.bf16.mxu0 %v19646_v58  ;;  %13002 = vmatprep.mubr.bf16.mxu0 %v23502_v59  ;;  %v19698_v58 = vld [vmem:[%s28286_s1 + $0x28b0] ss:$28 sps:$4 sm:$0xff]   ;;  %v19701_v12 = vld [vmem:[%s28286_s1 + $0x13b8] ss:$28 sps:$4 sm:$0xff]  }
 0x207   :  { %13494 = vmatprep.mubr.bf16.mxu1 %v22240_v25 }
 0x208   :  { %13465 = vmatpush1.bf16.msra.mxu1 %v19647_v61  ;;  %v19709_v61 = vld [vmem:[%s28286_s1 + $0x13f4] ss:$28 sps:$4 sm:$0xff]  }
 0x209   :  { %12973 = vmatpush1.bf16.msra.mxu0 %v19644_v60  ;;  %13466 = vmatprep.subr.bf16.mxu1 %v19655_v63  ;;  %v19706_v60 = vld [vmem:[%s28286_s1 + $0x28ec] ss:$28 sps:$4 sm:$0xff]  }
 0x20a   :  { %12974 = vmatprep.subr.bf16.mxu0 %v19652_v62  ;;  %v19704_v62 = vld [vmem:[%s28286_s1 + $0x28e8] ss:$28 sps:$4 sm:$0xff]   ;;  %v19707_v63 = vld [vmem:[%s28286_s1 + $0x13f0] ss:$28 sps:$4 sm:$0xff]  }
 0x20c   :  { %13467 = vmatpush1.bf16.msra.mxu1 %v19653_v1  ;;  %v19715_v1 = vld [vmem:[%s28286_s1 + $0x142c] ss:$28 sps:$4 sm:$0xff]  }
 0x20d   :  { %12975 = vmatpush1.bf16.msra.mxu0 %v19650_v0  ;;  %13468 = vmatprep.subr.bf16.mxu1 %v19661_v3  ;;  %v19712_v0 = vld [vmem:[%s28286_s1 + $0x2924] ss:$28 sps:$4 sm:$0xff]  }
 0x20e   :  { %12976 = vmatprep.subr.bf16.mxu0 %v19658_v2  ;;  %v19710_v2 = vld [vmem:[%s28286_s1 + $0x2920] ss:$28 sps:$4 sm:$0xff]   ;;  %v19713_v3 = vld [vmem:[%s28286_s1 + $0x1428] ss:$28 sps:$4 sm:$0xff]  }
 0x210   :  { %13469 = vmatpush1.bf16.msra.mxu1 %v19659_v5  ;;  %v19721_v5 = vld [vmem:[%s28286_s1 + $0x1464] ss:$28 sps:$4 sm:$0xff]  }
 0x211   :  { %12977 = vmatpush1.bf16.msra.mxu0 %v19656_v4  ;;  %13470 = vmatprep.subr.bf16.mxu1 %v19667_v57  ;;  %v19718_v4 = vld [vmem:[%s28286_s1 + $0x295c] ss:$28 sps:$4 sm:$0xff]  }
 0x212   :  { %12978 = vmatprep.subr.bf16.mxu0 %v19664_v14  ;;  %v19716_v14 = vld [vmem:[%s28286_s1 + $0x2958] ss:$28 sps:$4 sm:$0xff]   ;;  %v19719_v57 = vld [vmem:[%s28286_s1 + $0x1460] ss:$28 sps:$4 sm:$0xff]  }
 0x214   :  { %13471 = vmatpush1.bf16.msra.mxu1 %v19665_v22  ;;  %v19727_v22 = vld [vmem:[%s28286_s1 + $0x149c] ss:$28 sps:$4 sm:$0xff]  }
 0x215   :  { %12979 = vmatpush1.bf16.msra.mxu0 %v19662_v16  ;;  %13472 = vmatprep.subr.bf16.mxu1 %v19673_v21  ;;  %v19724_v16 = vld [vmem:[%s28286_s1 + $0x2994] ss:$28 sps:$4 sm:$0xff]  }
 0x216   :  { %12980 = vmatprep.subr.bf16.mxu0 %v19670_v20  ;;  %v19722_v20 = vld [vmem:[%s28286_s1 + $0x2990] ss:$28 sps:$4 sm:$0xff]   ;;  %v19725_v21 = vld [vmem:[%s28286_s1 + $0x1498] ss:$28 sps:$4 sm:$0xff]  }
 0x218   :  { %13473 = vmatpush1.bf16.msra.mxu1 %v19671_v27  ;;  %v19733_v27 = vld [vmem:[%s28286_s1 + $0x14d4] ss:$28 sps:$4 sm:$0xff]  }
 0x219   :  { %12981 = vmatpush1.bf16.msra.mxu0 %v19668_v26  ;;  %13474 = vmatprep.subr.bf16.mxu1 %v19679_v29  ;;  %v19730_v26 = vld [vmem:[%s28286_s1 + $0x29cc] ss:$28 sps:$4 sm:$0xff]  }
 0x21a   :  { %12982 = vmatprep.subr.bf16.mxu0 %v19676_v28  ;;  %v19728_v28 = vld [vmem:[%s28286_s1 + $0x29c8] ss:$28 sps:$4 sm:$0xff]   ;;  %v19731_v29 = vld [vmem:[%s28286_s1 + $0x14d0] ss:$28 sps:$4 sm:$0xff]  }
 0x21c   :  { %13475 = vmatpush1.bf16.msra.mxu1 %v19677_v31  ;;  %v19740_v31 = vld [vmem:[%s28286_s1 + $0x150c] ss:$28 sps:$4 sm:$0xff]  }
 0x21d   :  { %12983 = vmatpush1.bf16.msra.mxu0 %v19674_v30  ;;  %13476 = vmatprep.subr.bf16.mxu1 %v19685_v33  ;;  %v19737_v30 = vld [vmem:[%s28286_s1 + $0x2a04] ss:$28 sps:$4 sm:$0xff]   ;;  %v23695_v33 = vcombine.low %v23482_v51, %v23482_v51 }
 0x21e   :  { %12984 = vmatprep.subr.bf16.mxu0 %v19682_v32  ;;  %v23691_v32 = vld [vmem:[%s28287_s0 + $0x60] sm:$0xff] }
 0x21f   :  { %v19747_v51 = vld [vmem:[%s28286_s1 + $0x1544] ss:$28 sps:$4 sm:$0xff]  }
 0x220   :  { %13477 = vmatpush1.bf16.msra.mxu1 %v19683_v40  ;;  %v19738_v40 = vld [vmem:[%s28286_s1 + $0x1508] ss:$28 sps:$4 sm:$0xff]  }
 0x221   :  { %12985 = vmatpush1.bf16.msra.mxu0 %v19680_v34  ;;  %13478 = vmatprep.subr.bf16.mxu1 %v19691_v43  ;;  %v19735_v34 = vld [vmem:[%s28286_s1 + $0x2a00] ss:$28 sps:$4 sm:$0xff]   ;;  %v23711_v43 = vcombine.high %v23691_v32, %v23691_v32 }
 0x222   :  { %12986 = vmatprep.subr.bf16.mxu0 %v19688_v42  ;;  %v19744_v42 = vld [vmem:[%s28286_s1 + $0x2a3c] ss:$28 sps:$4 sm:$0xff]  }
 0x224   :  { %13479 = vmatpush1.bf16.msra.mxu1 %v19689_v10  ;;  %v19745_v10 = vld [vmem:[%s28286_s1 + $0x1540] ss:$28 sps:$4 sm:$0xff]  }
 0x225   :  { %12987 = vmatpush1.bf16.msra.mxu0 %v19686_v44  ;;  %13480 = vmatprep.subr.bf16.mxu1 %v19697_v47  ;;  %v19742_v44 = vld [vmem:[%s28286_s1 + $0x2a38] ss:$28 sps:$4 sm:$0xff]  }
 0x226   :  { %12988 = vmatprep.subr.bf16.mxu0 %v19694_v46  ;;  %v19750_v46 = vld [vmem:[%s28286_s1 + $0x2a74] ss:$28 sps:$4 sm:$0xff]   ;;  %v19753_v47 = vld [vmem:[%s28286_s1 + $0x157c] ss:$28 sps:$4 sm:$0xff]  }
 0x228   :  { %13481 = vmatpush1.bf16.msra.mxu1 %v19695_v50  ;;  %v19751_v50 = vld [vmem:[%s28286_s1 + $0x1578] ss:$28 sps:$4 sm:$0xff]  }
 0x229   :  { %12989 = vmatpush1.bf16.msra.mxu0 %v19692_v49  ;;  %13482 = vmatprep.subr.bf16.mxu1 %v19703_v55  ;;  %v19748_v49 = vld [vmem:[%s28286_s1 + $0x2a70] ss:$28 sps:$4 sm:$0xff]  }
 0x22a   :  { %12990 = vmatprep.subr.bf16.mxu0 %v19700_v54  ;;  %v19756_v54 = vld [vmem:[%s28286_s1 + $0x2aac] ss:$28 sps:$4 sm:$0xff]   ;;  %v19759_v55 = vld [vmem:[%s28286_s1 + $0x15b4] ss:$28 sps:$4 sm:$0xff]  }
 0x22c   :  { %13483 = vmatpush1.bf16.msra.mxu1 %v19701_v12  ;;  %v19757_v12 = vld [vmem:[%s28286_s1 + $0x15b0] ss:$28 sps:$4 sm:$0xff]  }
 0x22d   :  { %12991 = vmatpush1.bf16.msra.mxu0 %v19698_v58  ;;  %13484 = vmatprep.subr.bf16.mxu1 %v19709_v61  ;;  %v19754_v58 = vld [vmem:[%s28286_s1 + $0x2aa8] ss:$28 sps:$4 sm:$0xff]  }
 0x22e   :  { %12992 = vmatprep.subr.bf16.mxu0 %v19706_v60  ;;  %v19762_v60 = vld [vmem:[%s28286_s1 + $0x2ae4] ss:$28 sps:$4 sm:$0xff]   ;;  %v19765_v61 = vld [vmem:[%s28286_s1 + $0x15ec] ss:$28 sps:$4 sm:$0xff]  }
 0x230   :  { %13485 = vmatpush1.bf16.msra.mxu1 %v19707_v63  ;;  %v19763_v63 = vld [vmem:[%s28286_s1 + $0x15e8] ss:$28 sps:$4 sm:$0xff]  }
 0x231   :  { %12993 = vmatpush1.bf16.msra.mxu0 %v19704_v62  ;;  %13486 = vmatprep.subr.bf16.mxu1 %v19715_v1  ;;  %v19760_v62 = vld [vmem:[%s28286_s1 + $0x2ae0] ss:$28 sps:$4 sm:$0xff]  }
 0x232   :  { %12994 = vmatprep.subr.bf16.mxu0 %v19712_v0  ;;  %v19768_v0 = vld [vmem:[%s28286_s1 + $0x2b1c] ss:$28 sps:$4 sm:$0xff]   ;;  %v19771_v1 = vld [vmem:[%s28286_s1 + $0x1624] ss:$28 sps:$4 sm:$0xff]  }
 0x234   :  { %13487 = vmatpush1.bf16.msra.mxu1 %v19713_v3  ;;  %v19769_v3 = vld [vmem:[%s28286_s1 + $0x1620] ss:$28 sps:$4 sm:$0xff]  }
 0x235   :  { %12995 = vmatpush1.bf16.msra.mxu0 %v19710_v2  ;;  %13488 = vmatprep.subr.bf16.mxu1 %v19721_v5  ;;  %v19766_v2 = vld [vmem:[%s28286_s1 + $0x2b18] ss:$28 sps:$4 sm:$0xff]  }
 0x236   :  { %12996 = vmatprep.subr.bf16.mxu0 %v19718_v4  ;;  %v19774_v4 = vld [vmem:[%s28286_s1 + $0x2b54] ss:$28 sps:$4 sm:$0xff]   ;;  %v19777_v5 = vld [vmem:[%s28286_s1 + $0x165c] ss:$28 sps:$4 sm:$0xff]  }
 0x238   :  { %13489 = vmatpush1.bf16.msra.mxu1 %v19719_v57  ;;  %v19775_v57 = vld [vmem:[%s28286_s1 + $0x1658] ss:$28 sps:$4 sm:$0xff]  }
 0x239   :  { %12997 = vmatpush1.bf16.msra.mxu0 %v19716_v14  ;;  %13490 = vmatprep.subr.bf16.mxu1 %v19727_v22  ;;  %v19772_v14 = vld [vmem:[%s28286_s1 + $0x2b50] ss:$28 sps:$4 sm:$0xff]  }
 0x23a   :  { %12998 = vmatprep.subr.bf16.mxu0 %v19724_v16  ;;  %v19780_v16 = vld [vmem:[%s28286_s1 + $0x2b8c] ss:$28 sps:$4 sm:$0xff]   ;;  %v19783_v22 = vld [vmem:[%s28286_s1 + $0x1694] ss:$28 sps:$4 sm:$0xff]  }
 0x23c   :  { %13491 = vmatpush1.bf16.msra.mxu1 %v19725_v21  ;;  %v19781_v21 = vld [vmem:[%s28286_s1 + $0x1690] ss:$28 sps:$4 sm:$0xff]  }
 0x23d   :  { %12999 = vmatpush1.bf16.msra.mxu0 %v19722_v20  ;;  %13492 = vmatprep.subr.bf16.mxu1 %v19733_v27  ;;  %v19778_v20 = vld [vmem:[%s28286_s1 + $0x2b88] ss:$28 sps:$4 sm:$0xff]  }
 0x23e   :  { %13000 = vmatprep.subr.bf16.mxu0 %v19730_v26  ;;  %v19786_v26 = vld [vmem:[%s28286_s1 + $0x2bc4] ss:$28 sps:$4 sm:$0xff]   ;;  %v19789_v27 = vld [vmem:[%s28286_s1 + $0x16cc] ss:$28 sps:$4 sm:$0xff]  }
 0x240   :  { %13493 = vmatpush1.bf16.msra.mxu1 %v19731_v29  ;;  %v19787_v29 = vld [vmem:[%s28286_s1 + $0x16c8] ss:$28 sps:$4 sm:$0xff]  }
 0x241   :  { %13001 = vmatpush1.bf16.msra.mxu0 %v19728_v28  ;;  %13503 = vmatprep.subr.bf16.mxu1 %v19740_v31  ;;  %v19784_v28 = vld [vmem:[%s28286_s1 + $0x2bc0] ss:$28 sps:$4 sm:$0xff]  }
 0x242   :  { %13011 = vmatprep.subr.bf16.mxu0 %v19737_v30  ;;  %v19792_v30 = vld [vmem:[%s28286_s1 + $0x2bfc] ss:$28 sps:$4 sm:$0xff]   ;;  %v19795_v31 = vld [vmem:[%s28286_s1 + $0x1704] ss:$28 sps:$4 sm:$0xff]  }
 0x243   :  { %13495 = vmatmul.mubr.bf16.vlgmr.msra.gmra.mrb[4].mxu1 %v22435_v37 }
 0x244   :  { %13003 = vmatmul.mubr.bf16.vlgmr.msra.gmra.mrb[0].mxu0 %v23695_v33  ;;  %13504 = vmatpush1.bf16.msra.mxu1 %v19738_v40  ;;  %v19793_v40 = vld [vmem:[%s28286_s1 + $0x1700] ss:$28 sps:$4 sm:$0xff]  }
 0x245   :  { %13012 = vmatpush1.bf16.msra.mxu0 %v19735_v34  ;;  %13505 = vmatprep.subr.bf16.mxu1 %v19747_v51  ;;  %v19790_v34 = vld [vmem:[%s28286_s1 + $0x2bf8] ss:$28 sps:$4 sm:$0xff]  }
 0x246   :  { %13013 = vmatprep.subr.bf16.mxu0 %v19744_v42  ;;  %13043 = vmatprep.mubr.bf16.mxu0 %v23711_v43  ;;  %v19798_v42 = vld [vmem:[%s28286_s1 + $0x2c34] ss:$28 sps:$4 sm:$0xff]   ;;  %v19801_v51 = vld [vmem:[%s28286_s1 + $0x173c] ss:$28 sps:$4 sm:$0xff]  }
 0x247   :  { %13535 = vmatprep.mubr.bf16.mxu1 %v22453_v41 }
 0x248   :  { %13506 = vmatpush1.bf16.msra.mxu1 %v19745_v10  ;;  %v19799_v10 = vld [vmem:[%s28286_s1 + $0x1738] ss:$28 sps:$4 sm:$0xff]  }
 0x249   :  { %13014 = vmatpush1.bf16.msra.mxu0 %v19742_v44  ;;  %13507 = vmatprep.subr.bf16.mxu1 %v19753_v47  ;;  %v19796_v44 = vld [vmem:[%s28286_s1 + $0x2c30] ss:$28 sps:$4 sm:$0xff]  }
 0x24a   :  { %13015 = vmatprep.subr.bf16.mxu0 %v19750_v46  ;;  %v19804_v46 = vld [vmem:[%s28286_s1 + $0x2c6c] ss:$28 sps:$4 sm:$0xff]   ;;  %v19807_v47 = vld [vmem:[%s28286_s1 + $0x1774] ss:$28 sps:$4 sm:$0xff]  }
 0x24c   :  { %13508 = vmatpush1.bf16.msra.mxu1 %v19751_v50  ;;  %v19805_v50 = vld [vmem:[%s28286_s1 + $0x1770] ss:$28 sps:$4 sm:$0xff]  }
 0x24d   :  { %13016 = vmatpush1.bf16.msra.mxu0 %v19748_v49  ;;  %13509 = vmatprep.subr.bf16.mxu1 %v19759_v55  ;;  %v19802_v49 = vld [vmem:[%s28286_s1 + $0x2c68] ss:$28 sps:$4 sm:$0xff]  }
 0x24e   :  { %13017 = vmatprep.subr.bf16.mxu0 %v19756_v54  ;;  %v19810_v54 = vld [vmem:[%s28286_s1 + $0x2ca4] ss:$28 sps:$4 sm:$0xff]   ;;  %v19813_v55 = vld [vmem:[%s28286_s1 + $0x17ac] ss:$28 sps:$4 sm:$0xff]  }
 0x250   :  { %13510 = vmatpush1.bf16.msra.mxu1 %v19757_v12  ;;  %v19811_v12 = vld [vmem:[%s28286_s1 + $0x17a8] ss:$28 sps:$4 sm:$0xff]  }
 0x251   :  { %13018 = vmatpush1.bf16.msra.mxu0 %v19754_v58  ;;  %13511 = vmatprep.subr.bf16.mxu1 %v19765_v61  ;;  %v19808_v58 = vld [vmem:[%s28286_s1 + $0x2ca0] ss:$28 sps:$4 sm:$0xff]  }
 0x252   :  { %13019 = vmatprep.subr.bf16.mxu0 %v19762_v60  ;;  %v19816_v60 = vld [vmem:[%s28286_s1 + $0x2cdc] ss:$28 sps:$4 sm:$0xff]   ;;  %v19819_v61 = vld [vmem:[%s28286_s1 + $0x17e4] ss:$28 sps:$4 sm:$0xff]  }
 0x254   :  { %13512 = vmatpush1.bf16.msra.mxu1 %v19763_v63  ;;  %v19817_v63 = vld [vmem:[%s28286_s1 + $0x17e0] ss:$28 sps:$4 sm:$0xff]  }
 0x255   :  { %13020 = vmatpush1.bf16.msra.mxu0 %v19760_v62  ;;  %13513 = vmatprep.subr.bf16.mxu1 %v19771_v1  ;;  %v19814_v62 = vld [vmem:[%s28286_s1 + $0x2cd8] ss:$28 sps:$4 sm:$0xff]  }
 0x256   :  { %13021 = vmatprep.subr.bf16.mxu0 %v19768_v0  ;;  %v19822_v0 = vld [vmem:[%s28286_s1 + $0x2d14] ss:$28 sps:$4 sm:$0xff]   ;;  %v19825_v1 = vld [vmem:[%s28286_s1 + $0x181c] ss:$28 sps:$4 sm:$0xff]  }
 0x258   :  { %13514 = vmatpush1.bf16.msra.mxu1 %v19769_v3  ;;  %v19823_v3 = vld [vmem:[%s28286_s1 + $0x1818] ss:$28 sps:$4 sm:$0xff]  }
 0x259   :  { %13022 = vmatpush1.bf16.msra.mxu0 %v19766_v2  ;;  %13515 = vmatprep.subr.bf16.mxu1 %v19777_v5  ;;  %v19820_v2 = vld [vmem:[%s28286_s1 + $0x2d10] ss:$28 sps:$4 sm:$0xff]  }
 0x25a   :  { %13023 = vmatprep.subr.bf16.mxu0 %v19774_v4  ;;  %v19828_v4 = vld [vmem:[%s28286_s1 + $0x2d4c] ss:$28 sps:$4 sm:$0xff]   ;;  %v19831_v5 = vld [vmem:[%s28286_s1 + $0x1854] ss:$28 sps:$4 sm:$0xff]  }
 0x25c   :  { %13516 = vmatpush1.bf16.msra.mxu1 %v19775_v57  ;;  %v19829_v57 = vld [vmem:[%s28286_s1 + $0x1850] ss:$28 sps:$4 sm:$0xff]  }
 0x25d   :  { %13024 = vmatpush1.bf16.msra.mxu0 %v19772_v14  ;;  %13517 = vmatprep.subr.bf16.mxu1 %v19783_v22  ;;  %v19826_v14 = vld [vmem:[%s28286_s1 + $0x2d48] ss:$28 sps:$4 sm:$0xff]  }
 0x25e   :  { %13025 = vmatprep.subr.bf16.mxu0 %v19780_v16  ;;  %v19835_v16 = vld [vmem:[%s28286_s1 + $0x2d84] ss:$28 sps:$4 sm:$0xff]   ;;  %v19838_v22 = vld [vmem:[%s28286_s1 + $0x188c] ss:$28 sps:$4 sm:$0xff]  }
 0x260   :  { %13518 = vmatpush1.bf16.msra.mxu1 %v19781_v21  ;;  %v23904_v21 = vcombine.low %v23691_v32, %v23691_v32  ;;  %v19845_v32 = vld [vmem:[%s28286_s1 + $0x18c4] ss:$28 sps:$4 sm:$0xff]  }
 0x261   :  { %13026 = vmatpush1.bf16.msra.mxu0 %v19778_v20  ;;  %13519 = vmatprep.subr.bf16.mxu1 %v19789_v27  ;;  %v23900_v20 = vld [vmem:[%s28287_s0 + $0x68] sm:$0xff] }
 0x262   :  { %13027 = vmatprep.subr.bf16.mxu0 %v19786_v26  ;;  %v19833_v26 = vld [vmem:[%s28286_s1 + $0x2d80] ss:$28 sps:$4 sm:$0xff]   ;;  %v19836_v27 = vld [vmem:[%s28286_s1 + $0x1888] ss:$28 sps:$4 sm:$0xff]  }
 0x264   :  { %13520 = vmatpush1.bf16.msra.mxu1 %v19787_v29  ;;  %v23920_v29 = vcombine.high %v23900_v20, %v23900_v20 }
 0x265   :  { %13028 = vmatpush1.bf16.msra.mxu0 %v19784_v28  ;;  %13521 = vmatprep.subr.bf16.mxu1 %v19795_v31  ;;  %v19842_v28 = vld [vmem:[%s28286_s1 + $0x2dbc] ss:$28 sps:$4 sm:$0xff]  }
 0x266   :  { %13029 = vmatprep.subr.bf16.mxu0 %v19792_v30  ;;  %v19840_v30 = vld [vmem:[%s28286_s1 + $0x2db8] ss:$28 sps:$4 sm:$0xff]   ;;  %v19843_v31 = vld [vmem:[%s28286_s1 + $0x18c0] ss:$28 sps:$4 sm:$0xff]  }
 0x268   :  { %13522 = vmatpush1.bf16.msra.mxu1 %v19793_v40  ;;  %v19851_v40 = vld [vmem:[%s28286_s1 + $0x18fc] ss:$28 sps:$4 sm:$0xff]  }
 0x269   :  { %13030 = vmatpush1.bf16.msra.mxu0 %v19790_v34  ;;  %13523 = vmatprep.subr.bf16.mxu1 %v19801_v51  ;;  %v19848_v34 = vld [vmem:[%s28286_s1 + $0x2df4] ss:$28 sps:$4 sm:$0xff]  }
 0x26a   :  { %13031 = vmatprep.subr.bf16.mxu0 %v19798_v42  ;;  %v19846_v42 = vld [vmem:[%s28286_s1 + $0x2df0] ss:$28 sps:$4 sm:$0xff]   ;;  %v19849_v51 = vld [vmem:[%s28286_s1 + $0x18f8] ss:$28 sps:$4 sm:$0xff]  }
 0x26c   :  { %13524 = vmatpush1.bf16.msra.mxu1 %v19799_v10  ;;  %v19857_v10 = vld [vmem:[%s28286_s1 + $0x1934] ss:$28 sps:$4 sm:$0xff]  }
 0x26d   :  { %13032 = vmatpush1.bf16.msra.mxu0 %v19796_v44  ;;  %13525 = vmatprep.subr.bf16.mxu1 %v19807_v47  ;;  %v19854_v44 = vld [vmem:[%s28286_s1 + $0x2e2c] ss:$28 sps:$4 sm:$0xff]  }
 0x26e   :  { %13033 = vmatprep.subr.bf16.mxu0 %v19804_v46  ;;  %v19852_v46 = vld [vmem:[%s28286_s1 + $0x2e28] ss:$28 sps:$4 sm:$0xff]   ;;  %v19855_v47 = vld [vmem:[%s28286_s1 + $0x1930] ss:$28 sps:$4 sm:$0xff]  }
 0x270   :  { %13526 = vmatpush1.bf16.msra.mxu1 %v19805_v50  ;;  %v19863_v50 = vld [vmem:[%s28286_s1 + $0x196c] ss:$28 sps:$4 sm:$0xff]  }
 0x271   :  { %13034 = vmatpush1.bf16.msra.mxu0 %v19802_v49  ;;  %13527 = vmatprep.subr.bf16.mxu1 %v19813_v55  ;;  %v19860_v49 = vld [vmem:[%s28286_s1 + $0x2e64] ss:$28 sps:$4 sm:$0xff]  }
 0x272   :  { %13035 = vmatprep.subr.bf16.mxu0 %v19810_v54  ;;  %v19858_v54 = vld [vmem:[%s28286_s1 + $0x2e60] ss:$28 sps:$4 sm:$0xff]   ;;  %v19861_v55 = vld [vmem:[%s28286_s1 + $0x1968] ss:$28 sps:$4 sm:$0xff]  }
 0x274   :  { %13528 = vmatpush1.bf16.msra.mxu1 %v19811_v12  ;;  %v19869_v12 = vld [vmem:[%s28286_s1 + $0x19a4] ss:$28 sps:$4 sm:$0xff]  }
 0x275   :  { %13036 = vmatpush1.bf16.msra.mxu0 %v19808_v58  ;;  %13529 = vmatprep.subr.bf16.mxu1 %v19819_v61  ;;  %v19866_v58 = vld [vmem:[%s28286_s1 + $0x2e9c] ss:$28 sps:$4 sm:$0xff]  }
 0x276   :  { %13037 = vmatprep.subr.bf16.mxu0 %v19816_v60  ;;  %v19864_v60 = vld [vmem:[%s28286_s1 + $0x2e98] ss:$28 sps:$4 sm:$0xff]   ;;  %v19867_v61 = vld [vmem:[%s28286_s1 + $0x19a0] ss:$28 sps:$4 sm:$0xff]  }
 0x278   :  { %13530 = vmatpush1.bf16.msra.mxu1 %v19817_v63  ;;  %v19875_v63 = vld [vmem:[%s28286_s1 + $0x19dc] ss:$28 sps:$4 sm:$0xff]  }
 0x279   :  { %13038 = vmatpush1.bf16.msra.mxu0 %v19814_v62  ;;  %13531 = vmatprep.subr.bf16.mxu1 %v19825_v1  ;;  %v19872_v62 = vld [vmem:[%s28286_s1 + $0x2ed4] ss:$28 sps:$4 sm:$0xff]  }
 0x27a   :  { %13039 = vmatprep.subr.bf16.mxu0 %v19822_v0  ;;  %v19870_v0 = vld [vmem:[%s28286_s1 + $0x2ed0] ss:$28 sps:$4 sm:$0xff]   ;;  %v19873_v1 = vld [vmem:[%s28286_s1 + $0x19d8] ss:$28 sps:$4 sm:$0xff]  }
 0x27c   :  { %13532 = vmatpush1.bf16.msra.mxu1 %v19823_v3  ;;  %v19881_v3 = vld [vmem:[%s28286_s1 + $0x1a14] ss:$28 sps:$4 sm:$0xff]  }
 0x27d   :  { %13040 = vmatpush1.bf16.msra.mxu0 %v19820_v2  ;;  %13533 = vmatprep.subr.bf16.mxu1 %v19831_v5  ;;  %v19878_v2 = vld [vmem:[%s28286_s1 + $0x2f0c] ss:$28 sps:$4 sm:$0xff]  }
 0x27e   :  { %13041 = vmatprep.subr.bf16.mxu0 %v19828_v4  ;;  %v19876_v4 = vld [vmem:[%s28286_s1 + $0x2f08] ss:$28 sps:$4 sm:$0xff]   ;;  %v19879_v5 = vld [vmem:[%s28286_s1 + $0x1a10] ss:$28 sps:$4 sm:$0xff]  }
 0x280   :  { %13534 = vmatpush1.bf16.msra.mxu1 %v19829_v57  ;;  %v19887_v57 = vld [vmem:[%s28286_s1 + $0x1a4c] ss:$28 sps:$4 sm:$0xff]  }
 0x281   :  { %13042 = vmatpush1.bf16.msra.mxu0 %v19826_v14  ;;  %13544 = vmatprep.subr.bf16.mxu1 %v19838_v22  ;;  %v19884_v14 = vld [vmem:[%s28286_s1 + $0x2f44] ss:$28 sps:$4 sm:$0xff]  }
 0x282   :  { %13052 = vmatprep.subr.bf16.mxu0 %v19835_v16  ;;  %v19882_v16 = vld [vmem:[%s28286_s1 + $0x2f40] ss:$28 sps:$4 sm:$0xff]   ;;  %v19885_v22 = vld [vmem:[%s28286_s1 + $0x1a48] ss:$28 sps:$4 sm:$0xff]  }
 0x283   :  { %13536 = vmatmul.mubr.bf16.vlgmr.msra.gmra.mrb[4].mxu1 %v22647_v56 }
 0x284   :  { %13044 = vmatmul.mubr.bf16.vlgmr.msra.gmra.mrb[0].mxu0 %v23904_v21  ;;  %13545 = vmatpush1.bf16.msra.mxu1 %v19836_v27  ;;  %v19893_v27 = vld [vmem:[%s28286_s1 + $0x1a84] ss:$28 sps:$4 sm:$0xff]  }
 0x285   :  { %13053 = vmatpush1.bf16.msra.mxu0 %v19833_v26  ;;  %13546 = vmatprep.subr.bf16.mxu1 %v19845_v32  ;;  %v19890_v26 = vld [vmem:[%s28286_s1 + $0x2f7c] ss:$28 sps:$4 sm:$0xff]  }
 0x286   :  { %13054 = vmatprep.subr.bf16.mxu0 %v19842_v28  ;;  %13084 = vmatprep.mubr.bf16.mxu0 %v23920_v29  ;;  %v19888_v28 = vld [vmem:[%s28286_s1 + $0x2f78] ss:$28 sps:$4 sm:$0xff]   ;;  %v19891_v32 = vld [vmem:[%s28286_s1 + $0x1a80] ss:$28 sps:$4 sm:$0xff]  }
 0x287   :  { %13576 = vmatprep.mubr.bf16.mxu1 %v22662_v39 }
 0x288   :  { %13547 = vmatpush1.bf16.msra.mxu1 %v19843_v31  ;;  %v19899_v31 = vld [vmem:[%s28286_s1 + $0x1abc] ss:$28 sps:$4 sm:$0xff]  }
 0x289   :  { %13055 = vmatpush1.bf16.msra.mxu0 %v19840_v30  ;;  %13548 = vmatprep.subr.bf16.mxu1 %v19851_v40  ;;  %v19896_v30 = vld [vmem:[%s28286_s1 + $0x2fb4] ss:$28 sps:$4 sm:$0xff]  }
 0x28a   :  { %13056 = vmatprep.subr.bf16.mxu0 %v19848_v34  ;;  %v19894_v34 = vld [vmem:[%s28286_s1 + $0x2fb0] ss:$28 sps:$4 sm:$0xff]   ;;  %v19897_v40 = vld [vmem:[%s28286_s1 + $0x1ab8] ss:$28 sps:$4 sm:$0xff]  }
 0x28c   :  { %13549 = vmatpush1.bf16.msra.mxu1 %v19849_v51  ;;  %v19905_v51 = vld [vmem:[%s28286_s1 + $0x1af4] ss:$28 sps:$4 sm:$0xff]  }
 0x28d   :  { %13057 = vmatpush1.bf16.msra.mxu0 %v19846_v42  ;;  %13550 = vmatprep.subr.bf16.mxu1 %v19857_v10  ;;  %v19902_v42 = vld [vmem:[%s28286_s1 + $0x2fec] ss:$28 sps:$4 sm:$0xff]  }
 0x28e   :  { %13058 = vmatprep.subr.bf16.mxu0 %v19854_v44  ;;  %v19900_v44 = vld [vmem:[%s28286_s1 + $0x2fe8] ss:$28 sps:$4 sm:$0xff]   ;;  %v19903_v10 = vld [vmem:[%s28286_s1 + $0x1af0] ss:$28 sps:$4 sm:$0xff]  }
 0x290   :  { %13551 = vmatpush1.bf16.msra.mxu1 %v19855_v47  ;;  %v19911_v47 = vld [vmem:[%s28286_s1 + $0x1b2c] ss:$28 sps:$4 sm:$0xff]  }
 0x291   :  { %13059 = vmatpush1.bf16.msra.mxu0 %v19852_v46  ;;  %13552 = vmatprep.subr.bf16.mxu1 %v19863_v50  ;;  %v19908_v46 = vld [vmem:[%s28286_s1 + $0x3024] ss:$28 sps:$4 sm:$0xff]  }
 0x292   :  { %13060 = vmatprep.subr.bf16.mxu0 %v19860_v49  ;;  %v19906_v49 = vld [vmem:[%s28286_s1 + $0x3020] ss:$28 sps:$4 sm:$0xff]   ;;  %v19909_v50 = vld [vmem:[%s28286_s1 + $0x1b28] ss:$28 sps:$4 sm:$0xff]  }
 0x294   :  { %13553 = vmatpush1.bf16.msra.mxu1 %v19861_v55  ;;  %v19917_v55 = vld [vmem:[%s28286_s1 + $0x1b64] ss:$28 sps:$4 sm:$0xff]  }
 0x295   :  { %13061 = vmatpush1.bf16.msra.mxu0 %v19858_v54  ;;  %13554 = vmatprep.subr.bf16.mxu1 %v19869_v12  ;;  %v19914_v54 = vld [vmem:[%s28286_s1 + $0x305c] ss:$28 sps:$4 sm:$0xff]  }
 0x296   :  { %13062 = vmatprep.subr.bf16.mxu0 %v19866_v58  ;;  %v19912_v58 = vld [vmem:[%s28286_s1 + $0x3058] ss:$28 sps:$4 sm:$0xff]   ;;  %v19915_v12 = vld [vmem:[%s28286_s1 + $0x1b60] ss:$28 sps:$4 sm:$0xff]  }
 0x298   :  { %13555 = vmatpush1.bf16.msra.mxu1 %v19867_v61  ;;  %v19923_v61 = vld [vmem:[%s28286_s1 + $0x1b9c] ss:$28 sps:$4 sm:$0xff]  }
 0x299   :  { %13063 = vmatpush1.bf16.msra.mxu0 %v19864_v60  ;;  %13556 = vmatprep.subr.bf16.mxu1 %v19875_v63  ;;  %v19920_v60 = vld [vmem:[%s28286_s1 + $0x3094] ss:$28 sps:$4 sm:$0xff]  }
 0x29a   :  { %13064 = vmatprep.subr.bf16.mxu0 %v19872_v62  ;;  %v19918_v62 = vld [vmem:[%s28286_s1 + $0x3090] ss:$28 sps:$4 sm:$0xff]   ;;  %v19921_v63 = vld [vmem:[%s28286_s1 + $0x1b98] ss:$28 sps:$4 sm:$0xff]  }
 0x29c   :  { %13557 = vmatpush1.bf16.msra.mxu1 %v19873_v1  ;;  %v19929_v1 = vld [vmem:[%s28286_s1 + $0x1bd4] ss:$28 sps:$4 sm:$0xff]  }
 0x29d   :  { %13065 = vmatpush1.bf16.msra.mxu0 %v19870_v0  ;;  %13558 = vmatprep.subr.bf16.mxu1 %v19881_v3  ;;  %v19926_v0 = vld [vmem:[%s28286_s1 + $0x30cc] ss:$28 sps:$4 sm:$0xff]  }
 0x29e   :  { %13066 = vmatprep.subr.bf16.mxu0 %v19878_v2  ;;  %v19924_v2 = vld [vmem:[%s28286_s1 + $0x30c8] ss:$28 sps:$4 sm:$0xff]   ;;  %v19927_v3 = vld [vmem:[%s28286_s1 + $0x1bd0] ss:$28 sps:$4 sm:$0xff]  }
 0x2a0   :  { %13559 = vmatpush1.bf16.msra.mxu1 %v19879_v5  ;;  %v19936_v5 = vld [vmem:[%s28286_s1 + $0x1c0c] ss:$28 sps:$4 sm:$0xff]  }
 0x2a1   :  { %13067 = vmatpush1.bf16.msra.mxu0 %v19876_v4  ;;  %13560 = vmatprep.subr.bf16.mxu1 %v19887_v57  ;;  %v19933_v4 = vld [vmem:[%s28286_s1 + $0x3104] ss:$28 sps:$4 sm:$0xff]   ;;  %v24113_v57 = vcombine.low %v23900_v20, %v23900_v20 }
 0x2a2   :  { %13068 = vmatprep.subr.bf16.mxu0 %v19884_v14  ;;  %v24109_v14 = vld [vmem:[%s28287_s0 + $0x70] sm:$0xff]  ;;  %v19943_v20 = vld [vmem:[%s28286_s1 + $0x1c44] ss:$28 sps:$4 sm:$0xff]  }
 0x2a4   :  { %13561 = vmatpush1.bf16.msra.mxu1 %v19885_v22  ;;  %v19934_v22 = vld [vmem:[%s28286_s1 + $0x1c08] ss:$28 sps:$4 sm:$0xff]  }
 0x2a5   :  { %13069 = vmatpush1.bf16.msra.mxu0 %v19882_v16  ;;  %13562 = vmatprep.subr.bf16.mxu1 %v19893_v27  ;;  %v19931_v16 = vld [vmem:[%s28286_s1 + $0x3100] ss:$28 sps:$4 sm:$0xff]   ;;  %v24129_v27 = vcombine.high %v24109_v14, %v24109_v14 }
 0x2a6   :  { %13070 = vmatprep.subr.bf16.mxu0 %v19890_v26  ;;  %v19940_v26 = vld [vmem:[%s28286_s1 + $0x313c] ss:$28 sps:$4 sm:$0xff]  }
 0x2a8   :  { %13563 = vmatpush1.bf16.msra.mxu1 %v19891_v32  ;;  %v19941_v32 = vld [vmem:[%s28286_s1 + $0x1c40] ss:$28 sps:$4 sm:$0xff]  }
 0x2a9   :  { %13071 = vmatpush1.bf16.msra.mxu0 %v19888_v28  ;;  %13564 = vmatprep.subr.bf16.mxu1 %v19899_v31  ;;  %v19938_v28 = vld [vmem:[%s28286_s1 + $0x3138] ss:$28 sps:$4 sm:$0xff]  }
 0x2aa   :  { %13072 = vmatprep.subr.bf16.mxu0 %v19896_v30  ;;  %v19946_v30 = vld [vmem:[%s28286_s1 + $0x3174] ss:$28 sps:$4 sm:$0xff]   ;;  %v19949_v31 = vld [vmem:[%s28286_s1 + $0x1c7c] ss:$28 sps:$4 sm:$0xff]  }
 0x2ac   :  { %13565 = vmatpush1.bf16.msra.mxu1 %v19897_v40  ;;  %v19947_v40 = vld [vmem:[%s28286_s1 + $0x1c78] ss:$28 sps:$4 sm:$0xff]  }
 0x2ad   :  { %13073 = vmatpush1.bf16.msra.mxu0 %v19894_v34  ;;  %13566 = vmatprep.subr.bf16.mxu1 %v19905_v51  ;;  %v19944_v34 = vld [vmem:[%s28286_s1 + $0x3170] ss:$28 sps:$4 sm:$0xff]  }
 0x2ae   :  { %13074 = vmatprep.subr.bf16.mxu0 %v19902_v42  ;;  %v19952_v42 = vld [vmem:[%s28286_s1 + $0x31ac] ss:$28 sps:$4 sm:$0xff]   ;;  %v19955_v51 = vld [vmem:[%s28286_s1 + $0x1cb4] ss:$28 sps:$4 sm:$0xff]  }
 0x2b0   :  { %13567 = vmatpush1.bf16.msra.mxu1 %v19903_v10  ;;  %v19953_v10 = vld [vmem:[%s28286_s1 + $0x1cb0] ss:$28 sps:$4 sm:$0xff]  }
 0x2b1   :  { %13075 = vmatpush1.bf16.msra.mxu0 %v19900_v44  ;;  %13568 = vmatprep.subr.bf16.mxu1 %v19911_v47  ;;  %v19950_v44 = vld [vmem:[%s28286_s1 + $0x31a8] ss:$28 sps:$4 sm:$0xff]  }
 0x2b2   :  { %13076 = vmatprep.subr.bf16.mxu0 %v19908_v46  ;;  %v19958_v46 = vld [vmem:[%s28286_s1 + $0x31e4] ss:$28 sps:$4 sm:$0xff]   ;;  %v19961_v47 = vld [vmem:[%s28286_s1 + $0x1cec] ss:$28 sps:$4 sm:$0xff]  }
 0x2b4   :  { %13569 = vmatpush1.bf16.msra.mxu1 %v19909_v50  ;;  %v19959_v50 = vld [vmem:[%s28286_s1 + $0x1ce8] ss:$28 sps:$4 sm:$0xff]  }
 0x2b5   :  { %13077 = vmatpush1.bf16.msra.mxu0 %v19906_v49  ;;  %13570 = vmatprep.subr.bf16.mxu1 %v19917_v55  ;;  %v19956_v49 = vld [vmem:[%s28286_s1 + $0x31e0] ss:$28 sps:$4 sm:$0xff]  }
 0x2b6   :  { %13078 = vmatprep.subr.bf16.mxu0 %v19914_v54  ;;  %v19964_v54 = vld [vmem:[%s28286_s1 + $0x321c] ss:$28 sps:$4 sm:$0xff]   ;;  %v19967_v55 = vld [vmem:[%s28286_s1 + $0x1d24] ss:$28 sps:$4 sm:$0xff]  }
 0x2b8   :  { %13571 = vmatpush1.bf16.msra.mxu1 %v19915_v12  ;;  %v19965_v12 = vld [vmem:[%s28286_s1 + $0x1d20] ss:$28 sps:$4 sm:$0xff]  }
 0x2b9   :  { %13079 = vmatpush1.bf16.msra.mxu0 %v19912_v58  ;;  %13572 = vmatprep.subr.bf16.mxu1 %v19923_v61  ;;  %v19962_v58 = vld [vmem:[%s28286_s1 + $0x3218] ss:$28 sps:$4 sm:$0xff]  }
 0x2ba   :  { %13080 = vmatprep.subr.bf16.mxu0 %v19920_v60  ;;  %v19970_v60 = vld [vmem:[%s28286_s1 + $0x3254] ss:$28 sps:$4 sm:$0xff]   ;;  %v19973_v61 = vld [vmem:[%s28286_s1 + $0x1d5c] ss:$28 sps:$4 sm:$0xff]  }
 0x2bc   :  { %13573 = vmatpush1.bf16.msra.mxu1 %v19921_v63  ;;  %v19971_v63 = vld [vmem:[%s28286_s1 + $0x1d58] ss:$28 sps:$4 sm:$0xff]  }
 0x2bd   :  { %13081 = vmatpush1.bf16.msra.mxu0 %v19918_v62  ;;  %13574 = vmatprep.subr.bf16.mxu1 %v19929_v1  ;;  %v19968_v62 = vld [vmem:[%s28286_s1 + $0x3250] ss:$28 sps:$4 sm:$0xff]  }
 0x2be   :  { %13082 = vmatprep.subr.bf16.mxu0 %v19926_v0  ;;  %v19976_v0 = vld [vmem:[%s28286_s1 + $0x328c] ss:$28 sps:$4 sm:$0xff]   ;;  %v19979_v1 = vld [vmem:[%s28286_s1 + $0x1d94] ss:$28 sps:$4 sm:$0xff]  }
 0x2c0   :  { %13575 = vmatpush1.bf16.msra.mxu1 %v19927_v3  ;;  %v19977_v3 = vld [vmem:[%s28286_s1 + $0x1d90] ss:$28 sps:$4 sm:$0xff]  }
 0x2c1   :  { %13083 = vmatpush1.bf16.msra.mxu0 %v19924_v2  ;;  %13585 = vmatprep.subr.bf16.mxu1 %v19936_v5  ;;  %v19974_v2 = vld [vmem:[%s28286_s1 + $0x3288] ss:$28 sps:$4 sm:$0xff]  }
 0x2c2   :  { %13093 = vmatprep.subr.bf16.mxu0 %v19933_v4  ;;  %v19982_v4 = vld [vmem:[%s28286_s1 + $0x32c4] ss:$28 sps:$4 sm:$0xff]   ;;  %v19985_v5 = vld [vmem:[%s28286_s1 + $0x1dcc] ss:$28 sps:$4 sm:$0xff]  }
 0x2c3   :  { %13577 = vmatmul.mubr.bf16.vlgmr.msra.gmra.mrb[4].mxu1 %v22855_v11 }
 0x2c4   :  { %13085 = vmatmul.mubr.bf16.vlgmr.msra.gmra.mrb[0].mxu0 %v24113_v57  ;;  %13586 = vmatpush1.bf16.msra.mxu1 %v19934_v22  ;;  %v19983_v22 = vld [vmem:[%s28286_s1 + $0x1dc8] ss:$28 sps:$4 sm:$0xff]  }
 0x2c5   :  { %13094 = vmatpush1.bf16.msra.mxu0 %v19931_v16  ;;  %13587 = vmatprep.subr.bf16.mxu1 %v19943_v20  ;;  %v19980_v16 = vld [vmem:[%s28286_s1 + $0x32c0] ss:$28 sps:$4 sm:$0xff]  }
 0x2c6   :  { %13095 = vmatprep.subr.bf16.mxu0 %v19940_v26  ;;  %13125 = vmatprep.mubr.bf16.mxu0 %v24129_v27  ;;  %v19988_v26 = vld [vmem:[%s28286_s1 + $0x32fc] ss:$28 sps:$4 sm:$0xff]   ;;  %v19991_v20 = vld [vmem:[%s28286_s1 + $0x1e04] ss:$28 sps:$4 sm:$0xff]  }
 0x2c7   :  { %13617 = vmatprep.mubr.bf16.mxu1 %v22871_v15 }
 0x2c8   :  { %13588 = vmatpush1.bf16.msra.mxu1 %v19941_v32  ;;  %v19989_v32 = vld [vmem:[%s28286_s1 + $0x1e00] ss:$28 sps:$4 sm:$0xff]  }
 0x2c9   :  { %13096 = vmatpush1.bf16.msra.mxu0 %v19938_v28  ;;  %13589 = vmatprep.subr.bf16.mxu1 %v19949_v31  ;;  %v19986_v28 = vld [vmem:[%s28286_s1 + $0x32f8] ss:$28 sps:$4 sm:$0xff]  }
 0x2ca   :  { %13097 = vmatprep.subr.bf16.mxu0 %v19946_v30  ;;  %v19994_v30 = vld [vmem:[%s28286_s1 + $0x3334] ss:$28 sps:$4 sm:$0xff]   ;;  %v19997_v31 = vld [vmem:[%s28286_s1 + $0x1e3c] ss:$28 sps:$4 sm:$0xff]  }
 0x2cc   :  { %13590 = vmatpush1.bf16.msra.mxu1 %v19947_v40  ;;  %v19995_v40 = vld [vmem:[%s28286_s1 + $0x1e38] ss:$28 sps:$4 sm:$0xff]  }
 0x2cd   :  { %13098 = vmatpush1.bf16.msra.mxu0 %v19944_v34  ;;  %13591 = vmatprep.subr.bf16.mxu1 %v19955_v51  ;;  %v19992_v34 = vld [vmem:[%s28286_s1 + $0x3330] ss:$28 sps:$4 sm:$0xff]  }
 0x2ce   :  { %13099 = vmatprep.subr.bf16.mxu0 %v19952_v42  ;;  %v20000_v42 = vld [vmem:[%s28286_s1 + $0x336c] ss:$28 sps:$4 sm:$0xff]   ;;  %v20003_v51 = vld [vmem:[%s28286_s1 + $0x1e74] ss:$28 sps:$4 sm:$0xff]  }
 0x2d0   :  { %13592 = vmatpush1.bf16.msra.mxu1 %v19953_v10  ;;  %v20001_v10 = vld [vmem:[%s28286_s1 + $0x1e70] ss:$28 sps:$4 sm:$0xff]  }
 0x2d1   :  { %13100 = vmatpush1.bf16.msra.mxu0 %v19950_v44  ;;  %13593 = vmatprep.subr.bf16.mxu1 %v19961_v47  ;;  %v19998_v44 = vld [vmem:[%s28286_s1 + $0x3368] ss:$28 sps:$4 sm:$0xff]  }
 0x2d2   :  { %13101 = vmatprep.subr.bf16.mxu0 %v19958_v46  ;;  %v20006_v46 = vld [vmem:[%s28286_s1 + $0x33a4] ss:$28 sps:$4 sm:$0xff]   ;;  %v20009_v47 = vld [vmem:[%s28286_s1 + $0x1eac] ss:$28 sps:$4 sm:$0xff]  }
 0x2d4   :  { %13594 = vmatpush1.bf16.msra.mxu1 %v19959_v50  ;;  %v20007_v50 = vld [vmem:[%s28286_s1 + $0x1ea8] ss:$28 sps:$4 sm:$0xff]  }
 0x2d5   :  { %13102 = vmatpush1.bf16.msra.mxu0 %v19956_v49  ;;  %13595 = vmatprep.subr.bf16.mxu1 %v19967_v55  ;;  %v20004_v49 = vld [vmem:[%s28286_s1 + $0x33a0] ss:$28 sps:$4 sm:$0xff]  }
 0x2d6   :  { %13103 = vmatprep.subr.bf16.mxu0 %v19964_v54  ;;  %v20012_v54 = vld [vmem:[%s28286_s1 + $0x33dc] ss:$28 sps:$4 sm:$0xff]   ;;  %v20015_v55 = vld [vmem:[%s28286_s1 + $0x1ee4] ss:$28 sps:$4 sm:$0xff]  }
 0x2d8   :  { %13596 = vmatpush1.bf16.msra.mxu1 %v19965_v12  ;;  %v20013_v12 = vld [vmem:[%s28286_s1 + $0x1ee0] ss:$28 sps:$4 sm:$0xff]  }
 0x2d9   :  { %13104 = vmatpush1.bf16.msra.mxu0 %v19962_v58  ;;  %13597 = vmatprep.subr.bf16.mxu1 %v19973_v61  ;;  %v20010_v58 = vld [vmem:[%s28286_s1 + $0x33d8] ss:$28 sps:$4 sm:$0xff]  }
 0x2da   :  { %13105 = vmatprep.subr.bf16.mxu0 %v19970_v60  ;;  %v20018_v60 = vld [vmem:[%s28286_s1 + $0x3414] ss:$28 sps:$4 sm:$0xff]   ;;  %v20021_v61 = vld [vmem:[%s28286_s1 + $0x1f1c] ss:$28 sps:$4 sm:$0xff]  }
 0x2dc   :  { %13598 = vmatpush1.bf16.msra.mxu1 %v19971_v63  ;;  %v20019_v63 = vld [vmem:[%s28286_s1 + $0x1f18] ss:$28 sps:$4 sm:$0xff]  }
 0x2dd   :  { %13106 = vmatpush1.bf16.msra.mxu0 %v19968_v62  ;;  %13599 = vmatprep.subr.bf16.mxu1 %v19979_v1  ;;  %v20016_v62 = vld [vmem:[%s28286_s1 + $0x3410] ss:$28 sps:$4 sm:$0xff]  }
 0x2de   :  { %13107 = vmatprep.subr.bf16.mxu0 %v19976_v0  ;;  %v20024_v0 = vld [vmem:[%s28286_s1 + $0x344c] ss:$28 sps:$4 sm:$0xff]   ;;  %v20027_v1 = vld [vmem:[%s28286_s1 + $0x1f54] ss:$28 sps:$4 sm:$0xff]  }
 0x2e0   :  { %13600 = vmatpush1.bf16.msra.mxu1 %v19977_v3  ;;  %v20025_v3 = vld [vmem:[%s28286_s1 + $0x1f50] ss:$28 sps:$4 sm:$0xff]  }
 0x2e1   :  { %13108 = vmatpush1.bf16.msra.mxu0 %v19974_v2  ;;  %13601 = vmatprep.subr.bf16.mxu1 %v19985_v5  ;;  %v20022_v2 = vld [vmem:[%s28286_s1 + $0x3448] ss:$28 sps:$4 sm:$0xff]  }
 0x2e2   :  { %13109 = vmatprep.subr.bf16.mxu0 %v19982_v4  ;;  %v20031_v4 = vld [vmem:[%s28286_s1 + $0x3484] ss:$28 sps:$4 sm:$0xff]   ;;  %v20034_v5 = vld [vmem:[%s28286_s1 + $0x1f8c] ss:$28 sps:$4 sm:$0xff]  }
 0x2e4   :  { %13602 = vmatpush1.bf16.msra.mxu1 %v19983_v22  ;;  %v24322_v22 = vcombine.low %v24109_v14, %v24109_v14  ;;  %v20041_v14 = vld [vmem:[%s28286_s1 + $0x1fc4] ss:$28 sps:$4 sm:$0xff]  }
 0x2e5   :  { %13110 = vmatpush1.bf16.msra.mxu0 %v19980_v16  ;;  %13603 = vmatprep.subr.bf16.mxu1 %v19991_v20  ;;  %v24318_v16 = vld [vmem:[%s28287_s0 + $0x78] sm:$0xff]  ;;  %v20032_v20 = vld [vmem:[%s28286_s1 + $0x1f88] ss:$28 sps:$4 sm:$0xff]  }
 0x2e6   :  { %13111 = vmatprep.subr.bf16.mxu0 %v19988_v26  ;;  %v20029_v26 = vld [vmem:[%s28286_s1 + $0x3480] ss:$28 sps:$4 sm:$0xff]  }
 0x2e8   :  { %13604 = vmatpush1.bf16.msra.mxu1 %v19989_v32  ;;  %v24338_v32 = vcombine.high %v24318_v16, %v24318_v16 }
 0x2e9   :  { %13112 = vmatpush1.bf16.msra.mxu0 %v19986_v28  ;;  %13605 = vmatprep.subr.bf16.mxu1 %v19997_v31  ;;  %v20038_v28 = vld [vmem:[%s28286_s1 + $0x34bc] ss:$28 sps:$4 sm:$0xff]  }
 0x2ea   :  { %13113 = vmatprep.subr.bf16.mxu0 %v19994_v30  ;;  %v20036_v30 = vld [vmem:[%s28286_s1 + $0x34b8] ss:$28 sps:$4 sm:$0xff]   ;;  %v20039_v31 = vld [vmem:[%s28286_s1 + $0x1fc0] ss:$28 sps:$4 sm:$0xff]  }
 0x2ec   :  { %13606 = vmatpush1.bf16.msra.mxu1 %v19995_v40  ;;  %v20047_v40 = vld [vmem:[%s28286_s1 + $0x1ffc] ss:$28 sps:$4 sm:$0xff]  }
 0x2ed   :  { %13114 = vmatpush1.bf16.msra.mxu0 %v19992_v34  ;;  %13607 = vmatprep.subr.bf16.mxu1 %v20003_v51  ;;  %v20044_v34 = vld [vmem:[%s28286_s1 + $0x34f4] ss:$28 sps:$4 sm:$0xff]  }
 0x2ee   :  { %13115 = vmatprep.subr.bf16.mxu0 %v20000_v42  ;;  %v20042_v42 = vld [vmem:[%s28286_s1 + $0x34f0] ss:$28 sps:$4 sm:$0xff]   ;;  %v20045_v51 = vld [vmem:[%s28286_s1 + $0x1ff8] ss:$28 sps:$4 sm:$0xff]  }
 0x2f0   :  { %13608 = vmatpush1.bf16.msra.mxu1 %v20001_v10  ;;  %v20053_v10 = vld [vmem:[%s28286_s1 + $0x2034] ss:$28 sps:$4 sm:$0xff]  }
 0x2f1   :  { %13116 = vmatpush1.bf16.msra.mxu0 %v19998_v44  ;;  %13609 = vmatprep.subr.bf16.mxu1 %v20009_v47  ;;  %v20050_v44 = vld [vmem:[%s28286_s1 + $0x352c] ss:$28 sps:$4 sm:$0xff]  }
 0x2f2   :  { %13117 = vmatprep.subr.bf16.mxu0 %v20006_v46  ;;  %v20048_v46 = vld [vmem:[%s28286_s1 + $0x3528] ss:$28 sps:$4 sm:$0xff]   ;;  %v20051_v47 = vld [vmem:[%s28286_s1 + $0x2030] ss:$28 sps:$4 sm:$0xff]  }
 0x2f4   :  { %13610 = vmatpush1.bf16.msra.mxu1 %v20007_v50  ;;  %v20059_v50 = vld [vmem:[%s28286_s1 + $0x206c] ss:$28 sps:$4 sm:$0xff]  }
 0x2f5   :  { %13118 = vmatpush1.bf16.msra.mxu0 %v20004_v49  ;;  %13611 = vmatprep.subr.bf16.mxu1 %v20015_v55  ;;  %v20056_v49 = vld [vmem:[%s28286_s1 + $0x3564] ss:$28 sps:$4 sm:$0xff]  }
 0x2f6   :  { %13119 = vmatprep.subr.bf16.mxu0 %v20012_v54  ;;  %v20054_v54 = vld [vmem:[%s28286_s1 + $0x3560] ss:$28 sps:$4 sm:$0xff]   ;;  %v20057_v55 = vld [vmem:[%s28286_s1 + $0x2068] ss:$28 sps:$4 sm:$0xff]  }
 0x2f8   :  { %13612 = vmatpush1.bf16.msra.mxu1 %v20013_v12  ;;  %v20065_v12 = vld [vmem:[%s28286_s1 + $0x20a4] ss:$28 sps:$4 sm:$0xff]  }
 0x2f9   :  { %13120 = vmatpush1.bf16.msra.mxu0 %v20010_v58  ;;  %13613 = vmatprep.subr.bf16.mxu1 %v20021_v61  ;;  %v20062_v58 = vld [vmem:[%s28286_s1 + $0x359c] ss:$28 sps:$4 sm:$0xff]  }
 0x2fa   :  { %13121 = vmatprep.subr.bf16.mxu0 %v20018_v60  ;;  %v20060_v60 = vld [vmem:[%s28286_s1 + $0x3598] ss:$28 sps:$4 sm:$0xff]   ;;  %v20063_v61 = vld [vmem:[%s28286_s1 + $0x20a0] ss:$28 sps:$4 sm:$0xff]  }
 0x2fc   :  { %13614 = vmatpush1.bf16.msra.mxu1 %v20019_v63  ;;  %v20071_v63 = vld [vmem:[%s28286_s1 + $0x20dc] ss:$28 sps:$4 sm:$0xff]  }
 0x2fd   :  { %13122 = vmatpush1.bf16.msra.mxu0 %v20016_v62  ;;  %13615 = vmatprep.subr.bf16.mxu1 %v20027_v1  ;;  %v20068_v62 = vld [vmem:[%s28286_s1 + $0x35d4] ss:$28 sps:$4 sm:$0xff]  }
 0x2fe   :  { %13123 = vmatprep.subr.bf16.mxu0 %v20024_v0  ;;  %v20066_v0 = vld [vmem:[%s28286_s1 + $0x35d0] ss:$28 sps:$4 sm:$0xff]   ;;  %v20069_v1 = vld [vmem:[%s28286_s1 + $0x20d8] ss:$28 sps:$4 sm:$0xff]  }
 0x300   :  { %13616 = vmatpush1.bf16.msra.mxu1 %v20025_v3  ;;  %v20077_v3 = vld [vmem:[%s28286_s1 + $0x2114] ss:$28 sps:$4 sm:$0xff]  }
 0x301   :  { %13124 = vmatpush1.bf16.msra.mxu0 %v20022_v2  ;;  %13626 = vmatprep.subr.bf16.mxu1 %v20034_v5  ;;  %v20074_v2 = vld [vmem:[%s28286_s1 + $0x360c] ss:$28 sps:$4 sm:$0xff]  }
 0x302   :  { %13134 = vmatprep.subr.bf16.mxu0 %v20031_v4  ;;  %v20072_v4 = vld [vmem:[%s28286_s1 + $0x3608] ss:$28 sps:$4 sm:$0xff]   ;;  %v20075_v5 = vld [vmem:[%s28286_s1 + $0x2110] ss:$28 sps:$4 sm:$0xff]  }
 0x303   :  { %13618 = vmatmul.mubr.bf16.vlgmr.msra.gmra.mrb[4].mxu1 %v23064_v23 }
 0x304   :  { %13126 = vmatmul.mubr.bf16.vlgmr.msra.gmra.mrb[0].mxu0 %v24322_v22  ;;  %13627 = vmatpush1.bf16.msra.mxu1 %v20032_v20  ;;  %v20083_v20 = vld [vmem:[%s28286_s1 + $0x214c] ss:$28 sps:$4 sm:$0xff]  }
 0x305   :  { %13135 = vmatpush1.bf16.msra.mxu0 %v20029_v26  ;;  %13628 = vmatprep.subr.bf16.mxu1 %v20041_v14  ;;  %v20080_v26 = vld [vmem:[%s28286_s1 + $0x3644] ss:$28 sps:$4 sm:$0xff]  }
 0x306   :  { %13136 = vmatprep.subr.bf16.mxu0 %v20038_v28  ;;  %13166 = vmatprep.mubr.bf16.mxu0 %v24338_v32  ;;  %v20078_v28 = vld [vmem:[%s28286_s1 + $0x3640] ss:$28 sps:$4 sm:$0xff]   ;;  %v20081_v14 = vld [vmem:[%s28286_s1 + $0x2148] ss:$28 sps:$4 sm:$0xff]  }
 0x307   :  { %13658 = vmatprep.mubr.bf16.mxu1 %v23080_v45 }
 0x308   :  { %13629 = vmatpush1.bf16.msra.mxu1 %v20039_v31  ;;  %v20089_v31 = vld [vmem:[%s28286_s1 + $0x2184] ss:$28 sps:$4 sm:$0xff]  }
 0x309   :  { %13137 = vmatpush1.bf16.msra.mxu0 %v20036_v30  ;;  %13630 = vmatprep.subr.bf16.mxu1 %v20047_v40  ;;  %v20086_v30 = vld [vmem:[%s28286_s1 + $0x367c] ss:$28 sps:$4 sm:$0xff]  }
 0x30a   :  { %13138 = vmatprep.subr.bf16.mxu0 %v20044_v34  ;;  %v20084_v34 = vld [vmem:[%s28286_s1 + $0x3678] ss:$28 sps:$4 sm:$0xff]   ;;  %v20087_v40 = vld [vmem:[%s28286_s1 + $0x2180] ss:$28 sps:$4 sm:$0xff]  }
 0x30c   :  { %13631 = vmatpush1.bf16.msra.mxu1 %v20045_v51  ;;  %v20095_v51 = vld [vmem:[%s28286_s1 + $0x21bc] ss:$28 sps:$4 sm:$0xff]  }
 0x30d   :  { %13139 = vmatpush1.bf16.msra.mxu0 %v20042_v42  ;;  %13632 = vmatprep.subr.bf16.mxu1 %v20053_v10  ;;  %v20092_v42 = vld [vmem:[%s28286_s1 + $0x36b4] ss:$28 sps:$4 sm:$0xff]  }
 0x30e   :  { %13140 = vmatprep.subr.bf16.mxu0 %v20050_v44  ;;  %v20090_v44 = vld [vmem:[%s28286_s1 + $0x36b0] ss:$28 sps:$4 sm:$0xff]   ;;  %v20093_v10 = vld [vmem:[%s28286_s1 + $0x21b8] ss:$28 sps:$4 sm:$0xff]  }
 0x310   :  { %13633 = vmatpush1.bf16.msra.mxu1 %v20051_v47  ;;  %v20101_v47 = vld [vmem:[%s28286_s1 + $0x21f4] ss:$28 sps:$4 sm:$0xff]  }
 0x311   :  { %13141 = vmatpush1.bf16.msra.mxu0 %v20048_v46  ;;  %13634 = vmatprep.subr.bf16.mxu1 %v20059_v50  ;;  %v20098_v46 = vld [vmem:[%s28286_s1 + $0x36ec] ss:$28 sps:$4 sm:$0xff]  }
 0x312   :  { %13142 = vmatprep.subr.bf16.mxu0 %v20056_v49  ;;  %v20096_v49 = vld [vmem:[%s28286_s1 + $0x36e8] ss:$28 sps:$4 sm:$0xff]   ;;  %v20099_v50 = vld [vmem:[%s28286_s1 + $0x21f0] ss:$28 sps:$4 sm:$0xff]  }
 0x314   :  { %13635 = vmatpush1.bf16.msra.mxu1 %v20057_v55  ;;  %v20107_v55 = vld [vmem:[%s28286_s1 + $0x222c] ss:$28 sps:$4 sm:$0xff]  }
 0x315   :  { %13143 = vmatpush1.bf16.msra.mxu0 %v20054_v54  ;;  %13636 = vmatprep.subr.bf16.mxu1 %v20065_v12  ;;  %v20104_v54 = vld [vmem:[%s28286_s1 + $0x3724] ss:$28 sps:$4 sm:$0xff]  }
 0x316   :  { %13144 = vmatprep.subr.bf16.mxu0 %v20062_v58  ;;  %v20102_v58 = vld [vmem:[%s28286_s1 + $0x3720] ss:$28 sps:$4 sm:$0xff]   ;;  %v20105_v12 = vld [vmem:[%s28286_s1 + $0x2228] ss:$28 sps:$4 sm:$0xff]  }
 0x318   :  { %13637 = vmatpush1.bf16.msra.mxu1 %v20063_v61  ;;  %v20113_v61 = vld [vmem:[%s28286_s1 + $0x2264] ss:$28 sps:$4 sm:$0xff]  }
 0x319   :  { %13145 = vmatpush1.bf16.msra.mxu0 %v20060_v60  ;;  %13638 = vmatprep.subr.bf16.mxu1 %v20071_v63  ;;  %v20110_v60 = vld [vmem:[%s28286_s1 + $0x375c] ss:$28 sps:$4 sm:$0xff]  }
 0x31a   :  { %13146 = vmatprep.subr.bf16.mxu0 %v20068_v62  ;;  %v20108_v62 = vld [vmem:[%s28286_s1 + $0x3758] ss:$28 sps:$4 sm:$0xff]   ;;  %v20111_v63 = vld [vmem:[%s28286_s1 + $0x2260] ss:$28 sps:$4 sm:$0xff]  }
 0x31c   :  { %13639 = vmatpush1.bf16.msra.mxu1 %v20069_v1  ;;  %v20119_v1 = vld [vmem:[%s28286_s1 + $0x229c] ss:$28 sps:$4 sm:$0xff]  }
 0x31d   :  { %13147 = vmatpush1.bf16.msra.mxu0 %v20066_v0  ;;  %13640 = vmatprep.subr.bf16.mxu1 %v20077_v3  ;;  %v20116_v0 = vld [vmem:[%s28286_s1 + $0x3794] ss:$28 sps:$4 sm:$0xff]  }
 0x31e   :  { %13148 = vmatprep.subr.bf16.mxu0 %v20074_v2  ;;  %v20114_v2 = vld [vmem:[%s28286_s1 + $0x3790] ss:$28 sps:$4 sm:$0xff]   ;;  %v20117_v3 = vld [vmem:[%s28286_s1 + $0x2298] ss:$28 sps:$4 sm:$0xff]  }
 0x320   :  { %13641 = vmatpush1.bf16.msra.mxu1 %v20075_v5  ;;  %v20125_v5 = vld [vmem:[%s28286_s1 + $0x22d4] ss:$28 sps:$4 sm:$0xff]  }
 0x321   :  { %13149 = vmatpush1.bf16.msra.mxu0 %v20072_v4  ;;  %13642 = vmatprep.subr.bf16.mxu1 %v20083_v20  ;;  %v20122_v4 = vld [vmem:[%s28286_s1 + $0x37cc] ss:$28 sps:$4 sm:$0xff]  }
 0x322   :  { %13150 = vmatprep.subr.bf16.mxu0 %v20080_v26  ;;  %v20120_v26 = vld [vmem:[%s28286_s1 + $0x37c8] ss:$28 sps:$4 sm:$0xff]   ;;  %v20123_v20 = vld [vmem:[%s28286_s1 + $0x22d0] ss:$28 sps:$4 sm:$0xff]  }
 0x324   :  { %13643 = vmatpush1.bf16.msra.mxu1 %v20081_v14  ;;  %v20132_v14 = vld [vmem:[%s28286_s1 + $0x230c] ss:$28 sps:$4 sm:$0xff]  }
 0x325   :  { %13151 = vmatpush1.bf16.msra.mxu0 %v20078_v28  ;;  %13644 = vmatprep.subr.bf16.mxu1 %v20089_v31  ;;  %v20129_v28 = vld [vmem:[%s28286_s1 + $0x3804] ss:$28 sps:$4 sm:$0xff]   ;;  %v24531_v31 = vcombine.low %v24318_v16, %v24318_v16 }
 0x326   :  { %13152 = vmatprep.subr.bf16.mxu0 %v20086_v30  ;;  %v24527_v30 = vld [vmem:[%s28287_s0 + $0x80] sm:$0xff] }
 0x327   :  { %v20139_v16 = vld [vmem:[%s28286_s1 + $0x2344] ss:$28 sps:$4 sm:$0xff]  }
 0x328   :  { %13645 = vmatpush1.bf16.msra.mxu1 %v20087_v40  ;;  %v20130_v40 = vld [vmem:[%s28286_s1 + $0x2308] ss:$28 sps:$4 sm:$0xff]  }
 0x329   :  { %13153 = vmatpush1.bf16.msra.mxu0 %v20084_v34  ;;  %13646 = vmatprep.subr.bf16.mxu1 %v20095_v51  ;;  %v20127_v34 = vld [vmem:[%s28286_s1 + $0x3800] ss:$28 sps:$4 sm:$0xff]   ;;  %v24547_v51 = vcombine.high %v24527_v30, %v24527_v30 }
 0x32a   :  { %13154 = vmatprep.subr.bf16.mxu0 %v20092_v42  ;;  %v20136_v42 = vld [vmem:[%s28286_s1 + $0x383c] ss:$28 sps:$4 sm:$0xff]  }
 0x32c   :  { %13647 = vmatpush1.bf16.msra.mxu1 %v20093_v10  ;;  %v20137_v10 = vld [vmem:[%s28286_s1 + $0x2340] ss:$28 sps:$4 sm:$0xff]  }
 0x32d   :  { %13155 = vmatpush1.bf16.msra.mxu0 %v20090_v44  ;;  %13648 = vmatprep.subr.bf16.mxu1 %v20101_v47  ;;  %v20134_v44 = vld [vmem:[%s28286_s1 + $0x3838] ss:$28 sps:$4 sm:$0xff]  }
 0x32e   :  { %13156 = vmatprep.subr.bf16.mxu0 %v20098_v46  ;;  %v20142_v46 = vld [vmem:[%s28286_s1 + $0x3874] ss:$28 sps:$4 sm:$0xff]   ;;  %v20145_v47 = vld [vmem:[%s28286_s1 + $0x237c] ss:$28 sps:$4 sm:$0xff]  }
 0x330   :  { %13649 = vmatpush1.bf16.msra.mxu1 %v20099_v50  ;;  %v20143_v50 = vld [vmem:[%s28286_s1 + $0x2378] ss:$28 sps:$4 sm:$0xff]  }
 0x331   :  { %13157 = vmatpush1.bf16.msra.mxu0 %v20096_v49  ;;  %13650 = vmatprep.subr.bf16.mxu1 %v20107_v55  ;;  %v20140_v49 = vld [vmem:[%s28286_s1 + $0x3870] ss:$28 sps:$4 sm:$0xff]  }
 0x332   :  { %13158 = vmatprep.subr.bf16.mxu0 %v20104_v54  ;;  %v20148_v54 = vld [vmem:[%s28286_s1 + $0x38ac] ss:$28 sps:$4 sm:$0xff]   ;;  %v20151_v55 = vld [vmem:[%s28286_s1 + $0x23b4] ss:$28 sps:$4 sm:$0xff]  }
 0x334   :  { %13651 = vmatpush1.bf16.msra.mxu1 %v20105_v12  ;;  %v20149_v12 = vld [vmem:[%s28286_s1 + $0x23b0] ss:$28 sps:$4 sm:$0xff]  }
 0x335   :  { %13159 = vmatpush1.bf16.msra.mxu0 %v20102_v58  ;;  %13652 = vmatprep.subr.bf16.mxu1 %v20113_v61  ;;  %v20146_v58 = vld [vmem:[%s28286_s1 + $0x38a8] ss:$28 sps:$4 sm:$0xff]  }
 0x336   :  { %13160 = vmatprep.subr.bf16.mxu0 %v20110_v60  ;;  %v20154_v60 = vld [vmem:[%s28286_s1 + $0x38e4] ss:$28 sps:$4 sm:$0xff]   ;;  %v20157_v61 = vld [vmem:[%s28286_s1 + $0x23ec] ss:$28 sps:$4 sm:$0xff]  }
 0x338   :  { %13653 = vmatpush1.bf16.msra.mxu1 %v20111_v63  ;;  %v20155_v63 = vld [vmem:[%s28286_s1 + $0x23e8] ss:$28 sps:$4 sm:$0xff]  }
 0x339   :  { %13161 = vmatpush1.bf16.msra.mxu0 %v20108_v62  ;;  %13654 = vmatprep.subr.bf16.mxu1 %v20119_v1  ;;  %v20152_v62 = vld [vmem:[%s28286_s1 + $0x38e0] ss:$28 sps:$4 sm:$0xff]  }
 0x33a   :  { %13162 = vmatprep.subr.bf16.mxu0 %v20116_v0  ;;  %v20160_v0 = vld [vmem:[%s28286_s1 + $0x391c] ss:$28 sps:$4 sm:$0xff]   ;;  %v20163_v1 = vld [vmem:[%s28286_s1 + $0x2424] ss:$28 sps:$4 sm:$0xff]  }
 0x33c   :  { %13655 = vmatpush1.bf16.msra.mxu1 %v20117_v3  ;;  %v20161_v3 = vld [vmem:[%s28286_s1 + $0x2420] ss:$28 sps:$4 sm:$0xff]  }
 0x33d   :  { %13163 = vmatpush1.bf16.msra.mxu0 %v20114_v2  ;;  %13656 = vmatprep.subr.bf16.mxu1 %v20125_v5  ;;  %v20158_v2 = vld [vmem:[%s28286_s1 + $0x3918] ss:$28 sps:$4 sm:$0xff]  }
 0x33e   :  { %13164 = vmatprep.subr.bf16.mxu0 %v20122_v4  ;;  %v20166_v4 = vld [vmem:[%s28286_s1 + $0x3954] ss:$28 sps:$4 sm:$0xff]   ;;  %v20169_v5 = vld [vmem:[%s28286_s1 + $0x245c] ss:$28 sps:$4 sm:$0xff]  }
 0x340   :  { %13657 = vmatpush1.bf16.msra.mxu1 %v20123_v20  ;;  %v20167_v20 = vld [vmem:[%s28286_s1 + $0x2458] ss:$28 sps:$4 sm:$0xff]  }
 0x341   :  { %13165 = vmatpush1.bf16.msra.mxu0 %v20120_v26  ;;  %13667 = vmatprep.subr.bf16.mxu1 %v20132_v14  ;;  %v20164_v26 = vld [vmem:[%s28286_s1 + $0x3950] ss:$28 sps:$4 sm:$0xff]  }
 0x342   :  { %13175 = vmatprep.subr.bf16.mxu0 %v20129_v28  ;;  %v20172_v28 = vld [vmem:[%s28286_s1 + $0x398c] ss:$28 sps:$4 sm:$0xff]   ;;  %v20175_v14 = vld [vmem:[%s28286_s1 + $0x2494] ss:$28 sps:$4 sm:$0xff]  }
 0x343   :  { %13659 = vmatmul.mubr.bf16.vlgmr.msra.gmra.mrb[4].mxu1 %v23277_v13 }
 0x344   :  { %13167 = vmatmul.mubr.bf16.vlgmr.msra.gmra.mrb[0].mxu0 %v24531_v31  ;;  %13668 = vmatpush1.bf16.msra.mxu1 %v20130_v40  ;;  %v20173_v40 = vld [vmem:[%s28286_s1 + $0x2490] ss:$28 sps:$4 sm:$0xff]  }
 0x345   :  { %13176 = vmatpush1.bf16.msra.mxu0 %v20127_v34  ;;  %13669 = vmatprep.subr.bf16.mxu1 %v20139_v16  ;;  %v20170_v34 = vld [vmem:[%s28286_s1 + $0x3988] ss:$28 sps:$4 sm:$0xff]  }
 0x346   :  { %13177 = vmatprep.subr.bf16.mxu0 %v20136_v42  ;;  %13207 = vmatprep.mubr.bf16.mxu0 %v24547_v51  ;;  %v20178_v42 = vld [vmem:[%s28286_s1 + $0x39c4] ss:$28 sps:$4 sm:$0xff]   ;;  %v20181_v16 = vld [vmem:[%s28286_s1 + $0x24cc] ss:$28 sps:$4 sm:$0xff]  }
 0x347   :  { %13699 = vmatprep.mubr.bf16.mxu1 %v23293_v17 }
 0x348   :  { %13670 = vmatpush1.bf16.msra.mxu1 %v20137_v10  ;;  %v20179_v10 = vld [vmem:[%s28286_s1 + $0x24c8] ss:$28 sps:$4 sm:$0xff]  }
 0x349   :  { %13178 = vmatpush1.bf16.msra.mxu0 %v20134_v44  ;;  %13671 = vmatprep.subr.bf16.mxu1 %v20145_v47  ;;  %v20176_v44 = vld [vmem:[%s28286_s1 + $0x39c0] ss:$28 sps:$4 sm:$0xff]  }
 0x34a   :  { %13179 = vmatprep.subr.bf16.mxu0 %v20142_v46  ;;  %v20184_v46 = vld [vmem:[%s28286_s1 + $0x39fc] ss:$28 sps:$4 sm:$0xff]   ;;  %v20187_v47 = vld [vmem:[%s28286_s1 + $0x2504] ss:$28 sps:$4 sm:$0xff]  }
 0x34c   :  { %13672 = vmatpush1.bf16.msra.mxu1 %v20143_v50  ;;  %v20185_v50 = vld [vmem:[%s28286_s1 + $0x2500] ss:$28 sps:$4 sm:$0xff]  }
 0x34d   :  { %13180 = vmatpush1.bf16.msra.mxu0 %v20140_v49  ;;  %13673 = vmatprep.subr.bf16.mxu1 %v20151_v55  ;;  %v20182_v49 = vld [vmem:[%s28286_s1 + $0x39f8] ss:$28 sps:$4 sm:$0xff]  }
 0x34e   :  { %13181 = vmatprep.subr.bf16.mxu0 %v20148_v54  ;;  %v20190_v54 = vld [vmem:[%s28286_s1 + $0x3a34] ss:$28 sps:$4 sm:$0xff]   ;;  %v20193_v55 = vld [vmem:[%s28286_s1 + $0x253c] ss:$28 sps:$4 sm:$0xff]  }
 0x350   :  { %13674 = vmatpush1.bf16.msra.mxu1 %v20149_v12  ;;  %v20191_v12 = vld [vmem:[%s28286_s1 + $0x2538] ss:$28 sps:$4 sm:$0xff]  }
 0x351   :  { %13182 = vmatpush1.bf16.msra.mxu0 %v20146_v58  ;;  %13675 = vmatprep.subr.bf16.mxu1 %v20157_v61  ;;  %v20188_v58 = vld [vmem:[%s28286_s1 + $0x3a30] ss:$28 sps:$4 sm:$0xff]  }
 0x352   :  { %13183 = vmatprep.subr.bf16.mxu0 %v20154_v60  ;;  %v20196_v60 = vld [vmem:[%s28286_s1 + $0x3a6c] ss:$28 sps:$4 sm:$0xff]   ;;  %v20199_v61 = vld [vmem:[%s28286_s1 + $0x2574] ss:$28 sps:$4 sm:$0xff]  }
 0x354   :  { %13676 = vmatpush1.bf16.msra.mxu1 %v20155_v63  ;;  %v20197_v63 = vld [vmem:[%s28286_s1 + $0x2570] ss:$28 sps:$4 sm:$0xff]  }
 0x355   :  { %13184 = vmatpush1.bf16.msra.mxu0 %v20152_v62  ;;  %13677 = vmatprep.subr.bf16.mxu1 %v20163_v1  ;;  %v20194_v62 = vld [vmem:[%s28286_s1 + $0x3a68] ss:$28 sps:$4 sm:$0xff]  }
 0x356   :  { %13185 = vmatprep.subr.bf16.mxu0 %v20160_v0  ;;  %v20202_v0 = vld [vmem:[%s28286_s1 + $0x3aa4] ss:$28 sps:$4 sm:$0xff]   ;;  %v20205_v1 = vld [vmem:[%s28286_s1 + $0x25ac] ss:$28 sps:$4 sm:$0xff]  }
 0x358   :  { %13678 = vmatpush1.bf16.msra.mxu1 %v20161_v3  ;;  %v20203_v3 = vld [vmem:[%s28286_s1 + $0x25a8] ss:$28 sps:$4 sm:$0xff]  }
 0x359   :  { %13186 = vmatpush1.bf16.msra.mxu0 %v20158_v2  ;;  %13679 = vmatprep.subr.bf16.mxu1 %v20169_v5  ;;  %v20200_v2 = vld [vmem:[%s28286_s1 + $0x3aa0] ss:$28 sps:$4 sm:$0xff]  }
 0x35a   :  { %13187 = vmatprep.subr.bf16.mxu0 %v20166_v4  ;;  %v20208_v4 = vld [vmem:[%s28286_s1 + $0x3adc] ss:$28 sps:$4 sm:$0xff]   ;;  %v20211_v5 = vld [vmem:[%s28286_s1 + $0x25e4] ss:$28 sps:$4 sm:$0xff]  }
 0x35c   :  { %13680 = vmatpush1.bf16.msra.mxu1 %v20167_v20  ;;  %v20209_v20 = vld [vmem:[%s28286_s1 + $0x25e0] ss:$28 sps:$4 sm:$0xff]  }
 0x35d   :  { %13188 = vmatpush1.bf16.msra.mxu0 %v20164_v26  ;;  %13681 = vmatprep.subr.bf16.mxu1 %v20175_v14  ;;  %v20206_v26 = vld [vmem:[%s28286_s1 + $0x3ad8] ss:$28 sps:$4 sm:$0xff]  }
 0x35e   :  { %13189 = vmatprep.subr.bf16.mxu0 %v20172_v28  ;;  %v20214_v28 = vld [vmem:[%s28286_s1 + $0x3b14] ss:$28 sps:$4 sm:$0xff]   ;;  %v20217_v14 = vld [vmem:[%s28286_s1 + $0x261c] ss:$28 sps:$4 sm:$0xff]  }
 0x360   :  { %13682 = vmatpush1.bf16.msra.mxu1 %v20173_v40  ;;  %v20215_v40 = vld [vmem:[%s28286_s1 + $0x2618] ss:$28 sps:$4 sm:$0xff]  }
 0x361   :  { %13190 = vmatpush1.bf16.msra.mxu0 %v20170_v34  ;;  %13683 = vmatprep.subr.bf16.mxu1 %v20181_v16  ;;  %v20212_v34 = vld [vmem:[%s28286_s1 + $0x3b10] ss:$28 sps:$4 sm:$0xff]  }
 0x362   :  { %13191 = vmatprep.subr.bf16.mxu0 %v20178_v42  ;;  %v20220_v42 = vld [vmem:[%s28286_s1 + $0x3b4c] ss:$28 sps:$4 sm:$0xff]   ;;  %v20223_v16 = vld [vmem:[%s28286_s1 + $0x2654] ss:$28 sps:$4 sm:$0xff]  }
 0x364   :  { %13684 = vmatpush1.bf16.msra.mxu1 %v20179_v10  ;;  %v20221_v10 = vld [vmem:[%s28286_s1 + $0x2650] ss:$28 sps:$4 sm:$0xff]  }
 0x365   :  { %13192 = vmatpush1.bf16.msra.mxu0 %v20176_v44  ;;  %13685 = vmatprep.subr.bf16.mxu1 %v20187_v47  ;;  %v20218_v44 = vld [vmem:[%s28286_s1 + $0x3b48] ss:$28 sps:$4 sm:$0xff]  }
 0x366   :  { %13193 = vmatprep.subr.bf16.mxu0 %v20184_v46  ;;  %v20227_v46 = vld [vmem:[%s28286_s1 + $0x3b84] ss:$28 sps:$4 sm:$0xff]   ;;  %v20230_v47 = vld [vmem:[%s28286_s1 + $0x268c] ss:$28 sps:$4 sm:$0xff]  }
 0x368   :  { %13686 = vmatpush1.bf16.msra.mxu1 %v20185_v50  ;;  %v20225_v50 = vld [vmem:[%s28286_s1 + $0x3b80] ss:$28 sps:$4 sm:$0xff]  }
 0x369   :  { %13194 = vmatpush1.bf16.msra.mxu0 %v20182_v49  ;;  %13687 = vmatprep.subr.bf16.mxu1 %v20193_v55  ;;  %v24735_v49 = vcombine.low %v24527_v30, %v24527_v30  ;;  %v20234_v55 = vld [vmem:[%s28286_s1 + $0x3bbc] ss:$28 sps:$4 sm:$0xff]   ;;  %v20237_v30 = vld [vmem:[%s28286_s1 + $0x26c4] ss:$28 sps:$4 sm:$0xff]  }
 0x36a   :  { %13195 = vmatprep.subr.bf16.mxu0 %v20190_v54  ;;  %v20228_v54 = vld [vmem:[%s28286_s1 + $0x2688] ss:$28 sps:$4 sm:$0xff]  }
 0x36c   :  { %13688 = vmatpush1.bf16.msra.mxu1 %v20191_v12  ;;  %v20235_v12 = vld [vmem:[%s28286_s1 + $0x26c0] ss:$28 sps:$4 sm:$0xff]  }
 0x36d   :  { %13196 = vmatpush1.bf16.msra.mxu0 %v20188_v58  ;;  %13689 = vmatprep.subr.bf16.mxu1 %v20199_v61  ;;  %v20232_v58 = vld [vmem:[%s28286_s1 + $0x3bb8] ss:$28 sps:$4 sm:$0xff]  }
 0x36e   :  { %13197 = vmatprep.subr.bf16.mxu0 %v20196_v60  ;;  %v20240_v60 = vld [vmem:[%s28286_s1 + $0x3bf4] ss:$28 sps:$4 sm:$0xff]   ;;  %v20243_v61 = vld [vmem:[%s28286_s1 + $0x26fc] ss:$28 sps:$4 sm:$0xff]  }
 0x370   :  { %13690 = vmatpush1.bf16.msra.mxu1 %v20197_v63  ;;  %v20238_v63 = vld [vmem:[%s28286_s1 + $0x3bf0] ss:$28 sps:$4 sm:$0xff]  }
 0x371   :  { %13198 = vmatpush1.bf16.msra.mxu0 %v20194_v62  ;;  %13691 = vmatprep.subr.bf16.mxu1 %v20205_v1  ;;  %v21743_v62 = vmov 0   ;;  %v20246_v1 = vld [vmem:[%s28286_s1 + $0x3c2c] ss:$28 sps:$4 sm:$0xff]  }
 0x372   :  { %13199 = vmatprep.subr.bf16.mxu0 %v20202_v0  ;;  %v20241_v0 = vld [vmem:[%s28286_s1 + $0x26f8] ss:$28 sps:$4 sm:$0xff]  }
 0x374   :  { %13692 = vmatpush1.bf16.msra.mxu1 %v20203_v3  ;;  %v20244_v3 = vld [vmem:[%s28286_s1 + $0x3c28] ss:$28 sps:$4 sm:$0xff]  }
 0x375   :  { %13200 = vmatpush1.bf16.msra.mxu0 %v20200_v2  ;;  %13693 = vmatprep.subr.bf16.mxu1 %v20211_v5  ;;  %v20249_v2 = vld [vmem:[%s28286_s1 + $0x2734] ss:$28 sps:$4 sm:$0xff]   ;;  %v20252_v5 = vld [vmem:[%s28286_s1 + $0x3c64] ss:$28 sps:$4 sm:$0xff]  }
 0x376   :  { %13201 = vmatprep.subr.bf16.mxu0 %v20208_v4  ;;  %v20247_v4 = vld [vmem:[%s28286_s1 + $0x2730] ss:$28 sps:$4 sm:$0xff]  }
 0x378   :  { %13694 = vmatpush1.bf16.msra.mxu1 %v20209_v20  ;;  %v20250_v20 = vld [vmem:[%s28286_s1 + $0x3c60] ss:$28 sps:$4 sm:$0xff]  }
 0x379   :  { %13202 = vmatpush1.bf16.msra.mxu0 %v20206_v26  ;;  %13695 = vmatprep.subr.bf16.mxu1 %v20217_v14  ;;  %v20255_v26 = vld [vmem:[%s28286_s1 + $0x276c] ss:$28 sps:$4 sm:$0xff]   ;;  %v20258_v14 = vld [vmem:[%s28286_s1 + $0x3c9c] ss:$28 sps:$4 sm:$0xff]  }
 0x37a   :  { %13203 = vmatprep.subr.bf16.mxu0 %v20214_v28  ;;  %v20253_v28 = vld [vmem:[%s28286_s1 + $0x2768] ss:$28 sps:$4 sm:$0xff]  }
 0x37c   :  { %13696 = vmatpush1.bf16.msra.mxu1 %v20215_v40  ;;  %v20256_v40 = vld [vmem:[%s28286_s1 + $0x3c98] ss:$28 sps:$4 sm:$0xff]  }
 0x37d   :  { %13204 = vmatpush1.bf16.msra.mxu0 %v20212_v34  ;;  %13697 = vmatprep.subr.bf16.mxu1 %v20223_v16  ;;  %v20261_v34 = vld [vmem:[%s28286_s1 + $0x27a4] ss:$28 sps:$4 sm:$0xff]   ;;  %v20264_v16 = vld [vmem:[%s28286_s1 + $0x3cd4] ss:$28 sps:$4 sm:$0xff]  }
 0x37e   :  { %13205 = vmatprep.subr.bf16.mxu0 %v20220_v42  ;;  %v20259_v42 = vld [vmem:[%s28286_s1 + $0x27a0] ss:$28 sps:$4 sm:$0xff]  }
 0x380   :  { %13698 = vmatpush1.bf16.msra.mxu1 %v20221_v10  ;;  %v20262_v10 = vld [vmem:[%s28286_s1 + $0x3cd0] ss:$28 sps:$4 sm:$0xff]  }
 0x381   :  { %13206 = vmatpush1.bf16.msra.mxu0 %v20218_v44  ;;  %13708 = vmatprep.subr.bf16.mxu1 %v20230_v47  ;;  %v20267_v44 = vld [vmem:[%s28286_s1 + $0x27dc] ss:$28 sps:$4 sm:$0xff]   ;;  %v20270_v47 = vld [vmem:[%s28286_s1 + $0x3d0c] ss:$28 sps:$4 sm:$0xff]  }
 0x382   :  { %13216 = vmatprep.subr.bf16.mxu0 %v20227_v46  ;;  %v20265_v46 = vld [vmem:[%s28286_s1 + $0x27d8] ss:$28 sps:$4 sm:$0xff]  }
 0x383   :  { %13700 = vmatmul.mubr.bf16.vlgmr.msra.gmra.mrb[4].mxu1 %v23486_v52 }
 0x384   :  { %13208 = vmatmul.mubr.bf16.vlgmr.msra.gmra.mrb[0].mxu0 %v24735_v49  ;;  %13709 = vmatpush1.bf16.msra.mxu1 %v20228_v54  ;;  %v20268_v54 = vld [vmem:[%s28286_s1 + $0x3d08] ss:$28 sps:$4 sm:$0xff]  }
 0x385   :  { %13217 = vmatpush1.bf16.msra.mxu0 %v20225_v50  ;;  %13710 = vmatprep.subr.bf16.mxu1 %v20237_v30  ;;  %v20273_v50 = vld [vmem:[%s28286_s1 + $0x2814] ss:$28 sps:$4 sm:$0xff]   ;;  %v20274_v30 = vld [vmem:[%s28287_s0 + $0x88] ss:$0 sps:$4 sm:$0xff]  }
 0x386   :  { %13218 = vmatprep.subr.bf16.mxu0 %v20234_v55  ;;  %13248 = vmatprep.mubr.bf16.mxu0 %v21743_v62  ;;  %v20271_v55 = vld [vmem:[%s28286_s1 + $0x2810] ss:$28 sps:$4 sm:$0xff]  }
 0x387   :  { %13740 = vmatprep.mubr.bf16.mxu1 %v23502_v59 }
 0x388   :  { %13711 = vmatpush1.bf16.msra.mxu1 %v20235_v12  ;;  %v20280_v12 = vld [vmem:[%s28286_s1 + $0x14] ss:$28 sps:$4 sm:$0xff]  }
 0x389   :  { %13219 = vmatpush1.bf16.msra.mxu0 %v20232_v58  ;;  %13712 = vmatprep.subr.bf16.mxu1 %v20243_v61  ;;  %v20277_v58 = vld [vmem:[%s28286_s1 + $0x284c] ss:$28 sps:$4 sm:$0xff]  }
 0x38a   :  { %13220 = vmatprep.subr.bf16.mxu0 %v20240_v60  ;;  %v20275_v60 = vld [vmem:[%s28286_s1 + $0x2848] ss:$28 sps:$4 sm:$0xff]   ;;  %v20278_v61 = vld [vmem:[%s28286_s1 + $0x10] ss:$28 sps:$4 sm:$0xff]  }
 0x38c   :  { %13713 = vmatpush1.bf16.msra.mxu1 %v20241_v0  ;;  %v20286_v0 = vld [vmem:[%s28286_s1 + $0x4c] ss:$28 sps:$4 sm:$0xff]  }
 0x38d   :  { %13221 = vmatpush1.bf16.msra.mxu0 %v20238_v63  ;;  %13714 = vmatprep.subr.bf16.mxu1 %v20249_v2  ;;  %v20283_v63 = vld [vmem:[%s28286_s1 + $0x2884] ss:$28 sps:$4 sm:$0xff]  }
 0x38e   :  { %13222 = vmatprep.subr.bf16.mxu0 %v20246_v1  ;;  %v20281_v1 = vld [vmem:[%s28286_s1 + $0x2880] ss:$28 sps:$4 sm:$0xff]   ;;  %v20284_v2 = vld [vmem:[%s28286_s1 + $0x48] ss:$28 sps:$4 sm:$0xff]  }
 0x390   :  { %13715 = vmatpush1.bf16.msra.mxu1 %v20247_v4  ;;  %v20292_v4 = vld [vmem:[%s28286_s1 + $0x84] ss:$28 sps:$4 sm:$0xff]  }
 0x391   :  { %13223 = vmatpush1.bf16.msra.mxu0 %v20244_v3  ;;  %13716 = vmatprep.subr.bf16.mxu1 %v20255_v26  ;;  %v20289_v3 = vld [vmem:[%s28286_s1 + $0x28bc] ss:$28 sps:$4 sm:$0xff]  }
 0x392   :  { %13224 = vmatprep.subr.bf16.mxu0 %v20252_v5  ;;  %v20287_v5 = vld [vmem:[%s28286_s1 + $0x28b8] ss:$28 sps:$4 sm:$0xff]   ;;  %v20290_v26 = vld [vmem:[%s28286_s1 + $0x80] ss:$28 sps:$4 sm:$0xff]  }
 0x394   :  { %13717 = vmatpush1.bf16.msra.mxu1 %v20253_v28  ;;  %v20298_v28 = vld [vmem:[%s28286_s1 + $0xbc] ss:$28 sps:$4 sm:$0xff]  }
 0x395   :  { %13225 = vmatpush1.bf16.msra.mxu0 %v20250_v20  ;;  %13718 = vmatprep.subr.bf16.mxu1 %v20261_v34  ;;  %v20295_v20 = vld [vmem:[%s28286_s1 + $0x28f4] ss:$28 sps:$4 sm:$0xff]  }
 0x396   :  { %13226 = vmatprep.subr.bf16.mxu0 %v20258_v14  ;;  %v20293_v14 = vld [vmem:[%s28286_s1 + $0x28f0] ss:$28 sps:$4 sm:$0xff]   ;;  %v20296_v34 = vld [vmem:[%s28286_s1 + $0xb8] ss:$28 sps:$4 sm:$0xff]  }
 0x398   :  { %13719 = vmatpush1.bf16.msra.mxu1 %v20259_v42  ;;  %v20304_v42 = vld [vmem:[%s28286_s1 + $0xf4] ss:$28 sps:$4 sm:$0xff]  }
 0x399   :  { %13227 = vmatpush1.bf16.msra.mxu0 %v20256_v40  ;;  %13720 = vmatprep.subr.bf16.mxu1 %v20267_v44  ;;  %v20301_v40 = vld [vmem:[%s28286_s1 + $0x292c] ss:$28 sps:$4 sm:$0xff]  }
 0x39a   :  { %13228 = vmatprep.subr.bf16.mxu0 %v20264_v16  ;;  %v20299_v16 = vld [vmem:[%s28286_s1 + $0x2928] ss:$28 sps:$4 sm:$0xff]   ;;  %v20302_v44 = vld [vmem:[%s28286_s1 + $0xf0] ss:$28 sps:$4 sm:$0xff]  }
 0x39c   :  { %13721 = vmatpush1.bf16.msra.mxu1 %v20265_v46  ;;  %v20310_v46 = vld [vmem:[%s28286_s1 + $0x12c] ss:$28 sps:$4 sm:$0xff]  }
 0x39d   :  { %13229 = vmatpush1.bf16.msra.mxu0 %v20262_v10  ;;  %13722 = vmatprep.subr.bf16.mxu1 %v20273_v50  ;;  %v20307_v10 = vld [vmem:[%s28286_s1 + $0x2964] ss:$28 sps:$4 sm:$0xff]  }
 0x39e   :  { %13230 = vmatprep.subr.bf16.mxu0 %v20270_v47  ;;  %v20305_v47 = vld [vmem:[%s28286_s1 + $0x2960] ss:$28 sps:$4 sm:$0xff]   ;;  %v20308_v50 = vld [vmem:[%s28286_s1 + $0x128] ss:$28 sps:$4 sm:$0xff]  }
 0x3a0   :  { %13723 = vmatpush1.bf16.msra.mxu1 %v20271_v55  ;;  %v20316_v55 = vld [vmem:[%s28286_s1 + $0x164] ss:$28 sps:$4 sm:$0xff]  }
 0x3a1   :  { %13231 = vmatpush1.bf16.msra.mxu0 %v20268_v54  ;;  %13724 = vmatprep.subr.bf16.mxu1 %v20277_v58  ;;  %v20313_v54 = vld [vmem:[%s28286_s1 + $0x299c] ss:$28 sps:$4 sm:$0xff]  }
 0x3a2   :  { %13995 = vmatprep.subr.bf16.mxu0 %v20280_v12  ;;  %v20314_v58 = vld [vmem:[%s28286_s1 + $0x160] ss:$28 sps:$4 sm:$0xff]   ;;  %v20319_v12 = vld [vmem:[%s28286_s1 + $0x29d4] ss:$28 sps:$4 sm:$0xff]  }
 0x3a4   :  { %13249 = vmatmul.mubr.bf16.vlgmr.msra.gmra.mrb[0].mxu0 %v20274_v30  ;;  %13725 = vmatpush1.bf16.msra.mxu1 %v20275_v60  ;;  %v20311_v30 = vld [vmem:[%s28286_s1 + $0x2998] ss:$28 sps:$4 sm:$0xff]  }
 0x3a5   :  { %13996 = vmatpush1.bf16.msra.mxu0 %v20278_v61  ;;  %13726 = vmatprep.subr.bf16.mxu1 %v20283_v63  ;;  %v20322_v60 = vld [vmem:[%s28286_s1 + $0x19c] ss:$28 sps:$4 sm:$0xff]   ;;  %v20317_v61 = vld [vmem:[%s28286_s1 + $0x29d0] ss:$28 sps:$4 sm:$0xff]  }
 0x3a6   :  { %13997 = vmatprep.subr.bf16.mxu0 %v20286_v0  ;;  %14027 = vmatprep.mubr.bf16.mxu0 %v21920_v48  ;;  %v20320_v63 = vld [vmem:[%s28286_s1 + $0x198] ss:$28 sps:$4 sm:$0xff]   ;;  %v20325_v0 = vld [vmem:[%s28286_s1 + $0x2a0c] ss:$28 sps:$4 sm:$0xff]  }
 0x3a8   :  { %13727 = vmatpush1.bf16.msra.mxu1 %v20281_v1  ;;  %v20328_v1 = vld [vmem:[%s28286_s1 + $0x1d4] ss:$28 sps:$4 sm:$0xff]  }
 0x3a9   :  { %13998 = vmatpush1.bf16.msra.mxu0 %v20284_v2  ;;  %13728 = vmatprep.subr.bf16.mxu1 %v20289_v3  ;;  %v20323_v2 = vld [vmem:[%s28286_s1 + $0x2a08] ss:$28 sps:$4 sm:$0xff]   ;;  %v20326_v3 = vld [vmem:[%s28286_s1 + $0x1d0] ss:$28 sps:$4 sm:$0xff]  }
 0x3aa   :  { %13999 = vmatprep.subr.bf16.mxu0 %v20292_v4  ;;  %v20331_v4 = vld [vmem:[%s28286_s1 + $0x2a44] ss:$28 sps:$4 sm:$0xff]  }
 0x3ac   :  { %13729 = vmatpush1.bf16.msra.mxu1 %v20287_v5  ;;  %v20334_v5 = vld [vmem:[%s28286_s1 + $0x20c] ss:$28 sps:$4 sm:$0xff]  }
 0x3ad   :  { %14000 = vmatpush1.bf16.msra.mxu0 %v20290_v26  ;;  %13730 = vmatprep.subr.bf16.mxu1 %v20295_v20  ;;  %v20329_v26 = vld [vmem:[%s28286_s1 + $0x2a40] ss:$28 sps:$4 sm:$0xff]   ;;  %v20332_v20 = vld [vmem:[%s28286_s1 + $0x208] ss:$28 sps:$4 sm:$0xff]  }
 0x3ae   :  { %14001 = vmatprep.subr.bf16.mxu0 %v20298_v28  ;;  %v20337_v28 = vld [vmem:[%s28286_s1 + $0x2a7c] ss:$28 sps:$4 sm:$0xff]  }
 0x3b0   :  { %13731 = vmatpush1.bf16.msra.mxu1 %v20293_v14  ;;  %v20340_v14 = vld [vmem:[%s28286_s1 + $0x244] ss:$28 sps:$4 sm:$0xff]  }
 0x3b1   :  { %14002 = vmatpush1.bf16.msra.mxu0 %v20296_v34  ;;  %13732 = vmatprep.subr.bf16.mxu1 %v20301_v40  ;;  %v20335_v34 = vld [vmem:[%s28286_s1 + $0x2a78] ss:$28 sps:$4 sm:$0xff]   ;;  %v20338_v40 = vld [vmem:[%s28286_s1 + $0x240] ss:$28 sps:$4 sm:$0xff]  }
 0x3b2   :  { %14003 = vmatprep.subr.bf16.mxu0 %v20304_v42  ;;  %v20343_v42 = vld [vmem:[%s28286_s1 + $0x2ab4] ss:$28 sps:$4 sm:$0xff]  }
 0x3b4   :  { %13733 = vmatpush1.bf16.msra.mxu1 %v20299_v16  ;;  %v20346_v16 = vld [vmem:[%s28286_s1 + $0x27c] ss:$28 sps:$4 sm:$0xff]  }
 0x3b5   :  { %14004 = vmatpush1.bf16.msra.mxu0 %v20302_v44  ;;  %13734 = vmatprep.subr.bf16.mxu1 %v20307_v10  ;;  %v20341_v44 = vld [vmem:[%s28286_s1 + $0x2ab0] ss:$28 sps:$4 sm:$0xff]   ;;  %v20344_v10 = vld [vmem:[%s28286_s1 + $0x278] ss:$28 sps:$4 sm:$0xff]  }
 0x3b6   :  { %14005 = vmatprep.subr.bf16.mxu0 %v20310_v46  ;;  %v20349_v46 = vld [vmem:[%s28286_s1 + $0x2aec] ss:$28 sps:$4 sm:$0xff]  }
 0x3b8   :  { %13735 = vmatpush1.bf16.msra.mxu1 %v20305_v47  ;;  %v20352_v47 = vld [vmem:[%s28286_s1 + $0x2b4] ss:$28 sps:$4 sm:$0xff]  }
 0x3b9   :  { %14006 = vmatpush1.bf16.msra.mxu0 %v20308_v50  ;;  %13736 = vmatprep.subr.bf16.mxu1 %v20313_v54  ;;  %v20347_v50 = vld [vmem:[%s28286_s1 + $0x2ae8] ss:$28 sps:$4 sm:$0xff]   ;;  %v20350_v54 = vld [vmem:[%s28286_s1 + $0x2b0] ss:$28 sps:$4 sm:$0xff]  }
 0x3ba   :  { %14007 = vmatprep.subr.bf16.mxu0 %v20316_v55  ;;  %v20355_v55 = vld [vmem:[%s28286_s1 + $0x2b24] ss:$28 sps:$4 sm:$0xff]  }
 0x3bc   :  { %13737 = vmatpush1.bf16.msra.mxu1 %v20311_v30  ;;  %v20358_v30 = vld [vmem:[%s28286_s1 + $0x2ec] ss:$28 sps:$4 sm:$0xff]  }
 0x3bd   :  { %14008 = vmatpush1.bf16.msra.mxu0 %v20314_v58  ;;  %13738 = vmatprep.subr.bf16.mxu1 %v20319_v12  ;;  %v20353_v58 = vld [vmem:[%s28286_s1 + $0x2b20] ss:$28 sps:$4 sm:$0xff]   ;;  %v20356_v12 = vld [vmem:[%s28286_s1 + $0x2e8] ss:$28 sps:$4 sm:$0xff]  }
 0x3be   :  { %14009 = vmatprep.subr.bf16.mxu0 %v20322_v60  ;;  %v20361_v60 = vld [vmem:[%s28286_s1 + $0x2b5c] ss:$28 sps:$4 sm:$0xff]  }
 0x3c0   :  { %13739 = vmatpush1.bf16.msra.mxu1 %v20317_v61  ;;  %v20364_v61 = vld [vmem:[%s28286_s1 + $0x324] ss:$28 sps:$4 sm:$0xff]  }
 0x3c1   :  { %14010 = vmatpush1.bf16.msra.mxu0 %v20320_v63  ;;  %13749 = vmatprep.subr.bf16.mxu1 %v20325_v0  ;;  %v20359_v63 = vld [vmem:[%s28286_s1 + $0x2b58] ss:$28 sps:$4 sm:$0xff]   ;;  %v20362_v0 = vld [vmem:[%s28286_s1 + $0x320] ss:$28 sps:$4 sm:$0xff]  }
 0x3c2   :  { %14011 = vmatprep.subr.bf16.mxu0 %v20328_v1  ;;  %v20367_v1 = vld [vmem:[%s28286_s1 + $0x2b94] ss:$28 sps:$4 sm:$0xff]  }
 0x3c3   :  { %13741 = vmatmul.mubr.bf16.vlgmr.msra.gmra.mrb[4].mxu1 %v23695_v33 }
 0x3c4   :  { %13750 = vmatpush1.bf16.msra.mxu1 %v20323_v2  ;;  %13781 = vmatprep.mubr.bf16.mxu1 %v23711_v43  ;;  %v20370_v2 = vld [vmem:[%s28286_s1 + $0x35c] ss:$28 sps:$4 sm:$0xff]  }
 0x3c5   :  { %14012 = vmatpush1.bf16.msra.mxu0 %v20326_v3  ;;  %13751 = vmatprep.subr.bf16.mxu1 %v20331_v4  ;;  %v20365_v3 = vld [vmem:[%s28286_s1 + $0x2b90] ss:$28 sps:$4 sm:$0xff]   ;;  %v20368_v4 = vld [vmem:[%s28286_s1 + $0x358] ss:$28 sps:$4 sm:$0xff]  }
 0x3c6   :  { %14013 = vmatprep.subr.bf16.mxu0 %v20334_v5  ;;  %v20373_v5 = vld [vmem:[%s28286_s1 + $0x2bcc] ss:$28 sps:$4 sm:$0xff]  }
 0x3c8   :  { %13752 = vmatpush1.bf16.msra.mxu1 %v20329_v26  ;;  %v20376_v26 = vld [vmem:[%s28286_s1 + $0x394] ss:$28 sps:$4 sm:$0xff]  }
 0x3c9   :  { %14014 = vmatpush1.bf16.msra.mxu0 %v20332_v20  ;;  %13753 = vmatprep.subr.bf16.mxu1 %v20337_v28  ;;  %v20371_v20 = vld [vmem:[%s28286_s1 + $0x2bc8] ss:$28 sps:$4 sm:$0xff]   ;;  %v20374_v28 = vld [vmem:[%s28286_s1 + $0x390] ss:$28 sps:$4 sm:$0xff]  }
 0x3ca   :  { %14015 = vmatprep.subr.bf16.mxu0 %v20340_v14  ;;  %v20379_v14 = vld [vmem:[%s28286_s1 + $0x2c04] ss:$28 sps:$4 sm:$0xff]  }
 0x3cc   :  { %13754 = vmatpush1.bf16.msra.mxu1 %v20335_v34  ;;  %v20382_v34 = vld [vmem:[%s28286_s1 + $0x3cc] ss:$28 sps:$4 sm:$0xff]  }
 0x3cd   :  { %14016 = vmatpush1.bf16.msra.mxu0 %v20338_v40  ;;  %13755 = vmatprep.subr.bf16.mxu1 %v20343_v42  ;;  %v20377_v40 = vld [vmem:[%s28286_s1 + $0x2c00] ss:$28 sps:$4 sm:$0xff]   ;;  %v20380_v42 = vld [vmem:[%s28286_s1 + $0x3c8] ss:$28 sps:$4 sm:$0xff]  }
 0x3ce   :  { %14017 = vmatprep.subr.bf16.mxu0 %v20346_v16  ;;  %v20385_v16 = vld [vmem:[%s28286_s1 + $0x2c3c] ss:$28 sps:$4 sm:$0xff]  }
 0x3d0   :  { %13756 = vmatpush1.bf16.msra.mxu1 %v20341_v44  ;;  %v20388_v44 = vld [vmem:[%s28286_s1 + $0x404] ss:$28 sps:$4 sm:$0xff]  }
 0x3d1   :  { %14018 = vmatpush1.bf16.msra.mxu0 %v20344_v10  ;;  %13757 = vmatprep.subr.bf16.mxu1 %v20349_v46  ;;  %v20383_v10 = vld [vmem:[%s28286_s1 + $0x2c38] ss:$28 sps:$4 sm:$0xff]   ;;  %v20386_v46 = vld [vmem:[%s28286_s1 + $0x400] ss:$28 sps:$4 sm:$0xff]  }
 0x3d2   :  { %14019 = vmatprep.subr.bf16.mxu0 %v20352_v47  ;;  %v20391_v47 = vld [vmem:[%s28286_s1 + $0x2c74] ss:$28 sps:$4 sm:$0xff]  }
 0x3d4   :  { %13758 = vmatpush1.bf16.msra.mxu1 %v20347_v50  ;;  %v20394_v50 = vld [vmem:[%s28286_s1 + $0x43c] ss:$28 sps:$4 sm:$0xff]  }
 0x3d5   :  { %14020 = vmatpush1.bf16.msra.mxu0 %v20350_v54  ;;  %13759 = vmatprep.subr.bf16.mxu1 %v20355_v55  ;;  %v20389_v54 = vld [vmem:[%s28286_s1 + $0x2c70] ss:$28 sps:$4 sm:$0xff]   ;;  %v20392_v55 = vld [vmem:[%s28286_s1 + $0x438] ss:$28 sps:$4 sm:$0xff]  }
 0x3d6   :  { %14021 = vmatprep.subr.bf16.mxu0 %v20358_v30  ;;  %v20397_v30 = vld [vmem:[%s28286_s1 + $0x2cac] ss:$28 sps:$4 sm:$0xff]  }
 0x3d8   :  { %13760 = vmatpush1.bf16.msra.mxu1 %v20353_v58  ;;  %v20400_v58 = vld [vmem:[%s28286_s1 + $0x474] ss:$28 sps:$4 sm:$0xff]  }
 0x3d9   :  { %14022 = vmatpush1.bf16.msra.mxu0 %v20356_v12  ;;  %13761 = vmatprep.subr.bf16.mxu1 %v20361_v60  ;;  %v20395_v12 = vld [vmem:[%s28286_s1 + $0x2ca8] ss:$28 sps:$4 sm:$0xff]   ;;  %v20398_v60 = vld [vmem:[%s28286_s1 + $0x470] ss:$28 sps:$4 sm:$0xff]  }
 0x3da   :  { %14023 = vmatprep.subr.bf16.mxu0 %v20364_v61  ;;  %v20403_v61 = vld [vmem:[%s28286_s1 + $0x2ce4] ss:$28 sps:$4 sm:$0xff]  }
 0x3dc   :  { %13762 = vmatpush1.bf16.msra.mxu1 %v20359_v63  ;;  %v20406_v63 = vld [vmem:[%s28286_s1 + $0x4ac] ss:$28 sps:$4 sm:$0xff]  }
 0x3dd   :  { %14024 = vmatpush1.bf16.msra.mxu0 %v20362_v0  ;;  %13763 = vmatprep.subr.bf16.mxu1 %v20367_v1  ;;  %v20401_v0 = vld [vmem:[%s28286_s1 + $0x2ce0] ss:$28 sps:$4 sm:$0xff]   ;;  %v20404_v1 = vld [vmem:[%s28286_s1 + $0x4a8] ss:$28 sps:$4 sm:$0xff]  }
 0x3de   :  { %14025 = vmatprep.subr.bf16.mxu0 %v20370_v2  ;;  %v20409_v2 = vld [vmem:[%s28286_s1 + $0x2d1c] ss:$28 sps:$4 sm:$0xff]  }
 0x3e0   :  { %13764 = vmatpush1.bf16.msra.mxu1 %v20365_v3  ;;  %v20412_v3 = vld [vmem:[%s28286_s1 + $0x4e4] ss:$28 sps:$4 sm:$0xff]  }
 0x3e1   :  { %14026 = vmatpush1.bf16.msra.mxu0 %v20368_v4  ;;  %13765 = vmatprep.subr.bf16.mxu1 %v20373_v5  ;;  %v20407_v4 = vld [vmem:[%s28286_s1 + $0x2d18] ss:$28 sps:$4 sm:$0xff]   ;;  %v20410_v5 = vld [vmem:[%s28286_s1 + $0x4e0] ss:$28 sps:$4 sm:$0xff]  }
 0x3e2   :  { %14036 = vmatprep.subr.bf16.mxu0 %v20376_v26  ;;  %v20415_v26 = vld [vmem:[%s28286_s1 + $0x2d54] ss:$28 sps:$4 sm:$0xff]  }
 0x3e4   :  { %14028 = vmatmul.mubr.bf16.vlgmr.msra.gmra.mrb[4].mxu0 %v21986_v6  ;;  %13766 = vmatpush1.bf16.msra.mxu1 %v20371_v20  ;;  %v20418_v20 = vld [vmem:[%s28286_s1 + $0x51c] ss:$28 sps:$4 sm:$0xff]  }
 0x3e5   :  { %14037 = vmatpush1.bf16.msra.mxu0 %v20374_v28  ;;  %13767 = vmatprep.subr.bf16.mxu1 %v20379_v14  ;;  %v20413_v28 = vld [vmem:[%s28286_s1 + $0x2d50] ss:$28 sps:$4 sm:$0xff]   ;;  %v20416_v14 = vld [vmem:[%s28286_s1 + $0x518] ss:$28 sps:$4 sm:$0xff]  }
 0x3e6   :  { %14038 = vmatprep.subr.bf16.mxu0 %v20382_v34  ;;  %14068 = vmatprep.mubr.bf16.mxu0 %v22077_v35  ;;  %v20421_v34 = vld [vmem:[%s28286_s1 + $0x2d8c] ss:$28 sps:$4 sm:$0xff]  }
 0x3e8   :  { %13768 = vmatpush1.bf16.msra.mxu1 %v20377_v40  ;;  %v20424_v40 = vld [vmem:[%s28286_s1 + $0x554] ss:$28 sps:$4 sm:$0xff]  }
 0x3e9   :  { %14039 = vmatpush1.bf16.msra.mxu0 %v20380_v42  ;;  %13769 = vmatprep.subr.bf16.mxu1 %v20385_v16  ;;  %v20419_v42 = vld [vmem:[%s28286_s1 + $0x2d88] ss:$28 sps:$4 sm:$0xff]   ;;  %v20422_v16 = vld [vmem:[%s28286_s1 + $0x550] ss:$28 sps:$4 sm:$0xff]  }
 0x3ea   :  { %14040 = vmatprep.subr.bf16.mxu0 %v20388_v44  ;;  %v20427_v44 = vld [vmem:[%s28286_s1 + $0x2dc4] ss:$28 sps:$4 sm:$0xff]  }
 0x3ec   :  { %13770 = vmatpush1.bf16.msra.mxu1 %v20383_v10  ;;  %v20430_v10 = vld [vmem:[%s28286_s1 + $0x58c] ss:$28 sps:$4 sm:$0xff]  }
 0x3ed   :  { %14041 = vmatpush1.bf16.msra.mxu0 %v20386_v46  ;;  %13771 = vmatprep.subr.bf16.mxu1 %v20391_v47  ;;  %v20425_v46 = vld [vmem:[%s28286_s1 + $0x2dc0] ss:$28 sps:$4 sm:$0xff]   ;;  %v20428_v47 = vld [vmem:[%s28286_s1 + $0x588] ss:$28 sps:$4 sm:$0xff]  }
 0x3ee   :  { %14042 = vmatprep.subr.bf16.mxu0 %v20394_v50  ;;  %v20433_v50 = vld [vmem:[%s28286_s1 + $0x2dfc] ss:$28 sps:$4 sm:$0xff]  }
 0x3f0   :  { %13772 = vmatpush1.bf16.msra.mxu1 %v20389_v54  ;;  %v20436_v54 = vld [vmem:[%s28286_s1 + $0x5c4] ss:$28 sps:$4 sm:$0xff]  }
 0x3f1   :  { %14043 = vmatpush1.bf16.msra.mxu0 %v20392_v55  ;;  %13773 = vmatprep.subr.bf16.mxu1 %v20397_v30  ;;  %v20431_v55 = vld [vmem:[%s28286_s1 + $0x2df8] ss:$28 sps:$4 sm:$0xff]   ;;  %v20434_v30 = vld [vmem:[%s28286_s1 + $0x5c0] ss:$28 sps:$4 sm:$0xff]  }
 0x3f2   :  { %14044 = vmatprep.subr.bf16.mxu0 %v20400_v58  ;;  %v20439_v58 = vld [vmem:[%s28286_s1 + $0x2e34] ss:$28 sps:$4 sm:$0xff]  }
 0x3f4   :  { %13774 = vmatpush1.bf16.msra.mxu1 %v20395_v12  ;;  %v20442_v12 = vld [vmem:[%s28286_s1 + $0x5fc] ss:$28 sps:$4 sm:$0xff]  }
 0x3f5   :  { %14045 = vmatpush1.bf16.msra.mxu0 %v20398_v60  ;;  %13775 = vmatprep.subr.bf16.mxu1 %v20403_v61  ;;  %v20437_v60 = vld [vmem:[%s28286_s1 + $0x2e30] ss:$28 sps:$4 sm:$0xff]   ;;  %v20440_v61 = vld [vmem:[%s28286_s1 + $0x5f8] ss:$28 sps:$4 sm:$0xff]  }
 0x3f6   :  { %14046 = vmatprep.subr.bf16.mxu0 %v20406_v63  ;;  %v20445_v63 = vld [vmem:[%s28286_s1 + $0x2e6c] ss:$28 sps:$4 sm:$0xff]  }
 0x3f8   :  { %13776 = vmatpush1.bf16.msra.mxu1 %v20401_v0  ;;  %v20448_v0 = vld [vmem:[%s28286_s1 + $0x634] ss:$28 sps:$4 sm:$0xff]  }
 0x3f9   :  { %14047 = vmatpush1.bf16.msra.mxu0 %v20404_v1  ;;  %13777 = vmatprep.subr.bf16.mxu1 %v20409_v2  ;;  %v20443_v1 = vld [vmem:[%s28286_s1 + $0x2e68] ss:$28 sps:$4 sm:$0xff]   ;;  %v20446_v2 = vld [vmem:[%s28286_s1 + $0x630] ss:$28 sps:$4 sm:$0xff]  }
 0x3fa   :  { %14048 = vmatprep.subr.bf16.mxu0 %v20412_v3  ;;  %v20451_v3 = vld [vmem:[%s28286_s1 + $0x2ea4] ss:$28 sps:$4 sm:$0xff]  }
 0x3fc   :  { %13778 = vmatpush1.bf16.msra.mxu1 %v20407_v4  ;;  %v20454_v4 = vld [vmem:[%s28286_s1 + $0x66c] ss:$28 sps:$4 sm:$0xff]  }
 0x3fd   :  { %14049 = vmatpush1.bf16.msra.mxu0 %v20410_v5  ;;  %13779 = vmatprep.subr.bf16.mxu1 %v20415_v26  ;;  %v20449_v5 = vld [vmem:[%s28286_s1 + $0x2ea0] ss:$28 sps:$4 sm:$0xff]   ;;  %v20452_v26 = vld [vmem:[%s28286_s1 + $0x668] ss:$28 sps:$4 sm:$0xff]  }
 0x3fe   :  { %14050 = vmatprep.subr.bf16.mxu0 %v20418_v20  ;;  %v20457_v20 = vld [vmem:[%s28286_s1 + $0x2edc] ss:$28 sps:$4 sm:$0xff]  }
 0x400   :  { %13780 = vmatpush1.bf16.msra.mxu1 %v20413_v28  ;;  %v20460_v28 = vld [vmem:[%s28286_s1 + $0x6a4] ss:$28 sps:$4 sm:$0xff]  }
 0x401   :  { %14051 = vmatpush1.bf16.msra.mxu0 %v20416_v14  ;;  %13790 = vmatprep.subr.bf16.mxu1 %v20421_v34  ;;  %v20455_v14 = vld [vmem:[%s28286_s1 + $0x2ed8] ss:$28 sps:$4 sm:$0xff]   ;;  %v20458_v34 = vld [vmem:[%s28286_s1 + $0x6a0] ss:$28 sps:$4 sm:$0xff]  }
 0x402   :  { %14052 = vmatprep.subr.bf16.mxu0 %v20424_v40  ;;  %v20463_v40 = vld [vmem:[%s28286_s1 + $0x2f14] ss:$28 sps:$4 sm:$0xff]  }
 0x403   :  { %13782 = vmatmul.mubr.bf16.vlgmr.msra.gmra.mrb[4].mxu1 %v23904_v21 }
 0x404   :  { %13791 = vmatpush1.bf16.msra.mxu1 %v20419_v42  ;;  %13822 = vmatprep.mubr.bf16.mxu1 %v23920_v29  ;;  %v20466_v42 = vld [vmem:[%s28286_s1 + $0x6dc] ss:$28 sps:$4 sm:$0xff]  }
 0x405   :  { %14053 = vmatpush1.bf16.msra.mxu0 %v20422_v16  ;;  %13792 = vmatprep.subr.bf16.mxu1 %v20427_v44  ;;  %v20461_v16 = vld [vmem:[%s28286_s1 + $0x2f10] ss:$28 sps:$4 sm:$0xff]   ;;  %v20464_v44 = vld [vmem:[%s28286_s1 + $0x6d8] ss:$28 sps:$4 sm:$0xff]  }
 0x406   :  { %14054 = vmatprep.subr.bf16.mxu0 %v20430_v10  ;;  %v20469_v10 = vld [vmem:[%s28286_s1 + $0x2f4c] ss:$28 sps:$4 sm:$0xff]  }
 0x408   :  { %13793 = vmatpush1.bf16.msra.mxu1 %v20425_v46  ;;  %v20472_v46 = vld [vmem:[%s28286_s1 + $0x714] ss:$28 sps:$4 sm:$0xff]  }
 0x409   :  { %14055 = vmatpush1.bf16.msra.mxu0 %v20428_v47  ;;  %13794 = vmatprep.subr.bf16.mxu1 %v20433_v50  ;;  %v20467_v47 = vld [vmem:[%s28286_s1 + $0x2f48] ss:$28 sps:$4 sm:$0xff]   ;;  %v20470_v50 = vld [vmem:[%s28286_s1 + $0x710] ss:$28 sps:$4 sm:$0xff]  }
 0x40a   :  { %14056 = vmatprep.subr.bf16.mxu0 %v20436_v54  ;;  %v20475_v54 = vld [vmem:[%s28286_s1 + $0x2f84] ss:$28 sps:$4 sm:$0xff]  }
 0x40c   :  { %13795 = vmatpush1.bf16.msra.mxu1 %v20431_v55  ;;  %v20478_v55 = vld [vmem:[%s28286_s1 + $0x74c] ss:$28 sps:$4 sm:$0xff]  }
 0x40d   :  { %14057 = vmatpush1.bf16.msra.mxu0 %v20434_v30  ;;  %13796 = vmatprep.subr.bf16.mxu1 %v20439_v58  ;;  %v20473_v30 = vld [vmem:[%s28286_s1 + $0x2f80] ss:$28 sps:$4 sm:$0xff]   ;;  %v20476_v58 = vld [vmem:[%s28286_s1 + $0x748] ss:$28 sps:$4 sm:$0xff]  }
 0x40e   :  { %14058 = vmatprep.subr.bf16.mxu0 %v20442_v12  ;;  %v20481_v12 = vld [vmem:[%s28286_s1 + $0x2fbc] ss:$28 sps:$4 sm:$0xff]  }
 0x410   :  { %13797 = vmatpush1.bf16.msra.mxu1 %v20437_v60  ;;  %v20484_v60 = vld [vmem:[%s28286_s1 + $0x784] ss:$28 sps:$4 sm:$0xff]  }
 0x411   :  { %14059 = vmatpush1.bf16.msra.mxu0 %v20440_v61  ;;  %13798 = vmatprep.subr.bf16.mxu1 %v20445_v63  ;;  %v20479_v61 = vld [vmem:[%s28286_s1 + $0x2fb8] ss:$28 sps:$4 sm:$0xff]   ;;  %v20482_v63 = vld [vmem:[%s28286_s1 + $0x780] ss:$28 sps:$4 sm:$0xff]  }
 0x412   :  { %14060 = vmatprep.subr.bf16.mxu0 %v20448_v0  ;;  %v20487_v0 = vld [vmem:[%s28286_s1 + $0x2ff4] ss:$28 sps:$4 sm:$0xff]  }
 0x414   :  { %13799 = vmatpush1.bf16.msra.mxu1 %v20443_v1  ;;  %v20490_v1 = vld [vmem:[%s28286_s1 + $0x7bc] ss:$28 sps:$4 sm:$0xff]  }
 0x415   :  { %14061 = vmatpush1.bf16.msra.mxu0 %v20446_v2  ;;  %13800 = vmatprep.subr.bf16.mxu1 %v20451_v3  ;;  %v20485_v2 = vld [vmem:[%s28286_s1 + $0x2ff0] ss:$28 sps:$4 sm:$0xff]   ;;  %v20488_v3 = vld [vmem:[%s28286_s1 + $0x7b8] ss:$28 sps:$4 sm:$0xff]  }
 0x416   :  { %14062 = vmatprep.subr.bf16.mxu0 %v20454_v4  ;;  %v20493_v4 = vld [vmem:[%s28286_s1 + $0x302c] ss:$28 sps:$4 sm:$0xff]  }
 0x418   :  { %13801 = vmatpush1.bf16.msra.mxu1 %v20449_v5  ;;  %v20496_v5 = vld [vmem:[%s28286_s1 + $0x7f4] ss:$28 sps:$4 sm:$0xff]  }
 0x419   :  { %14063 = vmatpush1.bf16.msra.mxu0 %v20452_v26  ;;  %13802 = vmatprep.subr.bf16.mxu1 %v20457_v20  ;;  %v20491_v26 = vld [vmem:[%s28286_s1 + $0x3028] ss:$28 sps:$4 sm:$0xff]   ;;  %v20494_v20 = vld [vmem:[%s28286_s1 + $0x7f0] ss:$28 sps:$4 sm:$0xff]  }
 0x41a   :  { %14064 = vmatprep.subr.bf16.mxu0 %v20460_v28  ;;  %v20499_v28 = vld [vmem:[%s28286_s1 + $0x3064] ss:$28 sps:$4 sm:$0xff]  }
 0x41c   :  { %13803 = vmatpush1.bf16.msra.mxu1 %v20455_v14  ;;  %v20502_v14 = vld [vmem:[%s28286_s1 + $0x82c] ss:$28 sps:$4 sm:$0xff]  }
 0x41d   :  { %14065 = vmatpush1.bf16.msra.mxu0 %v20458_v34  ;;  %13804 = vmatprep.subr.bf16.mxu1 %v20463_v40  ;;  %v20497_v34 = vld [vmem:[%s28286_s1 + $0x3060] ss:$28 sps:$4 sm:$0xff]   ;;  %v20500_v40 = vld [vmem:[%s28286_s1 + $0x828] ss:$28 sps:$4 sm:$0xff]  }
 0x41e   :  { %14066 = vmatprep.subr.bf16.mxu0 %v20466_v42  ;;  %v20505_v42 = vld [vmem:[%s28286_s1 + $0x309c] ss:$28 sps:$4 sm:$0xff]  }
 0x420   :  { %13805 = vmatpush1.bf16.msra.mxu1 %v20461_v16  ;;  %v20508_v16 = vld [vmem:[%s28286_s1 + $0x864] ss:$28 sps:$4 sm:$0xff]  }
 0x421   :  { %14067 = vmatpush1.bf16.msra.mxu0 %v20464_v44  ;;  %13806 = vmatprep.subr.bf16.mxu1 %v20469_v10  ;;  %v20503_v44 = vld [vmem:[%s28286_s1 + $0x3098] ss:$28 sps:$4 sm:$0xff]   ;;  %v20506_v10 = vld [vmem:[%s28286_s1 + $0x860] ss:$28 sps:$4 sm:$0xff]  }
 0x422   :  { %14077 = vmatprep.subr.bf16.mxu0 %v20472_v46  ;;  %v20511_v46 = vld [vmem:[%s28286_s1 + $0x30d4] ss:$28 sps:$4 sm:$0xff]  }
 0x424   :  { %14069 = vmatmul.mubr.bf16.vlgmr.msra.gmra.mrb[4].mxu0 %v22212_v18  ;;  %13807 = vmatpush1.bf16.msra.mxu1 %v20467_v47  ;;  %v20514_v47 = vld [vmem:[%s28286_s1 + $0x89c] ss:$28 sps:$4 sm:$0xff]  }
 0x425   :  { %14078 = vmatpush1.bf16.msra.mxu0 %v20470_v50  ;;  %13808 = vmatprep.subr.bf16.mxu1 %v20475_v54  ;;  %v20509_v50 = vld [vmem:[%s28286_s1 + $0x30d0] ss:$28 sps:$4 sm:$0xff]   ;;  %v20512_v54 = vld [vmem:[%s28286_s1 + $0x898] ss:$28 sps:$4 sm:$0xff]  }
 0x426   :  { %14079 = vmatprep.subr.bf16.mxu0 %v20478_v55  ;;  %14109 = vmatprep.mubr.bf16.mxu0 %v22236_v24  ;;  %v20517_v55 = vld [vmem:[%s28286_s1 + $0x310c] ss:$28 sps:$4 sm:$0xff]  }
 0x428   :  { %13809 = vmatpush1.bf16.msra.mxu1 %v20473_v30  ;;  %v20520_v30 = vld [vmem:[%s28286_s1 + $0x8d4] ss:$28 sps:$4 sm:$0xff]  }
 0x429   :  { %14080 = vmatpush1.bf16.msra.mxu0 %v20476_v58  ;;  %13810 = vmatprep.subr.bf16.mxu1 %v20481_v12  ;;  %v20515_v58 = vld [vmem:[%s28286_s1 + $0x3108] ss:$28 sps:$4 sm:$0xff]   ;;  %v20518_v12 = vld [vmem:[%s28286_s1 + $0x8d0] ss:$28 sps:$4 sm:$0xff]  }
 0x42a   :  { %14081 = vmatprep.subr.bf16.mxu0 %v20484_v60  ;;  %v20523_v60 = vld [vmem:[%s28286_s1 + $0x3144] ss:$28 sps:$4 sm:$0xff]  }
 0x42c   :  { %13811 = vmatpush1.bf16.msra.mxu1 %v20479_v61  ;;  %v20526_v61 = vld [vmem:[%s28286_s1 + $0x90c] ss:$28 sps:$4 sm:$0xff]  }
 0x42d   :  { %14082 = vmatpush1.bf16.msra.mxu0 %v20482_v63  ;;  %13812 = vmatprep.subr.bf16.mxu1 %v20487_v0  ;;  %v20521_v63 = vld [vmem:[%s28286_s1 + $0x3140] ss:$28 sps:$4 sm:$0xff]   ;;  %v20524_v0 = vld [vmem:[%s28286_s1 + $0x908] ss:$28 sps:$4 sm:$0xff]  }
 0x42e   :  { %14083 = vmatprep.subr.bf16.mxu0 %v20490_v1  ;;  %v20529_v1 = vld [vmem:[%s28286_s1 + $0x317c] ss:$28 sps:$4 sm:$0xff]  }
 0x430   :  { %13813 = vmatpush1.bf16.msra.mxu1 %v20485_v2  ;;  %v20532_v2 = vld [vmem:[%s28286_s1 + $0x944] ss:$28 sps:$4 sm:$0xff]  }
 0x431   :  { %14084 = vmatpush1.bf16.msra.mxu0 %v20488_v3  ;;  %13814 = vmatprep.subr.bf16.mxu1 %v20493_v4  ;;  %v20527_v3 = vld [vmem:[%s28286_s1 + $0x3178] ss:$28 sps:$4 sm:$0xff]   ;;  %v20530_v4 = vld [vmem:[%s28286_s1 + $0x940] ss:$28 sps:$4 sm:$0xff]  }
 0x432   :  { %14085 = vmatprep.subr.bf16.mxu0 %v20496_v5  ;;  %v20535_v5 = vld [vmem:[%s28286_s1 + $0x31b4] ss:$28 sps:$4 sm:$0xff]  }
 0x434   :  { %13815 = vmatpush1.bf16.msra.mxu1 %v20491_v26  ;;  %v20538_v26 = vld [vmem:[%s28286_s1 + $0x97c] ss:$28 sps:$4 sm:$0xff]  }
 0x435   :  { %14086 = vmatpush1.bf16.msra.mxu0 %v20494_v20  ;;  %13816 = vmatprep.subr.bf16.mxu1 %v20499_v28  ;;  %v20533_v20 = vld [vmem:[%s28286_s1 + $0x31b0] ss:$28 sps:$4 sm:$0xff]   ;;  %v20536_v28 = vld [vmem:[%s28286_s1 + $0x978] ss:$28 sps:$4 sm:$0xff]  }
 0x436   :  { %14087 = vmatprep.subr.bf16.mxu0 %v20502_v14  ;;  %v20541_v14 = vld [vmem:[%s28286_s1 + $0x31ec] ss:$28 sps:$4 sm:$0xff]  }
 0x438   :  { %13817 = vmatpush1.bf16.msra.mxu1 %v20497_v34  ;;  %v20544_v34 = vld [vmem:[%s28286_s1 + $0x9b4] ss:$28 sps:$4 sm:$0xff]  }
 0x439   :  { %14088 = vmatpush1.bf16.msra.mxu0 %v20500_v40  ;;  %13818 = vmatprep.subr.bf16.mxu1 %v20505_v42  ;;  %v20539_v40 = vld [vmem:[%s28286_s1 + $0x31e8] ss:$28 sps:$4 sm:$0xff]   ;;  %v20542_v42 = vld [vmem:[%s28286_s1 + $0x9b0] ss:$28 sps:$4 sm:$0xff]  }
 0x43a   :  { %14089 = vmatprep.subr.bf16.mxu0 %v20508_v16  ;;  %v20547_v16 = vld [vmem:[%s28286_s1 + $0x3224] ss:$28 sps:$4 sm:$0xff]  }
 0x43c   :  { %13819 = vmatpush1.bf16.msra.mxu1 %v20503_v44  ;;  %v20550_v44 = vld [vmem:[%s28286_s1 + $0x9ec] ss:$28 sps:$4 sm:$0xff]  }
 0x43d   :  { %14090 = vmatpush1.bf16.msra.mxu0 %v20506_v10  ;;  %13820 = vmatprep.subr.bf16.mxu1 %v20511_v46  ;;  %v20545_v10 = vld [vmem:[%s28286_s1 + $0x3220] ss:$28 sps:$4 sm:$0xff]   ;;  %v20548_v46 = vld [vmem:[%s28286_s1 + $0x9e8] ss:$28 sps:$4 sm:$0xff]  }
 0x43e   :  { %14091 = vmatprep.subr.bf16.mxu0 %v20514_v47  ;;  %v20553_v47 = vld [vmem:[%s28286_s1 + $0x325c] ss:$28 sps:$4 sm:$0xff]  }
 0x440   :  { %13821 = vmatpush1.bf16.msra.mxu1 %v20509_v50  ;;  %v20556_v50 = vld [vmem:[%s28286_s1 + $0xa24] ss:$28 sps:$4 sm:$0xff]  }
 0x441   :  { %14092 = vmatpush1.bf16.msra.mxu0 %v20512_v54  ;;  %13831 = vmatprep.subr.bf16.mxu1 %v20517_v55  ;;  %v20551_v54 = vld [vmem:[%s28286_s1 + $0x3258] ss:$28 sps:$4 sm:$0xff]   ;;  %v20554_v55 = vld [vmem:[%s28286_s1 + $0xa20] ss:$28 sps:$4 sm:$0xff]  }
 0x442   :  { %14093 = vmatprep.subr.bf16.mxu0 %v20520_v30  ;;  %v20559_v30 = vld [vmem:[%s28286_s1 + $0x3294] ss:$28 sps:$4 sm:$0xff]  }
 0x443   :  { %13823 = vmatmul.mubr.bf16.vlgmr.msra.gmra.mrb[4].mxu1 %v24113_v57 }
 0x444   :  { %13832 = vmatpush1.bf16.msra.mxu1 %v20515_v58  ;;  %13863 = vmatprep.mubr.bf16.mxu1 %v24129_v27  ;;  %v20562_v58 = vld [vmem:[%s28286_s1 + $0xa5c] ss:$28 sps:$4 sm:$0xff]  }
 0x445   :  { %14094 = vmatpush1.bf16.msra.mxu0 %v20518_v12  ;;  %13833 = vmatprep.subr.bf16.mxu1 %v20523_v60  ;;  %v20557_v12 = vld [vmem:[%s28286_s1 + $0x3290] ss:$28 sps:$4 sm:$0xff]   ;;  %v20560_v60 = vld [vmem:[%s28286_s1 + $0xa58] ss:$28 sps:$4 sm:$0xff]  }
 0x446   :  { %14095 = vmatprep.subr.bf16.mxu0 %v20526_v61  ;;  %v20565_v61 = vld [vmem:[%s28286_s1 + $0x32cc] ss:$28 sps:$4 sm:$0xff]  }
 0x448   :  { %13834 = vmatpush1.bf16.msra.mxu1 %v20521_v63  ;;  %v20568_v63 = vld [vmem:[%s28286_s1 + $0xa94] ss:$28 sps:$4 sm:$0xff]  }
 0x449   :  { %14096 = vmatpush1.bf16.msra.mxu0 %v20524_v0  ;;  %13835 = vmatprep.subr.bf16.mxu1 %v20529_v1  ;;  %v20563_v0 = vld [vmem:[%s28286_s1 + $0x32c8] ss:$28 sps:$4 sm:$0xff]   ;;  %v20566_v1 = vld [vmem:[%s28286_s1 + $0xa90] ss:$28 sps:$4 sm:$0xff]  }
 0x44a   :  { %14097 = vmatprep.subr.bf16.mxu0 %v20532_v2  ;;  %v20571_v2 = vld [vmem:[%s28286_s1 + $0x3304] ss:$28 sps:$4 sm:$0xff]  }
 0x44c   :  { %13836 = vmatpush1.bf16.msra.mxu1 %v20527_v3  ;;  %v20574_v3 = vld [vmem:[%s28286_s1 + $0xacc] ss:$28 sps:$4 sm:$0xff]  }
 0x44d   :  { %14098 = vmatpush1.bf16.msra.mxu0 %v20530_v4  ;;  %13837 = vmatprep.subr.bf16.mxu1 %v20535_v5  ;;  %v2281_v4 = vlaneseq  ;;  %v20569_v5 = vld [vmem:[%s28286_s1 + $0x3300] ss:$28 sps:$4 sm:$0xff]  }
 0x44e   :  { %14099 = vmatprep.subr.bf16.mxu0 %v20538_v26  ;;  %v20572_v26 = vld [vmem:[%s28286_s1 + $0xac8] ss:$28 sps:$4 sm:$0xff]  }
 0x450   :  { %13838 = vmatpush1.bf16.msra.mxu1 %v20533_v20  ;;  %v20577_v20 = vld [vmem:[%s28286_s1 + $0x333c] ss:$28 sps:$4 sm:$0xff]  }
 0x451   :  { %14100 = vmatpush1.bf16.msra.mxu0 %v20536_v28  ;;  %13839 = vmatprep.subr.bf16.mxu1 %v20541_v14  ;;  %v20580_v28 = vld [vmem:[%s28286_s1 + $0xb04] ss:$28 sps:$4 sm:$0xff]   ;;  %v25453_v14 = vshrl.u32 %v2281_v4, 7 }
 0x452   :  { %14101 = vmatprep.subr.bf16.mxu0 %v20544_v34  ;;  %v20575_v34 = vld [vmem:[%s28286_s1 + $0x3338] ss:$28 sps:$4 sm:$0xff]   ;;  %v20604_v4 = vld [vmem:[%s28286_s1 + $0xbe4] ss:$28 sps:$4 sm:$0xff]  }
 0x454   :  { %13840 = vmatpush1.bf16.msra.mxu1 %v20539_v40  ;;  %v20578_v40 = vld [vmem:[%s28286_s1 + $0xb00] ss:$28 sps:$4 sm:$0xff]  }
 0x455   :  { %14102 = vmatpush1.bf16.msra.mxu0 %v20542_v42  ;;  %13841 = vmatprep.subr.bf16.mxu1 %v20547_v16  ;;  %v20583_v42 = vld [vmem:[%s28286_s1 + $0x3374] ss:$28 sps:$4 sm:$0xff]   ;;  %v20586_v16 = vld [vmem:[%s28286_s1 + $0xb3c] ss:$28 sps:$4 sm:$0xff]  }
 0x456   :  { %14103 = vmatprep.subr.bf16.mxu0 %v20550_v44  ;;  %v2279_v44 = vld [vmem:[%s28288_s2] sm:$0xff] }
 0x458   :  { %13842 = vmatpush1.bf16.msra.mxu1 %v20545_v10  ;;  %v2283_v10 = vsub.s32 0, %v25453_v14 }
 0x459   :  { %14104 = vmatpush1.bf16.msra.mxu0 %v20548_v46  ;;  %13843 = vmatprep.subr.bf16.mxu1 %v20553_v47  ;;  %v20581_v46 = vld [vmem:[%s28286_s1 + $0x3370] ss:$28 sps:$4 sm:$0xff]   ;;  %v20584_v47 = vld [vmem:[%s28286_s1 + $0xb38] ss:$28 sps:$4 sm:$0xff]  }
 0x45a   :  { %14105 = vmatprep.subr.bf16.mxu0 %v20556_v50  ;;  %v2287_v50 = vsub.s32 1, %v25453_v14 }
 0x45c   :  { %13844 = vmatpush1.bf16.msra.mxu1 %v20551_v54  ;;  %v20589_v54 = vld [vmem:[%s28286_s1 + $0x33ac] ss:$28 sps:$4 sm:$0xff]  }
 0x45d   :  { %14106 = vmatpush1.bf16.msra.mxu0 %v20554_v55  ;;  %13845 = vmatprep.subr.bf16.mxu1 %v20559_v30  ;;  %v20592_v55 = vld [vmem:[%s28286_s1 + $0xb74] ss:$28 sps:$4 sm:$0xff]   ;;  %v20587_v30 = vld [vmem:[%s28286_s1 + $0x33a8] ss:$28 sps:$4 sm:$0xff]  }
 0x45e   :  { %14107 = vmatprep.subr.bf16.mxu0 %v20562_v58  ;;  %v20590_v58 = vld [vmem:[%s28286_s1 + $0xb70] ss:$28 sps:$4 sm:$0xff]  }
 0x460   :  { %13846 = vmatpush1.bf16.msra.mxu1 %v20557_v12  ;;  %v2284_v12 = vrot.slane %v2279_v44, %v2283_v10  ;;  %v20605_v10 = vld [vmem:[%s28286_s1 + $0x3450] ss:$28 sps:$4 sm:$0xff]  }
 0x461   :  { %14108 = vmatpush1.bf16.msra.mxu0 %v20560_v60  ;;  %13847 = vmatprep.subr.bf16.mxu1 %v20565_v61  ;;  %v20595_v60 = vld [vmem:[%s28286_s1 + $0x33e4] ss:$28 sps:$4 sm:$0xff]   ;;  %v20598_v61 = vld [vmem:[%s28286_s1 + $0xbac] ss:$28 sps:$4 sm:$0xff]  }
 0x462   :  { %14118 = vmatprep.subr.bf16.mxu0 %v20568_v63  ;;  %v2288_v63 = vrot.slane %v2279_v44, %v2287_v50  ;;  %v20610_v44 = vld [vmem:[%s28286_s1 + $0xc1c] ss:$28 sps:$4 sm:$0xff]   ;;  %v20616_v50 = vld [vmem:[%s28286_s1 + $0xc54] ss:$28 sps:$4 sm:$0xff]  }
 0x464   :  { %14110 = vmatmul.mubr.bf16.vlgmr.msra.gmra.mrb[4].mxu0 %v22431_v36  ;;  %13848 = vmatpush1.bf16.msra.mxu1 %v20563_v0  ;;  %v20593_v0 = vld [vmem:[%s28286_s1 + $0x33e0] ss:$28 sps:$4 sm:$0xff]  }
 0x465   :  { %14119 = vmatpush1.bf16.msra.mxu0 %v20566_v1  ;;  %13849 = vmatprep.subr.bf16.mxu1 %v20571_v2  ;;  %v20596_v1 = vld [vmem:[%s28286_s1 + $0xba8] ss:$28 sps:$4 sm:$0xff]   ;;  %v18637_v2 = vadd.f32 %v23146_v8, %v2284_v12  ;;  %v20599_v8 = vld [vmem:[%s28286_s1 + $0x3418] ss:$28 sps:$4 sm:$0xff]   ;;  %v20617_v12 = vld [vmem:[%s28286_s1 + $0x34c0] ss:$28 sps:$4 sm:$0xff]  }
 0x466   :  { %14120 = vmatprep.subr.bf16.mxu0 %v20574_v3  ;;  %14150 = vmatprep.mubr.bf16.mxu0 %v21934_v53  ;;  %v20601_v3 = vld [vmem:[%s28286_s1 + $0x341c] ss:$28 sps:$4 sm:$0xff]  }
 0x468   :  { %13850 = vmatpush1.bf16.msra.mxu1 %v20569_v5  ;;  %v18639_v5 = vadd.f32 %v23148_v9, %v2288_v63  ;;  %v20607_v9 = vld [vmem:[%s28286_s1 + $0x3454] ss:$28 sps:$4 sm:$0xff]   ;;  %v20628_v63 = vld [vmem:[%s28286_s1 + $0xcc4] ss:$28 sps:$4 sm:$0xff]  }
 0x469   :  { %14121 = vmatpush1.bf16.msra.mxu0 %v20572_v26  ;;  %13851 = vmatprep.subr.bf16.mxu1 %v20577_v20 }
 0x46a   :  { %14122 = vmatprep.subr.bf16.mxu0 %v20580_v28 }
 0x46c   :  { %13852 = vmatpush1.bf16.msra.mxu1 %v20575_v34 }
 0x46d   :  { %14123 = vmatpush1.bf16.msra.mxu0 %v20578_v40  ;;  %13853 = vmatprep.subr.bf16.mxu1 %v20583_v42  ;;  %v20602_v42 = vld [vmem:[%s28286_s1 + $0xbe0] ss:$28 sps:$4 sm:$0xff]  }
 0x46e   :  { %14124 = vmatprep.subr.bf16.mxu0 %v20586_v16 }
 0x470   :  { %13854 = vmatpush1.bf16.msra.mxu1 %v20581_v46  ;;  %v20608_v46 = vld [vmem:[%s28286_s1 + $0xc18] ss:$28 sps:$4 sm:$0xff]  }
 0x471   :  { %14125 = vmatpush1.bf16.msra.mxu0 %v20584_v47  ;;  %13855 = vmatprep.subr.bf16.mxu1 %v20589_v54  ;;  %v20613_v47 = vld [vmem:[%s28286_s1 + $0x348c] ss:$28 sps:$4 sm:$0xff]  }
 0x472   :  { %14126 = vmatprep.subr.bf16.mxu0 %v20592_v55  ;;  %v20611_v54 = vld [vmem:[%s28286_s1 + $0x3488] ss:$28 sps:$4 sm:$0xff]   ;;  %v20614_v55 = vld [vmem:[%s28286_s1 + $0xc50] ss:$28 sps:$4 sm:$0xff]  }
 0x474   :  { %13856 = vmatpush1.bf16.msra.mxu1 %v20587_v30  ;;  %v20619_v30 = vld [vmem:[%s28286_s1 + $0x34c4] ss:$28 sps:$4 sm:$0xff]  }
 0x475   :  { %14127 = vmatpush1.bf16.msra.mxu0 %v20590_v58  ;;  %13857 = vmatprep.subr.bf16.mxu1 %v20595_v60  ;;  %v20622_v58 = vld [vmem:[%s28286_s1 + $0xc8c] ss:$28 sps:$4 sm:$0xff]  }
 0x476   :  { %14128 = vmatprep.subr.bf16.mxu0 %v20598_v61  ;;  %v20620_v60 = vld [vmem:[%s28286_s1 + $0xc88] ss:$28 sps:$4 sm:$0xff]   ;;  %v20625_v61 = vld [vmem:[%s28286_s1 + $0x34fc] ss:$28 sps:$4 sm:$0xff]  }
 0x477   :  { %v13250_v26 = vpop.f32.mrb[0].mxu0 }
 0x478   :  { %v25510_v20 = vadd.f32 %v18637_v2, %v13250_v26  ;;  %v13252_v28 = vpop.f32.mrb[1].mxu0  ;;  %13858 = vmatpush1.bf16.msra.mxu1 %v20593_v0  ;;  %v20623_v0 = vld [vmem:[%s28286_s1 + $0x34f8] ss:$28 sps:$4 sm:$0xff]   ;;  %v20637_v26 = vld [vmem:[%s28286_s1 + $0x356c] ss:$28 sps:$4 sm:$0xff]  }
 0x479   :  { %v25512_v34 = vadd.f32 %v18639_v5, %v13252_v28  ;;  %v13254_v40 = vpop.f32.mrb[2].mxu0  ;;  %14129 = vmatpush1.bf16.msra.mxu0 %v20596_v1  ;;  %13859 = vmatprep.subr.bf16.mxu1 %v20601_v3  ;;  %v20626_v1 = vld [vmem:[%s28286_s1 + $0xcc0] ss:$28 sps:$4 sm:$0xff]   ;;  %v20631_v2 = vld [vmem:[%s28286_s1 + $0x3534] ss:$28 sps:$4 sm:$0xff]  }
 0x47a   :  { %v13255_v16 = vpop.f32.mrb[3].mxu0  ;;  %14130 = vmatprep.subr.bf16.mxu0 %v20604_v4  ;;  %v20634_v3 = vld [vmem:[%s28286_s1 + $0xcfc] ss:$28 sps:$4 sm:$0xff]   ;;  %v20629_v4 = vld [vmem:[%s28286_s1 + $0x3530] ss:$28 sps:$4 sm:$0xff]  }
 0x47b   :  { %v20632_v5 = vld [vmem:[%s28286_s1 + $0xcf8] ss:$28 sps:$4 sm:$0xff]   ;;  %v20635_v40 = vld [vmem:[%s28286_s1 + $0x3568] ss:$28 sps:$4 sm:$0xff]  }
 0x47c   :  { %13860 = vmatpush1.bf16.msra.mxu1 %v20599_v8  ;;  %v20640_v28 = vld [vmem:[%s28286_s1 + $0xd34] ss:$28 sps:$4 sm:$0xff]   ;;  %v20646_v16 = vld [vmem:[%s28286_s1 + $0xd6c] ss:$28 sps:$4 sm:$0xff]  }
 0x47d   :  { %14131 = vmatpush1.bf16.msra.mxu0 %v20602_v42  ;;  %13861 = vmatprep.subr.bf16.mxu1 %v20607_v9  ;;  %v20638_v8 = vld [vmem:[%s28286_s1 + $0xd30] ss:$28 sps:$4 sm:$0xff]   ;;  %v20643_v42 = vld [vmem:[%s28286_s1 + $0x35a4] ss:$28 sps:$4 sm:$0xff]  }
 0x47e   :  { %14132 = vmatprep.subr.bf16.mxu0 %v20610_v44  ;;  %v20641_v9 = vld [vmem:[%s28286_s1 + $0x35a0] ss:$28 sps:$4 sm:$0xff]   ;;  %v20644_v44 = vld [vmem:[%s28286_s1 + $0xd68] ss:$28 sps:$4 sm:$0xff]  }
 0x480   :  { %13862 = vmatpush1.bf16.msra.mxu1 %v20605_v10  ;;  %v20649_v10 = vld [vmem:[%s28286_s1 + $0x35dc] ss:$28 sps:$4 sm:$0xff]  }
 0x481   :  { %14133 = vmatpush1.bf16.msra.mxu0 %v20608_v46  ;;  %13872 = vmatprep.subr.bf16.mxu1 %v20613_v47  ;;  %v20652_v46 = vld [vmem:[%s28286_s1 + $0xda4] ss:$28 sps:$4 sm:$0xff]   ;;  %v20647_v47 = vld [vmem:[%s28286_s1 + $0x35d8] ss:$28 sps:$4 sm:$0xff]  }
 0x482   :  { %14134 = vmatprep.subr.bf16.mxu0 %v20616_v50  ;;  %v20650_v50 = vld [vmem:[%s28286_s1 + $0xda0] ss:$28 sps:$4 sm:$0xff]  }
 0x483   :  { %13864 = vmatmul.mubr.bf16.vlgmr.msra.gmra.mrb[4].mxu1 %v24322_v22 }
 0x484   :  { %13873 = vmatpush1.bf16.msra.mxu1 %v20611_v54  ;;  %13904 = vmatprep.mubr.bf16.mxu1 %v24338_v32  ;;  %v20655_v54 = vld [vmem:[%s28286_s1 + $0x3614] ss:$28 sps:$4 sm:$0xff]  }
 0x485   :  { %14135 = vmatpush1.bf16.msra.mxu0 %v20614_v55  ;;  %13874 = vmatprep.subr.bf16.mxu1 %v20619_v30  ;;  %v20658_v55 = vld [vmem:[%s28286_s1 + $0xddc] ss:$28 sps:$4 sm:$0xff]   ;;  %v20653_v30 = vld [vmem:[%s28286_s1 + $0x3610] ss:$28 sps:$4 sm:$0xff]  }
 0x486   :  { %14136 = vmatprep.subr.bf16.mxu0 %v20622_v58  ;;  %v20656_v58 = vld [vmem:[%s28286_s1 + $0xdd8] ss:$28 sps:$4 sm:$0xff]  }
 0x488   :  { %13875 = vmatpush1.bf16.msra.mxu1 %v20617_v12  ;;  %v20661_v12 = vld [vmem:[%s28286_s1 + $0x364c] ss:$28 sps:$4 sm:$0xff]  }
 0x489   :  { %14137 = vmatpush1.bf16.msra.mxu0 %v20620_v60  ;;  %13876 = vmatprep.subr.bf16.mxu1 %v20625_v61  ;;  %v20664_v60 = vld [vmem:[%s28286_s1 + $0xe14] ss:$28 sps:$4 sm:$0xff]   ;;  %v20659_v61 = vld [vmem:[%s28286_s1 + $0x3648] ss:$28 sps:$4 sm:$0xff]  }
 0x48a   :  { %14138 = vmatprep.subr.bf16.mxu0 %v20628_v63  ;;  %v20662_v63 = vld [vmem:[%s28286_s1 + $0xe10] ss:$28 sps:$4 sm:$0xff]  }
 0x48c   :  { %13877 = vmatpush1.bf16.msra.mxu1 %v20623_v0  ;;  %v20667_v0 = vld [vmem:[%s28286_s1 + $0x3684] ss:$28 sps:$4 sm:$0xff]  }
 0x48d   :  { %14139 = vmatpush1.bf16.msra.mxu0 %v20626_v1  ;;  %13878 = vmatprep.subr.bf16.mxu1 %v20631_v2  ;;  %v20670_v1 = vld [vmem:[%s28286_s1 + $0xe4c] ss:$28 sps:$4 sm:$0xff]   ;;  %v20665_v2 = vld [vmem:[%s28286_s1 + $0x3680] ss:$28 sps:$4 sm:$0xff]  }
 0x48e   :  { %14140 = vmatprep.subr.bf16.mxu0 %v20634_v3  ;;  %v20668_v3 = vld [vmem:[%s28286_s1 + $0xe48] ss:$28 sps:$4 sm:$0xff]  }
 0x490   :  { %13879 = vmatpush1.bf16.msra.mxu1 %v20629_v4  ;;  %v20673_v4 = vld [vmem:[%s28286_s1 + $0x36bc] ss:$28 sps:$4 sm:$0xff]  }
 0x491   :  { %14141 = vmatpush1.bf16.msra.mxu0 %v20632_v5  ;;  %13880 = vmatprep.subr.bf16.mxu1 %v20637_v26  ;;  %v20676_v5 = vld [vmem:[%s28286_s1 + $0xe84] ss:$28 sps:$4 sm:$0xff]   ;;  %v20671_v26 = vld [vmem:[%s28286_s1 + $0x36b8] ss:$28 sps:$4 sm:$0xff]  }
 0x492   :  { %14142 = vmatprep.subr.bf16.mxu0 %v20640_v28  ;;  %v20674_v28 = vld [vmem:[%s28286_s1 + $0xe80] ss:$28 sps:$4 sm:$0xff]  }
 0x494   :  { %13881 = vmatpush1.bf16.msra.mxu1 %v20635_v40  ;;  %v20679_v40 = vld [vmem:[%s28286_s1 + $0x36f4] ss:$28 sps:$4 sm:$0xff]  }
 0x495   :  { %14143 = vmatpush1.bf16.msra.mxu0 %v20638_v8  ;;  %13882 = vmatprep.subr.bf16.mxu1 %v20643_v42  ;;  %v20682_v8 = vld [vmem:[%s28286_s1 + $0xebc] ss:$28 sps:$4 sm:$0xff]   ;;  %v20677_v42 = vld [vmem:[%s28286_s1 + $0x36f0] ss:$28 sps:$4 sm:$0xff]  }
 0x496   :  { %14144 = vmatprep.subr.bf16.mxu0 %v20646_v16  ;;  %v20680_v16 = vld [vmem:[%s28286_s1 + $0xeb8] ss:$28 sps:$4 sm:$0xff]  }
 0x498   :  { %13883 = vmatpush1.bf16.msra.mxu1 %v20641_v9  ;;  %v20685_v9 = vld [vmem:[%s28286_s1 + $0x372c] ss:$28 sps:$4 sm:$0xff]  }
 0x499   :  { %14145 = vmatpush1.bf16.msra.mxu0 %v20644_v44  ;;  %13884 = vmatprep.subr.bf16.mxu1 %v20649_v10  ;;  %v20688_v44 = vld [vmem:[%s28286_s1 + $0xef4] ss:$28 sps:$4 sm:$0xff]   ;;  %v20683_v10 = vld [vmem:[%s28286_s1 + $0x3728] ss:$28 sps:$4 sm:$0xff]  }
 0x49a   :  { %14146 = vmatprep.subr.bf16.mxu0 %v20652_v46  ;;  %v20686_v46 = vld [vmem:[%s28286_s1 + $0xef0] ss:$28 sps:$4 sm:$0xff]  }
 0x49c   :  { %13885 = vmatpush1.bf16.msra.mxu1 %v20647_v47  ;;  %v20691_v47 = vld [vmem:[%s28286_s1 + $0x3764] ss:$28 sps:$4 sm:$0xff]  }
 0x49d   :  { %14147 = vmatpush1.bf16.msra.mxu0 %v20650_v50  ;;  %13886 = vmatprep.subr.bf16.mxu1 %v20655_v54  ;;  %v20694_v50 = vld [vmem:[%s28286_s1 + $0xf2c] ss:$28 sps:$4 sm:$0xff]   ;;  %v20689_v54 = vld [vmem:[%s28286_s1 + $0x3760] ss:$28 sps:$4 sm:$0xff]  }
 0x49e   :  { %14148 = vmatprep.subr.bf16.mxu0 %v20658_v55  ;;  %v20692_v55 = vld [vmem:[%s28286_s1 + $0xf28] ss:$28 sps:$4 sm:$0xff]  }
 0x4a0   :  { %13887 = vmatpush1.bf16.msra.mxu1 %v20653_v30  ;;  %v20697_v30 = vld [vmem:[%s28286_s1 + $0x379c] ss:$28 sps:$4 sm:$0xff]  }
 0x4a1   :  { %14149 = vmatpush1.bf16.msra.mxu0 %v20656_v58  ;;  %13888 = vmatprep.subr.bf16.mxu1 %v20661_v12  ;;  %v20700_v58 = vld [vmem:[%s28286_s1 + $0xf64] ss:$28 sps:$4 sm:$0xff]   ;;  %v20695_v12 = vld [vmem:[%s28286_s1 + $0x3798] ss:$28 sps:$4 sm:$0xff]  }
 0x4a2   :  { %14159 = vmatprep.subr.bf16.mxu0 %v20664_v60  ;;  %v20698_v60 = vld [vmem:[%s28286_s1 + $0xf60] ss:$28 sps:$4 sm:$0xff]  }
 0x4a4   :  { %14151 = vmatmul.mubr.bf16.vlgmr.msra.gmra.mrb[4].mxu0 %v21988_v7  ;;  %13889 = vmatpush1.bf16.msra.mxu1 %v20659_v61  ;;  %v20703_v61 = vld [vmem:[%s28286_s1 + $0x37d4] ss:$28 sps:$4 sm:$0xff]  }
 0x4a5   :  { %14160 = vmatpush1.bf16.msra.mxu0 %v20662_v63  ;;  %13890 = vmatprep.subr.bf16.mxu1 %v20667_v0  ;;  %v20706_v63 = vld [vmem:[%s28286_s1 + $0xf9c] ss:$28 sps:$4 sm:$0xff]   ;;  %v20701_v0 = vld [vmem:[%s28286_s1 + $0x37d0] ss:$28 sps:$4 sm:$0xff]  }
 0x4a6   :  { %14161 = vmatprep.subr.bf16.mxu0 %v20670_v1  ;;  %14191 = vmatprep.mubr.bf16.mxu0 %v22089_v38  ;;  %v20704_v1 = vld [vmem:[%s28286_s1 + $0xf98] ss:$28 sps:$4 sm:$0xff]  }
 0x4a8   :  { %13891 = vmatpush1.bf16.msra.mxu1 %v20665_v2  ;;  %v20709_v2 = vld [vmem:[%s28286_s1 + $0x380c] ss:$28 sps:$4 sm:$0xff]  }
 0x4a9   :  { %14162 = vmatpush1.bf16.msra.mxu0 %v20668_v3  ;;  %13892 = vmatprep.subr.bf16.mxu1 %v20673_v4  ;;  %v20712_v3 = vld [vmem:[%s28286_s1 + $0xfd4] ss:$28 sps:$4 sm:$0xff]   ;;  %v20707_v4 = vld [vmem:[%s28286_s1 + $0x3808] ss:$28 sps:$4 sm:$0xff]  }
 0x4aa   :  { %14163 = vmatprep.subr.bf16.mxu0 %v20676_v5  ;;  %v20710_v5 = vld [vmem:[%s28286_s1 + $0xfd0] ss:$28 sps:$4 sm:$0xff]  }
 0x4ac   :  { %13893 = vmatpush1.bf16.msra.mxu1 %v20671_v26  ;;  %v20715_v26 = vld [vmem:[%s28286_s1 + $0x3844] ss:$28 sps:$4 sm:$0xff]  }
 0x4ad   :  { %14164 = vmatpush1.bf16.msra.mxu0 %v20674_v28  ;;  %13894 = vmatprep.subr.bf16.mxu1 %v20679_v40  ;;  %v20718_v28 = vld [vmem:[%s28286_s1 + $0x100c] ss:$28 sps:$4 sm:$0xff]   ;;  %v20713_v40 = vld [vmem:[%s28286_s1 + $0x3840] ss:$28 sps:$4 sm:$0xff]  }
 0x4ae   :  { %14165 = vmatprep.subr.bf16.mxu0 %v20682_v8  ;;  %v20716_v8 = vld [vmem:[%s28286_s1 + $0x1008] ss:$28 sps:$4 sm:$0xff]  }
 0x4b0   :  { %13895 = vmatpush1.bf16.msra.mxu1 %v20677_v42  ;;  %v20721_v42 = vld [vmem:[%s28286_s1 + $0x387c] ss:$28 sps:$4 sm:$0xff]  }
 0x4b1   :  { %14166 = vmatpush1.bf16.msra.mxu0 %v20680_v16  ;;  %13896 = vmatprep.subr.bf16.mxu1 %v20685_v9  ;;  %v20724_v16 = vld [vmem:[%s28286_s1 + $0x1044] ss:$28 sps:$4 sm:$0xff]   ;;  %v20719_v9 = vld [vmem:[%s28286_s1 + $0x3878] ss:$28 sps:$4 sm:$0xff]  }
 0x4b2   :  { %14167 = vmatprep.subr.bf16.mxu0 %v20688_v44  ;;  %v20722_v44 = vld [vmem:[%s28286_s1 + $0x1040] ss:$28 sps:$4 sm:$0xff]  }
 0x4b4   :  { %13897 = vmatpush1.bf16.msra.mxu1 %v20683_v10  ;;  %v20727_v10 = vld [vmem:[%s28286_s1 + $0x38b4] ss:$28 sps:$4 sm:$0xff]  }
 0x4b5   :  { %14168 = vmatpush1.bf16.msra.mxu0 %v20686_v46  ;;  %13898 = vmatprep.subr.bf16.mxu1 %v20691_v47  ;;  %v20730_v46 = vld [vmem:[%s28286_s1 + $0x107c] ss:$28 sps:$4 sm:$0xff]   ;;  %v20725_v47 = vld [vmem:[%s28286_s1 + $0x38b0] ss:$28 sps:$4 sm:$0xff]  }
 0x4b6   :  { %14169 = vmatprep.subr.bf16.mxu0 %v20694_v50  ;;  %v20728_v50 = vld [vmem:[%s28286_s1 + $0x1078] ss:$28 sps:$4 sm:$0xff]  }
 0x4b8   :  { %13899 = vmatpush1.bf16.msra.mxu1 %v20689_v54  ;;  %v20733_v54 = vld [vmem:[%s28286_s1 + $0x38ec] ss:$28 sps:$4 sm:$0xff]  }
 0x4b9   :  { %14170 = vmatpush1.bf16.msra.mxu0 %v20692_v55  ;;  %13900 = vmatprep.subr.bf16.mxu1 %v20697_v30  ;;  %v20736_v55 = vld [vmem:[%s28286_s1 + $0x10b4] ss:$28 sps:$4 sm:$0xff]   ;;  %v20731_v30 = vld [vmem:[%s28286_s1 + $0x38e8] ss:$28 sps:$4 sm:$0xff]  }
 0x4ba   :  { %14171 = vmatprep.subr.bf16.mxu0 %v20700_v58  ;;  %v20734_v58 = vld [vmem:[%s28286_s1 + $0x10b0] ss:$28 sps:$4 sm:$0xff]  }
 0x4bc   :  { %13901 = vmatpush1.bf16.msra.mxu1 %v20695_v12  ;;  %v20739_v12 = vld [vmem:[%s28286_s1 + $0x3924] ss:$28 sps:$4 sm:$0xff]  }
 0x4bd   :  { %14172 = vmatpush1.bf16.msra.mxu0 %v20698_v60  ;;  %13902 = vmatprep.subr.bf16.mxu1 %v20703_v61  ;;  %v20742_v60 = vld [vmem:[%s28286_s1 + $0x10ec] ss:$28 sps:$4 sm:$0xff]   ;;  %v20737_v61 = vld [vmem:[%s28286_s1 + $0x3920] ss:$28 sps:$4 sm:$0xff]  }
 0x4be   :  { %14173 = vmatprep.subr.bf16.mxu0 %v20706_v63  ;;  %v20740_v63 = vld [vmem:[%s28286_s1 + $0x10e8] ss:$28 sps:$4 sm:$0xff]  }
 0x4c0   :  { %13903 = vmatpush1.bf16.msra.mxu1 %v20701_v0  ;;  %v20745_v0 = vld [vmem:[%s28286_s1 + $0x395c] ss:$28 sps:$4 sm:$0xff]  }
 0x4c1   :  { %14174 = vmatpush1.bf16.msra.mxu0 %v20704_v1  ;;  %13913 = vmatprep.subr.bf16.mxu1 %v20709_v2  ;;  %v20748_v1 = vld [vmem:[%s28286_s1 + $0x1124] ss:$28 sps:$4 sm:$0xff]   ;;  %v20743_v2 = vld [vmem:[%s28286_s1 + $0x3958] ss:$28 sps:$4 sm:$0xff]  }
 0x4c2   :  { %14175 = vmatprep.subr.bf16.mxu0 %v20712_v3  ;;  %v20746_v3 = vld [vmem:[%s28286_s1 + $0x1120] ss:$28 sps:$4 sm:$0xff]  }
 0x4c3   :  { %13905 = vmatmul.mubr.bf16.vlgmr.msra.gmra.mrb[4].mxu1 %v24531_v31 }
 0x4c4   :  { %13914 = vmatpush1.bf16.msra.mxu1 %v20707_v4  ;;  %13945 = vmatprep.mubr.bf16.mxu1 %v24547_v51  ;;  %v20751_v4 = vld [vmem:[%s28286_s1 + $0x3994] ss:$28 sps:$4 sm:$0xff]  }
 0x4c5   :  { %14176 = vmatpush1.bf16.msra.mxu0 %v20710_v5  ;;  %13915 = vmatprep.subr.bf16.mxu1 %v20715_v26  ;;  %v20754_v5 = vld [vmem:[%s28286_s1 + $0x115c] ss:$28 sps:$4 sm:$0xff]   ;;  %v20749_v26 = vld [vmem:[%s28286_s1 + $0x3990] ss:$28 sps:$4 sm:$0xff]  }
 0x4c6   :  { %14177 = vmatprep.subr.bf16.mxu0 %v20718_v28  ;;  %v20752_v28 = vld [vmem:[%s28286_s1 + $0x1158] ss:$28 sps:$4 sm:$0xff]  }
 0x4c8   :  { %13916 = vmatpush1.bf16.msra.mxu1 %v20713_v40  ;;  %v20757_v40 = vld [vmem:[%s28286_s1 + $0x39cc] ss:$28 sps:$4 sm:$0xff]  }
 0x4c9   :  { %14178 = vmatpush1.bf16.msra.mxu0 %v20716_v8  ;;  %13917 = vmatprep.subr.bf16.mxu1 %v20721_v42  ;;  %v20760_v8 = vld [vmem:[%s28286_s1 + $0x1194] ss:$28 sps:$4 sm:$0xff]   ;;  %v20755_v42 = vld [vmem:[%s28286_s1 + $0x39c8] ss:$28 sps:$4 sm:$0xff]  }
 0x4ca   :  { %14179 = vmatprep.subr.bf16.mxu0 %v20724_v16  ;;  %v20758_v16 = vld [vmem:[%s28286_s1 + $0x1190] ss:$28 sps:$4 sm:$0xff]  }
 0x4cc   :  { %13918 = vmatpush1.bf16.msra.mxu1 %v20719_v9  ;;  %v20763_v9 = vld [vmem:[%s28286_s1 + $0x3a04] ss:$28 sps:$4 sm:$0xff]  }
 0x4cd   :  { %14180 = vmatpush1.bf16.msra.mxu0 %v20722_v44  ;;  %13919 = vmatprep.subr.bf16.mxu1 %v20727_v10  ;;  %v20766_v44 = vld [vmem:[%s28286_s1 + $0x11cc] ss:$28 sps:$4 sm:$0xff]   ;;  %v20761_v10 = vld [vmem:[%s28286_s1 + $0x3a00] ss:$28 sps:$4 sm:$0xff]  }
 0x4ce   :  { %14181 = vmatprep.subr.bf16.mxu0 %v20730_v46  ;;  %v20764_v46 = vld [vmem:[%s28286_s1 + $0x11c8] ss:$28 sps:$4 sm:$0xff]  }
 0x4d0   :  { %13920 = vmatpush1.bf16.msra.mxu1 %v20725_v47  ;;  %v20769_v47 = vld [vmem:[%s28286_s1 + $0x3a3c] ss:$28 sps:$4 sm:$0xff]  }
 0x4d1   :  { %14182 = vmatpush1.bf16.msra.mxu0 %v20728_v50  ;;  %13921 = vmatprep.subr.bf16.mxu1 %v20733_v54  ;;  %v20772_v50 = vld [vmem:[%s28286_s1 + $0x1204] ss:$28 sps:$4 sm:$0xff]   ;;  %v20767_v54 = vld [vmem:[%s28286_s1 + $0x3a38] ss:$28 sps:$4 sm:$0xff]  }
 0x4d2   :  { %14183 = vmatprep.subr.bf16.mxu0 %v20736_v55  ;;  %v20770_v55 = vld [vmem:[%s28286_s1 + $0x1200] ss:$28 sps:$4 sm:$0xff]  }
 0x4d4   :  { %13922 = vmatpush1.bf16.msra.mxu1 %v20731_v30  ;;  %v20775_v30 = vld [vmem:[%s28286_s1 + $0x3a74] ss:$28 sps:$4 sm:$0xff]  }
 0x4d5   :  { %14184 = vmatpush1.bf16.msra.mxu0 %v20734_v58  ;;  %13923 = vmatprep.subr.bf16.mxu1 %v20739_v12  ;;  %v20778_v58 = vld [vmem:[%s28286_s1 + $0x123c] ss:$28 sps:$4 sm:$0xff]   ;;  %v20773_v12 = vld [vmem:[%s28286_s1 + $0x3a70] ss:$28 sps:$4 sm:$0xff]  }
 0x4d6   :  { %14185 = vmatprep.subr.bf16.mxu0 %v20742_v60  ;;  %v20776_v60 = vld [vmem:[%s28286_s1 + $0x1238] ss:$28 sps:$4 sm:$0xff]  }
 0x4d8   :  { %13924 = vmatpush1.bf16.msra.mxu1 %v20737_v61  ;;  %v20781_v61 = vld [vmem:[%s28286_s1 + $0x3aac] ss:$28 sps:$4 sm:$0xff]  }
 0x4d9   :  { %14186 = vmatpush1.bf16.msra.mxu0 %v20740_v63  ;;  %13925 = vmatprep.subr.bf16.mxu1 %v20745_v0  ;;  %v20784_v63 = vld [vmem:[%s28286_s1 + $0x1274] ss:$28 sps:$4 sm:$0xff]   ;;  %v20779_v0 = vld [vmem:[%s28286_s1 + $0x3aa8] ss:$28 sps:$4 sm:$0xff]  }
 0x4da   :  { %14187 = vmatprep.subr.bf16.mxu0 %v20748_v1  ;;  %v20782_v1 = vld [vmem:[%s28286_s1 + $0x1270] ss:$28 sps:$4 sm:$0xff]  }
 0x4dc   :  { %13926 = vmatpush1.bf16.msra.mxu1 %v20743_v2  ;;  %v20787_v2 = vld [vmem:[%s28286_s1 + $0x3ae4] ss:$28 sps:$4 sm:$0xff]  }
 0x4dd   :  { %14188 = vmatpush1.bf16.msra.mxu0 %v20746_v3  ;;  %13927 = vmatprep.subr.bf16.mxu1 %v20751_v4  ;;  %v20790_v3 = vld [vmem:[%s28286_s1 + $0x12ac] ss:$28 sps:$4 sm:$0xff]   ;;  %v20785_v4 = vld [vmem:[%s28286_s1 + $0x3ae0] ss:$28 sps:$4 sm:$0xff]  }
 0x4de   :  { %14189 = vmatprep.subr.bf16.mxu0 %v20754_v5  ;;  %v20788_v5 = vld [vmem:[%s28286_s1 + $0x12a8] ss:$28 sps:$4 sm:$0xff]  }
 0x4e0   :  { %13928 = vmatpush1.bf16.msra.mxu1 %v20749_v26  ;;  %v20793_v26 = vld [vmem:[%s28286_s1 + $0x3b1c] ss:$28 sps:$4 sm:$0xff]  }
 0x4e1   :  { %14190 = vmatpush1.bf16.msra.mxu0 %v20752_v28  ;;  %13929 = vmatprep.subr.bf16.mxu1 %v20757_v40  ;;  %v20796_v28 = vld [vmem:[%s28286_s1 + $0x12e4] ss:$28 sps:$4 sm:$0xff]   ;;  %v20791_v40 = vld [vmem:[%s28286_s1 + $0x3b18] ss:$28 sps:$4 sm:$0xff]  }
 0x4e2   :  { %14200 = vmatprep.subr.bf16.mxu0 %v20760_v8  ;;  %v20794_v8 = vld [vmem:[%s28286_s1 + $0x12e0] ss:$28 sps:$4 sm:$0xff]  }
 0x4e4   :  { %14192 = vmatmul.mubr.bf16.vlgmr.msra.gmra.mrb[4].mxu0 %v22216_v19  ;;  %13930 = vmatpush1.bf16.msra.mxu1 %v20755_v42  ;;  %v20799_v42 = vld [vmem:[%s28286_s1 + $0x3b54] ss:$28 sps:$4 sm:$0xff]  }
 0x4e5   :  { %14201 = vmatpush1.bf16.msra.mxu0 %v20758_v16  ;;  %13931 = vmatprep.subr.bf16.mxu1 %v20763_v9  ;;  %v20802_v16 = vld [vmem:[%s28286_s1 + $0x131c] ss:$28 sps:$4 sm:$0xff]   ;;  %v20797_v9 = vld [vmem:[%s28286_s1 + $0x3b50] ss:$28 sps:$4 sm:$0xff]  }
 0x4e6   :  { %14202 = vmatprep.subr.bf16.mxu0 %v20766_v44  ;;  %14232 = vmatprep.mubr.bf16.mxu0 %v22240_v25  ;;  %v20800_v44 = vld [vmem:[%s28286_s1 + $0x1318] ss:$28 sps:$4 sm:$0xff]  }
 0x4e8   :  { %13932 = vmatpush1.bf16.msra.mxu1 %v20761_v10  ;;  %v20805_v10 = vld [vmem:[%s28286_s1 + $0x3b8c] ss:$28 sps:$4 sm:$0xff]  }
 0x4e9   :  { %14203 = vmatpush1.bf16.msra.mxu0 %v20764_v46  ;;  %13933 = vmatprep.subr.bf16.mxu1 %v20769_v47  ;;  %v20808_v46 = vld [vmem:[%s28286_s1 + $0x1354] ss:$28 sps:$4 sm:$0xff]   ;;  %v20803_v47 = vld [vmem:[%s28286_s1 + $0x3b88] ss:$28 sps:$4 sm:$0xff]  }
 0x4ea   :  { %14204 = vmatprep.subr.bf16.mxu0 %v20772_v50  ;;  %v20806_v50 = vld [vmem:[%s28286_s1 + $0x1350] ss:$28 sps:$4 sm:$0xff]  }
 0x4ec   :  { %13934 = vmatpush1.bf16.msra.mxu1 %v20767_v54  ;;  %v20811_v54 = vld [vmem:[%s28286_s1 + $0x3bc4] ss:$28 sps:$4 sm:$0xff]  }
 0x4ed   :  { %14205 = vmatpush1.bf16.msra.mxu0 %v20770_v55  ;;  %13935 = vmatprep.subr.bf16.mxu1 %v20775_v30  ;;  %v20814_v55 = vld [vmem:[%s28286_s1 + $0x138c] ss:$28 sps:$4 sm:$0xff]   ;;  %v20809_v30 = vld [vmem:[%s28286_s1 + $0x3bc0] ss:$28 sps:$4 sm:$0xff]  }
 0x4ee   :  { %14206 = vmatprep.subr.bf16.mxu0 %v20778_v58  ;;  %v20812_v58 = vld [vmem:[%s28286_s1 + $0x1388] ss:$28 sps:$4 sm:$0xff]  }
 0x4f0   :  { %13936 = vmatpush1.bf16.msra.mxu1 %v20773_v12  ;;  %v20817_v12 = vld [vmem:[%s28286_s1 + $0x3bfc] ss:$28 sps:$4 sm:$0xff]  }
 0x4f1   :  { %14207 = vmatpush1.bf16.msra.mxu0 %v20776_v60  ;;  %13937 = vmatprep.subr.bf16.mxu1 %v20781_v61  ;;  %v20820_v60 = vld [vmem:[%s28286_s1 + $0x13c4] ss:$28 sps:$4 sm:$0xff]   ;;  %v20815_v61 = vld [vmem:[%s28286_s1 + $0x3bf8] ss:$28 sps:$4 sm:$0xff]  }
 0x4f2   :  { %14208 = vmatprep.subr.bf16.mxu0 %v20784_v63  ;;  %v20818_v63 = vld [vmem:[%s28286_s1 + $0x13c0] ss:$28 sps:$4 sm:$0xff]  }
 0x4f4   :  { %13938 = vmatpush1.bf16.msra.mxu1 %v20779_v0  ;;  %v20823_v0 = vld [vmem:[%s28286_s1 + $0x3c34] ss:$28 sps:$4 sm:$0xff]  }
 0x4f5   :  { %14209 = vmatpush1.bf16.msra.mxu0 %v20782_v1  ;;  %13939 = vmatprep.subr.bf16.mxu1 %v20787_v2  ;;  %v20826_v1 = vld [vmem:[%s28286_s1 + $0x13fc] ss:$28 sps:$4 sm:$0xff]   ;;  %v20821_v2 = vld [vmem:[%s28286_s1 + $0x3c30] ss:$28 sps:$4 sm:$0xff]  }
 0x4f6   :  { %14210 = vmatprep.subr.bf16.mxu0 %v20790_v3  ;;  %v20824_v3 = vld [vmem:[%s28286_s1 + $0x13f8] ss:$28 sps:$4 sm:$0xff]  }
 0x4f8   :  { %13940 = vmatpush1.bf16.msra.mxu1 %v20785_v4  ;;  %v20829_v4 = vld [vmem:[%s28286_s1 + $0x3c6c] ss:$28 sps:$4 sm:$0xff]  }
 0x4f9   :  { %14211 = vmatpush1.bf16.msra.mxu0 %v20788_v5  ;;  %13941 = vmatprep.subr.bf16.mxu1 %v20793_v26  ;;  %v20832_v5 = vld [vmem:[%s28286_s1 + $0x1434] ss:$28 sps:$4 sm:$0xff]   ;;  %v20827_v26 = vld [vmem:[%s28286_s1 + $0x3c68] ss:$28 sps:$4 sm:$0xff]  }
 0x4fa   :  { %14212 = vmatprep.subr.bf16.mxu0 %v20796_v28  ;;  %v20830_v28 = vld [vmem:[%s28286_s1 + $0x1430] ss:$28 sps:$4 sm:$0xff]  }
 0x4fc   :  { %13942 = vmatpush1.bf16.msra.mxu1 %v20791_v40  ;;  %v20835_v40 = vld [vmem:[%s28286_s1 + $0x3ca4] ss:$28 sps:$4 sm:$0xff]  }
 0x4fd   :  { %14213 = vmatpush1.bf16.msra.mxu0 %v20794_v8  ;;  %13943 = vmatprep.subr.bf16.mxu1 %v20799_v42  ;;  %v20838_v8 = vld [vmem:[%s28286_s1 + $0x146c] ss:$28 sps:$4 sm:$0xff]   ;;  %v20833_v42 = vld [vmem:[%s28286_s1 + $0x3ca0] ss:$28 sps:$4 sm:$0xff]  }
 0x4fe   :  { %14214 = vmatprep.subr.bf16.mxu0 %v20802_v16  ;;  %v20836_v16 = vld [vmem:[%s28286_s1 + $0x1468] ss:$28 sps:$4 sm:$0xff]  }
 0x500   :  { %13944 = vmatpush1.bf16.msra.mxu1 %v20797_v9  ;;  %v20841_v9 = vld [vmem:[%s28286_s1 + $0x3cdc] ss:$28 sps:$4 sm:$0xff]  }
 0x501   :  { %14215 = vmatpush1.bf16.msra.mxu0 %v20800_v44  ;;  %13954 = vmatprep.subr.bf16.mxu1 %v20805_v10  ;;  %v20844_v44 = vld [vmem:[%s28286_s1 + $0x14a4] ss:$28 sps:$4 sm:$0xff]   ;;  %v20839_v10 = vld [vmem:[%s28286_s1 + $0x3cd8] ss:$28 sps:$4 sm:$0xff]  }
 0x502   :  { %14216 = vmatprep.subr.bf16.mxu0 %v20808_v46  ;;  %v20842_v46 = vld [vmem:[%s28286_s1 + $0x14a0] ss:$28 sps:$4 sm:$0xff]  }
 0x503   :  { %13946 = vmatmul.mubr.bf16.vlgmr.msra.gmra.mrb[4].mxu1 %v24735_v49 }
 0x504   :  { %13955 = vmatpush1.bf16.msra.mxu1 %v20803_v47  ;;  %13986 = vmatprep.mubr.bf16.mxu1 %v21743_v62  ;;  %v20847_v47 = vld [vmem:[%s28286_s1 + $0x3d14] ss:$28 sps:$4 sm:$0xff]  }
 0x505   :  { %14217 = vmatpush1.bf16.msra.mxu0 %v20806_v50  ;;  %13956 = vmatprep.subr.bf16.mxu1 %v20811_v54  ;;  %v20850_v50 = vld [vmem:[%s28286_s1 + $0x14dc] ss:$28 sps:$4 sm:$0xff]   ;;  %v20845_v54 = vld [vmem:[%s28286_s1 + $0x3d10] ss:$28 sps:$4 sm:$0xff]  }
 0x506   :  { %14218 = vmatprep.subr.bf16.mxu0 %v20814_v55  ;;  %v20848_v55 = vld [vmem:[%s28286_s1 + $0x14d8] ss:$28 sps:$4 sm:$0xff]  }
 0x508   :  { %13957 = vmatpush1.bf16.msra.mxu1 %v20809_v30  ;;  %v20853_v30 = vld [vmem:[%s28286_s1 + $0x1514] ss:$28 sps:$4 sm:$0xff]  }
 0x509   :  { %14219 = vmatpush1.bf16.msra.mxu0 %v20812_v58  ;;  %13958 = vmatprep.subr.bf16.mxu1 %v20817_v12  ;;  %v20854_v58 = vld [vmem:[%s28286_s1 + $0x1d8] ss:$28 sps:$4 sm:$0xff]   ;;  %v20851_v12 = vld [vmem:[%s28286_s1 + $0x1510] ss:$28 sps:$4 sm:$0xff]  }
 0x50a   :  { %14220 = vmatprep.subr.bf16.mxu0 %v20820_v60  ;;  %v20855_v60 = vld [vmem:[%s28286_s1 + $0x18] ss:$28 sps:$4 sm:$0xff]  }
 0x50c   :  { %13959 = vmatpush1.bf16.msra.mxu1 %v20815_v61  ;;  %v20858_v61 = vld [vmem:[%s28286_s1 + $0x154c] ss:$28 sps:$4 sm:$0xff]  }
 0x50d   :  { %14221 = vmatpush1.bf16.msra.mxu0 %v20818_v63  ;;  %13960 = vmatprep.subr.bf16.mxu1 %v20823_v0  ;;  %v20859_v63 = vld [vmem:[%s28286_s1 + $0x210] ss:$28 sps:$4 sm:$0xff]   ;;  %v21739_v0 = vld [vmem:[%s28287_s0 + $0x88] ss:$0 sps:$4 sm:$0xff]  }
 0x50e   :  { %14222 = vmatprep.subr.bf16.mxu0 %v20826_v1  ;;  %v20856_v1 = vld [vmem:[%s28286_s1 + $0x1548] ss:$28 sps:$4 sm:$0xff]  }
 0x510   :  { %13961 = vmatpush1.bf16.msra.mxu1 %v20821_v2  ;;  %v20860_v2 = vld [vmem:[%s28286_s1 + $0x50] ss:$28 sps:$4 sm:$0xff]  }
 0x511   :  { %14223 = vmatpush1.bf16.msra.mxu0 %v20824_v3  ;;  %13962 = vmatprep.subr.bf16.mxu1 %v20829_v4  ;;  %v20863_v3 = vld [vmem:[%s28286_s1 + $0x1584] ss:$28 sps:$4 sm:$0xff]  }
 0x512   :  { %14224 = vmatprep.subr.bf16.mxu0 %v20832_v5  ;;  %v20864_v4 = vld [vmem:[%s28286_s1 + $0x248] ss:$28 sps:$4 sm:$0xff]   ;;  %v20861_v5 = vld [vmem:[%s28286_s1 + $0x1580] ss:$28 sps:$4 sm:$0xff]  }
 0x514   :  { %13963 = vmatpush1.bf16.msra.mxu1 %v20827_v26  ;;  %v20865_v26 = vld [vmem:[%s28286_s1 + $0x88] ss:$28 sps:$4 sm:$0xff]  }
 0x515   :  { %14225 = vmatpush1.bf16.msra.mxu0 %v20830_v28  ;;  %13964 = vmatprep.subr.bf16.mxu1 %v20835_v40  ;;  %v20868_v28 = vld [vmem:[%s28286_s1 + $0x15bc] ss:$28 sps:$4 sm:$0xff]  }
 0x516   :  { %14226 = vmatprep.subr.bf16.mxu0 %v20838_v8  ;;  %v20866_v40 = vld [vmem:[%s28286_s1 + $0x15b8] ss:$28 sps:$4 sm:$0xff]   ;;  %v20870_v8 = vld [vmem:[%s28286_s1 + $0xc0] ss:$28 sps:$4 sm:$0xff]  }
 0x518   :  { %13965 = vmatpush1.bf16.msra.mxu1 %v20833_v42  ;;  %v20873_v42 = vld [vmem:[%s28286_s1 + $0x15f4] ss:$28 sps:$4 sm:$0xff]  }
 0x519   :  { %14227 = vmatpush1.bf16.msra.mxu0 %v20836_v16  ;;  %13966 = vmatprep.subr.bf16.mxu1 %v20841_v9  ;;  %v20874_v16 = vld [vmem:[%s28286_s1 + $0x2b8] ss:$28 sps:$4 sm:$0xff]   ;;  %v20871_v9 = vld [vmem:[%s28286_s1 + $0x15f0] ss:$28 sps:$4 sm:$0xff]  }
 0x51a   :  { %14228 = vmatprep.subr.bf16.mxu0 %v20844_v44  ;;  %v20875_v44 = vld [vmem:[%s28286_s1 + $0xf8] ss:$28 sps:$4 sm:$0xff]  }
 0x51c   :  { %13967 = vmatpush1.bf16.msra.mxu1 %v20839_v10  ;;  %v20878_v10 = vld [vmem:[%s28286_s1 + $0x162c] ss:$28 sps:$4 sm:$0xff]  }
 0x51d   :  { %14229 = vmatpush1.bf16.msra.mxu0 %v20842_v46  ;;  %13968 = vmatprep.subr.bf16.mxu1 %v20847_v47  ;;  %v20879_v46 = vld [vmem:[%s28286_s1 + $0x2f0] ss:$28 sps:$4 sm:$0xff]   ;;  %v20876_v47 = vld [vmem:[%s28286_s1 + $0x1628] ss:$28 sps:$4 sm:$0xff]  }
 0x51e   :  { %14230 = vmatprep.subr.bf16.mxu0 %v20850_v50  ;;  %v20880_v50 = vld [vmem:[%s28286_s1 + $0x130] ss:$28 sps:$4 sm:$0xff]  }
 0x520   :  { %13969 = vmatpush1.bf16.msra.mxu1 %v20845_v54  ;;  %v20883_v54 = vld [vmem:[%s28286_s1 + $0x1664] ss:$28 sps:$4 sm:$0xff]  }
 0x521   :  { %14231 = vmatpush1.bf16.msra.mxu0 %v20848_v55  ;;  %18139 = vmatprep.subr.bf16.mxu1 %v20854_v58  ;;  %v20884_v55 = vld [vmem:[%s28286_s1 + $0x328] ss:$28 sps:$4 sm:$0xff]  }
 0x522   :  { %14241 = vmatprep.subr.bf16.mxu0 %v20853_v30  ;;  %v20881_v30 = vld [vmem:[%s28286_s1 + $0x1660] ss:$28 sps:$4 sm:$0xff]   ;;  %v20885_v58 = vld [vmem:[%s28286_s1 + $0x168] ss:$28 sps:$4 sm:$0xff]  }
 0x523   :  { %13987 = vmatmul.mubr.bf16.vlgmr.msra.gmra.mrb[4].mxu1 %v21739_v0  ;;  %v20893_v0 = vld [vmem:[%s28286_s1 + $0x16d4] ss:$28 sps:$4 sm:$0xff]  }
 0x524   :  { %14233 = vmatmul.mubr.bf16.vlgmr.msra.gmra.mrb[4].mxu0 %v22435_v37  ;;  %18140 = vmatpush3.bf16.msra.mxu1 %v20855_v60  ;;  %v20889_v60 = vld [vmem:[%s28286_s1 + $0x360] ss:$28 sps:$4 sm:$0xff]  }
 0x525   :  { %14242 = vmatpush1.bf16.msra.mxu0 %v20851_v12  ;;  %18141 = vmatprep.subr.bf16.mxu1 %v20859_v63  ;;  %v20888_v12 = vld [vmem:[%s28286_s1 + $0x169c] ss:$28 sps:$4 sm:$0xff]  }
 0x526   :  { %14243 = vmatprep.subr.bf16.mxu0 %v20858_v61  ;;  %14765 = vmatprep.mubr.bf16.mxu1 %v21920_v48  ;;  %v20869_v48 = vld [vmem:[%s28286_s1 + $0x280] ss:$28 sps:$4 sm:$0xff]   ;;  %v20886_v61 = vld [vmem:[%s28286_s1 + $0x1698] ss:$28 sps:$4 sm:$0xff]  }
 0x527   :  { %14273 = vmatprep.mubr.bf16.mxu0 %v22453_v41  ;;  %v20890_v63 = vld [vmem:[%s28286_s1 + $0x1a0] ss:$28 sps:$4 sm:$0xff]  }
 0x528   :  { %18142 = vmatpush3.bf16.msra.mxu1 %v20860_v2  ;;  %v20891_v2 = vld [vmem:[%s28286_s1 + $0x16d0] ss:$28 sps:$4 sm:$0xff]  }
 0x529   :  { %14244 = vmatpush1.bf16.msra.mxu0 %v20856_v1  ;;  %18143 = vmatprep.subr.bf16.mxu1 %v20864_v4  ;;  %v20894_v1 = vld [vmem:[%s28286_s1 + $0x558] ss:$28 sps:$4 sm:$0xff]   ;;  %v20898_v4 = vld [vmem:[%s28286_s1 + $0x170c] ss:$28 sps:$4 sm:$0xff]  }
 0x52a   :  { %14245 = vmatprep.subr.bf16.mxu0 %v20863_v3  ;;  %v20895_v3 = vld [vmem:[%s28286_s1 + $0x398] ss:$28 sps:$4 sm:$0xff]  }
 0x52c   :  { %18144 = vmatpush3.bf16.msra.mxu1 %v20865_v26  ;;  %v20896_v26 = vld [vmem:[%s28286_s1 + $0x1708] ss:$28 sps:$4 sm:$0xff]  }
 0x52d   :  { %14246 = vmatpush1.bf16.msra.mxu0 %v20861_v5  ;;  %18145 = vmatprep.subr.bf16.mxu1 %v20869_v48  ;;  %v20899_v5 = vld [vmem:[%s28286_s1 + $0x590] ss:$28 sps:$4 sm:$0xff]   ;;  %v20903_v48 = vld [vmem:[%s28286_s1 + $0x1744] ss:$28 sps:$4 sm:$0xff]  }
 0x52e   :  { %14247 = vmatprep.subr.bf16.mxu0 %v20868_v28  ;;  %v20900_v28 = vld [vmem:[%s28286_s1 + $0x3d0] ss:$28 sps:$4 sm:$0xff]  }
 0x530   :  { %18146 = vmatpush3.bf16.msra.mxu1 %v20870_v8  ;;  %v20905_v8 = vld [vmem:[%s28286_s1 + $0x408] ss:$28 sps:$4 sm:$0xff]  }
 0x531   :  { %14248 = vmatpush1.bf16.msra.mxu0 %v20866_v40  ;;  %18147 = vmatprep.subr.bf16.mxu1 %v20874_v16  ;;  %v20901_v40 = vld [vmem:[%s28286_s1 + $0x1740] ss:$28 sps:$4 sm:$0xff]   ;;  %v20906_v16 = vld [vmem:[%s28286_s1 + $0x1778] ss:$28 sps:$4 sm:$0xff]  }
 0x532   :  { %14249 = vmatprep.subr.bf16.mxu0 %v20873_v42  ;;  %v20908_v42 = vld [vmem:[%s28286_s1 + $0x177c] ss:$28 sps:$4 sm:$0xff]  }
 0x534   :  { %18148 = vmatpush3.bf16.msra.mxu1 %v20875_v44  ;;  %v20913_v44 = vld [vmem:[%s28286_s1 + $0x17b4] ss:$28 sps:$4 sm:$0xff]  }
 0x535   :  { %14250 = vmatpush1.bf16.msra.mxu0 %v20871_v9  ;;  %18149 = vmatprep.subr.bf16.mxu1 %v20879_v46  ;;  %v20910_v9 = vld [vmem:[%s28286_s1 + $0x440] ss:$28 sps:$4 sm:$0xff]   ;;  %v20911_v46 = vld [vmem:[%s28286_s1 + $0x17b0] ss:$28 sps:$4 sm:$0xff]  }
 0x536   :  { %14251 = vmatprep.subr.bf16.mxu0 %v20878_v10  ;;  %v20914_v10 = vld [vmem:[%s28286_s1 + $0x638] ss:$28 sps:$4 sm:$0xff]  }
 0x538   :  { %18150 = vmatpush3.bf16.msra.mxu1 %v20880_v50  ;;  %v20918_v50 = vld [vmem:[%s28286_s1 + $0x17ec] ss:$28 sps:$4 sm:$0xff]  }
 0x539   :  { %14252 = vmatpush1.bf16.msra.mxu0 %v20876_v47  ;;  %18151 = vmatprep.subr.bf16.mxu1 %v20884_v55  ;;  %v20915_v47 = vld [vmem:[%s28286_s1 + $0x478] ss:$28 sps:$4 sm:$0xff]   ;;  %v20916_v55 = vld [vmem:[%s28286_s1 + $0x17e8] ss:$28 sps:$4 sm:$0xff]  }
 0x53a   :  { %14253 = vmatprep.subr.bf16.mxu0 %v20883_v54  ;;  %v20919_v54 = vld [vmem:[%s28286_s1 + $0x670] ss:$28 sps:$4 sm:$0xff]  }
 0x53c   :  { %18152 = vmatpush3.bf16.msra.mxu1 %v20885_v58  ;;  %v20923_v58 = vld [vmem:[%s28286_s1 + $0x1824] ss:$28 sps:$4 sm:$0xff]  }
 0x53d   :  { %14254 = vmatpush1.bf16.msra.mxu0 %v20881_v30  ;;  %18153 = vmatprep.subr.bf16.mxu1 %v20889_v60  ;;  %v20920_v30 = vld [vmem:[%s28286_s1 + $0x4b0] ss:$28 sps:$4 sm:$0xff]   ;;  %v20921_v60 = vld [vmem:[%s28286_s1 + $0x1820] ss:$28 sps:$4 sm:$0xff]  }
 0x53e   :  { %14255 = vmatprep.subr.bf16.mxu0 %v20888_v12  ;;  %v20924_v12 = vld [vmem:[%s28286_s1 + $0x6a8] ss:$28 sps:$4 sm:$0xff]  }
 0x540   :  { %18154 = vmatpush3.bf16.msra.mxu1 %v20890_v63  ;;  %v20928_v63 = vld [vmem:[%s28286_s1 + $0x185c] ss:$28 sps:$4 sm:$0xff]  }
 0x541   :  { %14256 = vmatpush1.bf16.msra.mxu0 %v20886_v61  ;;  %18161 = vmatprep.subr.bf16.mxu1 %v20894_v1  ;;  %v20925_v61 = vld [vmem:[%s28286_s1 + $0x4e8] ss:$28 sps:$4 sm:$0xff]   ;;  %v20926_v1 = vld [vmem:[%s28286_s1 + $0x1858] ss:$28 sps:$4 sm:$0xff]  }
 0x542   :  { %14257 = vmatprep.subr.bf16.mxu0 %v20893_v0  ;;  %v20929_v0 = vld [vmem:[%s28286_s1 + $0x6e0] ss:$28 sps:$4 sm:$0xff]  }
 0x543   :  { %14766 = vmatmul.mubr.bf16.vlgmr.msra.gmra.mrb[8].mxu1 %v21986_v6  ;;  %v20904_v6 = vld [vmem:[%s28286_s1 + $0x5c8] ss:$28 sps:$4 sm:$0xff]  }
 0x544   :  { %18162 = vmatpush3.bf16.msra.mxu1 %v20895_v3  ;;  %14805 = vmatprep.mubr.bf16.mxu1 %v22077_v35  ;;  %v20909_v35 = vld [vmem:[%s28286_s1 + $0x600] ss:$28 sps:$4 sm:$0xff]   ;;  %v20933_v3 = vld [vmem:[%s28286_s1 + $0x1894] ss:$28 sps:$4 sm:$0xff]  }
 0x545   :  { %14258 = vmatpush1.bf16.msra.mxu0 %v20891_v2  ;;  %18163 = vmatprep.subr.bf16.mxu1 %v20899_v5  ;;  %v20930_v2 = vld [vmem:[%s28286_s1 + $0x520] ss:$28 sps:$4 sm:$0xff]   ;;  %v20931_v5 = vld [vmem:[%s28286_s1 + $0x1890] ss:$28 sps:$4 sm:$0xff]  }
 0x546   :  { %14259 = vmatprep.subr.bf16.mxu0 %v20898_v4  ;;  %v20934_v4 = vld [vmem:[%s28286_s1 + $0x8d8] ss:$28 sps:$4 sm:$0xff]  }
 0x548   :  { %18164 = vmatpush3.bf16.msra.mxu1 %v20900_v28  ;;  %v20938_v28 = vld [vmem:[%s28286_s1 + $0x18cc] ss:$28 sps:$4 sm:$0xff]  }
 0x549   :  { %14260 = vmatpush1.bf16.msra.mxu0 %v20896_v26  ;;  %18165 = vmatprep.subr.bf16.mxu1 %v20904_v6  ;;  %v20935_v26 = vld [vmem:[%s28286_s1 + $0x718] ss:$28 sps:$4 sm:$0xff]   ;;  %v20936_v6 = vld [vmem:[%s28286_s1 + $0x18c8] ss:$28 sps:$4 sm:$0xff]  }
 0x54a   :  { %14261 = vmatprep.subr.bf16.mxu0 %v20903_v48  ;;  %v20939_v48 = vld [vmem:[%s28286_s1 + $0x910] ss:$28 sps:$4 sm:$0xff]  }
 0x54c   :  { %18166 = vmatpush3.bf16.msra.mxu1 %v20905_v8  ;;  %v20943_v8 = vld [vmem:[%s28286_s1 + $0x1904] ss:$28 sps:$4 sm:$0xff]  }
 0x54d   :  { %14262 = vmatpush1.bf16.msra.mxu0 %v20901_v40  ;;  %18167 = vmatprep.subr.bf16.mxu1 %v20909_v35  ;;  %v20940_v40 = vld [vmem:[%s28286_s1 + $0x750] ss:$28 sps:$4 sm:$0xff]   ;;  %v20945_v35 = vld [vmem:[%s28286_s1 + $0x788] ss:$28 sps:$4 sm:$0xff]  }
 0x54e   :  { %14263 = vmatprep.subr.bf16.mxu0 %v20908_v42  ;;  %v20941_v42 = vld [vmem:[%s28286_s1 + $0x1900] ss:$28 sps:$4 sm:$0xff]  }
 0x550   :  { %18168 = vmatpush3.bf16.msra.mxu1 %v20910_v9  ;;  %v20946_v9 = vld [vmem:[%s28286_s1 + $0x1938] ss:$28 sps:$4 sm:$0xff]  }
 0x551   :  { %14264 = vmatpush1.bf16.msra.mxu0 %v20906_v16  ;;  %18169 = vmatprep.subr.bf16.mxu1 %v20914_v10  ;;  %v20948_v16 = vld [vmem:[%s28286_s1 + $0x193c] ss:$28 sps:$4 sm:$0xff]   ;;  %v20953_v10 = vld [vmem:[%s28286_s1 + $0x1974] ss:$28 sps:$4 sm:$0xff]  }
 0x552   :  { %14265 = vmatprep.subr.bf16.mxu0 %v20913_v44  ;;  %v20950_v44 = vld [vmem:[%s28286_s1 + $0x7c0] ss:$28 sps:$4 sm:$0xff]  }
 0x554   :  { %18170 = vmatpush3.bf16.msra.mxu1 %v20915_v47  ;;  %v20951_v47 = vld [vmem:[%s28286_s1 + $0x1970] ss:$28 sps:$4 sm:$0xff]  }
 0x555   :  { %14266 = vmatpush1.bf16.msra.mxu0 %v20911_v46  ;;  %18171 = vmatprep.subr.bf16.mxu1 %v20919_v54  ;;  %v20954_v46 = vld [vmem:[%s28286_s1 + $0x9b8] ss:$28 sps:$4 sm:$0xff]   ;;  %v20958_v54 = vld [vmem:[%s28286_s1 + $0x19ac] ss:$28 sps:$4 sm:$0xff]  }
 0x556   :  { %14267 = vmatprep.subr.bf16.mxu0 %v20918_v50  ;;  %v20955_v50 = vld [vmem:[%s28286_s1 + $0x7f8] ss:$28 sps:$4 sm:$0xff]  }
 0x558   :  { %18172 = vmatpush3.bf16.msra.mxu1 %v20920_v30  ;;  %v20956_v30 = vld [vmem:[%s28286_s1 + $0x19a8] ss:$28 sps:$4 sm:$0xff]  }
 0x559   :  { %14268 = vmatpush1.bf16.msra.mxu0 %v20916_v55  ;;  %18173 = vmatprep.subr.bf16.mxu1 %v20924_v12  ;;  %v20959_v55 = vld [vmem:[%s28286_s1 + $0x9f0] ss:$28 sps:$4 sm:$0xff]   ;;  %v20963_v12 = vld [vmem:[%s28286_s1 + $0x19e4] ss:$28 sps:$4 sm:$0xff]  }
 0x55a   :  { %14269 = vmatprep.subr.bf16.mxu0 %v20923_v58  ;;  %v20960_v58 = vld [vmem:[%s28286_s1 + $0x830] ss:$28 sps:$4 sm:$0xff]  }
 0x55c   :  { %18174 = vmatpush3.bf16.msra.mxu1 %v20925_v61  ;;  %v20961_v61 = vld [vmem:[%s28286_s1 + $0x19e0] ss:$28 sps:$4 sm:$0xff]  }
 0x55d   :  { %14270 = vmatpush1.bf16.msra.mxu0 %v20921_v60  ;;  %18175 = vmatprep.subr.bf16.mxu1 %v20929_v0  ;;  %v20964_v60 = vld [vmem:[%s28286_s1 + $0xa28] ss:$28 sps:$4 sm:$0xff]   ;;  %v20968_v0 = vld [vmem:[%s28286_s1 + $0x1a1c] ss:$28 sps:$4 sm:$0xff]  }
 0x55e   :  { %14271 = vmatprep.subr.bf16.mxu0 %v20928_v63  ;;  %v20965_v63 = vld [vmem:[%s28286_s1 + $0x868] ss:$28 sps:$4 sm:$0xff]  }
 0x560   :  { %18176 = vmatpush3.bf16.msra.mxu1 %v20930_v2  ;;  %v20966_v2 = vld [vmem:[%s28286_s1 + $0x1a18] ss:$28 sps:$4 sm:$0xff]  }
 0x561   :  { %14272 = vmatpush1.bf16.msra.mxu0 %v20926_v1  ;;  %18183 = vmatprep.subr.bf16.mxu1 %v20934_v4  ;;  %v20969_v1 = vld [vmem:[%s28286_s1 + $0xa60] ss:$28 sps:$4 sm:$0xff]   ;;  %v20973_v4 = vld [vmem:[%s28286_s1 + $0x1a54] ss:$28 sps:$4 sm:$0xff]  }
 0x562   :  { %14282 = vmatprep.subr.bf16.mxu0 %v20933_v3  ;;  %v20970_v3 = vld [vmem:[%s28286_s1 + $0x8a0] ss:$28 sps:$4 sm:$0xff]  }
 0x563   :  { %14806 = vmatmul.mubr.bf16.vlgmr.msra.gmra.mrb[12].mxu1 %v22212_v18  ;;  %v20944_v18 = vld [vmem:[%s28286_s1 + $0x948] ss:$28 sps:$4 sm:$0xff]  }
 0x564   :  { %14274 = vmatmul.mubr.bf16.vlgmr.msra.gmra.mrb[4].mxu0 %v22647_v56  ;;  %18184 = vmatpush3.bf16.msra.mxu1 %v20935_v26  ;;  %v20971_v26 = vld [vmem:[%s28286_s1 + $0x1a50] ss:$28 sps:$4 sm:$0xff]  }
 0x565   :  { %14283 = vmatpush1.bf16.msra.mxu0 %v20931_v5  ;;  %18185 = vmatprep.subr.bf16.mxu1 %v20939_v48  ;;  %v20974_v5 = vld [vmem:[%s28286_s1 + $0xc58] ss:$28 sps:$4 sm:$0xff]   ;;  %v20978_v48 = vld [vmem:[%s28286_s1 + $0x1a8c] ss:$28 sps:$4 sm:$0xff]  }
 0x566   :  { %14284 = vmatprep.subr.bf16.mxu0 %v20938_v28  ;;  %14845 = vmatprep.mubr.bf16.mxu1 %v22236_v24  ;;  %v20949_v24 = vld [vmem:[%s28286_s1 + $0x980] ss:$28 sps:$4 sm:$0xff]   ;;  %v20975_v28 = vld [vmem:[%s28286_s1 + $0xa98] ss:$28 sps:$4 sm:$0xff]  }
 0x567   :  { %14314 = vmatprep.mubr.bf16.mxu0 %v22662_v39 }
 0x568   :  { %18186 = vmatpush3.bf16.msra.mxu1 %v20940_v40  ;;  %v20976_v40 = vld [vmem:[%s28286_s1 + $0x1a88] ss:$28 sps:$4 sm:$0xff]  }
 0x569   :  { %14285 = vmatpush1.bf16.msra.mxu0 %v20936_v6  ;;  %18187 = vmatprep.subr.bf16.mxu1 %v20944_v18  ;;  %v20979_v6 = vld [vmem:[%s28286_s1 + $0xc90] ss:$28 sps:$4 sm:$0xff]   ;;  %v20983_v18 = vld [vmem:[%s28286_s1 + $0x1ac4] ss:$28 sps:$4 sm:$0xff]  }
 0x56a   :  { %14286 = vmatprep.subr.bf16.mxu0 %v20943_v8  ;;  %v20980_v8 = vld [vmem:[%s28286_s1 + $0xad0] ss:$28 sps:$4 sm:$0xff]  }
 0x56c   :  { %18188 = vmatpush3.bf16.msra.mxu1 %v20945_v35  ;;  %v20985_v35 = vld [vmem:[%s28286_s1 + $0xb08] ss:$28 sps:$4 sm:$0xff]  }
 0x56d   :  { %14287 = vmatpush1.bf16.msra.mxu0 %v20941_v42  ;;  %18189 = vmatprep.subr.bf16.mxu1 %v20949_v24  ;;  %v20981_v42 = vld [vmem:[%s28286_s1 + $0x1ac0] ss:$28 sps:$4 sm:$0xff]   ;;  %v20986_v24 = vld [vmem:[%s28286_s1 + $0x1af8] ss:$28 sps:$4 sm:$0xff]  }
 0x56e   :  { %14288 = vmatprep.subr.bf16.mxu0 %v20948_v16  ;;  %v20988_v16 = vld [vmem:[%s28286_s1 + $0x1afc] ss:$28 sps:$4 sm:$0xff]  }
 0x570   :  { %18190 = vmatpush3.bf16.msra.mxu1 %v20950_v44  ;;  %v20993_v44 = vld [vmem:[%s28286_s1 + $0x1b34] ss:$28 sps:$4 sm:$0xff]  }
 0x571   :  { %14289 = vmatpush1.bf16.msra.mxu0 %v20946_v9  ;;  %18191 = vmatprep.subr.bf16.mxu1 %v20954_v46  ;;  %v20990_v9 = vld [vmem:[%s28286_s1 + $0xb40] ss:$28 sps:$4 sm:$0xff]   ;;  %v20991_v46 = vld [vmem:[%s28286_s1 + $0x1b30] ss:$28 sps:$4 sm:$0xff]  }
 0x572   :  { %14290 = vmatprep.subr.bf16.mxu0 %v20953_v10  ;;  %v20994_v10 = vld [vmem:[%s28286_s1 + $0xd38] ss:$28 sps:$4 sm:$0xff]  }
 0x574   :  { %18192 = vmatpush3.bf16.msra.mxu1 %v20955_v50  ;;  %v20998_v50 = vld [vmem:[%s28286_s1 + $0x1b6c] ss:$28 sps:$4 sm:$0xff]  }
 0x575   :  { %14291 = vmatpush1.bf16.msra.mxu0 %v20951_v47  ;;  %18193 = vmatprep.subr.bf16.mxu1 %v20959_v55  ;;  %v20995_v47 = vld [vmem:[%s28286_s1 + $0xb78] ss:$28 sps:$4 sm:$0xff]   ;;  %v20996_v55 = vld [vmem:[%s28286_s1 + $0x1b68] ss:$28 sps:$4 sm:$0xff]  }
 0x576   :  { %14292 = vmatprep.subr.bf16.mxu0 %v20958_v54  ;;  %v20999_v54 = vld [vmem:[%s28286_s1 + $0xd70] ss:$28 sps:$4 sm:$0xff]  }
 0x578   :  { %18194 = vmatpush3.bf16.msra.mxu1 %v20960_v58  ;;  %v21003_v58 = vld [vmem:[%s28286_s1 + $0x1ba4] ss:$28 sps:$4 sm:$0xff]  }
 0x579   :  { %14293 = vmatpush1.bf16.msra.mxu0 %v20956_v30  ;;  %18195 = vmatprep.subr.bf16.mxu1 %v20964_v60  ;;  %v21000_v30 = vld [vmem:[%s28286_s1 + $0xbb0] ss:$28 sps:$4 sm:$0xff]   ;;  %v21001_v60 = vld [vmem:[%s28286_s1 + $0x1ba0] ss:$28 sps:$4 sm:$0xff]  }
 0x57a   :  { %14294 = vmatprep.subr.bf16.mxu0 %v20963_v12  ;;  %v21004_v12 = vld [vmem:[%s28286_s1 + $0xda8] ss:$28 sps:$4 sm:$0xff]  }
 0x57c   :  { %18196 = vmatpush3.bf16.msra.mxu1 %v20965_v63  ;;  %v21008_v63 = vld [vmem:[%s28286_s1 + $0x1bdc] ss:$28 sps:$4 sm:$0xff]  }
 0x57d   :  { %14295 = vmatpush1.bf16.msra.mxu0 %v20961_v61  ;;  %18197 = vmatprep.subr.bf16.mxu1 %v20969_v1  ;;  %v21005_v61 = vld [vmem:[%s28286_s1 + $0xbe8] ss:$28 sps:$4 sm:$0xff]   ;;  %v21006_v1 = vld [vmem:[%s28286_s1 + $0x1bd8] ss:$28 sps:$4 sm:$0xff]  }
 0x57e   :  { %14296 = vmatprep.subr.bf16.mxu0 %v20968_v0  ;;  %v21009_v0 = vld [vmem:[%s28286_s1 + $0xde0] ss:$28 sps:$4 sm:$0xff]  }
 0x580   :  { %18198 = vmatpush3.bf16.msra.mxu1 %v20970_v3  ;;  %v21013_v3 = vld [vmem:[%s28286_s1 + $0x1c14] ss:$28 sps:$4 sm:$0xff]  }
 0x581   :  { %14297 = vmatpush1.bf16.msra.mxu0 %v20966_v2  ;;  %18205 = vmatprep.subr.bf16.mxu1 %v20974_v5  ;;  %v21010_v2 = vld [vmem:[%s28286_s1 + $0xc20] ss:$28 sps:$4 sm:$0xff]   ;;  %v21011_v5 = vld [vmem:[%s28286_s1 + $0x1c10] ss:$28 sps:$4 sm:$0xff]  }
 0x582   :  { %14298 = vmatprep.subr.bf16.mxu0 %v20973_v4  ;;  %v21014_v4 = vld [vmem:[%s28286_s1 + $0xfd8] ss:$28 sps:$4 sm:$0xff]  }
 0x583   :  { %14846 = vmatmul.mubr.bf16.vlgmr.msra.gmra.mrb[16].mxu1 %v22431_v36  ;;  %v20984_v36 = vld [vmem:[%s28286_s1 + $0xcc8] ss:$28 sps:$4 sm:$0xff]  }
 0x584   :  { %18206 = vmatpush3.bf16.msra.mxu1 %v20975_v28  ;;  %14885 = vmatprep.mubr.bf16.mxu1 %v21934_v53  ;;  %v20989_v53 = vld [vmem:[%s28286_s1 + $0xd00] ss:$28 sps:$4 sm:$0xff]   ;;  %v21018_v28 = vld [vmem:[%s28286_s1 + $0x1c4c] ss:$28 sps:$4 sm:$0xff]  }
 0x585   :  { %14299 = vmatpush1.bf16.msra.mxu0 %v20971_v26  ;;  %18207 = vmatprep.subr.bf16.mxu1 %v20979_v6  ;;  %v21015_v26 = vld [vmem:[%s28286_s1 + $0xe18] ss:$28 sps:$4 sm:$0xff]   ;;  %v21016_v6 = vld [vmem:[%s28286_s1 + $0x1c48] ss:$28 sps:$4 sm:$0xff]  }
 0x586   :  { %14300 = vmatprep.subr.bf16.mxu0 %v20978_v48  ;;  %v21019_v48 = vld [vmem:[%s28286_s1 + $0x1010] ss:$28 sps:$4 sm:$0xff]  }
 0x588   :  { %18208 = vmatpush3.bf16.msra.mxu1 %v20980_v8  ;;  %v21023_v8 = vld [vmem:[%s28286_s1 + $0x1c84] ss:$28 sps:$4 sm:$0xff]  }
 0x589   :  { %14301 = vmatpush1.bf16.msra.mxu0 %v20976_v40  ;;  %18209 = vmatprep.subr.bf16.mxu1 %v20984_v36  ;;  %v21020_v40 = vld [vmem:[%s28286_s1 + $0xe50] ss:$28 sps:$4 sm:$0xff]   ;;  %v21025_v36 = vld [vmem:[%s28286_s1 + $0xe88] ss:$28 sps:$4 sm:$0xff]  }
 0x58a   :  { %14302 = vmatprep.subr.bf16.mxu0 %v20983_v18  ;;  %v21021_v18 = vld [vmem:[%s28286_s1 + $0x1c80] ss:$28 sps:$4 sm:$0xff]  }
 0x58c   :  { %18210 = vmatpush3.bf16.msra.mxu1 %v20985_v35  ;;  %v21026_v35 = vld [vmem:[%s28286_s1 + $0x1cb8] ss:$28 sps:$4 sm:$0xff]  }
 0x58d   :  { %14303 = vmatpush1.bf16.msra.mxu0 %v20981_v42  ;;  %18211 = vmatprep.subr.bf16.mxu1 %v20989_v53  ;;  %v21028_v42 = vld [vmem:[%s28286_s1 + $0x1cbc] ss:$28 sps:$4 sm:$0xff]   ;;  %v21033_v53 = vld [vmem:[%s28286_s1 + $0x1cf4] ss:$28 sps:$4 sm:$0xff]  }
 0x58e   :  { %14304 = vmatprep.subr.bf16.mxu0 %v20988_v16  ;;  %v21030_v16 = vld [vmem:[%s28286_s1 + $0xec0] ss:$28 sps:$4 sm:$0xff]  }
 0x590   :  { %18212 = vmatpush3.bf16.msra.mxu1 %v20990_v9  ;;  %v21031_v9 = vld [vmem:[%s28286_s1 + $0x1cf0] ss:$28 sps:$4 sm:$0xff]  }
 0x591   :  { %14305 = vmatpush1.bf16.msra.mxu0 %v20986_v24  ;;  %18213 = vmatprep.subr.bf16.mxu1 %v20994_v10  ;;  %v21034_v24 = vld [vmem:[%s28286_s1 + $0x10b8] ss:$28 sps:$4 sm:$0xff]   ;;  %v21038_v10 = vld [vmem:[%s28286_s1 + $0x1d2c] ss:$28 sps:$4 sm:$0xff]  }
 0x592   :  { %14306 = vmatprep.subr.bf16.mxu0 %v20993_v44  ;;  %v21035_v44 = vld [vmem:[%s28286_s1 + $0xef8] ss:$28 sps:$4 sm:$0xff]  }
 0x594   :  { %18214 = vmatpush3.bf16.msra.mxu1 %v20995_v47  ;;  %v21036_v47 = vld [vmem:[%s28286_s1 + $0x1d28] ss:$28 sps:$4 sm:$0xff]  }
 0x595   :  { %14307 = vmatpush1.bf16.msra.mxu0 %v20991_v46  ;;  %18215 = vmatprep.subr.bf16.mxu1 %v20999_v54  ;;  %v21039_v46 = vld [vmem:[%s28286_s1 + $0x10f0] ss:$28 sps:$4 sm:$0xff]   ;;  %v21043_v54 = vld [vmem:[%s28286_s1 + $0x1d64] ss:$28 sps:$4 sm:$0xff]  }
 0x596   :  { %14308 = vmatprep.subr.bf16.mxu0 %v20998_v50  ;;  %v21040_v50 = vld [vmem:[%s28286_s1 + $0xf30] ss:$28 sps:$4 sm:$0xff]  }
 0x598   :  { %18216 = vmatpush3.bf16.msra.mxu1 %v21000_v30  ;;  %v21041_v30 = vld [vmem:[%s28286_s1 + $0x1d60] ss:$28 sps:$4 sm:$0xff]  }
 0x599   :  { %14309 = vmatpush1.bf16.msra.mxu0 %v20996_v55  ;;  %18217 = vmatprep.subr.bf16.mxu1 %v21004_v12  ;;  %v21044_v55 = vld [vmem:[%s28286_s1 + $0x1128] ss:$28 sps:$4 sm:$0xff]   ;;  %v21048_v12 = vld [vmem:[%s28286_s1 + $0x1d9c] ss:$28 sps:$4 sm:$0xff]  }
 0x59a   :  { %14310 = vmatprep.subr.bf16.mxu0 %v21003_v58  ;;  %v21045_v58 = vld [vmem:[%s28286_s1 + $0xf68] ss:$28 sps:$4 sm:$0xff]  }
 0x59c   :  { %18218 = vmatpush3.bf16.msra.mxu1 %v21005_v61  ;;  %v21046_v61 = vld [vmem:[%s28286_s1 + $0x1d98] ss:$28 sps:$4 sm:$0xff]  }
 0x59d   :  { %14311 = vmatpush1.bf16.msra.mxu0 %v21001_v60  ;;  %18219 = vmatprep.subr.bf16.mxu1 %v21009_v0  ;;  %v21049_v60 = vld [vmem:[%s28286_s1 + $0x1160] ss:$28 sps:$4 sm:$0xff]   ;;  %v21053_v0 = vld [vmem:[%s28286_s1 + $0x1dd4] ss:$28 sps:$4 sm:$0xff]  }
 0x59e   :  { %14312 = vmatprep.subr.bf16.mxu0 %v21008_v63  ;;  %v21050_v63 = vld [vmem:[%s28286_s1 + $0xfa0] ss:$28 sps:$4 sm:$0xff]  }
 0x5a0   :  { %18220 = vmatpush3.bf16.msra.mxu1 %v21010_v2  ;;  %v21051_v2 = vld [vmem:[%s28286_s1 + $0x1dd0] ss:$28 sps:$4 sm:$0xff]  }
 0x5a1   :  { %14313 = vmatpush1.bf16.msra.mxu0 %v21006_v1  ;;  %18227 = vmatprep.subr.bf16.mxu1 %v21014_v4  ;;  %v21054_v1 = vld [vmem:[%s28286_s1 + $0x1358] ss:$28 sps:$4 sm:$0xff]   ;;  %v21058_v4 = vld [vmem:[%s28286_s1 + $0x1e0c] ss:$28 sps:$4 sm:$0xff]  }
 0x5a2   :  { %14323 = vmatprep.subr.bf16.mxu0 %v21013_v3  ;;  %v21055_v3 = vld [vmem:[%s28286_s1 + $0x1198] ss:$28 sps:$4 sm:$0xff]  }
 0x5a3   :  { %14886 = vmatmul.mubr.bf16.vlgmr.msra.gmra.mrb[20].mxu1 %v21988_v7  ;;  %v21024_v7 = vld [vmem:[%s28286_s1 + $0x1048] ss:$28 sps:$4 sm:$0xff]  }
 0x5a4   :  { %14315 = vmatmul.mubr.bf16.vlgmr.msra.gmra.mrb[4].mxu0 %v22855_v11  ;;  %18228 = vmatpush3.bf16.msra.mxu1 %v21015_v26  ;;  %v21056_v26 = vld [vmem:[%s28286_s1 + $0x1e08] ss:$28 sps:$4 sm:$0xff]  }
 0x5a5   :  { %14324 = vmatpush1.bf16.msra.mxu0 %v21011_v5  ;;  %18229 = vmatprep.subr.bf16.mxu1 %v21019_v48  ;;  %v21059_v5 = vld [vmem:[%s28286_s1 + $0x1390] ss:$28 sps:$4 sm:$0xff]   ;;  %v21063_v48 = vld [vmem:[%s28286_s1 + $0x1e44] ss:$28 sps:$4 sm:$0xff]  }
 0x5a6   :  { %14325 = vmatprep.subr.bf16.mxu0 %v21018_v28  ;;  %14925 = vmatprep.mubr.bf16.mxu1 %v22089_v38  ;;  %v21029_v38 = vld [vmem:[%s28286_s1 + $0x1080] ss:$28 sps:$4 sm:$0xff]   ;;  %v21060_v28 = vld [vmem:[%s28286_s1 + $0x11d0] ss:$28 sps:$4 sm:$0xff]  }
 0x5a7   :  { %14355 = vmatprep.mubr.bf16.mxu0 %v22871_v15 }
 0x5a8   :  { %18230 = vmatpush3.bf16.msra.mxu1 %v21020_v40  ;;  %v21065_v40 = vld [vmem:[%s28286_s1 + $0x1208] ss:$28 sps:$4 sm:$0xff]  }
 0x5a9   :  { %14326 = vmatpush1.bf16.msra.mxu0 %v21016_v6  ;;  %18231 = vmatprep.subr.bf16.mxu1 %v21024_v7  ;;  %v21061_v6 = vld [vmem:[%s28286_s1 + $0x1e40] ss:$28 sps:$4 sm:$0xff]   ;;  %v21066_v7 = vld [vmem:[%s28286_s1 + $0x1e78] ss:$28 sps:$4 sm:$0xff]  }
 0x5aa   :  { %14327 = vmatprep.subr.bf16.mxu0 %v21023_v8  ;;  %v21068_v8 = vld [vmem:[%s28286_s1 + $0x1e7c] ss:$28 sps:$4 sm:$0xff]  }
 0x5ac   :  { %18232 = vmatpush3.bf16.msra.mxu1 %v21025_v36  ;;  %v21073_v36 = vld [vmem:[%s28286_s1 + $0x1eb4] ss:$28 sps:$4 sm:$0xff]  }
 0x5ad   :  { %14328 = vmatpush1.bf16.msra.mxu0 %v21021_v18  ;;  %18233 = vmatprep.subr.bf16.mxu1 %v21029_v38  ;;  %v21070_v18 = vld [vmem:[%s28286_s1 + $0x1240] ss:$28 sps:$4 sm:$0xff]   ;;  %v21071_v38 = vld [vmem:[%s28286_s1 + $0x1eb0] ss:$28 sps:$4 sm:$0xff]  }
 0x5ae   :  { %14329 = vmatprep.subr.bf16.mxu0 %v21028_v42  ;;  %v21074_v42 = vld [vmem:[%s28286_s1 + $0x1438] ss:$28 sps:$4 sm:$0xff]  }
 0x5b0   :  { %18234 = vmatpush3.bf16.msra.mxu1 %v21030_v16  ;;  %v21078_v16 = vld [vmem:[%s28286_s1 + $0x1eec] ss:$28 sps:$4 sm:$0xff]  }
 0x5b1   :  { %14330 = vmatpush1.bf16.msra.mxu0 %v21026_v35  ;;  %18235 = vmatprep.subr.bf16.mxu1 %v21034_v24  ;;  %v21075_v35 = vld [vmem:[%s28286_s1 + $0x1278] ss:$28 sps:$4 sm:$0xff]   ;;  %v21076_v24 = vld [vmem:[%s28286_s1 + $0x1ee8] ss:$28 sps:$4 sm:$0xff]  }
 0x5b2   :  { %14331 = vmatprep.subr.bf16.mxu0 %v21033_v53  ;;  %v21079_v53 = vld [vmem:[%s28286_s1 + $0x1470] ss:$28 sps:$4 sm:$0xff]  }
 0x5b4   :  { %18236 = vmatpush3.bf16.msra.mxu1 %v21035_v44  ;;  %v21083_v44 = vld [vmem:[%s28286_s1 + $0x1f24] ss:$28 sps:$4 sm:$0xff]  }
 0x5b5   :  { %14332 = vmatpush1.bf16.msra.mxu0 %v21031_v9  ;;  %18237 = vmatprep.subr.bf16.mxu1 %v21039_v46  ;;  %v21080_v9 = vld [vmem:[%s28286_s1 + $0x12b0] ss:$28 sps:$4 sm:$0xff]   ;;  %v21081_v46 = vld [vmem:[%s28286_s1 + $0x1f20] ss:$28 sps:$4 sm:$0xff]  }
 0x5b6   :  { %14333 = vmatprep.subr.bf16.mxu0 %v21038_v10  ;;  %v21084_v10 = vld [vmem:[%s28286_s1 + $0x14a8] ss:$28 sps:$4 sm:$0xff]  }
 0x5b8   :  { %18238 = vmatpush3.bf16.msra.mxu1 %v21040_v50  ;;  %v21088_v50 = vld [vmem:[%s28286_s1 + $0x1f5c] ss:$28 sps:$4 sm:$0xff]  }
 0x5b9   :  { %14334 = vmatpush1.bf16.msra.mxu0 %v21036_v47  ;;  %18239 = vmatprep.subr.bf16.mxu1 %v21044_v55  ;;  %v21085_v47 = vld [vmem:[%s28286_s1 + $0x12e8] ss:$28 sps:$4 sm:$0xff]   ;;  %v21086_v55 = vld [vmem:[%s28286_s1 + $0x1f58] ss:$28 sps:$4 sm:$0xff]  }
 0x5ba   :  { %14335 = vmatprep.subr.bf16.mxu0 %v21043_v54  ;;  %v21089_v54 = vld [vmem:[%s28286_s1 + $0x14e0] ss:$28 sps:$4 sm:$0xff]  }
 0x5bc   :  { %18240 = vmatpush3.bf16.msra.mxu1 %v21045_v58  ;;  %v21093_v58 = vld [vmem:[%s28286_s1 + $0x1f94] ss:$28 sps:$4 sm:$0xff]  }
 0x5bd   :  { %14336 = vmatpush1.bf16.msra.mxu0 %v21041_v30  ;;  %18241 = vmatprep.subr.bf16.mxu1 %v21049_v60  ;;  %v21090_v30 = vld [vmem:[%s28286_s1 + $0x1320] ss:$28 sps:$4 sm:$0xff]   ;;  %v21091_v60 = vld [vmem:[%s28286_s1 + $0x1f90] ss:$28 sps:$4 sm:$0xff]  }
 0x5be   :  { %14337 = vmatprep.subr.bf16.mxu0 %v21048_v12  ;;  %v21094_v12 = vld [vmem:[%s28286_s1 + $0x16d8] ss:$28 sps:$4 sm:$0xff]  }
 0x5c0   :  { %18242 = vmatpush3.bf16.msra.mxu1 %v21050_v63  ;;  %v21098_v63 = vld [vmem:[%s28286_s1 + $0x1fcc] ss:$28 sps:$4 sm:$0xff]  }
 0x5c1   :  { %14338 = vmatpush1.bf16.msra.mxu0 %v21046_v61  ;;  %18249 = vmatprep.subr.bf16.mxu1 %v21054_v1  ;;  %v21095_v61 = vld [vmem:[%s28286_s1 + $0x1518] ss:$28 sps:$4 sm:$0xff]   ;;  %v21096_v1 = vld [vmem:[%s28286_s1 + $0x1fc8] ss:$28 sps:$4 sm:$0xff]  }
 0x5c2   :  { %14339 = vmatprep.subr.bf16.mxu0 %v21053_v0  ;;  %v21099_v0 = vld [vmem:[%s28286_s1 + $0x1710] ss:$28 sps:$4 sm:$0xff]  }
 0x5c3   :  { %14926 = vmatmul.mubr.bf16.vlgmr.msra.gmra.mrb[24].mxu1 %v22216_v19  ;;  %v21064_v19 = vld [vmem:[%s28286_s1 + $0x13c8] ss:$28 sps:$4 sm:$0xff]  }
 0x5c4   :  { %18250 = vmatpush3.bf16.msra.mxu1 %v21055_v3  ;;  %14965 = vmatprep.mubr.bf16.mxu1 %v22240_v25  ;;  %v21069_v25 = vld [vmem:[%s28286_s1 + $0x1400] ss:$28 sps:$4 sm:$0xff]  }
 0x5c5   :  { %14340 = vmatpush1.bf16.msra.mxu0 %v21051_v2  ;;  %18251 = vmatprep.subr.bf16.mxu1 %v21059_v5  ;;  %v21100_v2 = vld [vmem:[%s28286_s1 + $0x1550] ss:$28 sps:$4 sm:$0xff]   ;;  %v21103_v3 = vld [vmem:[%s28286_s1 + $0x2004] ss:$28 sps:$4 sm:$0xff]  }
 0x5c6   :  { %14341 = vmatprep.subr.bf16.mxu0 %v21058_v4  ;;  %v21101_v4 = vld [vmem:[%s28286_s1 + $0x2000] ss:$28 sps:$4 sm:$0xff]   ;;  %v21105_v5 = vld [vmem:[%s28286_s1 + $0x1588] ss:$28 sps:$4 sm:$0xff]  }
 0x5c8   :  { %18252 = vmatpush3.bf16.msra.mxu1 %v21060_v28  ;;  %v21106_v28 = vld [vmem:[%s28286_s1 + $0x2038] ss:$28 sps:$4 sm:$0xff]  }
 0x5c9   :  { %14342 = vmatpush1.bf16.msra.mxu0 %v21056_v26  ;;  %18253 = vmatprep.subr.bf16.mxu1 %v21064_v19  ;;  %v21108_v26 = vld [vmem:[%s28286_s1 + $0x203c] ss:$28 sps:$4 sm:$0xff]   ;;  %v21113_v19 = vld [vmem:[%s28286_s1 + $0x2074] ss:$28 sps:$4 sm:$0xff]  }
 0x5ca   :  { %14343 = vmatprep.subr.bf16.mxu0 %v21063_v48  ;;  %v21110_v48 = vld [vmem:[%s28286_s1 + $0x15c0] ss:$28 sps:$4 sm:$0xff]  }
 0x5cc   :  { %18254 = vmatpush3.bf16.msra.mxu1 %v21065_v40  ;;  %v21111_v40 = vld [vmem:[%s28286_s1 + $0x2070] ss:$28 sps:$4 sm:$0xff]  }
 0x5cd   :  { %14344 = vmatpush1.bf16.msra.mxu0 %v21061_v6  ;;  %18255 = vmatprep.subr.bf16.mxu1 %v21069_v25  ;;  %v21114_v6 = vld [vmem:[%s28286_s1 + $0x17b8] ss:$28 sps:$4 sm:$0xff]   ;;  %v21118_v25 = vld [vmem:[%s28286_s1 + $0x20ac] ss:$28 sps:$4 sm:$0xff]  }
 0x5ce   :  { %14345 = vmatprep.subr.bf16.mxu0 %v21068_v8  ;;  %v21115_v8 = vld [vmem:[%s28286_s1 + $0x15f8] ss:$28 sps:$4 sm:$0xff]  }
 0x5d0   :  { %18256 = vmatpush3.bf16.msra.mxu1 %v21070_v18  ;;  %v21116_v18 = vld [vmem:[%s28286_s1 + $0x20a8] ss:$28 sps:$4 sm:$0xff]  }
 0x5d1   :  { %14346 = vmatpush1.bf16.msra.mxu0 %v21066_v7  ;;  %18257 = vmatprep.subr.bf16.mxu1 %v21074_v42  ;;  %v21119_v7 = vld [vmem:[%s28286_s1 + $0x17f0] ss:$28 sps:$4 sm:$0xff]   ;;  %v21123_v42 = vld [vmem:[%s28286_s1 + $0x20e4] ss:$28 sps:$4 sm:$0xff]  }
 0x5d2   :  { %14347 = vmatprep.subr.bf16.mxu0 %v21073_v36  ;;  %v21120_v36 = vld [vmem:[%s28286_s1 + $0x1630] ss:$28 sps:$4 sm:$0xff]  }
 0x5d4   :  { %18258 = vmatpush3.bf16.msra.mxu1 %v21075_v35 }
 0x5d5   :  { %14348 = vmatpush1.bf16.msra.mxu0 %v21071_v38  ;;  %18259 = vmatprep.subr.bf16.mxu1 %v21079_v53  ;;  %v21124_v38 = vld [vmem:[%s28286_s1 + $0x1828] ss:$28 sps:$4 sm:$0xff]  }
 0x5d6   :  { %14349 = vmatprep.subr.bf16.mxu0 %v21078_v16 }
 0x5d8   :  { %18260 = vmatpush3.bf16.msra.mxu1 %v21080_v9  ;;  %v21125_v9 = vld [vmem:[%s28286_s1 + $0x1668] ss:$28 sps:$4 sm:$0xff]  }
 0x5d9   :  { %14350 = vmatpush1.bf16.msra.mxu0 %v21076_v24  ;;  %18261 = vmatprep.subr.bf16.mxu1 %v21084_v10  ;;  %v21121_v24 = vld [vmem:[%s28286_s1 + $0x20e0] ss:$28 sps:$4 sm:$0xff]  }
 0x5da   :  { %14351 = vmatprep.subr.bf16.mxu0 %v21083_v44  ;;  %v21128_v10 = vld [vmem:[%s28286_s1 + $0x211c] ss:$28 sps:$4 sm:$0xff]  }
 0x5dc   :  { %18262 = vmatpush3.bf16.msra.mxu1 %v21085_v47  ;;  %v21126_v47 = vld [vmem:[%s28286_s1 + $0x2118] ss:$28 sps:$4 sm:$0xff]  }
 0x5dd   :  { %14352 = vmatpush1.bf16.msra.mxu0 %v21081_v46  ;;  %18263 = vmatprep.subr.bf16.mxu1 %v21089_v54  ;;  %v21129_v46 = vld [vmem:[%s28286_s1 + $0x1860] ss:$28 sps:$4 sm:$0xff]   ;;  %v21133_v54 = vld [vmem:[%s28286_s1 + $0x2154] ss:$28 sps:$4 sm:$0xff]  }
 0x5de   :  { %14353 = vmatprep.subr.bf16.mxu0 %v21088_v50  ;;  %v21130_v50 = vld [vmem:[%s28286_s1 + $0x16a0] ss:$28 sps:$4 sm:$0xff]  }
 0x5e0   :  { %18264 = vmatpush3.bf16.msra.mxu1 %v21090_v30  ;;  %v21131_v30 = vld [vmem:[%s28286_s1 + $0x2150] ss:$28 sps:$4 sm:$0xff]  }
 0x5e1   :  { %14354 = vmatpush1.bf16.msra.mxu0 %v21086_v55  ;;  %18271 = vmatprep.subr.bf16.mxu1 %v21094_v12  ;;  %v21134_v55 = vld [vmem:[%s28286_s1 + $0x1a58] ss:$28 sps:$4 sm:$0xff]   ;;  %v21138_v12 = vld [vmem:[%s28286_s1 + $0x218c] ss:$28 sps:$4 sm:$0xff]  }
 0x5e2   :  { %14364 = vmatprep.subr.bf16.mxu0 %v21093_v58  ;;  %v21135_v58 = vld [vmem:[%s28286_s1 + $0x1898] ss:$28 sps:$4 sm:$0xff]  }
 0x5e3   :  { %14966 = vmatmul.mubr.bf16.vlgmr.msra.gmra.mrb[28].mxu1 %v22435_v37  ;;  %v21104_v37 = vld [vmem:[%s28286_s1 + $0x1748] ss:$28 sps:$4 sm:$0xff]  }
 0x5e4   :  { %14356 = vmatmul.mubr.bf16.vlgmr.msra.gmra.mrb[4].mxu0 %v23064_v23  ;;  %18272 = vmatpush3.bf16.msra.mxu1 %v21095_v61  ;;  %v21136_v61 = vld [vmem:[%s28286_s1 + $0x2188] ss:$28 sps:$4 sm:$0xff]  }
 0x5e5   :  { %14365 = vmatpush1.bf16.msra.mxu0 %v21091_v60  ;;  %18273 = vmatprep.subr.bf16.mxu1 %v21099_v0  ;;  %v21139_v60 = vld [vmem:[%s28286_s1 + $0x1a90] ss:$28 sps:$4 sm:$0xff]   ;;  %v21143_v0 = vld [vmem:[%s28286_s1 + $0x21c4] ss:$28 sps:$4 sm:$0xff]  }
 0x5e6   :  { %14366 = vmatprep.subr.bf16.mxu0 %v21098_v63  ;;  %15005 = vmatprep.mubr.bf16.mxu1 %v22453_v41  ;;  %v21109_v41 = vld [vmem:[%s28286_s1 + $0x1780] ss:$28 sps:$4 sm:$0xff]   ;;  %v21140_v63 = vld [vmem:[%s28286_s1 + $0x18d0] ss:$28 sps:$4 sm:$0xff]  }
 0x5e7   :  { %14396 = vmatprep.mubr.bf16.mxu0 %v23080_v45 }
 0x5e8   :  { %18274 = vmatpush3.bf16.msra.mxu1 %v21100_v2  ;;  %v21145_v2 = vld [vmem:[%s28286_s1 + $0x1908] ss:$28 sps:$4 sm:$0xff]  }
 0x5e9   :  { %14367 = vmatpush1.bf16.msra.mxu0 %v21096_v1  ;;  %18275 = vmatprep.subr.bf16.mxu1 %v21104_v37  ;;  %v21141_v1 = vld [vmem:[%s28286_s1 + $0x21c0] ss:$28 sps:$4 sm:$0xff]   ;;  %v21146_v37 = vld [vmem:[%s28286_s1 + $0x21f8] ss:$28 sps:$4 sm:$0xff]  }
 0x5ea   :  { %14368 = vmatprep.subr.bf16.mxu0 %v21103_v3  ;;  %v21148_v3 = vld [vmem:[%s28286_s1 + $0x21fc] ss:$28 sps:$4 sm:$0xff]  }
 0x5ec   :  { %18276 = vmatpush3.bf16.msra.mxu1 %v21105_v5  ;;  %v21153_v5 = vld [vmem:[%s28286_s1 + $0x2234] ss:$28 sps:$4 sm:$0xff]  }
 0x5ed   :  { %14369 = vmatpush1.bf16.msra.mxu0 %v21101_v4  ;;  %18277 = vmatprep.subr.bf16.mxu1 %v21109_v41  ;;  %v21150_v4 = vld [vmem:[%s28286_s1 + $0x1940] ss:$28 sps:$4 sm:$0xff]   ;;  %v21151_v41 = vld [vmem:[%s28286_s1 + $0x2230] ss:$28 sps:$4 sm:$0xff]  }
 0x5ee   :  { %14370 = vmatprep.subr.bf16.mxu0 %v21108_v26  ;;  %v21154_v26 = vld [vmem:[%s28286_s1 + $0x1b38] ss:$28 sps:$4 sm:$0xff]  }
 0x5f0   :  { %18278 = vmatpush3.bf16.msra.mxu1 %v21110_v48  ;;  %v21158_v48 = vld [vmem:[%s28286_s1 + $0x226c] ss:$28 sps:$4 sm:$0xff]  }
 0x5f1   :  { %14371 = vmatpush1.bf16.msra.mxu0 %v21106_v28  ;;  %18279 = vmatprep.subr.bf16.mxu1 %v21114_v6  ;;  %v21155_v28 = vld [vmem:[%s28286_s1 + $0x1978] ss:$28 sps:$4 sm:$0xff]   ;;  %v21156_v6 = vld [vmem:[%s28286_s1 + $0x2268] ss:$28 sps:$4 sm:$0xff]  }
 0x5f2   :  { %14372 = vmatprep.subr.bf16.mxu0 %v21113_v19  ;;  %v21159_v19 = vld [vmem:[%s28286_s1 + $0x1b70] ss:$28 sps:$4 sm:$0xff]  }
 0x5f4   :  { %18280 = vmatpush3.bf16.msra.mxu1 %v21115_v8  ;;  %v21163_v8 = vld [vmem:[%s28286_s1 + $0x22a4] ss:$28 sps:$4 sm:$0xff]  }
 0x5f5   :  { %14373 = vmatpush1.bf16.msra.mxu0 %v21111_v40  ;;  %18281 = vmatprep.subr.bf16.mxu1 %v21119_v7  ;;  %v21160_v40 = vld [vmem:[%s28286_s1 + $0x19b0] ss:$28 sps:$4 sm:$0xff]   ;;  %v21161_v7 = vld [vmem:[%s28286_s1 + $0x22a0] ss:$28 sps:$4 sm:$0xff]  }
 0x5f6   :  { %14374 = vmatprep.subr.bf16.mxu0 %v21118_v25  ;;  %v26700_v35 = vpop.f32.mrb[4].mxu1  ;;  %v21164_v25 = vld [vmem:[%s28286_s1 + $0x1ba8] ss:$28 sps:$4 sm:$0xff]  }
 0x5f7   :  { %v26702_v16 = vpop.f32.mrb[5].mxu1 }
 0x5f8   :  { %v13992_v53 = vpop.f32.mrb[6].mxu1  ;;  %18282 = vmatpush3.bf16.msra.mxu1 %v21120_v36  ;;  %v21168_v36 = vld [vmem:[%s28286_s1 + $0x22dc] ss:$28 sps:$4 sm:$0xff]  }
 0x5f9   :  { %14375 = vmatpush1.bf16.msra.mxu0 %v21116_v18  ;;  %v13993_v44 = vpop.f32.mrb[7].mxu1  ;;  %18283 = vmatprep.subr.bf16.mxu1 %v21124_v38  ;;  %v21165_v18 = vld [vmem:[%s28286_s1 + $0x19e8] ss:$28 sps:$4 sm:$0xff]   ;;  %v21166_v38 = vld [vmem:[%s28286_s1 + $0x22d8] ss:$28 sps:$4 sm:$0xff]  }
 0x5fa   :  { %14376 = vmatprep.subr.bf16.mxu0 %v21123_v42  ;;  %v21169_v42 = vld [vmem:[%s28286_s1 + $0x1be0] ss:$28 sps:$4 sm:$0xff]   ;;  %v21171_v44 = vld [vmem:[%s28286_s1 + $0x2310] ss:$28 sps:$4 sm:$0xff]  }
 0x5fb   :  { %v21170_v53 = vld [vmem:[%s28286_s1 + $0x1a20] ss:$28 sps:$4 sm:$0xff]  }
 0x5fc   :  { %18284 = vmatpush3.bf16.msra.mxu1 %v21125_v9  ;;  %v21174_v9 = vld [vmem:[%s28286_s1 + $0x1dd8] ss:$28 sps:$4 sm:$0xff]  }
 0x5fd   :  { %14377 = vmatpush1.bf16.msra.mxu0 %v21121_v24  ;;  %18285 = vmatprep.subr.bf16.mxu1 %v21129_v46  ;;  %v21173_v24 = vld [vmem:[%s28286_s1 + $0x2314] ss:$28 sps:$4 sm:$0xff]   ;;  %v21178_v46 = vld [vmem:[%s28286_s1 + $0x234c] ss:$28 sps:$4 sm:$0xff]  }
 0x5fe   :  { %14378 = vmatprep.subr.bf16.mxu0 %v21128_v10  ;;  %v21175_v10 = vld [vmem:[%s28286_s1 + $0x1c18] ss:$28 sps:$4 sm:$0xff]  }
 0x600   :  { %18286 = vmatpush3.bf16.msra.mxu1 %v21130_v50  ;;  %v21176_v50 = vld [vmem:[%s28286_s1 + $0x2348] ss:$28 sps:$4 sm:$0xff]  }
 0x601   :  { %14379 = vmatpush1.bf16.msra.mxu0 %v21126_v47  ;;  %18293 = vmatprep.subr.bf16.mxu1 %v21134_v55  ;;  %v21179_v47 = vld [vmem:[%s28286_s1 + $0x1e10] ss:$28 sps:$4 sm:$0xff]   ;;  %v21183_v55 = vld [vmem:[%s28286_s1 + $0x2384] ss:$28 sps:$4 sm:$0xff]  }
 0x602   :  { %14380 = vmatprep.subr.bf16.mxu0 %v21133_v54  ;;  %v21180_v54 = vld [vmem:[%s28286_s1 + $0x1c50] ss:$28 sps:$4 sm:$0xff]  }
 0x603   :  { %15006 = vmatmul.mubr.bf16.vlgmr.msra.gmra.mrb[32].mxu1 %v22647_v56  ;;  %v21144_v56 = vld [vmem:[%s28286_s1 + $0x1ac8] ss:$28 sps:$4 sm:$0xff]  }
 0x604   :  { %18294 = vmatpush3.bf16.msra.mxu1 %v21135_v58  ;;  %15045 = vmatprep.mubr.bf16.mxu1 %v22662_v39  ;;  %v21149_v39 = vld [vmem:[%s28286_s1 + $0x1b00] ss:$28 sps:$4 sm:$0xff]   ;;  %v21185_v58 = vld [vmem:[%s28286_s1 + $0x1c88] ss:$28 sps:$4 sm:$0xff]  }
 0x605   :  { %14381 = vmatpush1.bf16.msra.mxu0 %v21131_v30  ;;  %18295 = vmatprep.subr.bf16.mxu1 %v21139_v60  ;;  %v21181_v30 = vld [vmem:[%s28286_s1 + $0x2380] ss:$28 sps:$4 sm:$0xff]   ;;  %v21186_v60 = vld [vmem:[%s28286_s1 + $0x23b8] ss:$28 sps:$4 sm:$0xff]  }
 0x606   :  { %14382 = vmatprep.subr.bf16.mxu0 %v21138_v12  ;;  %v21188_v12 = vld [vmem:[%s28286_s1 + $0x23bc] ss:$28 sps:$4 sm:$0xff]  }
 0x608   :  { %18296 = vmatpush3.bf16.msra.mxu1 %v21140_v63  ;;  %v21193_v63 = vld [vmem:[%s28286_s1 + $0x23f4] ss:$28 sps:$4 sm:$0xff]  }
 0x609   :  { %14383 = vmatpush1.bf16.msra.mxu0 %v21136_v61  ;;  %18297 = vmatprep.subr.bf16.mxu1 %v21144_v56  ;;  %v21190_v61 = vld [vmem:[%s28286_s1 + $0x1cc0] ss:$28 sps:$4 sm:$0xff]   ;;  %v21191_v56 = vld [vmem:[%s28286_s1 + $0x23f0] ss:$28 sps:$4 sm:$0xff]  }
 0x60a   :  { %14384 = vmatprep.subr.bf16.mxu0 %v21143_v0  ;;  %v21194_v0 = vld [vmem:[%s28286_s1 + $0x1eb8] ss:$28 sps:$4 sm:$0xff]  }
 0x60c   :  { %18298 = vmatpush3.bf16.msra.mxu1 %v21145_v2  ;;  %v21198_v2 = vld [vmem:[%s28286_s1 + $0x242c] ss:$28 sps:$4 sm:$0xff]  }
 0x60d   :  { %14385 = vmatpush1.bf16.msra.mxu0 %v21141_v1  ;;  %18299 = vmatprep.subr.bf16.mxu1 %v21149_v39  ;;  %v21195_v1 = vld [vmem:[%s28286_s1 + $0x1cf8] ss:$28 sps:$4 sm:$0xff]   ;;  %v21196_v39 = vld [vmem:[%s28286_s1 + $0x2428] ss:$28 sps:$4 sm:$0xff]  }
 0x60e   :  { %14386 = vmatprep.subr.bf16.mxu0 %v21148_v3  ;;  %v21199_v3 = vld [vmem:[%s28286_s1 + $0x1ef0] ss:$28 sps:$4 sm:$0xff]  }
 0x610   :  { %18300 = vmatpush3.bf16.msra.mxu1 %v21150_v4  ;;  %v21203_v4 = vld [vmem:[%s28286_s1 + $0x2464] ss:$28 sps:$4 sm:$0xff]  }
 0x611   :  { %14387 = vmatpush1.bf16.msra.mxu0 %v21146_v37  ;;  %18301 = vmatprep.subr.bf16.mxu1 %v21154_v26  ;;  %v21200_v37 = vld [vmem:[%s28286_s1 + $0x1d30] ss:$28 sps:$4 sm:$0xff]   ;;  %v21201_v26 = vld [vmem:[%s28286_s1 + $0x2460] ss:$28 sps:$4 sm:$0xff]  }
 0x612   :  { %14388 = vmatprep.subr.bf16.mxu0 %v21153_v5  ;;  %v21204_v5 = vld [vmem:[%s28286_s1 + $0x1f28] ss:$28 sps:$4 sm:$0xff]  }
 0x614   :  { %18302 = vmatpush3.bf16.msra.mxu1 %v21155_v28  ;;  %v21208_v28 = vld [vmem:[%s28286_s1 + $0x249c] ss:$28 sps:$4 sm:$0xff]  }
 0x615   :  { %14389 = vmatpush1.bf16.msra.mxu0 %v21151_v41  ;;  %18303 = vmatprep.subr.bf16.mxu1 %v21159_v19  ;;  %v21205_v41 = vld [vmem:[%s28286_s1 + $0x1d68] ss:$28 sps:$4 sm:$0xff]   ;;  %v21206_v19 = vld [vmem:[%s28286_s1 + $0x2498] ss:$28 sps:$4 sm:$0xff]  }
 0x616   :  { %14390 = vmatprep.subr.bf16.mxu0 %v21158_v48  ;;  %v21209_v48 = vld [vmem:[%s28286_s1 + $0x1f60] ss:$28 sps:$4 sm:$0xff]  }
 0x618   :  { %18304 = vmatpush3.bf16.msra.mxu1 %v21160_v40  ;;  %v21213_v40 = vld [vmem:[%s28286_s1 + $0x24d4] ss:$28 sps:$4 sm:$0xff]  }
 0x619   :  { %14391 = vmatpush1.bf16.msra.mxu0 %v21156_v6  ;;  %18305 = vmatprep.subr.bf16.mxu1 %v21164_v25  ;;  %v21210_v6 = vld [vmem:[%s28286_s1 + $0x1da0] ss:$28 sps:$4 sm:$0xff]   ;;  %v21211_v25 = vld [vmem:[%s28286_s1 + $0x24d0] ss:$28 sps:$4 sm:$0xff]  }
 0x61a   :  { %14392 = vmatprep.subr.bf16.mxu0 %v21163_v8  ;;  %v21214_v8 = vld [vmem:[%s28286_s1 + $0x2158] ss:$28 sps:$4 sm:$0xff]  }
 0x61c   :  { %18306 = vmatpush3.bf16.msra.mxu1 %v21165_v18  ;;  %v21218_v18 = vld [vmem:[%s28286_s1 + $0x250c] ss:$28 sps:$4 sm:$0xff]  }
 0x61d   :  { %14393 = vmatpush1.bf16.msra.mxu0 %v21161_v7  ;;  %18307 = vmatprep.subr.bf16.mxu1 %v21169_v42  ;;  %v21215_v7 = vld [vmem:[%s28286_s1 + $0x1f98] ss:$28 sps:$4 sm:$0xff]   ;;  %v21216_v42 = vld [vmem:[%s28286_s1 + $0x2508] ss:$28 sps:$4 sm:$0xff]  }
 0x61e   :  { %14394 = vmatprep.subr.bf16.mxu0 %v21168_v36  ;;  %v21219_v36 = vld [vmem:[%s28286_s1 + $0x2190] ss:$28 sps:$4 sm:$0xff]  }
 0x620   :  { %18308 = vmatpush3.bf16.msra.mxu1 %v21170_v53  ;;  %v21223_v53 = vld [vmem:[%s28286_s1 + $0x2544] ss:$28 sps:$4 sm:$0xff]  }
 0x621   :  { %14395 = vmatpush1.bf16.msra.mxu0 %v21166_v38  ;;  %18315 = vmatprep.subr.bf16.mxu1 %v21174_v9  ;;  %v21220_v38 = vld [vmem:[%s28286_s1 + $0x1fd0] ss:$28 sps:$4 sm:$0xff]   ;;  %v21225_v9 = vld [vmem:[%s28286_s1 + $0x2008] ss:$28 sps:$4 sm:$0xff]  }
 0x622   :  { %14405 = vmatprep.subr.bf16.mxu0 %v21173_v24  ;;  %v21221_v24 = vld [vmem:[%s28286_s1 + $0x2540] ss:$28 sps:$4 sm:$0xff]  }
 0x623   :  { %15046 = vmatmul.mubr.bf16.vlgmr.msra.gmra.mrb[36].mxu1 %v22855_v11  ;;  %v21184_v11 = vld [vmem:[%s28286_s1 + $0x1e48] ss:$28 sps:$4 sm:$0xff]  }
 0x624   :  { %14397 = vmatmul.mubr.bf16.vlgmr.msra.gmra.mrb[4].mxu0 %v23277_v13  ;;  %18316 = vmatpush3.bf16.msra.mxu1 %v21175_v10  ;;  %v18155_v10 = vpop.f32.mrb[8].mxu1 }
 0x625   :  { %14406 = vmatpush1.bf16.msra.mxu0 %v21171_v44  ;;  %18317 = vmatprep.subr.bf16.mxu1 %v21179_v47  ;;  %v21228_v44 = vld [vmem:[%s28286_s1 + $0x257c] ss:$28 sps:$4 sm:$0xff]  }
 0x626   :  { %14407 = vmatprep.subr.bf16.mxu0 %v21178_v46  ;;  %15085 = vmatprep.mubr.bf16.mxu1 %v22871_v15  ;;  %v21189_v15 = vld [vmem:[%s28286_s1 + $0x1e80] ss:$28 sps:$4 sm:$0xff]   ;;  %v21226_v46 = vld [vmem:[%s28286_s1 + $0x2578] ss:$28 sps:$4 sm:$0xff]  }
 0x627   :  { %14437 = vmatprep.mubr.bf16.mxu0 %v23293_v17  ;;  %v21230_v47 = vld [vmem:[%s28286_s1 + $0x2040] ss:$28 sps:$4 sm:$0xff]  }
 0x628   :  { %18318 = vmatpush3.bf16.msra.mxu1 %v21180_v54  ;;  %v18156_v54 = vpop.f32.mrb[9].mxu1 }
 0x629   :  { %14408 = vmatpush1.bf16.msra.mxu0 %v21176_v50  ;;  %18319 = vmatprep.subr.bf16.mxu1 %v21184_v11  ;;  %v2307_v50 = vsub.s32 6, %v25453_v14  ;;  %v21234_v11 = vld [vmem:[%s28286_s1 + $0x2238] ss:$28 sps:$4 sm:$0xff]  }
 0x62a   :  { %14409 = vmatprep.subr.bf16.mxu0 %v21183_v55  ;;  %v21233_v55 = vld [vmem:[%s28286_s1 + $0x25b4] ss:$28 sps:$4 sm:$0xff]  }
 0x62c   :  { %18320 = vmatpush3.bf16.msra.mxu1 %v21185_v58  ;;  %v18158_v58 = vpop.f32.mrb[10].mxu1 }
 0x62d   :  { %14410 = vmatpush1.bf16.msra.mxu0 %v21181_v30  ;;  %18321 = vmatprep.subr.bf16.mxu1 %v21189_v15  ;;  %v18157_v30 = vadd.f32 %v18156_v54, %v18155_v10  ;;  %v21258_v10 = vld [vmem:[%s28286_s1 + $0x26cc] ss:$28 sps:$4 sm:$0xff]   ;;  %v21263_v54 = vld [vmem:[%s28286_s1 + $0x2704] ss:$28 sps:$4 sm:$0xff]   ;;  %v21266_v58 = vld [vmem:[%s28286_s1 + $0x2738] ss:$28 sps:$4 sm:$0xff]  }
 0x62e   :  { %14411 = vmatprep.subr.bf16.mxu0 %v21188_v12  ;;  %v21740_v12 = vld [vmem:[%s28288_s2] sm:$0xff] }
 0x62f   :  { %v2308_v15 = vrot.slane %v21740_v12, %v2307_v50  ;;  %v21260_v50 = vld [vmem:[%s28286_s1 + $0x2350] ss:$28 sps:$4 sm:$0xff]   ;;  %v21270_v12 = vld [vmem:[%s28286_s1 + $0x23c0] ss:$28 sps:$4 sm:$0xff]  }
 0x630   :  { %18322 = vmatpush3.bf16.msra.mxu1 %v21190_v61 }
 0x631   :  { %14412 = vmatpush1.bf16.msra.mxu0 %v21186_v60  ;;  %18323 = vmatprep.subr.bf16.mxu1 %v21194_v0  ;;  %v18159_v60 = vpop.f32.mrb[11].mxu1  ;;  %v21235_v0 = vld [vmem:[%s28286_s1 + $0x2078] ss:$28 sps:$4 sm:$0xff]  }
 0x632   :  { %14413 = vmatprep.subr.bf16.mxu0 %v21193_v63  ;;  %v21231_v63 = vld [vmem:[%s28286_s1 + $0x25b0] ss:$28 sps:$4 sm:$0xff]   ;;  %v21274_v60 = vld [vmem:[%s28286_s1 + $0x25b8] ss:$28 sps:$4 sm:$0xff]  }
 0x634   :  { %18324 = vmatpush3.bf16.msra.mxu1 %v21195_v1 }
 0x635   :  { %14414 = vmatpush1.bf16.msra.mxu0 %v21191_v56  ;;  %18325 = vmatprep.subr.bf16.mxu1 %v21199_v3  ;;  %v14768_v56 = vadd.f32 %v18157_v30, %v2308_v15  ;;  %v21239_v3 = vld [vmem:[%s28286_s1 + $0x2270] ss:$28 sps:$4 sm:$0xff]   ;;  %v21268_v30 = vld [vmem:[%s28286_s1 + $0x273c] ss:$28 sps:$4 sm:$0xff]  }
 0x636   :  { %14415 = vmatprep.subr.bf16.mxu0 %v21198_v2  ;;  %v18177_v61 = vpop.f32.mrb[12].mxu1  ;;  %v21238_v2 = vld [vmem:[%s28286_s1 + $0x25ec] ss:$28 sps:$4 sm:$0xff]   ;;  %v21273_v15 = vld [vmem:[%s28286_s1 + $0x2774] ss:$28 sps:$4 sm:$0xff]  }
 0x637   :  { %v18178_v1 = vpop.f32.mrb[13].mxu1 }
 0x638   :  { %18326 = vmatpush3.bf16.msra.mxu1 %v21200_v37  ;;  %v18180_v37 = vpop.f32.mrb[14].mxu1 }
 0x639   :  { %14416 = vmatpush1.bf16.msra.mxu0 %v21196_v39  ;;  %18327 = vmatprep.subr.bf16.mxu1 %v21204_v5  ;;  %v18179_v39 = vadd.f32 %v18178_v1, %v18177_v61  ;;  %v21271_v61 = vld [vmem:[%s28286_s1 + $0x2770] ss:$28 sps:$4 sm:$0xff]   ;;  %v21276_v1 = vld [vmem:[%s28286_s1 + $0x27a8] ss:$28 sps:$4 sm:$0xff]  }
 0x63a   :  { %14417 = vmatprep.subr.bf16.mxu0 %v21203_v4  ;;  %v18181_v4 = vpop.f32.mrb[15].mxu1 }
 0x63b   :  { %v14808_v5 = vadd.f32 %v18179_v39, %v14768_v56  ;;  %v21279_v56 = vld [vmem:[%s28286_s1 + $0x25f0] ss:$28 sps:$4 sm:$0xff]   ;;  %v21284_v39 = vld [vmem:[%s28286_s1 + $0x2628] ss:$28 sps:$4 sm:$0xff]  }
 0x63c   :  { %18328 = vmatpush3.bf16.msra.mxu1 %v21205_v41  ;;  %v21240_v41 = vld [vmem:[%s28286_s1 + $0x20b0] ss:$28 sps:$4 sm:$0xff]  }
 0x63d   :  { %14418 = vmatpush1.bf16.msra.mxu0 %v21201_v26  ;;  %18329 = vmatprep.subr.bf16.mxu1 %v21209_v48  ;;  %v21236_v26 = vld [vmem:[%s28286_s1 + $0x25e8] ss:$28 sps:$4 sm:$0xff]  }
 0x63e   :  { %14419 = vmatprep.subr.bf16.mxu0 %v21208_v28  ;;  %v21243_v28 = vld [vmem:[%s28286_s1 + $0x2624] ss:$28 sps:$4 sm:$0xff]  }
 0x63f   :  { %v21244_v48 = vld [vmem:[%s28286_s1 + $0x22a8] ss:$28 sps:$4 sm:$0xff]  }
 0x640   :  { %18330 = vmatpush3.bf16.msra.mxu1 %v21210_v6 }
 0x641   :  { %14420 = vmatpush1.bf16.msra.mxu0 %v21206_v19  ;;  %18337 = vmatprep.subr.bf16.mxu1 %v21214_v8  ;;  %v21245_v8 = vld [vmem:[%s28286_s1 + $0x20e8] ss:$28 sps:$4 sm:$0xff]  }
 0x642   :  { %14421 = vmatprep.subr.bf16.mxu0 %v21213_v40  ;;  %v21241_v40 = vld [vmem:[%s28286_s1 + $0x2620] ss:$28 sps:$4 sm:$0xff]  }
 0x643   :  { %15086 = vmatmul.mubr.bf16.vlgmr.msra.gmra.mrb[40].mxu1 %v23064_v23  ;;  %v21224_v23 = vld [vmem:[%s28286_s1 + $0x21c8] ss:$28 sps:$4 sm:$0xff]  }
 0x644   :  { %18338 = vmatpush3.bf16.msra.mxu1 %v21215_v7  ;;  %15125 = vmatprep.mubr.bf16.mxu1 %v23080_v45  ;;  %v21229_v45 = vld [vmem:[%s28286_s1 + $0x2200] ss:$28 sps:$4 sm:$0xff]  }
 0x645   :  { %14422 = vmatpush1.bf16.msra.mxu0 %v21211_v25  ;;  %18339 = vmatprep.subr.bf16.mxu1 %v21219_v36  ;;  %v21249_v36 = vld [vmem:[%s28286_s1 + $0x22e0] ss:$28 sps:$4 sm:$0xff]  }
 0x646   :  { %14423 = vmatprep.subr.bf16.mxu0 %v21218_v18  ;;  %v21248_v18 = vld [vmem:[%s28286_s1 + $0x265c] ss:$28 sps:$4 sm:$0xff]  }
 0x648   :  { %18340 = vmatpush3.bf16.msra.mxu1 %v21220_v38 }
 0x649   :  { %14424 = vmatpush1.bf16.msra.mxu0 %v21216_v42  ;;  %18341 = vmatprep.subr.bf16.mxu1 %v21224_v23  ;;  %v21250_v23 = vld [vmem:[%s28286_s1 + $0x2120] ss:$28 sps:$4 sm:$0xff]  }
 0x64a   :  { %14425 = vmatprep.subr.bf16.mxu0 %v21223_v53  ;;  %v21246_v53 = vld [vmem:[%s28286_s1 + $0x2658] ss:$28 sps:$4 sm:$0xff]  }
 0x64c   :  { %18342 = vmatpush3.bf16.msra.mxu1 %v21225_v9  ;;  %v21254_v9 = vld [vmem:[%s28286_s1 + $0x24d8] ss:$28 sps:$4 sm:$0xff]  }
 0x64d   :  { %14426 = vmatpush1.bf16.msra.mxu0 %v21221_v24  ;;  %18343 = vmatprep.subr.bf16.mxu1 %v21229_v45  ;;  %v21253_v24 = vld [vmem:[%s28286_s1 + $0x2694] ss:$28 sps:$4 sm:$0xff]  }
 0x64e   :  { %14427 = vmatprep.subr.bf16.mxu0 %v21228_v44  ;;  %v21251_v44 = vld [vmem:[%s28286_s1 + $0x2690] ss:$28 sps:$4 sm:$0xff]   ;;  %v21255_v45 = vld [vmem:[%s28286_s1 + $0x2318] ss:$28 sps:$4 sm:$0xff]  }
 0x650   :  { %18344 = vmatpush3.bf16.msra.mxu1 %v21230_v47  ;;  %v21256_v47 = vld [vmem:[%s28286_s1 + $0x26c8] ss:$28 sps:$4 sm:$0xff]  }
 0x651   :  { %14428 = vmatpush1.bf16.msra.mxu0 %v21226_v46  ;;  %18345 = vmatprep.subr.bf16.mxu1 %v21234_v11  ;;  %v21259_v46 = vld [vmem:[%s28286_s1 + $0x2510] ss:$28 sps:$4 sm:$0xff]   ;;  %v21265_v11 = vld [vmem:[%s28286_s1 + $0x2388] ss:$28 sps:$4 sm:$0xff]  }
 0x652   :  { %14429 = vmatprep.subr.bf16.mxu0 %v21233_v55  ;;  %v21261_v55 = vld [vmem:[%s28286_s1 + $0x2700] ss:$28 sps:$4 sm:$0xff]  }
 0x654   :  { %18346 = vmatpush3.bf16.msra.mxu1 %v21235_v0  ;;  %v21278_v0 = vld [vmem:[%s28286_s1 + $0x27ac] ss:$28 sps:$4 sm:$0xff]  }
 0x655   :  { %14430 = vmatpush1.bf16.msra.mxu0 %v21231_v63  ;;  %18347 = vmatprep.subr.bf16.mxu1 %v21239_v3  ;;  %v21275_v63 = vld [vmem:[%s28286_s1 + $0x23f8] ss:$28 sps:$4 sm:$0xff]   ;;  %v21283_v3 = vld [vmem:[%s28286_s1 + $0x27e4] ss:$28 sps:$4 sm:$0xff]  }
 0x656   :  { %14431 = vmatprep.subr.bf16.mxu0 %v21238_v2  ;;  %v18199_v19 = vpop.f32.mrb[16].mxu1  ;;  %v21280_v2 = vld [vmem:[%s28286_s1 + $0x2430] ss:$28 sps:$4 sm:$0xff]  }
 0x657   :  { %v18200_v6 = vpop.f32.mrb[17].mxu1 }
 0x658   :  { %18348 = vmatpush3.bf16.msra.mxu1 %v21240_v41  ;;  %v18201_v25 = vadd.f32 %v18200_v6, %v18199_v19  ;;  %v18202_v7 = vpop.f32.mrb[18].mxu1  ;;  %v21289_v19 = vld [vmem:[%s28286_s1 + $0x2660] ss:$28 sps:$4 sm:$0xff]  }
 0x659   :  { %14432 = vmatpush1.bf16.msra.mxu0 %v21236_v26  ;;  %18349 = vmatprep.subr.bf16.mxu1 %v21244_v48  ;;  %v18203_v42 = vpop.f32.mrb[19].mxu1  ;;  %v21285_v26 = vld [vmem:[%s28286_s1 + $0x2468] ss:$28 sps:$4 sm:$0xff]   ;;  %v21288_v48 = vld [vmem:[%s28286_s1 + $0x281c] ss:$28 sps:$4 sm:$0xff]  }
 0x65a   :  { %14433 = vmatprep.subr.bf16.mxu0 %v21243_v28  ;;  %v27016_v38 = vadd.f32 %v18201_v25, %v14808_v5  ;;  %v21281_v5 = vld [vmem:[%s28286_s1 + $0x27e0] ss:$28 sps:$4 sm:$0xff]   ;;  %v21293_v7 = vld [vmem:[%s28286_s1 + $0x2854] ss:$28 sps:$4 sm:$0xff]  }
 0x65b   :  { %v21290_v25 = vld [vmem:[%s28286_s1 + $0x24a0] ss:$28 sps:$4 sm:$0xff]   ;;  %v21295_v42 = vld [vmem:[%s28286_s1 + $0x2698] ss:$28 sps:$4 sm:$0xff]  }
 0x65c   :  { %18350 = vmatpush3.bf16.msra.mxu1 %v21245_v8  ;;  %v21286_v8 = vld [vmem:[%s28286_s1 + $0x2818] ss:$28 sps:$4 sm:$0xff]  }
 0x65d   :  { %14434 = vmatpush1.bf16.msra.mxu0 %v21241_v40  ;;  %18351 = vmatprep.subr.bf16.mxu1 %v21249_v36  ;;  %v21291_v36 = vld [vmem:[%s28286_s1 + $0x2850] ss:$28 sps:$4 sm:$0xff]  }
 0x65e   :  { %14435 = vmatprep.subr.bf16.mxu0 %v21248_v18  ;;  %v21294_v18 = vld [vmem:[%s28286_s1 + $0x2858] ss:$28 sps:$4 sm:$0xff]  }
 0x660   :  { %18352 = vmatpush3.bf16.msra.mxu1 %v21250_v23  ;;  %v21296_v23 = vld [vmem:[%s28286_s1 + $0x2888] ss:$28 sps:$4 sm:$0xff]  }
 0x661   :  { %14436 = vmatpush1.bf16.msra.mxu0 %v21246_v53  ;;  %18359 = vmatprep.subr.bf16.mxu1 %v21254_v9  ;;  %v21299_v53 = vld [vmem:[%s28286_s1 + $0x2890] ss:$28 sps:$4 sm:$0xff]   ;;  %v21303_v9 = vld [vmem:[%s28286_s1 + $0x28c4] ss:$28 sps:$4 sm:$0xff]  }
 0x662   :  { %14446 = vmatprep.subr.bf16.mxu0 %v21253_v24  ;;  %v21300_v24 = vld [vmem:[%s28286_s1 + $0x26d0] ss:$28 sps:$4 sm:$0xff]  }
 0x663   :  { %15126 = vmatmul.mubr.bf16.vlgmr.msra.gmra.mrb[44].mxu1 %v23277_v13  ;;  %v21264_v13 = vld [vmem:[%s28286_s1 + $0x2548] ss:$28 sps:$4 sm:$0xff]  }
 0x664   :  { %14438 = vmatmul.mubr.bf16.vlgmr.msra.gmra.mrb[4].mxu0 %v23486_v52  ;;  %18360 = vmatpush3.bf16.msra.mxu1 %v21255_v45  ;;  %v21305_v45 = vld [vmem:[%s28286_s1 + $0x2708] ss:$28 sps:$4 sm:$0xff]  }
 0x665   :  { %14447 = vmatpush1.bf16.msra.mxu0 %v21251_v44  ;;  %18361 = vmatprep.subr.bf16.mxu1 %v21259_v46  ;;  %v21301_v44 = vld [vmem:[%s28286_s1 + $0x28c0] ss:$28 sps:$4 sm:$0xff]   ;;  %v21306_v46 = vld [vmem:[%s28286_s1 + $0x28f8] ss:$28 sps:$4 sm:$0xff]  }
 0x666   :  { %14448 = vmatprep.subr.bf16.mxu0 %v21258_v10  ;;  %15165 = vmatprep.mubr.bf16.mxu1 %v23293_v17  ;;  %v21269_v17 = vld [vmem:[%s28286_s1 + $0x2580] ss:$28 sps:$4 sm:$0xff]  }
 0x667   :  { %14478 = vmatprep.mubr.bf16.mxu0 %v23502_v59  ;;  %v21308_v10 = vld [vmem:[%s28286_s1 + $0x28fc] ss:$28 sps:$4 sm:$0xff]  }
 0x668   :  { %18362 = vmatpush3.bf16.msra.mxu1 %v21260_v50  ;;  %v21313_v50 = vld [vmem:[%s28286_s1 + $0x2934] ss:$28 sps:$4 sm:$0xff]  }
 0x669   :  { %14449 = vmatpush1.bf16.msra.mxu0 %v21256_v47  ;;  %18363 = vmatprep.subr.bf16.mxu1 %v21264_v13  ;;  %v21310_v47 = vld [vmem:[%s28286_s1 + $0x2740] ss:$28 sps:$4 sm:$0xff]   ;;  %v21311_v13 = vld [vmem:[%s28286_s1 + $0x2930] ss:$28 sps:$4 sm:$0xff]  }
 0x66a   :  { %14450 = vmatprep.subr.bf16.mxu0 %v21263_v54  ;;  %v21314_v54 = vld [vmem:[%s28286_s1 + $0x2938] ss:$28 sps:$4 sm:$0xff]  }
 0x66c   :  { %18364 = vmatpush3.bf16.msra.mxu1 %v21265_v11  ;;  %v21318_v11 = vld [vmem:[%s28286_s1 + $0x296c] ss:$28 sps:$4 sm:$0xff]  }
 0x66d   :  { %14451 = vmatpush1.bf16.msra.mxu0 %v21261_v55  ;;  %18365 = vmatprep.subr.bf16.mxu1 %v21269_v17  ;;  %v21315_v55 = vld [vmem:[%s28286_s1 + $0x2778] ss:$28 sps:$4 sm:$0xff]   ;;  %v21316_v17 = vld [vmem:[%s28286_s1 + $0x2968] ss:$28 sps:$4 sm:$0xff]  }
 0x66e   :  { %14452 = vmatprep.subr.bf16.mxu0 %v21268_v30  ;;  %v21319_v30 = vld [vmem:[%s28286_s1 + $0x2970] ss:$28 sps:$4 sm:$0xff]  }
 0x670   :  { %18366 = vmatpush3.bf16.msra.mxu1 %v21270_v12  ;;  %v21323_v12 = vld [vmem:[%s28286_s1 + $0x29a4] ss:$28 sps:$4 sm:$0xff]  }
 0x671   :  { %14453 = vmatpush1.bf16.msra.mxu0 %v21266_v58  ;;  %18367 = vmatprep.subr.bf16.mxu1 %v21274_v60  ;;  %v21320_v58 = vld [vmem:[%s28286_s1 + $0x27b0] ss:$28 sps:$4 sm:$0xff]  }
 0x672   :  { %14454 = vmatprep.subr.bf16.mxu0 %v21273_v15  ;;  %v21324_v15 = vld [vmem:[%s28286_s1 + $0x29a8] ss:$28 sps:$4 sm:$0xff]  }
 0x674   :  { %18368 = vmatpush3.bf16.msra.mxu1 %v21275_v63  ;;  %v21321_v63 = vld [vmem:[%s28286_s1 + $0x29a0] ss:$28 sps:$4 sm:$0xff]  }
 0x675   :  { %14455 = vmatpush1.bf16.msra.mxu0 %v21271_v61  ;;  %18369 = vmatprep.subr.bf16.mxu1 %v21279_v56 }
 0x676   :  { %14456 = vmatprep.subr.bf16.mxu0 %v21278_v0  ;;  %v18221_v37 = vpop.f32.mrb[20].mxu1  ;;  %v21325_v0 = vld [vmem:[%s28286_s1 + $0x27e8] ss:$28 sps:$4 sm:$0xff]  }
 0x677   :  { %v18222_v4 = vpop.f32.mrb[21].mxu1 }
 0x678   :  { %18370 = vmatpush3.bf16.msra.mxu1 %v21280_v2  ;;  %v18223_v41 = vadd.f32 %v18222_v4, %v18221_v37  ;;  %v18224_v28 = vpop.f32.mrb[22].mxu1  ;;  %v21328_v2 = vld [vmem:[%s28286_s1 + $0x29dc] ss:$28 sps:$4 sm:$0xff]  }
 0x679   :  { %14457 = vmatpush1.bf16.msra.mxu0 %v21276_v1  ;;  %18371 = vmatprep.subr.bf16.mxu1 %v21284_v39  ;;  %v18225_v6 = vpop.f32.mrb[23].mxu1  ;;  %v21326_v4 = vld [vmem:[%s28286_s1 + $0x29d8] ss:$28 sps:$4 sm:$0xff]   ;;  %v21331_v28 = vld [vmem:[%s28286_s1 + $0x2a10] ss:$28 sps:$4 sm:$0xff]  }
 0x67a   :  { %14458 = vmatprep.subr.bf16.mxu0 %v21283_v3  ;;  %v27119_v40 = vadd.f32 %v18223_v41, %v27016_v38  ;;  %v21298_v38 = vld [vmem:[%s28286_s1 + $0x288c] ss:$28 sps:$4 sm:$0xff]   ;;  %v21329_v3 = vld [vmem:[%s28286_s1 + $0x29e0] ss:$28 sps:$4 sm:$0xff]   ;;  %v21334_v41 = vld [vmem:[%s28286_s1 + $0x2bd8] ss:$28 sps:$4 sm:$0xff]  }
 0x67b   :  { %v21339_v6 = vld [vmem:[%s28286_s1 + $0x2c10] ss:$28 sps:$4 sm:$0xff]  }
 0x67c   :  { %18372 = vmatpush3.bf16.msra.mxu1 %v21285_v26  ;;  %v21333_v26 = vld [vmem:[%s28286_s1 + $0x2a14] ss:$28 sps:$4 sm:$0xff]  }
 0x67d   :  { %14459 = vmatpush1.bf16.msra.mxu0 %v21281_v5  ;;  %18373 = vmatprep.subr.bf16.mxu1 %v21289_v19  ;;  %v21330_v5 = vld [vmem:[%s28286_s1 + $0x2820] ss:$28 sps:$4 sm:$0xff]   ;;  %v21338_v19 = vld [vmem:[%s28286_s1 + $0x2a4c] ss:$28 sps:$4 sm:$0xff]  }
 0x67e   :  { %14460 = vmatprep.subr.bf16.mxu0 %v21288_v48  ;;  %v21335_v48 = vld [vmem:[%s28286_s1 + $0x2a18] ss:$28 sps:$4 sm:$0xff]  }
 0x680   :  { %18374 = vmatpush3.bf16.msra.mxu1 %v21290_v25  ;;  %v21343_v25 = vld [vmem:[%s28286_s1 + $0x2a84] ss:$28 sps:$4 sm:$0xff]  }
 0x681   :  { %14461 = vmatpush1.bf16.msra.mxu0 %v21286_v8  ;;  %18381 = vmatprep.subr.bf16.mxu1 %v21294_v18  ;;  %v21340_v8 = vld [vmem:[%s28286_s1 + $0x2a50] ss:$28 sps:$4 sm:$0xff]   ;;  %v21345_v18 = vld [vmem:[%s28286_s1 + $0x2a88] ss:$28 sps:$4 sm:$0xff]  }
 0x682   :  { %14462 = vmatprep.subr.bf16.mxu0 %v21293_v7  ;;  %v21341_v7 = vld [vmem:[%s28286_s1 + $0x2a80] ss:$28 sps:$4 sm:$0xff]  }
 0x683   :  { %15166 = vmatmul.mubr.bf16.vlgmr.msra.gmra.mrb[48].mxu1 %v23486_v52  ;;  %v21304_v52 = vld [vmem:[%s28286_s1 + $0x28c8] ss:$28 sps:$4 sm:$0xff]  }
 0x684   :  { %18382 = vmatpush3.bf16.msra.mxu1 %v21295_v42  ;;  %15205 = vmatprep.mubr.bf16.mxu1 %v23502_v59  ;;  %v21309_v59 = vld [vmem:[%s28286_s1 + $0x2900] ss:$28 sps:$4 sm:$0xff]   ;;  %v21346_v42 = vld [vmem:[%s28286_s1 + $0x2ab8] ss:$28 sps:$4 sm:$0xff]  }
 0x685   :  { %14463 = vmatpush1.bf16.msra.mxu0 %v21291_v36  ;;  %18383 = vmatprep.subr.bf16.mxu1 %v21299_v53  ;;  %v21348_v36 = vld [vmem:[%s28286_s1 + $0x2abc] ss:$28 sps:$4 sm:$0xff]   ;;  %v21353_v53 = vld [vmem:[%s28286_s1 + $0x2af4] ss:$28 sps:$4 sm:$0xff]  }
 0x686   :  { %14464 = vmatprep.subr.bf16.mxu0 %v21298_v38  ;;  %v21350_v38 = vld [vmem:[%s28286_s1 + $0x2ac0] ss:$28 sps:$4 sm:$0xff]  }
 0x688   :  { %18384 = vmatpush3.bf16.msra.mxu1 %v21300_v24  ;;  %v21351_v24 = vld [vmem:[%s28286_s1 + $0x2af0] ss:$28 sps:$4 sm:$0xff]  }
 0x689   :  { %14465 = vmatpush1.bf16.msra.mxu0 %v21296_v23  ;;  %18385 = vmatprep.subr.bf16.mxu1 %v21304_v52  ;;  %v21354_v23 = vld [vmem:[%s28286_s1 + $0x2cb8] ss:$28 sps:$4 sm:$0xff]   ;;  %v21358_v52 = vld [vmem:[%s28286_s1 + $0x2b2c] ss:$28 sps:$4 sm:$0xff]  }
 0x68a   :  { %14466 = vmatprep.subr.bf16.mxu0 %v21303_v9  ;;  %v21355_v9 = vld [vmem:[%s28286_s1 + $0x2af8] ss:$28 sps:$4 sm:$0xff]  }
 0x68c   :  { %18386 = vmatpush3.bf16.msra.mxu1 %v21305_v45  ;;  %v21356_v45 = vld [vmem:[%s28286_s1 + $0x2b28] ss:$28 sps:$4 sm:$0xff]  }
 0x68d   :  { %14467 = vmatpush1.bf16.msra.mxu0 %v21301_v44  ;;  %18387 = vmatprep.subr.bf16.mxu1 %v21309_v59  ;;  %v21359_v44 = vld [vmem:[%s28286_s1 + $0x2cf0] ss:$28 sps:$4 sm:$0xff]   ;;  %v21363_v59 = vld [vmem:[%s28286_s1 + $0x2b64] ss:$28 sps:$4 sm:$0xff]  }
 0x68e   :  { %14468 = vmatprep.subr.bf16.mxu0 %v21308_v10  ;;  %v21360_v10 = vld [vmem:[%s28286_s1 + $0x2b30] ss:$28 sps:$4 sm:$0xff]  }
 0x690   :  { %18388 = vmatpush3.bf16.msra.mxu1 %v21310_v47 }
 0x691   :  { %14469 = vmatpush1.bf16.msra.mxu0 %v21306_v46  ;;  %18389 = vmatprep.subr.bf16.mxu1 %v21314_v54  ;;  %v21364_v46 = vld [vmem:[%s28286_s1 + $0x2d28] ss:$28 sps:$4 sm:$0xff]   ;;  %v21361_v54 = vld [vmem:[%s28286_s1 + $0x2b60] ss:$28 sps:$4 sm:$0xff]  }
 0x692   :  { %14470 = vmatprep.subr.bf16.mxu0 %v21313_v50 }
 0x694   :  { %18390 = vmatpush3.bf16.msra.mxu1 %v21315_v55 }
 0x695   :  { %14471 = vmatpush1.bf16.msra.mxu0 %v21311_v13  ;;  %18391 = vmatprep.subr.bf16.mxu1 %v21319_v30  ;;  %v21365_v13 = vld [vmem:[%s28286_s1 + $0x2b68] ss:$28 sps:$4 sm:$0xff]   ;;  %v21368_v30 = vld [vmem:[%s28286_s1 + $0x2b9c] ss:$28 sps:$4 sm:$0xff]  }
 0x696   :  { %14472 = vmatprep.subr.bf16.mxu0 %v21318_v11  ;;  %v18243_v60 = vpop.f32.mrb[24].mxu1 }
 0x697   :  { %v18244_v61 = vpop.f32.mrb[25].mxu1 }
 0x698   :  { %18392 = vmatpush3.bf16.msra.mxu1 %v21320_v58  ;;  %v18245_v56 = vadd.f32 %v18244_v61, %v18243_v60  ;;  %v18246_v1 = vpop.f32.mrb[26].mxu1  ;;  %v21370_v60 = vld [vmem:[%s28286_s1 + $0x2ba0] ss:$28 sps:$4 sm:$0xff]   ;;  %v21373_v61 = vld [vmem:[%s28286_s1 + $0x2bd4] ss:$28 sps:$4 sm:$0xff]  }
 0x699   :  { %14473 = vmatpush1.bf16.msra.mxu0 %v21316_v17  ;;  %18393 = vmatprep.subr.bf16.mxu1 %v21324_v15  ;;  %v18247_v39 = vpop.f32.mrb[27].mxu1  ;;  %v21369_v17 = vld [vmem:[%s28286_s1 + $0x2d60] ss:$28 sps:$4 sm:$0xff]   ;;  %v21366_v15 = vld [vmem:[%s28286_s1 + $0x2b98] ss:$28 sps:$4 sm:$0xff]  }
 0x69a   :  { %14474 = vmatprep.subr.bf16.mxu0 %v21323_v12  ;;  %v27220_v37 = vadd.f32 %v18245_v56, %v27119_v40  ;;  %v21336_v40 = vld [vmem:[%s28286_s1 + $0x2a48] ss:$28 sps:$4 sm:$0xff]   ;;  %v21375_v56 = vld [vmem:[%s28286_s1 + $0x2d98] ss:$28 sps:$4 sm:$0xff]   ;;  %v21380_v39 = vld [vmem:[%s28286_s1 + $0x2dd0] ss:$28 sps:$4 sm:$0xff]  }
 0x69b   :  { %v21378_v1 = vld [vmem:[%s28286_s1 + $0x2c0c] ss:$28 sps:$4 sm:$0xff]  }
 0x69c   :  { %18394 = vmatpush3.bf16.msra.mxu1 %v21325_v0  ;;  %v21371_v0 = vld [vmem:[%s28286_s1 + $0x2bd0] ss:$28 sps:$4 sm:$0xff]  }
 0x69d   :  { %14475 = vmatpush1.bf16.msra.mxu0 %v21321_v63  ;;  %18395 = vmatprep.subr.bf16.mxu1 %v21329_v3  ;;  %v21374_v63 = vld [vmem:[%s28286_s1 + $0x2f58] ss:$28 sps:$4 sm:$0xff]   ;;  %v21376_v3 = vld [vmem:[%s28286_s1 + $0x2c08] ss:$28 sps:$4 sm:$0xff]  }
 0x69e   :  { %14476 = vmatprep.subr.bf16.mxu0 %v21328_v2  ;;  %v21379_v2 = vld [vmem:[%s28286_s1 + $0x2f90] ss:$28 sps:$4 sm:$0xff]  }
 0x6a0   :  { %18396 = vmatpush3.bf16.msra.mxu1 %v21330_v5  ;;  %v21381_v5 = vld [vmem:[%s28286_s1 + $0x2c40] ss:$28 sps:$4 sm:$0xff]  }
 0x6a1   :  { %14477 = vmatpush1.bf16.msra.mxu0 %v21326_v4  ;;  %18403 = vmatprep.subr.bf16.mxu1 %v21334_v41  ;;  %v21384_v4 = vld [vmem:[%s28286_s1 + $0x2fc8] ss:$28 sps:$4 sm:$0xff]   ;;  %v21388_v41 = vld [vmem:[%s28286_s1 + $0x2c7c] ss:$28 sps:$4 sm:$0xff]  }
 0x6a2   :  { %14487 = vmatprep.subr.bf16.mxu0 %v21333_v26  ;;  %v21385_v26 = vld [vmem:[%s28286_s1 + $0x2e08] ss:$28 sps:$4 sm:$0xff]  }
 0x6a3   :  { %15206 = vmatmul.mubr.bf16.vlgmr.msra.gmra.mrb[52].mxu1 %v23695_v33 }
 0x6a4   :  { %14479 = vmatmul.mubr.bf16.vlgmr.msra.gmra.mrb[4].mxu0 %v23695_v33  ;;  %18404 = vmatpush3.bf16.msra.mxu1 %v21335_v48  ;;  %v21344_v33 = vld [vmem:[%s28286_s1 + $0x2c48] ss:$28 sps:$4 sm:$0xff]   ;;  %v21386_v48 = vld [vmem:[%s28286_s1 + $0x2c78] ss:$28 sps:$4 sm:$0xff]  }
 0x6a5   :  { %14488 = vmatpush1.bf16.msra.mxu0 %v21331_v28  ;;  %18405 = vmatprep.subr.bf16.mxu1 %v21339_v6  ;;  %v21389_v28 = vld [vmem:[%s28286_s1 + $0x3000] ss:$28 sps:$4 sm:$0xff]   ;;  %v21393_v6 = vld [vmem:[%s28286_s1 + $0x2cb4] ss:$28 sps:$4 sm:$0xff]  }
 0x6a6   :  { %14489 = vmatprep.subr.bf16.mxu0 %v21338_v19  ;;  %15245 = vmatprep.mubr.bf16.mxu1 %v23711_v43  ;;  %v21390_v19 = vld [vmem:[%s28286_s1 + $0x2e40] ss:$28 sps:$4 sm:$0xff]  }
 0x6a7   :  { %14519 = vmatprep.mubr.bf16.mxu0 %v23711_v43  ;;  %v21349_v43 = vld [vmem:[%s28286_s1 + $0x2c80] ss:$28 sps:$4 sm:$0xff]  }
 0x6a8   :  { %18406 = vmatpush3.bf16.msra.mxu1 %v21340_v8  ;;  %v21391_v8 = vld [vmem:[%s28286_s1 + $0x2cb0] ss:$28 sps:$4 sm:$0xff]  }
 0x6a9   :  { %14490 = vmatpush1.bf16.msra.mxu0 %v21336_v40  ;;  %18407 = vmatprep.subr.bf16.mxu1 %v21344_v33  ;;  %v21394_v40 = vld [vmem:[%s28286_s1 + $0x3038] ss:$28 sps:$4 sm:$0xff]   ;;  %v21398_v33 = vld [vmem:[%s28286_s1 + $0x2cec] ss:$28 sps:$4 sm:$0xff]  }
 0x6aa   :  { %14491 = vmatprep.subr.bf16.mxu0 %v21343_v25  ;;  %v21395_v25 = vld [vmem:[%s28286_s1 + $0x2e78] ss:$28 sps:$4 sm:$0xff]  }
 0x6ac   :  { %18408 = vmatpush3.bf16.msra.mxu1 %v21345_v18  ;;  %v21396_v18 = vld [vmem:[%s28286_s1 + $0x2ce8] ss:$28 sps:$4 sm:$0xff]  }
 0x6ad   :  { %14492 = vmatpush1.bf16.msra.mxu0 %v21341_v7  ;;  %18409 = vmatprep.subr.bf16.mxu1 %v21349_v43  ;;  %v21399_v7 = vld [vmem:[%s28286_s1 + $0x3070] ss:$28 sps:$4 sm:$0xff]   ;;  %v21403_v43 = vld [vmem:[%s28286_s1 + $0x2d24] ss:$28 sps:$4 sm:$0xff]  }
 0x6ae   :  { %14493 = vmatprep.subr.bf16.mxu0 %v21348_v36  ;;  %v21400_v36 = vld [vmem:[%s28286_s1 + $0x2eb0] ss:$28 sps:$4 sm:$0xff]  }
 0x6b0   :  { %18410 = vmatpush3.bf16.msra.mxu1 %v21350_v38 }
 0x6b1   :  { %14494 = vmatpush1.bf16.msra.mxu0 %v21346_v42  ;;  %18411 = vmatprep.subr.bf16.mxu1 %v21354_v23  ;;  %v21404_v42 = vld [vmem:[%s28286_s1 + $0x30a8] ss:$28 sps:$4 sm:$0xff]   ;;  %v21401_v23 = vld [vmem:[%s28286_s1 + $0x2d20] ss:$28 sps:$4 sm:$0xff]  }
 0x6b2   :  { %14495 = vmatprep.subr.bf16.mxu0 %v21353_v53 }
 0x6b4   :  { %18412 = vmatpush3.bf16.msra.mxu1 %v21355_v9 }
 0x6b5   :  { %14496 = vmatpush1.bf16.msra.mxu0 %v21351_v24  ;;  %18413 = vmatprep.subr.bf16.mxu1 %v21359_v44  ;;  %v21405_v24 = vld [vmem:[%s28286_s1 + $0x2ee8] ss:$28 sps:$4 sm:$0xff]   ;;  %v21408_v44 = vld [vmem:[%s28286_s1 + $0x2d5c] ss:$28 sps:$4 sm:$0xff]  }
 0x6b6   :  { %14497 = vmatprep.subr.bf16.mxu0 %v21358_v52  ;;  %v18265_v47 = vpop.f32.mrb[28].mxu1 }
 0x6b7   :  { %v18266_v50 = vpop.f32.mrb[29].mxu1 }
 0x6b8   :  { %18414 = vmatpush3.bf16.msra.mxu1 %v21360_v10  ;;  %v18267_v55 = vadd.f32 %v18266_v50, %v18265_v47  ;;  %v18268_v11 = vpop.f32.mrb[30].mxu1  ;;  %v21410_v47 = vld [vmem:[%s28286_s1 + $0x2f20] ss:$28 sps:$4 sm:$0xff]   ;;  %v21413_v50 = vld [vmem:[%s28286_s1 + $0x2d94] ss:$28 sps:$4 sm:$0xff]  }
 0x6b9   :  { %14498 = vmatpush1.bf16.msra.mxu0 %v21356_v45  ;;  %18415 = vmatprep.subr.bf16.mxu1 %v21364_v46  ;;  %v18269_v58 = vpop.f32.mrb[31].mxu1  ;;  %v21409_v45 = vld [vmem:[%s28286_s1 + $0x30e0] ss:$28 sps:$4 sm:$0xff]   ;;  %v21406_v46 = vld [vmem:[%s28286_s1 + $0x2d58] ss:$28 sps:$4 sm:$0xff]  }
 0x6ba   :  { %14499 = vmatprep.subr.bf16.mxu0 %v21363_v59  ;;  %v27323_v12 = vadd.f32 %v18267_v55, %v27220_v37  ;;  %v21383_v37 = vld [vmem:[%s28286_s1 + $0x2c44] ss:$28 sps:$4 sm:$0xff]   ;;  %v21415_v55 = vld [vmem:[%s28286_s1 + $0x3118] ss:$28 sps:$4 sm:$0xff]   ;;  %v21418_v11 = vld [vmem:[%s28286_s1 + $0x2dcc] ss:$28 sps:$4 sm:$0xff]  }
 0x6bb   :  { %v21420_v58 = vld [vmem:[%s28286_s1 + $0x3150] ss:$28 sps:$4 sm:$0xff]  }
 0x6bc   :  { %18416 = vmatpush3.bf16.msra.mxu1 %v21365_v13  ;;  %v21411_v13 = vld [vmem:[%s28286_s1 + $0x2d90] ss:$28 sps:$4 sm:$0xff]  }
 0x6bd   :  { %14500 = vmatpush1.bf16.msra.mxu0 %v21361_v54  ;;  %18417 = vmatprep.subr.bf16.mxu1 %v21369_v17  ;;  %v21414_v54 = vld [vmem:[%s28286_s1 + $0x32d8] ss:$28 sps:$4 sm:$0xff]   ;;  %v21416_v17 = vld [vmem:[%s28286_s1 + $0x2dc8] ss:$28 sps:$4 sm:$0xff]  }
 0x6be   :  { %14501 = vmatprep.subr.bf16.mxu0 %v21368_v30  ;;  %v21419_v30 = vld [vmem:[%s28286_s1 + $0x3310] ss:$28 sps:$4 sm:$0xff]  }
 0x6c0   :  { %18418 = vmatpush3.bf16.msra.mxu1 %v21370_v60  ;;  %v21425_v60 = vld [vmem:[%s28286_s1 + $0x3188] ss:$28 sps:$4 sm:$0xff]  }
 0x6c1   :  { %14502 = vmatpush1.bf16.msra.mxu0 %v21366_v15  ;;  %18425 = vmatprep.subr.bf16.mxu1 %v21374_v63  ;;  %v21424_v15 = vld [vmem:[%s28286_s1 + $0x3348] ss:$28 sps:$4 sm:$0xff]   ;;  %v21426_v63 = vld [vmem:[%s28286_s1 + $0x2e38] ss:$28 sps:$4 sm:$0xff]  }
 0x6c2   :  { %14503 = vmatprep.subr.bf16.mxu0 %v21373_v61  ;;  %v21428_v61 = vld [vmem:[%s28286_s1 + $0x2e3c] ss:$28 sps:$4 sm:$0xff]  }
 0x6c3   :  { %15246 = vmatmul.mubr.bf16.vlgmr.msra.gmra.mrb[56].mxu1 %v23904_v21 }
 0x6c4   :  { %18426 = vmatpush3.bf16.msra.mxu1 %v21375_v56  ;;  %15285 = vmatprep.mubr.bf16.mxu1 %v23920_v29  ;;  %v21433_v56 = vld [vmem:[%s28286_s1 + $0x2e74] ss:$28 sps:$4 sm:$0xff]  }
 0x6c5   :  { %14504 = vmatpush1.bf16.msra.mxu0 %v21371_v0  ;;  %18427 = vmatprep.subr.bf16.mxu1 %v21379_v2  ;;  %v21430_v0 = vld [vmem:[%s28286_s1 + $0x31c0] ss:$28 sps:$4 sm:$0xff]   ;;  %v21431_v2 = vld [vmem:[%s28286_s1 + $0x2e70] ss:$28 sps:$4 sm:$0xff]  }
 0x6c6   :  { %14505 = vmatprep.subr.bf16.mxu0 %v21378_v1  ;;  %v21434_v1 = vld [vmem:[%s28286_s1 + $0x33b8] ss:$28 sps:$4 sm:$0xff]  }
 0x6c8   :  { %18428 = vmatpush3.bf16.msra.mxu1 %v21380_v39  ;;  %v21438_v39 = vld [vmem:[%s28286_s1 + $0x2eac] ss:$28 sps:$4 sm:$0xff]  }
 0x6c9   :  { %14506 = vmatpush1.bf16.msra.mxu0 %v21376_v3  ;;  %18429 = vmatprep.subr.bf16.mxu1 %v21384_v4  ;;  %v21435_v3 = vld [vmem:[%s28286_s1 + $0x31f8] ss:$28 sps:$4 sm:$0xff]   ;;  %v21436_v4 = vld [vmem:[%s28286_s1 + $0x2ea8] ss:$28 sps:$4 sm:$0xff]  }
 0x6ca   :  { %14507 = vmatprep.subr.bf16.mxu0 %v21383_v37  ;;  %v21439_v37 = vld [vmem:[%s28286_s1 + $0x33f0] ss:$28 sps:$4 sm:$0xff]  }
 0x6cc   :  { %18430 = vmatpush3.bf16.msra.mxu1 %v21385_v26  ;;  %v21443_v26 = vld [vmem:[%s28286_s1 + $0x2ee4] ss:$28 sps:$4 sm:$0xff]  }
 0x6cd   :  { %14508 = vmatpush1.bf16.msra.mxu0 %v21381_v5  ;;  %18431 = vmatprep.subr.bf16.mxu1 %v21389_v28  ;;  %v21440_v5 = vld [vmem:[%s28286_s1 + $0x3230] ss:$28 sps:$4 sm:$0xff]  }
 0x6ce   :  { %14509 = vmatprep.subr.bf16.mxu0 %v21388_v41  ;;  %v21444_v41 = vld [vmem:[%s28286_s1 + $0x3428] ss:$28 sps:$4 sm:$0xff]  }
 0x6d0   :  { %18432 = vmatpush3.bf16.msra.mxu1 %v21390_v19  ;;  %v21445_v19 = vld [vmem:[%s28286_s1 + $0x3268] ss:$28 sps:$4 sm:$0xff]  }
 0x6d1   :  { %14510 = vmatpush1.bf16.msra.mxu0 %v21386_v48  ;;  %18433 = vmatprep.subr.bf16.mxu1 %v21394_v40  ;;  %v21441_v48 = vld [vmem:[%s28286_s1 + $0x2ee0] ss:$28 sps:$4 sm:$0xff]  }
 0x6d2   :  { %14511 = vmatprep.subr.bf16.mxu0 %v21393_v6  ;;  %v21448_v40 = vld [vmem:[%s28286_s1 + $0x2f1c] ss:$28 sps:$4 sm:$0xff]  }
 0x6d4   :  { %18434 = vmatpush3.bf16.msra.mxu1 %v21395_v25 }
 0x6d5   :  { %14512 = vmatpush1.bf16.msra.mxu0 %v21391_v8  ;;  %18435 = vmatprep.subr.bf16.mxu1 %v21399_v7  ;;  %v21449_v8 = vld [vmem:[%s28286_s1 + $0x3460] ss:$28 sps:$4 sm:$0xff]  }
 0x6d6   :  { %14513 = vmatprep.subr.bf16.mxu0 %v21398_v33  ;;  %v18287_v38 = vpop.f32.mrb[32].mxu1 }
 0x6d7   :  { %v18288_v53 = vpop.f32.mrb[33].mxu1 }
 0x6d8   :  { %18436 = vmatpush3.bf16.msra.mxu1 %v21400_v36  ;;  %v18289_v9 = vadd.f32 %v18288_v53, %v18287_v38  ;;  %v18290_v52 = vpop.f32.mrb[34].mxu1  ;;  %v21446_v36 = vld [vmem:[%s28286_s1 + $0x2f18] ss:$28 sps:$4 sm:$0xff]   ;;  %v21451_v53 = vld [vmem:[%s28286_s1 + $0x2f50] ss:$28 sps:$4 sm:$0xff]  }
 0x6d9   :  { %14514 = vmatpush1.bf16.msra.mxu0 %v21396_v18  ;;  %18437 = vmatprep.subr.bf16.mxu1 %v21404_v42  ;;  %v18291_v10 = vpop.f32.mrb[35].mxu1  ;;  %v21453_v42 = vld [vmem:[%s28286_s1 + $0x2f54] ss:$28 sps:$4 sm:$0xff]   ;;  %v21456_v52 = vld [vmem:[%s28286_s1 + $0x2f88] ss:$28 sps:$4 sm:$0xff]  }
 0x6da   :  { %14515 = vmatprep.subr.bf16.mxu0 %v21403_v43  ;;  %v27424_v59 = vadd.f32 %v18289_v9, %v27323_v12  ;;  %v21423_v12 = vld [vmem:[%s28286_s1 + $0x2e04] ss:$28 sps:$4 sm:$0xff]   ;;  %v21454_v38 = vld [vmem:[%s28286_s1 + $0x3658] ss:$28 sps:$4 sm:$0xff]   ;;  %v21459_v9 = vld [vmem:[%s28286_s1 + $0x3690] ss:$28 sps:$4 sm:$0xff]  }
 0x6db   :  { %v21450_v43 = vld [vmem:[%s28286_s1 + $0x32a0] ss:$28 sps:$4 sm:$0xff]   ;;  %v21464_v10 = vld [vmem:[%s28286_s1 + $0x36c8] ss:$28 sps:$4 sm:$0xff]  }
 0x6dc   :  { %18438 = vmatpush3.bf16.msra.mxu1 %v21405_v24  ;;  %v21458_v24 = vld [vmem:[%s28286_s1 + $0x2f8c] ss:$28 sps:$4 sm:$0xff]  }
 0x6dd   :  { %14516 = vmatpush1.bf16.msra.mxu0 %v21401_v23  ;;  %18439 = vmatprep.subr.bf16.mxu1 %v21409_v45  ;;  %v21455_v23 = vld [vmem:[%s28286_s1 + $0x3498] ss:$28 sps:$4 sm:$0xff]   ;;  %v21463_v45 = vld [vmem:[%s28286_s1 + $0x2fc4] ss:$28 sps:$4 sm:$0xff]  }
 0x6de   :  { %14517 = vmatprep.subr.bf16.mxu0 %v21408_v44  ;;  %v21460_v44 = vld [vmem:[%s28286_s1 + $0x34d0] ss:$28 sps:$4 sm:$0xff]  }
 0x6e0   :  { %18440 = vmatpush3.bf16.msra.mxu1 %v21410_v47  ;;  %v21468_v47 = vld [vmem:[%s28286_s1 + $0x2ffc] ss:$28 sps:$4 sm:$0xff]  }
 0x6e1   :  { %14518 = vmatpush1.bf16.msra.mxu0 %v21406_v46  ;;  %18447 = vmatprep.subr.bf16.mxu1 %v21414_v54  ;;  %v21465_v46 = vld [vmem:[%s28286_s1 + $0x3508] ss:$28 sps:$4 sm:$0xff]   ;;  %v21466_v54 = vld [vmem:[%s28286_s1 + $0x2ff8] ss:$28 sps:$4 sm:$0xff]  }
 0x6e2   :  { %14528 = vmatprep.subr.bf16.mxu0 %v21413_v50  ;;  %v21469_v50 = vld [vmem:[%s28286_s1 + $0x3700] ss:$28 sps:$4 sm:$0xff]  }
 0x6e3   :  { %15286 = vmatmul.mubr.bf16.vlgmr.msra.gmra.mrb[60].mxu1 %v24113_v57 }
 0x6e4   :  { %14520 = vmatmul.mubr.bf16.vlgmr.msra.gmra.mrb[4].mxu0 %v23904_v21  ;;  %18448 = vmatpush3.bf16.msra.mxu1 %v21415_v55  ;;  %v21421_v21 = vld [vmem:[%s28286_s1 + $0x2e00] ss:$28 sps:$4 sm:$0xff]   ;;  %v21473_v55 = vld [vmem:[%s28286_s1 + $0x3034] ss:$28 sps:$4 sm:$0xff]  }
 0x6e5   :  { %14529 = vmatpush1.bf16.msra.mxu0 %v21411_v13  ;;  %18449 = vmatprep.subr.bf16.mxu1 %v21419_v30  ;;  %v21470_v13 = vld [vmem:[%s28286_s1 + $0x3540] ss:$28 sps:$4 sm:$0xff]   ;;  %v21471_v30 = vld [vmem:[%s28286_s1 + $0x3030] ss:$28 sps:$4 sm:$0xff]  }
 0x6e6   :  { %14530 = vmatprep.subr.bf16.mxu0 %v21418_v11  ;;  %15325 = vmatprep.mubr.bf16.mxu1 %v24129_v27  ;;  %v21474_v11 = vld [vmem:[%s28286_s1 + $0x3738] ss:$28 sps:$4 sm:$0xff]  }
 0x6e7   :  { %14560 = vmatprep.mubr.bf16.mxu0 %v23920_v29  ;;  %v21429_v29 = vld [vmem:[%s28286_s1 + $0x3380] ss:$28 sps:$4 sm:$0xff]  }
 0x6e8   :  { %18450 = vmatpush3.bf16.msra.mxu1 %v21420_v58  ;;  %v21478_v58 = vld [vmem:[%s28286_s1 + $0x306c] ss:$28 sps:$4 sm:$0xff]  }
 0x6e9   :  { %14531 = vmatpush1.bf16.msra.mxu0 %v21416_v17  ;;  %18451 = vmatprep.subr.bf16.mxu1 %v21424_v15  ;;  %v21475_v17 = vld [vmem:[%s28286_s1 + $0x3578] ss:$28 sps:$4 sm:$0xff]   ;;  %v21476_v15 = vld [vmem:[%s28286_s1 + $0x3068] ss:$28 sps:$4 sm:$0xff]  }
 0x6ea   :  { %14532 = vmatprep.subr.bf16.mxu0 %v21423_v12  ;;  %v21479_v12 = vld [vmem:[%s28286_s1 + $0x3770] ss:$28 sps:$4 sm:$0xff]  }
 0x6ec   :  { %18452 = vmatpush3.bf16.msra.mxu1 %v21425_v60  ;;  %v21483_v60 = vld [vmem:[%s28286_s1 + $0x30a4] ss:$28 sps:$4 sm:$0xff]  }
 0x6ed   :  { %14533 = vmatpush1.bf16.msra.mxu0 %v21421_v21  ;;  %18453 = vmatprep.subr.bf16.mxu1 %v21429_v29  ;;  %v21480_v21 = vld [vmem:[%s28286_s1 + $0x35b0] ss:$28 sps:$4 sm:$0xff]  }
 0x6ee   :  { %14534 = vmatprep.subr.bf16.mxu0 %v21428_v61  ;;  %v21484_v61 = vld [vmem:[%s28286_s1 + $0x37a8] ss:$28 sps:$4 sm:$0xff]  }
 0x6f0   :  { %18454 = vmatpush3.bf16.msra.mxu1 %v21430_v0  ;;  %v21485_v0 = vld [vmem:[%s28286_s1 + $0x35e8] ss:$28 sps:$4 sm:$0xff]  }
 0x6f1   :  { %14535 = vmatpush1.bf16.msra.mxu0 %v21426_v63  ;;  %18455 = vmatprep.subr.bf16.mxu1 %v21434_v1  ;;  %v21481_v63 = vld [vmem:[%s28286_s1 + $0x30a0] ss:$28 sps:$4 sm:$0xff]  }
 0x6f2   :  { %14536 = vmatprep.subr.bf16.mxu0 %v21433_v56  ;;  %v21488_v1 = vld [vmem:[%s28286_s1 + $0x30dc] ss:$28 sps:$4 sm:$0xff]  }
 0x6f4   :  { %18456 = vmatpush3.bf16.msra.mxu1 %v21435_v3 }
 0x6f5   :  { %14537 = vmatpush1.bf16.msra.mxu0 %v21431_v2  ;;  %18457 = vmatprep.subr.bf16.mxu1 %v21439_v37 }
 0x6f6   :  { %14538 = vmatprep.subr.bf16.mxu0 %v21438_v39  ;;  %v18309_v28 = vpop.f32.mrb[36].mxu1  ;;  %v21489_v39 = vld [vmem:[%s28286_s1 + $0x37e0] ss:$28 sps:$4 sm:$0xff]  }
 0x6f7   :  { %v18310_v6 = vpop.f32.mrb[37].mxu1 }
 0x6f8   :  { %v18311_v25 = vadd.f32 %v18310_v6, %v18309_v28  ;;  %18458 = vmatpush3.bf16.msra.mxu1 %v21440_v5  ;;  %v18312_v33 = vpop.f32.mrb[38].mxu1  ;;  %v21486_v5 = vld [vmem:[%s28286_s1 + $0x30d8] ss:$28 sps:$4 sm:$0xff]   ;;  %v21498_v6 = vld [vmem:[%s28286_s1 + $0x314c] ss:$28 sps:$4 sm:$0xff]  }
 0x6f9   :  { %14539 = vmatpush1.bf16.msra.mxu0 %v21436_v4  ;;  %18459 = vmatprep.subr.bf16.mxu1 %v21444_v41  ;;  %v18313_v7 = vpop.f32.mrb[39].mxu1  ;;  %v21493_v41 = vld [vmem:[%s28286_s1 + $0x3114] ss:$28 sps:$4 sm:$0xff]   ;;  %v21503_v33 = vld [vmem:[%s28286_s1 + $0x3184] ss:$28 sps:$4 sm:$0xff]  }
 0x6fa   :  { %14540 = vmatprep.subr.bf16.mxu0 %v21443_v26  ;;  %v27527_v18 = vadd.f32 %v18311_v25, %v27424_v59  ;;  %v21461_v59 = vld [vmem:[%s28286_s1 + $0x2fc0] ss:$28 sps:$4 sm:$0xff]   ;;  %v21494_v28 = vld [vmem:[%s28286_s1 + $0x39d8] ss:$28 sps:$4 sm:$0xff]   ;;  %v21500_v25 = vld [vmem:[%s28286_s1 + $0x3850] ss:$28 sps:$4 sm:$0xff]  }
 0x6fb   :  { %v21490_v26 = vld [vmem:[%s28286_s1 + $0x3620] ss:$28 sps:$4 sm:$0xff]  }
 0x6fc   :  { %18460 = vmatpush3.bf16.msra.mxu1 %v21445_v19  ;;  %v21495_v19 = vld [vmem:[%s28286_s1 + $0x3818] ss:$28 sps:$4 sm:$0xff]   ;;  %v21501_v7 = vld [vmem:[%s28286_s1 + $0x3180] ss:$28 sps:$4 sm:$0xff]  }
 0x6fd   :  { %14541 = vmatpush1.bf16.msra.mxu0 %v21441_v48  ;;  %18461 = vmatprep.subr.bf16.mxu1 %v21449_v8  ;;  %v21491_v48 = vld [vmem:[%s28286_s1 + $0x3110] ss:$28 sps:$4 sm:$0xff]   ;;  %v21496_v8 = vld [vmem:[%s28286_s1 + $0x3148] ss:$28 sps:$4 sm:$0xff]  }
 0x6fe   :  { %14542 = vmatprep.subr.bf16.mxu0 %v21448_v40  ;;  %v21499_v40 = vld [vmem:[%s28286_s1 + $0x3a10] ss:$28 sps:$4 sm:$0xff]  }
 0x700   :  { %18462 = vmatpush3.bf16.msra.mxu1 %v21450_v43  ;;  %v21506_v43 = vld [vmem:[%s28286_s1 + $0x31b8] ss:$28 sps:$4 sm:$0xff]  }
 0x701   :  { %14543 = vmatpush1.bf16.msra.mxu0 %v21446_v36  ;;  %18469 = vmatprep.subr.bf16.mxu1 %v21454_v38  ;;  %v21508_v36 = vld [vmem:[%s28286_s1 + $0x31bc] ss:$28 sps:$4 sm:$0xff]   ;;  %v21513_v38 = vld [vmem:[%s28286_s1 + $0x31f4] ss:$28 sps:$4 sm:$0xff]  }
 0x702   :  { %14544 = vmatprep.subr.bf16.mxu0 %v21453_v42  ;;  %v21510_v42 = vld [vmem:[%s28286_s1 + $0x38c0] ss:$28 sps:$4 sm:$0xff]  }
 0x703   :  { %15326 = vmatmul.mubr.bf16.vlgmr.msra.gmra.mrb[64].mxu1 %v24322_v22 }
 0x704   :  { %18470 = vmatpush3.bf16.msra.mxu1 %v21455_v23  ;;  %15365 = vmatprep.mubr.bf16.mxu1 %v24338_v32  ;;  %v21511_v23 = vld [vmem:[%s28286_s1 + $0x31f0] ss:$28 sps:$4 sm:$0xff]  }
 0x705   :  { %14545 = vmatpush1.bf16.msra.mxu0 %v21451_v53  ;;  %18471 = vmatprep.subr.bf16.mxu1 %v21459_v9  ;;  %v21514_v53 = vld [vmem:[%s28286_s1 + $0x3ab8] ss:$28 sps:$4 sm:$0xff]   ;;  %v21518_v9 = vld [vmem:[%s28286_s1 + $0x322c] ss:$28 sps:$4 sm:$0xff]  }
 0x706   :  { %14546 = vmatprep.subr.bf16.mxu0 %v21458_v24  ;;  %v21515_v24 = vld [vmem:[%s28286_s1 + $0x38f8] ss:$28 sps:$4 sm:$0xff]  }
 0x708   :  { %18472 = vmatpush3.bf16.msra.mxu1 %v21460_v44  ;;  %v21516_v44 = vld [vmem:[%s28286_s1 + $0x3228] ss:$28 sps:$4 sm:$0xff]  }
 0x709   :  { %14547 = vmatpush1.bf16.msra.mxu0 %v21456_v52  ;;  %18473 = vmatprep.subr.bf16.mxu1 %v21464_v10  ;;  %v21519_v52 = vld [vmem:[%s28286_s1 + $0x3af0] ss:$28 sps:$4 sm:$0xff]   ;;  %v21523_v10 = vld [vmem:[%s28286_s1 + $0x3264] ss:$28 sps:$4 sm:$0xff]  }
 0x70a   :  { %14548 = vmatprep.subr.bf16.mxu0 %v21463_v45  ;;  %v21520_v45 = vld [vmem:[%s28286_s1 + $0x3930] ss:$28 sps:$4 sm:$0xff]  }
 0x70c   :  { %18474 = vmatpush3.bf16.msra.mxu1 %v21465_v46 }
 0x70d   :  { %14549 = vmatpush1.bf16.msra.mxu0 %v21461_v59  ;;  %18475 = vmatprep.subr.bf16.mxu1 %v21469_v50  ;;  %v21524_v59 = vld [vmem:[%s28286_s1 + $0x3b28] ss:$28 sps:$4 sm:$0xff]  }
 0x70e   :  { %14550 = vmatprep.subr.bf16.mxu0 %v21468_v47 }
 0x710   :  { %18476 = vmatpush3.bf16.msra.mxu1 %v21470_v13  ;;  %v21525_v13 = vld [vmem:[%s28286_s1 + $0x3968] ss:$28 sps:$4 sm:$0xff]  }
 0x711   :  { %14551 = vmatpush1.bf16.msra.mxu0 %v21466_v54  ;;  %18477 = vmatprep.subr.bf16.mxu1 %v21474_v11  ;;  %v21521_v54 = vld [vmem:[%s28286_s1 + $0x3260] ss:$28 sps:$4 sm:$0xff]  }
 0x712   :  { %14552 = vmatprep.subr.bf16.mxu0 %v21473_v55  ;;  %v21528_v11 = vld [vmem:[%s28286_s1 + $0x329c] ss:$28 sps:$4 sm:$0xff]  }
 0x714   :  { %18478 = vmatpush3.bf16.msra.mxu1 %v21475_v17 }
 0x715   :  { %14553 = vmatpush1.bf16.msra.mxu0 %v21471_v30  ;;  %18479 = vmatprep.subr.bf16.mxu1 %v21479_v12  ;;  %v21529_v30 = vld [vmem:[%s28286_s1 + $0x3b60] ss:$28 sps:$4 sm:$0xff]   ;;  %v21526_v12 = vld [vmem:[%s28286_s1 + $0x3298] ss:$28 sps:$4 sm:$0xff]  }
 0x716   :  { %14554 = vmatprep.subr.bf16.mxu0 %v21478_v58  ;;  %v18331_v29 = vpop.f32.mrb[40].mxu1 }
 0x717   :  { %v18332_v56 = vpop.f32.mrb[41].mxu1 }
 0x718   :  { %v18333_v2 = vadd.f32 %v18332_v56, %v18331_v29  ;;  %18480 = vmatpush3.bf16.msra.mxu1 %v21480_v21  ;;  %v18334_v3 = vpop.f32.mrb[42].mxu1  ;;  %v21533_v21 = vld [vmem:[%s28286_s1 + $0x32d4] ss:$28 sps:$4 sm:$0xff]   ;;  %v21744_v29 = vmov 0.0  }
 0x719   :  { %14555 = vmatpush1.bf16.msra.mxu0 %v21476_v15  ;;  %18481 = vmatprep.subr.bf16.mxu1 %v21484_v61  ;;  %v18335_v37 = vpop.f32.mrb[43].mxu1  ;;  %v21530_v15 = vld [vmem:[%s28286_s1 + $0x39a0] ss:$28 sps:$4 sm:$0xff]   ;;  %v21534_v61 = vld [vmem:[%s28286_s1 + $0x3b98] ss:$28 sps:$4 sm:$0xff]  }
 0x71a   :  { %14556 = vmatprep.subr.bf16.mxu0 %v21483_v60  ;;  %v27628_v4 = vadd.f32 %v18333_v2, %v27527_v18  ;;  %v21505_v18 = vld [vmem:[%s28286_s1 + $0x3888] ss:$28 sps:$4 sm:$0xff]   ;;  %v21531_v60 = vld [vmem:[%s28286_s1 + $0x32d0] ss:$28 sps:$4 sm:$0xff]   ;;  %v21539_v2 = vld [vmem:[%s28286_s1 + $0x3340] ss:$28 sps:$4 sm:$0xff]  }
 0x71b   :  { %v21538_v56 = vld [vmem:[%s28286_s1 + $0x3bd0] ss:$28 sps:$4 sm:$0xff]   ;;  %v21542_v3 = vld [vmem:[%s28286_s1 + $0x3c08] ss:$28 sps:$4 sm:$0xff]   ;;  %v21543_v37 = vld [vmem:[%s28286_s1 + $0x3378] ss:$28 sps:$4 sm:$0xff]  }
 0x71c   :  { %18482 = vmatpush3.bf16.msra.mxu1 %v21485_v0  ;;  %v21535_v0 = vld [vmem:[%s28286_s1 + $0x3308] ss:$28 sps:$4 sm:$0xff]  }
 0x71d   :  { %14557 = vmatpush1.bf16.msra.mxu0 %v21481_v63  ;;  %18483 = vmatprep.subr.bf16.mxu1 %v21489_v39  ;;  %v21537_v63 = vld [vmem:[%s28286_s1 + $0x330c] ss:$28 sps:$4 sm:$0xff]   ;;  %v21545_v39 = vld [vmem:[%s28286_s1 + $0x337c] ss:$28 sps:$4 sm:$0xff]  }
 0x71e   :  { %14558 = vmatprep.subr.bf16.mxu0 %v21488_v1  ;;  %v21541_v1 = vld [vmem:[%s28286_s1 + $0x3344] ss:$28 sps:$4 sm:$0xff]  }
 0x720   :  { %18484 = vmatpush3.bf16.msra.mxu1 %v21490_v26  ;;  %v21547_v26 = vld [vmem:[%s28286_s1 + $0x33b0] ss:$28 sps:$4 sm:$0xff]  }
 0x721   :  { %14559 = vmatpush1.bf16.msra.mxu0 %v21486_v5  ;;  %18491 = vmatprep.subr.bf16.mxu1 %v21494_v28  ;;  %v21549_v5 = vld [vmem:[%s28286_s1 + $0x33b4] ss:$28 sps:$4 sm:$0xff]   ;;  %v21553_v28 = vld [vmem:[%s28286_s1 + $0x33ec] ss:$28 sps:$4 sm:$0xff]  }
 0x722   :  { %14569 = vmatprep.subr.bf16.mxu0 %v21493_v41  ;;  %v21550_v41 = vld [vmem:[%s28286_s1 + $0x3c78] ss:$28 sps:$4 sm:$0xff]  }
 0x723   :  { %15366 = vmatmul.mubr.bf16.vlgmr.msra.gmra.mrb[68].mxu1 %v24531_v31 }
 0x724   :  { %14561 = vmatmul.mubr.bf16.vlgmr.msra.gmra.mrb[4].mxu0 %v24113_v57  ;;  %18492 = vmatpush3.bf16.msra.mxu1 %v21495_v19  ;;  %v21504_v57 = vld [vmem:[%s28286_s1 + $0x3a48] ss:$28 sps:$4 sm:$0xff]   ;;  %v21554_v19 = vld [vmem:[%s28286_s1 + $0x3cb0] ss:$28 sps:$4 sm:$0xff]  }
 0x725   :  { %14570 = vmatpush1.bf16.msra.mxu0 %v21491_v48  ;;  %18493 = vmatprep.subr.bf16.mxu1 %v21499_v40  ;;  %v21551_v48 = vld [vmem:[%s28286_s1 + $0x33e8] ss:$28 sps:$4 sm:$0xff]  }
 0x726   :  { %14571 = vmatprep.subr.bf16.mxu0 %v21498_v6  ;;  %15405 = vmatprep.mubr.bf16.mxu1 %v24547_v51  ;;  %v21557_v6 = vld [vmem:[%s28286_s1 + $0x3424] ss:$28 sps:$4 sm:$0xff]  }
 0x727   :  { %14601 = vmatprep.mubr.bf16.mxu0 %v24129_v27  ;;  %v21509_v27 = vld [vmem:[%s28286_s1 + $0x3a80] ss:$28 sps:$4 sm:$0xff]  }
 0x728   :  { %18494 = vmatpush3.bf16.msra.mxu1 %v21500_v25 }
 0x729   :  { %14572 = vmatpush1.bf16.msra.mxu0 %v21496_v8  ;;  %18495 = vmatprep.subr.bf16.mxu1 %v21504_v57  ;;  %v21558_v57 = vld [vmem:[%s28286_s1 + $0x3ce8] ss:$28 sps:$4 sm:$0xff]  }
 0x72a   :  { %14573 = vmatprep.subr.bf16.mxu0 %v21503_v33  ;;  %v21555_v33 = vld [vmem:[%s28286_s1 + $0x3420] ss:$28 sps:$4 sm:$0xff]  }
 0x72c   :  { %18496 = vmatpush3.bf16.msra.mxu1 %v21505_v18  ;;  %v21561_v18 = vld [vmem:[%s28286_s1 + $0x345c] ss:$28 sps:$4 sm:$0xff]  }
 0x72d   :  { %14574 = vmatpush1.bf16.msra.mxu0 %v21501_v7  ;;  %18497 = vmatprep.subr.bf16.mxu1 %v21509_v27 }
 0x72e   :  { %14575 = vmatprep.subr.bf16.mxu0 %v21508_v36 }
 0x730   :  { %18498 = vmatpush3.bf16.msra.mxu1 %v21510_v42  ;;  %v21562_v42 = vld [vmem:[%s28286_s1 + $0x3d20] ss:$28 sps:$4 sm:$0xff]  }
 0x731   :  { %14576 = vmatpush1.bf16.msra.mxu0 %v21506_v43  ;;  %18499 = vmatprep.subr.bf16.mxu1 %v21514_v53  ;;  %v21559_v43 = vld [vmem:[%s28286_s1 + $0x3458] ss:$28 sps:$4 sm:$0xff]   ;;  %v21566_v53 = vld [vmem:[%s28289_s3 + $0x40] sm:$0xff]  }
 0x732   :  { %14577 = vmatprep.subr.bf16.mxu0 %v21513_v38  ;;  %v21565_v38 = vld [vmem:[%s28286_s1 + $0x3494] ss:$28 sps:$4 sm:$0xff]  }
 0x734   :  { %18500 = vmatpush3.bf16.msra.mxu1 %v21515_v24  ;;  %v21563_v24 = vld [vmem:[%s28286_s1 + $0x3490] ss:$28 sps:$4 sm:$0xff]  }
 0x735   :  { %14578 = vmatpush1.bf16.msra.mxu0 %v21511_v23  ;;  %18501 = vmatprep.subr.bf16.mxu1 %v21519_v52  ;;  %v15454_v23 = vmax.f32 %v25512_v34, 0.0  ;;  %v21570_v52 = vld [vmem:[%s28286_s1 + $0x34cc] ss:$28 sps:$4 sm:$0xff]  }
 0x736   :  { %14579 = vmatprep.subr.bf16.mxu0 %v21518_v9  ;;  %v18353_v46 = vpop.f32.mrb[44].mxu1  ;;  %v21567_v9 = vld [vmem:[%s28289_s3] sm:$0xff]   ;;  %v21571_v34 = vld [vmem:[%s28289_s3 + $0x48] sm:$0xff]  }
 0x737   :  { %v18354_v47 = vpop.f32.mrb[45].mxu1 }
 0x738   :  { %v18355_v50 = vadd.f32 %v18354_v47, %v18353_v46  ;;  %18502 = vmatpush3.bf16.msra.mxu1 %v21520_v45  ;;  %v18356_v55 = vpop.f32.mrb[46].mxu1  ;;  %v27847_v45 = vld [vmem:[%s28287_s0 + $0x88] ss:$0 sps:$4 sm:$0xff]   ;;  %v21575_v46 = vld [vmem:[%s28286_s1 + $0x3504] ss:$28 sps:$4 sm:$0xff]  }
 0x739   :  { %14580 = vmatpush1.bf16.msra.mxu0 %v21516_v44  ;;  %18503 = vmatprep.subr.bf16.mxu1 %v21524_v59  ;;  %v18357_v17 = vpop.f32.mrb[47].mxu1  ;;  %v15461_v44 = vpack.c.bf16 %v15454_v23, %v15454_v23  ;;  %v21572_v59 = vld [vmem:[%s28289_s3 + $0x8] sm:$0xff]   ;;  %v21573_v47 = vld [vmem:[%s28286_s1 + $0x3500] ss:$28 sps:$4 sm:$0xff]  }
 0x73a   :  { %14581 = vmatprep.subr.bf16.mxu0 %v21523_v10  ;;  %v27731_v58 = vadd.f32 %v18355_v50, %v27628_v4  ;;  %v21546_v4 = vld [vmem:[%s28286_s1 + $0x3c40] ss:$28 sps:$4 sm:$0xff]   ;;  %v21568_v10 = vld [vmem:[%s28286_s1 + $0x34c8] ss:$28 sps:$4 sm:$0xff]   ;;  %v21577_v50 = vld [vmem:[%s28289_s3 + $0x10] sm:$0xff]  }
 0x73b   :  { %v21582_v55 = vld [vmem:[%s28289_s3 + $0x18] sm:$0xff]   ;;  %v21583_v17 = vld [vmem:[%s28286_s1 + $0x3570] ss:$28 sps:$4 sm:$0xff]  }
 0x73c   :  { %18504 = vmatpush3.bf16.msra.mxu1 %v21525_v13  ;;  %v21578_v13 = vld [vmem:[%s28286_s1 + $0x3538] ss:$28 sps:$4 sm:$0xff]   ;;  %v21613_v23 = vld [vmem:[%s28286_s1 + $0x36c0] ss:$28 sps:$4 sm:$0xff]  }
 0x73d   :  { %14582 = vmatpush1.bf16.msra.mxu0 %v21521_v54  ;;  %18505 = vmatprep.subr.bf16.mxu1 %v21529_v30  ;;  %v21580_v54 = vld [vmem:[%s28286_s1 + $0x353c] ss:$28 sps:$4 sm:$0xff]   ;;  %v21586_v30 = vld [vmem:[%s28289_s3 + $0x60] sm:$0xff]  }
 0x73e   :  { %14583 = vmatprep.subr.bf16.mxu0 %v21528_v11  ;;  %v21585_v11 = vld [vmem:[%s28286_s1 + $0x3574] ss:$28 sps:$4 sm:$0xff]  }
 0x740   :  { %18506 = vmatpush3.bf16.msra.mxu1 %v21530_v15  ;;  %v21591_v15 = vld [vmem:[%s28289_s3 + $0x68] sm:$0xff]  }
 0x741   :  { %14584 = vmatpush1.bf16.msra.mxu0 %v21526_v12  ;;  %18597 = vmatprep.subr.bf16.mxu1 %v21744_v29  ;;  %v21590_v12 = vld [vmem:[%s28286_s1 + $0x35ac] ss:$28 sps:$4 sm:$0xff]  }
 0x742   :  { %14585 = vmatprep.subr.bf16.mxu0 %v21533_v21  ;;  %v2295_v21 = vsub.s32 3, %v25453_v14 }
 0x743   :  { %15406 = vmatmul.mubr.bf16.vlgmr.msra.gmra.mrb[72].mxu1 %v24735_v49 }
 0x744   :  { %18598 = vmatpush3.bf16.msra.mxu1 %v21534_v61  ;;  %18613 = vmatprep.mubr.msk.bf16.mxu1 %vm21745_vm0, %v21744_v29  ;;  %v21592_v61 = vld [vmem:[%s28289_s3 + $0x28] sm:$0xff]  }
 0x745   :  { %14586 = vmatpush1.bf16.msra.mxu0 %v21531_v60  ;;  %18599 = vmatprep.subr.bf16.mxu1 %v21744_v29  ;;  %v21588_v60 = vld [vmem:[%s28286_s1 + $0x35a8] ss:$28 sps:$4 sm:$0xff]  }
 0x746   :  { %14587 = vmatprep.subr.bf16.mxu0 %v21537_v63  ;;  %v21595_v63 = vld [vmem:[%s28286_s1 + $0x35e4] ss:$28 sps:$4 sm:$0xff]  }
 0x748   :  { %18600 = vmatpush3.bf16.msra.mxu1 %v21538_v56 }
 0x749   :  { %14588 = vmatpush1.bf16.msra.mxu0 %v21535_v0  ;;  %18601 = vmatprep.subr.bf16.mxu1 %v21744_v29  ;;  %v21596_v0 = vld [vmem:[%s28289_s3 + $0x70] sm:$0xff]  }
 0x74a   :  { %14589 = vmatprep.subr.bf16.mxu0 %v21541_v1  ;;  %v27916_v1 = vld [vmem:[%s28288_s2] sm:$0xff] }
 0x74c   :  { %18602 = vmatpush3.bf16.msra.mxu1 %v21542_v3 }
 0x74d   :  { %14590 = vmatpush1.bf16.msra.mxu0 %v21539_v2  ;;  %18603 = vmatprep.subr.bf16.mxu1 %v21744_v29  ;;  %v2296_v2 = vrot.slane %v27916_v1, %v2295_v21  ;;  %v21637_v21 = vld [vmem:[%s28289_s3 + $0xb0] sm:$0xff]  }
 0x74e   :  { %14591 = vmatprep.subr.bf16.mxu0 %v21545_v39 }
 0x750   :  { %18604 = vmatpush3.bf16.msra.mxu1 %v21546_v4  ;;  %v21597_v4 = vld [vmem:[%s28289_s3 + $0x30] sm:$0xff]  }
 0x751   :  { %14592 = vmatpush1.bf16.msra.mxu0 %v21543_v37  ;;  %18605 = vmatprep.subr.bf16.mxu1 %v21744_v29  ;;  %v21593_v37 = vld [vmem:[%s28286_s1 + $0x35e0] ss:$28 sps:$4 sm:$0xff]  }
 0x752   :  { %14593 = vmatprep.subr.bf16.mxu0 %v21549_v5 }
 0x754   :  { %18606 = vmatpush3.bf16.msra.mxu1 %v21550_v41  ;;  %v21601_v41 = vld [vmem:[%s28289_s3 + $0x78] sm:$0xff]  }
 0x755   :  { %14594 = vmatpush1.bf16.msra.mxu0 %v21547_v26  ;;  %18607 = vmatprep.subr.bf16.mxu1 %v21744_v29  ;;  %v21600_v26 = vld [vmem:[%s28286_s1 + $0x361c] ss:$28 sps:$4 sm:$0xff]  }
 0x756   :  { %14595 = vmatprep.subr.bf16.mxu0 %v21553_v28  ;;  %v18375_v40 = vpop.f32.mrb[48].mxu1 }
 0x757   :  { %v18376_v8 = vpop.f32.mrb[49].mxu1 }
 0x758   :  { %v18377_v25 = vadd.f32 %v18376_v8, %v18375_v40  ;;  %18608 = vmatpush3.bf16.msra.mxu1 %v21554_v19  ;;  %v18378_v7 = vpop.f32.mrb[50].mxu1  ;;  %v18642_v19 = vadd.f32 %v26702_v16, %v2296_v2  ;;  %v21602_v40 = vld [vmem:[%s28289_s3 + $0x38] sm:$0xff]   ;;  %v15453_v8 = vmax.f32 %v25510_v20, 0.0  ;;  %v21606_v16 = vld [vmem:[%s28289_s3 + $0xc0] sm:$0xff]  }
 0x759   :  { %14596 = vmatpush1.bf16.msra.mxu0 %v21551_v48  ;;  %18609 = vmatprep.subr.bf16.mxu1 %v21744_v29  ;;  %v18379_v36 = vpop.f32.mrb[51].mxu1  ;;  %v21607_v20 = vld [vmem:[%s28289_s3 + $0x80] sm:$0xff]  }
 0x75a   :  { %14597 = vmatprep.subr.bf16.mxu0 %v21557_v6  ;;  %v27816_v27 = vadd.f32 %v18377_v25, %v27731_v58  ;;  %v21587_v58 = vld [vmem:[%s28289_s3 + $0x20] sm:$0xff]   ;;  %v21598_v6 = vld [vmem:[%s28286_s1 + $0x3618] ss:$28 sps:$4 sm:$0xff]   ;;  %v15460_v7 = vpack.c.bf16 %v15453_v8, %v15453_v8  ;;  %v21611_v36 = vld [vmem:[%s28289_s3 + $0xc8] sm:$0xff]  }
 0x75b   :  { %v21605_v25 = vld [vmem:[%s28286_s1 + $0x3654] ss:$28 sps:$4 sm:$0xff]   ;;  %v21658_v8 = vld [vmem:[%s28286_s1 + $0x3928] ss:$28 sps:$4 sm:$0xff]  }
 0x75c   :  { %18610 = vmatpush3.bf16.msra.mxu1 %v21558_v57  ;;  %v21603_v57 = vld [vmem:[%s28286_s1 + $0x3650] ss:$28 sps:$4 sm:$0xff]  }
 0x75d   :  { %14598 = vmatpush1.bf16.msra.mxu0 %v21555_v33  ;;  %18611 = vmatprep.subr.bf16.mxu1 %v21744_v29  ;;  %v15456_v33 = vmax.f32 %v18642_v19, 0.0  ;;  %v21657_v19 = vld [vmem:[%s28286_s1 + $0x38f4] ss:$28 sps:$4 sm:$0xff]  }
 0x75e   :  { %14599 = vmatprep.subr.bf16.mxu0 %v21561_v18  ;;  %v21610_v18 = vld [vmem:[%s28286_s1 + $0x368c] ss:$28 sps:$4 sm:$0xff]  }
 0x760   :  { %18612 = vmatpush3.bf16.msra.mxu1 %v21562_v42  ;;  %v21612_v42 = vld [vmem:[%s28289_s3 + $0x88] sm:$0xff]  }
 0x761   :  { %14600 = vmatpush1.bf16.msra.mxu0 %v21559_v43  ;;  %18522 = vmatprep.subr.bf16.mxu1 %v21566_v53  ;;  %v21608_v43 = vld [vmem:[%s28286_s1 + $0x3688] ss:$28 sps:$4 sm:$0xff]   ;;  %v21616_v53 = vld [vmem:[%s28289_s3 + $0xd0] sm:$0xff]  }
 0x762   :  { %14610 = vmatprep.subr.bf16.mxu0 %v21565_v38  ;;  %v21615_v38 = vld [vmem:[%s28286_s1 + $0x36c4] ss:$28 sps:$4 sm:$0xff]  }
 0x763   :  { %18614 = vmatmul.mubr.bf16.vlgmr.msra.gmra.mrb[76].mxu1 %v27847_v45 }
 0x764   :  { %14602 = vmatmul.mubr.bf16.vlgmr.msra.gmra.mrb[4].mxu0 %v24322_v22  ;;  %18523 = vmatpush3.bf16.msra.mxu1 %v21567_v9  ;;  %v21576_v22 = vld [vmem:[%s28289_s3 + $0x50] sm:$0xff]   ;;  %v21620_v9 = vld [vmem:[%s28286_s1 + $0x36fc] ss:$28 sps:$4 sm:$0xff]  }
 0x765   :  { %14611 = vmatpush1.bf16.msra.mxu0 %v21563_v24  ;;  %15954 = vmatprep.mubr.bf16.mxu1 %v15461_v44  ;;  %v21617_v24 = vld [vmem:[%s28289_s3 + $0x90] sm:$0xff]   ;;  %v21622_v44 = vld [vmem:[%s28289_s3 + $0x98] sm:$0xff]  }
 0x766   :  { %14612 = vmatprep.subr.bf16.mxu0 %v21570_v52  ;;  %18524 = vmatprep.subr.bf16.mxu1 %v21571_v34  ;;  %v21621_v52 = vld [vmem:[%s28289_s3 + $0xd8] sm:$0xff]  }
 0x767   :  { %14642 = vmatprep.mubr.bf16.mxu0 %v24338_v32  ;;  %v21581_v32 = vld [vmem:[%s28289_s3 + $0x58] sm:$0xff]  }
 0x768   :  { %18525 = vmatpush3.bf16.msra.mxu1 %v21572_v59  ;;  %v21618_v34 = vld [vmem:[%s28286_s1 + $0x36f8] ss:$28 sps:$4 sm:$0xff]   ;;  %v21626_v59 = vld [vmem:[%s28289_s3 + $0xe0] sm:$0xff]  }
 0x769   :  { %14613 = vmatpush1.bf16.msra.mxu0 %v21568_v10  ;;  %18526 = vmatprep.subr.bf16.mxu1 %v21576_v22  ;;  %v21625_v10 = vld [vmem:[%s28286_s1 + $0x3734] ss:$28 sps:$4 sm:$0xff]   ;;  %v21627_v22 = vld [vmem:[%s28289_s3 + $0xa0] sm:$0xff]  }
 0x76a   :  { %14614 = vmatprep.subr.bf16.mxu0 %v21575_v46  ;;  %v21623_v46 = vld [vmem:[%s28286_s1 + $0x3730] ss:$28 sps:$4 sm:$0xff]  }
 0x76c   :  { %18527 = vmatpush3.bf16.msra.mxu1 %v21577_v50  ;;  %v21630_v50 = vld [vmem:[%s28286_s1 + $0x376c] ss:$28 sps:$4 sm:$0xff]  }
 0x76d   :  { %14615 = vmatpush1.bf16.msra.mxu0 %v21573_v47  ;;  %18528 = vmatprep.subr.bf16.mxu1 %v21581_v32  ;;  %v2291_v47 = vsub.s32 2, %v25453_v14  ;;  %v21628_v32 = vld [vmem:[%s28286_s1 + $0x3768] ss:$28 sps:$4 sm:$0xff]  }
 0x76e   :  { %14616 = vmatprep.subr.bf16.mxu0 %v21580_v54  ;;  %v21631_v54 = vld [vmem:[%s28289_s3 + $0xe8] sm:$0xff]  }
 0x770   :  { %18529 = vmatpush3.bf16.msra.mxu1 %v21582_v55  ;;  %v2292_v55 = vrot.slane %v27916_v1, %v2291_v47 }
 0x771   :  { %14617 = vmatpush1.bf16.msra.mxu0 %v21578_v13  ;;  %18530 = vmatprep.subr.bf16.mxu1 %v21586_v30  ;;  %v21632_v13 = vld [vmem:[%s28289_s3 + $0xa8] sm:$0xff]   ;;  %v21636_v30 = vld [vmem:[%s28289_s3 + $0xf0] sm:$0xff]  }
 0x772   :  { %14618 = vmatprep.subr.bf16.mxu0 %v21585_v11  ;;  %v21635_v11 = vld [vmem:[%s28286_s1 + $0x37a4] ss:$28 sps:$4 sm:$0xff]  }
 0x774   :  { %18531 = vmatpush3.bf16.msra.mxu1 %v21587_v58 }
 0x775   :  { %14619 = vmatpush1.bf16.msra.mxu0 %v21583_v17  ;;  %18532 = vmatprep.subr.bf16.mxu1 %v21591_v15  ;;  %v21633_v15 = vld [vmem:[%s28286_s1 + $0x37a0] ss:$28 sps:$4 sm:$0xff]  }
 0x776   :  { %14620 = vmatprep.subr.bf16.mxu0 %v21590_v12  ;;  %v18397_v56 = vpop.f32.mrb[52].mxu1 }
 0x777   :  { %v18398_v3 = vpop.f32.mrb[53].mxu1 }
 0x778   :  { %v18399_v39 = vadd.f32 %v18398_v3, %v18397_v56  ;;  %18533 = vmatpush3.bf16.msra.mxu1 %v21592_v61  ;;  %v18400_v5 = vpop.f32.mrb[54].mxu1  ;;  %v18641_v61 = vadd.f32 %v26700_v35, %v2292_v55  ;;  %v21638_v3 = vld [vmem:[%s28286_s1 + $0x37d8] ss:$28 sps:$4 sm:$0xff]  }
 0x779   :  { %14621 = vmatpush1.bf16.msra.mxu0 %v21588_v60  ;;  %18534 = vmatprep.subr.bf16.mxu1 %v21596_v0  ;;  %v18401_v28 = vpop.f32.mrb[55].mxu1  ;;  %v21641_v0 = vld [vmem:[%s28289_s3 + $0xf8] sm:$0xff]  }
 0x77a   :  { %14622 = vmatprep.subr.bf16.mxu0 %v21595_v63  ;;  %v27932_v48 = vadd.f32 %v18399_v39, %v27816_v27  ;;  %v15463_v27 = vpack.c.bf16 %v15456_v33, %v15456_v33  ;;  %v21640_v63 = vld [vmem:[%s28286_s1 + $0x37dc] ss:$28 sps:$4 sm:$0xff]   ;;  %v15455_v39 = vmax.f32 %v18641_v61, 0.0  ;;  %v21651_v28 = vld [vmem:[%s28286_s1 + $0x3884] ss:$28 sps:$4 sm:$0xff]  }
 0x77b   :  { %v21642_v35 = vld [vmem:[%s28289_s3 + $0xb8] sm:$0xff]  }
 0x77c   :  { %18535 = vmatpush3.bf16.msra.mxu1 %v21597_v4  ;;  %v21643_v4 = vld [vmem:[%s28286_s1 + $0x3810] ss:$28 sps:$4 sm:$0xff]   ;;  %v15462_v5 = vpack.c.bf16 %v15455_v39, %v15455_v39  ;;  %v21690_v55 = vld [vmem:[%s28286_s1 + $0x3b5c] ss:$28 sps:$4 sm:$0xff]  }
 0x77d   :  { %14623 = vmatpush1.bf16.msra.mxu0 %v21593_v37  ;;  %18536 = vmatprep.subr.bf16.mxu1 %v21601_v41  ;;  %v21645_v37 = vld [vmem:[%s28286_s1 + $0x3814] ss:$28 sps:$4 sm:$0xff]   ;;  %v21646_v41 = vld [vmem:[%s28286_s1 + $0x3848] ss:$28 sps:$4 sm:$0xff]   ;;  %v21697_v61 = vld [vmem:[%s28286_s1 + $0x3c00] ss:$28 sps:$4 sm:$0xff]  }
 0x77e   :  { %14624 = vmatprep.subr.bf16.mxu0 %v21600_v26  ;;  %v21648_v26 = vld [vmem:[%s28286_s1 + $0x384c] ss:$28 sps:$4 sm:$0xff]  }
 0x780   :  { %18537 = vmatpush3.bf16.msra.mxu1 %v21602_v40  ;;  %v21660_v40 = vld [vmem:[%s28286_s1 + $0x392c] ss:$28 sps:$4 sm:$0xff]  }
 0x781   :  { %14625 = vmatpush1.bf16.msra.mxu0 %v21598_v6  ;;  %18544 = vmatprep.subr.bf16.mxu1 %v21606_v16  ;;  %v21655_v6 = vld [vmem:[%s28286_s1 + $0x38f0] ss:$28 sps:$4 sm:$0xff]  }
 0x782   :  { %14626 = vmatprep.subr.bf16.mxu0 %v21605_v25  ;;  %v21663_v25 = vld [vmem:[%s28286_s1 + $0x3964] ss:$28 sps:$4 sm:$0xff]  }
 0x783   :  { %15955 = vmatmul.mubr.bf16.vlgmr.msra.gmra.mrb[80].mxu1 %v15460_v7 }
 0x784   :  { %18545 = vmatpush3.bf16.msra.mxu1 %v21607_v20  ;;  %15994 = vmatprep.mubr.bf16.mxu1 %v15463_v27  ;;  %v21661_v20 = vld [vmem:[%s28286_s1 + $0x3960] ss:$28 sps:$4 sm:$0xff]  }
 0x785   :  { %14627 = vmatpush1.bf16.msra.mxu0 %v21603_v57  ;;  %18546 = vmatprep.subr.bf16.mxu1 %v21611_v36 }
 0x786   :  { %14628 = vmatprep.subr.bf16.mxu0 %v21610_v18  ;;  %v21666_v18 = vld [vmem:[%s28286_s1 + $0x399c] ss:$28 sps:$4 sm:$0xff]  }
 0x788   :  { %18547 = vmatpush3.bf16.msra.mxu1 %v21612_v42  ;;  %v21669_v42 = vld [vmem:[%s28286_s1 + $0x39d4] ss:$28 sps:$4 sm:$0xff]  }
 0x789   :  { %14629 = vmatpush1.bf16.msra.mxu0 %v21608_v43  ;;  %18548 = vmatprep.subr.bf16.mxu1 %v21616_v53  ;;  %v21664_v43 = vld [vmem:[%s28286_s1 + $0x3998] ss:$28 sps:$4 sm:$0xff]   ;;  %v21672_v53 = vld [vmem:[%s28286_s1 + $0x3a0c] ss:$28 sps:$4 sm:$0xff]  }
 0x78a   :  { %14630 = vmatprep.subr.bf16.mxu0 %v21615_v38  ;;  %v21667_v38 = vld [vmem:[%s28286_s1 + $0x39d0] ss:$28 sps:$4 sm:$0xff]  }
 0x78c   :  { %18549 = vmatpush3.bf16.msra.mxu1 %v21617_v24  ;;  %v21675_v24 = vld [vmem:[%s28286_s1 + $0x3a44] ss:$28 sps:$4 sm:$0xff]  }
 0x78d   :  { %14631 = vmatpush1.bf16.msra.mxu0 %v21613_v23  ;;  %18550 = vmatprep.subr.bf16.mxu1 %v21621_v52  ;;  %v21670_v23 = vld [vmem:[%s28286_s1 + $0x3a08] ss:$28 sps:$4 sm:$0xff]   ;;  %v21678_v52 = vld [vmem:[%s28286_s1 + $0x3a7c] ss:$28 sps:$4 sm:$0xff]  }
 0x78e   :  { %14632 = vmatprep.subr.bf16.mxu0 %v21620_v9  ;;  %v21673_v9 = vld [vmem:[%s28286_s1 + $0x3a40] ss:$28 sps:$4 sm:$0xff]  }
 0x790   :  { %18551 = vmatpush3.bf16.msra.mxu1 %v21622_v44  ;;  %v21681_v44 = vld [vmem:[%s28286_s1 + $0x3ab4] ss:$28 sps:$4 sm:$0xff]  }
 0x791   :  { %14633 = vmatpush1.bf16.msra.mxu0 %v21618_v34  ;;  %18552 = vmatprep.subr.bf16.mxu1 %v21626_v59  ;;  %v21676_v34 = vld [vmem:[%s28286_s1 + $0x3a78] ss:$28 sps:$4 sm:$0xff]   ;;  %v21684_v59 = vld [vmem:[%s28286_s1 + $0x3aec] ss:$28 sps:$4 sm:$0xff]  }
 0x792   :  { %14634 = vmatprep.subr.bf16.mxu0 %v21625_v10  ;;  %v21679_v10 = vld [vmem:[%s28286_s1 + $0x3ab0] ss:$28 sps:$4 sm:$0xff]  }
 0x794   :  { %18553 = vmatpush3.bf16.msra.mxu1 %v21627_v22  ;;  %v21687_v22 = vld [vmem:[%s28286_s1 + $0x3b24] ss:$28 sps:$4 sm:$0xff]  }
 0x795   :  { %14635 = vmatpush1.bf16.msra.mxu0 %v21623_v46  ;;  %18554 = vmatprep.subr.bf16.mxu1 %v21631_v54  ;;  %v21682_v46 = vld [vmem:[%s28286_s1 + $0x3ae8] ss:$28 sps:$4 sm:$0xff]  }
 0x796   :  { %14636 = vmatprep.subr.bf16.mxu0 %v21630_v50  ;;  %v18419_v17 = vpop.f32.mrb[56].mxu1 }
 0x797   :  { %v18420_v58 = vpop.f32.mrb[57].mxu1 }
 0x798   :  { %v18421_v12 = vadd.f32 %v18420_v58, %v18419_v17  ;;  %18555 = vmatpush3.bf16.msra.mxu1 %v21632_v13  ;;  %v18422_v60 = vpop.f32.mrb[58].mxu1  ;;  %v21688_v17 = vld [vmem:[%s28286_s1 + $0x3b58] ss:$28 sps:$4 sm:$0xff]  }
 0x799   :  { %14637 = vmatpush1.bf16.msra.mxu0 %v21628_v32  ;;  %18556 = vmatprep.subr.bf16.mxu1 %v21636_v30  ;;  %v18423_v56 = vpop.f32.mrb[59].mxu1  ;;  %v21685_v32 = vld [vmem:[%s28286_s1 + $0x3b20] ss:$28 sps:$4 sm:$0xff]   ;;  %v21693_v58 = vld [vmem:[%s28286_s1 + $0x3b94] ss:$28 sps:$4 sm:$0xff]  }
 0x79a   :  { %14638 = vmatprep.subr.bf16.mxu0 %v21635_v11  ;;  %v15248_v2 = vadd.f32 %v18421_v12, %v27932_v48  ;;  %v21649_v48 = vld [vmem:[%s28286_s1 + $0x3880] ss:$28 sps:$4 sm:$0xff]   ;;  %v21691_v12 = vld [vmem:[%s28286_s1 + $0x3b90] ss:$28 sps:$4 sm:$0xff]  }
 0x79b   :  { %v21699_v60 = vld [vmem:[%s28286_s1 + $0x3c04] ss:$28 sps:$4 sm:$0xff]   ;;  %v21708_v56 = vld [vmem:[%s28286_s1 + $0x3cac] ss:$28 sps:$4 sm:$0xff]  }
 0x79c   :  { %18557 = vmatpush3.bf16.msra.mxu1 %v21637_v21  ;;  %v21694_v21 = vld [vmem:[%s28286_s1 + $0x3bc8] ss:$28 sps:$4 sm:$0xff]  }
 0x79d   :  { %14639 = vmatpush1.bf16.msra.mxu0 %v21633_v15  ;;  %18558 = vmatprep.subr.bf16.mxu1 %v21641_v0  ;;  %v21696_v15 = vld [vmem:[%s28286_s1 + $0x3bcc] ss:$28 sps:$4 sm:$0xff]  }
 0x79e   :  { %14640 = vmatprep.subr.bf16.mxu0 %v21640_v63  ;;  %v21705_v63 = vld [vmem:[%s28286_s1 + $0x3c74] ss:$28 sps:$4 sm:$0xff]  }
 0x79f   :  { %v21703_v0 = vld [vmem:[%s28286_s1 + $0x3c70] ss:$28 sps:$4 sm:$0xff]  }
 0x7a0   :  { %18559 = vmatpush3.bf16.msra.mxu1 %v21642_v35 }
 0x7a1   :  { %14641 = vmatpush1.bf16.msra.mxu0 %v21638_v3  ;;  %v21711_v3 = vld [vmem:[%s28286_s1 + $0x3ce4] ss:$28 sps:$4 sm:$0xff]  }
 0x7a2   :  { %14651 = vmatprep.subr.bf16.mxu0 %v21645_v37 }
 0x7a3   :  { %15995 = vmatmul.mubr.bf16.vlgmr.msra.gmra.mrb[84].mxu1 %v15462_v5 }
 0x7a4   :  { %14643 = vmatmul.mubr.bf16.vlgmr.msra.gmra.mrb[4].mxu0 %v24531_v31  ;;  %v21654_v31 = vld [vmem:[%s28286_s1 + $0x38bc] ss:$28 sps:$4 sm:$0xff]  }
 0x7a5   :  { %14652 = vmatpush1.bf16.msra.mxu0 %v21643_v4  ;;  %14683 = vmatprep.mubr.bf16.mxu0 %v24547_v51  ;;  %v21652_v51 = vld [vmem:[%s28286_s1 + $0x38b8] ss:$28 sps:$4 sm:$0xff]   ;;  %v21709_v4 = vld [vmem:[%s28286_s1 + $0x3ce0] ss:$28 sps:$4 sm:$0xff]  }
 0x7a6   :  { %14653 = vmatprep.subr.bf16.mxu0 %v21648_v26  ;;  %v21714_v26 = vld [vmem:[%s28286_s1 + $0x3d1c] ss:$28 sps:$4 sm:$0xff]  }
 0x7a9   :  { %14654 = vmatpush1.bf16.msra.mxu0 %v21646_v41 }
 0x7aa   :  { %14655 = vmatprep.subr.bf16.mxu0 %v21651_v28 }
 0x7ad   :  { %14656 = vmatpush1.bf16.msra.mxu0 %v21649_v48  ;;  %v21715_v48 = vld [vmem:[%s28289_s3 + $0x140] sm:$0xff]  }
 0x7ae   :  { %14657 = vmatprep.subr.bf16.mxu0 %v21654_v31  ;;  %v21716_v31 = vld [vmem:[%s28289_s3 + $0x100] sm:$0xff]   ;;  %18566 = vmatprep.subr.bf16.mxu1 %v21715_v48 }
 0x7af   :  { %18567 = vmatpush3.bf16.msra.mxu1 %v21716_v31 }
 0x7b1   :  { %14658 = vmatpush1.bf16.msra.mxu0 %v21652_v51  ;;  %v21717_v51 = vld [vmem:[%s28289_s3 + $0x148] sm:$0xff]  }
 0x7b2   :  { %14659 = vmatprep.subr.bf16.mxu0 %v21657_v19  ;;  %v21712_v19 = vld [vmem:[%s28286_s1 + $0x3d18] ss:$28 sps:$4 sm:$0xff]   ;;  %18568 = vmatprep.subr.bf16.mxu1 %v21717_v51 }
 0x7b5   :  { %14660 = vmatpush1.bf16.msra.mxu0 %v21655_v6  ;;  %v21718_v6 = vld [vmem:[%s28289_s3 + $0x108] sm:$0xff]  }
 0x7b6   :  { %14661 = vmatprep.subr.bf16.mxu0 %v21660_v40  ;;  %v18441_v16 = vpop.f32.mrb[60].mxu1  ;;  %v21719_v40 = vld [vmem:[%s28289_s3 + $0x150] sm:$0xff]   ;;  %18569 = vmatpush3.bf16.msra.mxu1 %v21718_v6 }
 0x7b7   :  { %v18442_v33 = vpop.f32.mrb[61].mxu1  ;;  %18570 = vmatprep.subr.bf16.mxu1 %v21719_v40 }
 0x7b8   :  { %v18443_v57 = vadd.f32 %v18442_v33, %v18441_v16  ;;  %v18444_v7 = vpop.f32.mrb[62].mxu1  ;;  %v21722_v16 = vld [vmem:[%s28289_s3 + $0x118] sm:$0xff]   ;;  %v21723_v33 = vld [vmem:[%s28289_s3 + $0x160] sm:$0xff]  }
 0x7b9   :  { %14662 = vmatpush1.bf16.msra.mxu0 %v21658_v8  ;;  %v18445_v36 = vpop.f32.mrb[63].mxu1  ;;  %v21720_v8 = vld [vmem:[%s28289_s3 + $0x110] sm:$0xff]  }
 0x7ba   :  { %14663 = vmatprep.subr.bf16.mxu0 %v21663_v25  ;;  %v15288_v27 = vadd.f32 %v18443_v57, %v15248_v2  ;;  %v21706_v2 = vld [vmem:[%s28286_s1 + $0x3ca8] ss:$28 sps:$4 sm:$0xff]   ;;  %v21721_v25 = vld [vmem:[%s28289_s3 + $0x158] sm:$0xff]   ;;  %18571 = vmatpush3.bf16.msra.mxu1 %v21720_v8 }
 0x7bb   :  { %18572 = vmatprep.subr.bf16.mxu1 %v21721_v25  ;;  %v21724_v57 = vld [vmem:[%s28289_s3 + $0x120] sm:$0xff]  }
 0x7bd   :  { %14664 = vmatpush1.bf16.msra.mxu0 %v21661_v20  ;;  %v21726_v20 = vld [vmem:[%s28289_s3 + $0x128] sm:$0xff]  }
 0x7be   :  { %14665 = vmatprep.subr.bf16.mxu0 %v21666_v18  ;;  %18573 = vmatpush3.bf16.msra.mxu1 %v21722_v16 }
 0x7bf   :  { %18574 = vmatprep.subr.bf16.mxu1 %v21723_v33 }
 0x7c1   :  { %14666 = vmatpush1.bf16.msra.mxu0 %v21664_v43 }
 0x7c2   :  { %14667 = vmatprep.subr.bf16.mxu0 %v21669_v42  ;;  %18575 = vmatpush3.bf16.msra.mxu1 %v21724_v57 }
 0x7c5   :  { %14668 = vmatpush1.bf16.msra.mxu0 %v21667_v38 }
 0x7c6   :  { %14669 = vmatprep.subr.bf16.mxu0 %v21672_v53 }
 0x7c9   :  { %14670 = vmatpush1.bf16.msra.mxu0 %v21670_v23 }
 0x7ca   :  { %14671 = vmatprep.subr.bf16.mxu0 %v21675_v24 }
 0x7cd   :  { %14672 = vmatpush1.bf16.msra.mxu0 %v21673_v9 }
 0x7ce   :  { %14673 = vmatprep.subr.bf16.mxu0 %v21678_v52  ;;  %v21727_v52 = vld [vmem:[%s28289_s3 + $0x170] sm:$0xff]  }
 0x7d1   :  { %14674 = vmatpush1.bf16.msra.mxu0 %v21676_v34 }
 0x7d2   :  { %14675 = vmatprep.subr.bf16.mxu0 %v21681_v44  ;;  %v21728_v44 = vld [vmem:[%s28289_s3 + $0x130] sm:$0xff]  }
 0x7d5   :  { %14676 = vmatpush1.bf16.msra.mxu0 %v21679_v10 }
 0x7d6   :  { %14677 = vmatprep.subr.bf16.mxu0 %v21684_v59  ;;  %v18463_v47 = vpop.f32.mrb[64].mxu1 }
 0x7d7   :  { %v18464_v50 = vpop.f32.mrb[65].mxu1 }
 0x7d8   :  { %v18465_v54 = vadd.f32 %v18464_v50, %v18463_v47  ;;  %v18466_v13 = vpop.f32.mrb[66].mxu1  ;;  %v21729_v47 = vld [vmem:[%s28289_s3 + $0x178] sm:$0xff]  }
 0x7d9   :  { %14678 = vmatpush1.bf16.msra.mxu0 %v21682_v46  ;;  %v18467_v11 = vpop.f32.mrb[67].mxu1  ;;  %v21730_v50 = vld [vmem:[%s28289_s3 + $0x138] sm:$0xff]  }
 0x7da   :  { %14679 = vmatprep.subr.bf16.mxu0 %v21687_v22  ;;  %v15328_v30 = vadd.f32 %v18465_v54, %v15288_v27  ;;  %v18082_v54 = vld [vmem:[%s28290_s4] ss:$0 sm:$0xff] }
 0x7dd   :  { %14680 = vmatpush1.bf16.msra.mxu0 %v21685_v32 }
 0x7de   :  { %14681 = vmatprep.subr.bf16.mxu0 %v21690_v55 }
 0x7e1   :  { %14682 = vmatpush1.bf16.msra.mxu0 %v21688_v17 }
 0x7e2   :  { %14692 = vmatprep.subr.bf16.mxu0 %v21693_v58 }
 0x7e4   :  { %14684 = vmatmul.mubr.bf16.vlgmr.msra.gmra.mrb[4].mxu0 %v24735_v49  ;;  %v21702_v49 = vld [vmem:[%s28286_s1 + $0x3c3c] ss:$28 sps:$4 sm:$0xff]  }
 0x7e5   :  { %14693 = vmatpush1.bf16.msra.mxu0 %v21691_v12  ;;  %14724 = vmatprep.mubr.bf16.mxu0 %v21743_v62  ;;  %v21700_v62 = vld [vmem:[%s28286_s1 + $0x3c38] ss:$28 sps:$4 sm:$0xff]   ;;  %v2299_v12 = vsub.s32 4, %v25453_v14 }
 0x7e6   :  { %14694 = vmatprep.subr.bf16.mxu0 %v21696_v15  ;;  %v2303_v15 = vsub.s32 5, %v25453_v14  ;;  %v21732_v14 = vld [vmem:[%s28289_s3 + $0x188] sm:$0xff]  }
 0x7e9   :  { %14695 = vmatpush1.bf16.msra.mxu0 %v21694_v21  ;;  %v2300_v21 = vrot.slane %v27916_v1, %v2299_v12 }
 0x7ea   :  { %14696 = vmatprep.subr.bf16.mxu0 %v21699_v60  ;;  %v2304_v60 = vrot.slane %v27916_v1, %v2303_v15  ;;  %v21733_v1 = vld [vmem:[%s28289_s3 + $0x190] sm:$0xff]  }
 0x7ed   :  { %14697 = vmatpush1.bf16.msra.mxu0 %v21697_v61 }
 0x7ee   :  { %14698 = vmatprep.subr.bf16.mxu0 %v21702_v49 }
 0x7f1   :  { %14699 = vmatpush1.bf16.msra.mxu0 %v21700_v62 }
 0x7f2   :  { %14700 = vmatprep.subr.bf16.mxu0 %v21705_v63 }
 0x7f5   :  { %14701 = vmatpush1.bf16.msra.mxu0 %v21703_v0 }
 0x7f6   :  { %14702 = vmatprep.subr.bf16.mxu0 %v21708_v56  ;;  %v18485_v35 = vpop.f32.mrb[68].mxu1 }
 0x7f7   :  { %v18486_v39 = vpop.f32.mrb[69].mxu1 }
 0x7f8   :  { %v18487_v37 = vadd.f32 %v18486_v39, %v18485_v35  ;;  %v18488_v5 = vpop.f32.mrb[70].mxu1  ;;  %v21731_v39 = vld [vmem:[%s28289_s3 + $0x180] sm:$0xff]  }
 0x7f9   :  { %14703 = vmatpush1.bf16.msra.mxu0 %v21706_v2  ;;  %v18489_v41 = vpop.f32.mrb[71].mxu1  ;;  %v21735_v5 = vld [vmem:[%s28289_s3 + $0x1a0] sm:$0xff]  }
 0x7fa   :  { %14704 = vmatprep.subr.bf16.mxu0 %v21711_v3  ;;  %v15368_v28 = vadd.f32 %v18487_v37, %v15328_v30  ;;  %v21737_v41 = vld [vmem:[%s28289_s3 + $0x1b0] sm:$0xff]  }
 0x7fd   :  { %14705 = vmatpush1.bf16.msra.mxu0 %v21709_v4  ;;  %v21734_v4 = vld [vmem:[%s28289_s3 + $0x198] sm:$0xff]  }
 0x7fe   :  { %14706 = vmatprep.subr.bf16.mxu0 %v21714_v26  ;;  %v21736_v26 = vld [vmem:[%s28289_s3 + $0x1a8] sm:$0xff]  }
 0x801   :  { %14707 = vmatpush1.bf16.msra.mxu0 %v21712_v19 }
 0x804   :  { %14725 = vmatmul.mubr.bf16.vlgmr.msra.gmra.mrb[4].mxu0 %v27847_v45  ;;  %v21725_v45 = vld [vmem:[%s28289_s3 + $0x168] sm:$0xff]  }
 0x805   :  { %18576 = vmatprep.subr.bf16.mxu1 %v21725_v45 }
 0x806   :  { %18577 = vmatpush3.bf16.msra.mxu1 %v21726_v20 }
 0x807   :  { %18578 = vmatprep.subr.bf16.mxu1 %v21727_v52 }
 0x80a   :  { %18579 = vmatpush3.bf16.msra.mxu1 %v21728_v44 }
 0x80b   :  { %18580 = vmatprep.subr.bf16.mxu1 %v21729_v47 }
 0x80e   :  { %18581 = vmatpush3.bf16.msra.mxu1 %v21730_v50 }
 0x80f   :  { %18617 = vmatprep.subr.bf16.mxu1 %v21744_v29 }
 0x816   :  { %v18507_v7 = vpop.f32.mrb[72].mxu1 }
 0x817   :  { %v18508_v18 = vpop.f32.mrb[73].mxu1 }
 0x818   :  { %v18509_v36 = vadd.f32 %v18508_v18, %v18507_v7  ;;  %v18510_v27 = vpop.f32.mrb[74].mxu1 }
 0x819   :  { %v18511_v43 = vpop.f32.mrb[75].mxu1 }
 0x81a   :  { %v15408_v42 = vadd.f32 %v18509_v36, %v15368_v28  ;;  %v21738_v28 = vld [vmem:[%s28289_s3 + $0x1b8] sm:$0xff]  }
 0x836   :  { %v15447_v38 = vpop.f32.mrb[76].mxu1 }
 0x837   :  { %v28227_v53 = vadd.f32 %v15447_v38, %v15408_v42  ;;  %v18615_v23 = vpop.f32.mrb[77].mxu1 }
 0x838   :  { %v15450_v24 = vpop.f32.mrb[78].mxu1 }
 0x839   :  { %v18616_v9 = vpop.f32.mrb[79].mxu1  ;;  %v15459_v48 = vmax.f32 %v28227_v53, 0.0 }
 0x83b   :  { %v15466_v31 = vpack.c.bf16 %v15459_v48, %v15459_v48 }
 0x856   :  { %v18538_v34 = vpop.f32.mrb[80].mxu1 }
 0x857   :  { %v18539_v10 = vpop.f32.mrb[81].mxu1 }
 0x858   :  { %v18540_v59 = vadd.f32 %v18539_v10, %v18538_v34  ;;  %v18541_v46 = vpop.f32.mrb[82].mxu1 }
 0x859   :  { %v18542_v22 = vpop.f32.mrb[83].mxu1 }
 0x85a   :  { %v15957_v55 = vadd.f32 %v18540_v59, %v18082_v54 }
 0x876   :  { %v18560_v32 = vpop.f32.mrb[84].mxu1 }
 0x877   :  { %v18561_v13 = vpop.f32.mrb[85].mxu1 }
 0x878   :  { %v18562_v11 = vadd.f32 %v18561_v13, %v18560_v32  ;;  %v18563_v30 = vpop.f32.mrb[86].mxu1 }
 0x879   :  { %v18564_v17 = vpop.f32.mrb[87].mxu1 }
 0x87a   :  { %v15997_v58 = vadd.f32 %v18562_v11, %v15957_v55 }
 0x8d7   :  { %v14726_v61 = vpop.f32.mrb[4].mxu0 }
 0x8d8   :  { %v18643_v49 = vadd.f32 %v14726_v61, %v2300_v21  ;;  %v14728_v62 = vpop.f32.mrb[5].mxu0 }
 0x8d9   :  { %v18644_v63 = vadd.f32 %v14728_v62, %v2304_v60  ;;  %v14730_v0 = vpop.f32.mrb[6].mxu0 }
 0x8da   :  { %v15457_v56 = vmax.f32 %v18643_v49, 0.0  ;;  %v14731_v2 = vpop.f32.mrb[7].mxu0 }
 0x8db   :  { %v15458_v3 = vmax.f32 %v18644_v63, 0.0 }
 0x8dc   :  { %v15464_v37 = vpack.c.bf16 %v15457_v56, %v15457_v56 }
 0x8dd   :  { %v15465_v35 = vpack.c.bf16 %v15458_v3, %v15458_v3 }
 0x8df   :  { %16034 = vmatprep.mubr.bf16.mxu1 %v15465_v35 }
 0x8e0   :  { %16035 = vmatmul.mubr.bf16.vlgmr.msra.gmra.mrb[88].mxu1 %v15464_v37 }
 0x8e1   :  { %18618 = vmatpush3.bf16.msra.mxu1 %v21731_v39  ;;  %18633 = vmatprep.mubr.msk.bf16.mxu1 %vm21745_vm0, %v21744_v29 }
 0x8e2   :  { %18619 = vmatprep.subr.bf16.mxu1 %v21744_v29 }
 0x8e5   :  { %18620 = vmatpush3.bf16.msra.mxu1 %v21732_v14 }
 0x8e6   :  { %18621 = vmatprep.subr.bf16.mxu1 %v21744_v29 }
 0x8e9   :  { %18622 = vmatpush3.bf16.msra.mxu1 %v21733_v1 }
 0x8ea   :  { %18623 = vmatprep.subr.bf16.mxu1 %v21744_v29 }
 0x8ed   :  { %18624 = vmatpush3.bf16.msra.mxu1 %v21734_v4 }
 0x8ee   :  { %18625 = vmatprep.subr.bf16.mxu1 %v21744_v29 }
 0x8f1   :  { %18626 = vmatpush3.bf16.msra.mxu1 %v21735_v5 }
 0x8f2   :  { %18627 = vmatprep.subr.bf16.mxu1 %v21744_v29 }
 0x8f5   :  { %18628 = vmatpush3.bf16.msra.mxu1 %v21736_v26 }
 0x8f6   :  { %18629 = vmatprep.subr.bf16.mxu1 %v21744_v29 }
 0x8f9   :  { %18630 = vmatpush3.bf16.msra.mxu1 %v21737_v41 }
 0x8fa   :  { %18631 = vmatprep.subr.bf16.mxu1 %v21744_v29 }
 0x8fd   :  { %18632 = vmatpush3.bf16.msra.mxu1 %v21738_v28 }
 0x900   :  { %18634 = vmatmul.mubr.bf16.vlgmr.msra.gmra.mrb[92].mxu1 %v15466_v31 }
 0x9b3   :  { %v18582_v51 = vpop.f32.mrb[88].mxu1 }
 0x9b4   :  { %v18583_v19 = vpop.f32.mrb[89].mxu1 }
 0x9b5   :  { %v18584_v6 = vadd.f32 %v18583_v19, %v18582_v51  ;;  %v18585_v40 = vpop.f32.mrb[90].mxu1 }
 0x9b6   :  { %v18586_v8 = vpop.f32.mrb[91].mxu1 }
 0x9b7   :  { %v16037_v25 = vadd.f32 %v18584_v6, %v15997_v58 }
 0x9d3   :  { %v16076_v16 = vpop.f32.mrb[92].mxu1 }
 0x9d4   :  { %v16077_v33 = vadd.f32 %v16076_v16, %v16037_v25  ;;  %v18635_v57 = vpop.f32.mrb[93].mxu1 }
 0x9d5   :  { %v16079_v45 = vpop.f32.mrb[94].mxu1 }
 0x9d6   :  { %16082 = vst [vmem:[%s28291_s5] sm:$0xff] %v16077_v33  ;;  %v18636_v20 = vpop.f32.mrb[95].mxu1 }

</bundles_post_ra>
